<compile_context>
chip_gen: v7x
topology: tpu7x:2x2x1
jax: 0.10.0
libtpu: 0.0.40
codegen_flags: <defaults>
</compile_context>

<pallas_src>
import functools
import math

import jax
import jax.numpy as jnp
from jax.experimental import pallas as pl
from jax.experimental.pallas import tpu as pltpu


def _round_up(x, m):
    return ((x + m - 1) // m) * m


def _silu(y):
    # exp + approximate reciprocal both land on the otherwise-idle EUP slot.
    return y * pl.reciprocal(1.0 + jnp.exp(-y), approx=True)


def _conv_taps(d_ref, w_ref, b_ref, l_out):
    """SiLU( sum_k d[k:k+l_out] @ w[k] + b ) with bf16 MXU operands, f32 accum."""
    K = w_ref.shape[0]
    acc = jnp.dot(d_ref[0:l_out, :].astype(jnp.bfloat16), w_ref[0],
                  preferred_element_type=jnp.float32)
    for k in range(1, K):                               # K = 11, statically unrolled
        acc = acc + jnp.dot(d_ref[k:k + l_out, :].astype(jnp.bfloat16), w_ref[k],
                            preferred_element_type=jnp.float32)
    return _silu(acc + b_ref[...])


def _fused_deconv_kernel(
        z_ref, w_in_ref, b_in_ref,
        w1_ref, b1_ref, w2_ref, b2_ref, w3_ref, b3_ref,
        gamma_ref, beta_ref,
        o_ref,
        d1_ref, x1_ref, d2_ref, d3_ref,
        *, L0, s1, q1, L1, s2, q2, L2, s3, q3, L3, d_model, c_out_p, eps):
    del s3  # conv3 has stride 1 (module invariant, asserted in the wrapper)

    # Zero the dilation / halo scratches (tiny memsets; keeps grid steps independent).
    d1_ref[...] = jnp.zeros_like(d1_ref)
    d2_ref[...] = jnp.zeros_like(d2_ref)
    d3_ref[...] = jnp.zeros_like(d3_ref)

    # ---- Stage 1: Linear(d_latent, 576) + SiLU, emitted row-by-row directly in
    # channel-last, zero-dilated + halo-padded layout (folds view(-1,64,9) and
    # the later permute(0,2,1) into the kernel; no 576-wide masked store).
    z = z_ref[0]                                                  # (1, d_latent) f32
    for l in range(L0):
        row = jnp.dot(z, w_in_ref[l], preferred_element_type=jnp.float32)
        row = _silu(row + b_in_ref[l:l + 1, :])                   # (1, 128)
        d1_ref[q1 + s1 * l:q1 + s1 * l + 1, :] = row

    # ---- Stage 2: ConvTranspose1d #1 + SiLU, scattered into conv2's dilated input.
    x1 = _conv_taps(d1_ref, w1_ref, b1_ref, L1)                   # (L1, 128) f32
    x1_ref[0:L1, :] = x1
    for i in range(L1):                                           # stride-s2 scatter
        d2_ref[q2 + s2 * i:q2 + s2 * i + 1, :] = x1_ref[i:i + 1, :]

    # ---- Stage 3: ConvTranspose1d #2 + SiLU (conv3 has stride 1: plain halo offset).
    x2 = _conv_taps(d2_ref, w2_ref, b2_ref, L2)                   # (L2, 128) f32
    d3_ref[q3:q3 + L2, :] = x2

    # ---- Stage 4: ConvTranspose1d #3 + SiLU.
    x3 = _conv_taps(d3_ref, w3_ref, b3_ref, L3)                   # (L3, c_out_p) f32

    # ---- Stage 5: LayerNorm (torch semantics: unbiased std, eps added to std),
    # then drop the last time step.  Padded channels are exactly zero, so only a
    # closed-form correction of the variance is needed when c_out_p > d_model.
    mean = jnp.sum(x3, axis=-1, keepdims=True) * (1.0 / d_model)
    diff = x3 - mean
    ssq = jnp.sum(diff * diff, axis=-1, keepdims=True)
    if c_out_p != d_model:
        ssq = ssq - (c_out_p - d_model) * mean * mean
    std = jnp.sqrt(ssq * (1.0 / (d_model - 1)))
    inv = pl.reciprocal(std + eps, approx=True)                   # EUP vrcp
    y = gamma_ref[...] * diff * inv + beta_ref[...]
    o_ref[0] = y[0:L3 - 1, :].astype(o_ref.dtype)                 # drop last step


# -----------------------------------------------------------------------------
# One-time host-side weight packing (perf feedback: keep flip / transpose /
# channel-pad off the per-call critical path).
# -----------------------------------------------------------------------------
def pack_deconv_params(params):
    w_in, b_in = params['w_in'], params['b_in']        # (d_latent, 576), (576,)
    d_latent, d576 = w_in.shape
    C0 = 64
    L0 = d576 // C0                                     # 9
    C0p = _round_up(C0, 128)

    # h.view(B, 64, 9) -> channel-last: x0[l, c] = h[c*L0 + l]
    w_in_pack = jnp.zeros((L0, d_latent, C0p), jnp.float32)
    w_in_pack = w_in_pack.at[:, :, :C0].set(
        w_in.reshape(d_latent, C0, L0).transpose(2, 0, 1))
    b_in_pack = jnp.zeros((L0, C0p), jnp.float32).at[:, :C0].set(
        b_in.reshape(C0, L0).T)

    convs = []
    c_in_p = C0p
    for (w, b, stride, padding) in params['convs']:
        c_in, c_out, K = w.shape
        assert c_in_p == _round_up(c_in, 128)
        c_out_p = _round_up(c_out, 128)
        assert K - 1 - padding >= 0, "kernel_size must exceed padding"
        w_p = jnp.zeros((c_in_p, c_out_p, K), jnp.float32).at[:c_in, :c_out, :].set(w)
        # tap-flipped (K, C_in_p, C_out_p); bf16 MXU operands, f32 accumulation.
        w_stack = jnp.flip(w_p, axis=2).transpose(2, 0, 1).astype(jnp.bfloat16)
        b_p = jnp.zeros((1, c_out_p), jnp.float32).at[0, :c_out].set(b)
        convs.append(dict(w=w_stack, b=b_p, stride=int(stride), padding=int(padding),
                          K=int(K), c_out_p=int(c_out_p)))
        c_in_p = c_out_p

    d_model = params['a_2'].shape[0]
    c3p = _round_up(d_model, 128)
    gamma = jnp.zeros((1, c3p), jnp.float32).at[0, :d_model].set(params['a_2'])
    beta = jnp.zeros((1, c3p), jnp.float32).at[0, :d_model].set(params['b_2'])

    return dict(w_in=w_in_pack, b_in=b_in_pack, convs=convs, gamma=gamma, beta=beta,
                meta=dict(d_latent=int(d_latent), L0=int(L0), C0p=int(C0p),
                          d_model=int(d_model), c3p=int(c3p)))


# -----------------------------------------------------------------------------
# Fused forward: one pallas_call for the whole module.
# -----------------------------------------------------------------------------
def deconv_forward(z, packed, eps=1e-6):
    meta = packed['meta']
    B = z.shape[0]
    d_latent, L0, C0p = meta['d_latent'], meta['L0'], meta['C0p']
    d_model, c3p = meta['d_model'], meta['c3p']
    c1, c2, c3 = packed['convs']
    assert c3['stride'] == 1, "module guarantees stride 1 on the last deconv"

    def lens(l_in, conv):
        l_out = (l_in - 1) * conv['stride'] - 2 * conv['padding'] + conv['K']
        return l_out, conv['K'] - 1 - conv['padding']

    L1, q1 = lens(L0, c1)
    L2, q2 = lens(L1, c2)
    L3, q3 = lens(L2, c3)

    # Dilated + halo scratch row counts (rounded to sublane multiples of 8).
    r1 = _round_up(L1 + c1['K'] - 1, 8)
    r2 = _round_up(L2 + c2['K'] - 1, 8)
    r3 = _round_up(L3 + c3['K'] - 1, 8)
    rx1 = _round_up(L1, 8)

    c1p_in, c2p_in, c3p_in = C0p, c1['c_out_p'], c2['c_out_p']

    kernel = functools.partial(
        _fused_deconv_kernel,
        L0=L0, s1=c1['stride'], q1=q1, L1=L1,
        s2=c2['stride'], q2=q2, L2=L2,
        s3=c3['stride'], q3=q3, L3=L3,
        d_model=d_model, c_out_p=c3p, eps=eps)

    out = pl.pallas_call(
        kernel,
        out_shape=jax.ShapeDtypeStruct((B, L3 - 1, c3p), z.dtype),
        grid_spec=pltpu.PrefetchScalarGridSpec(
            num_scalar_prefetch=0,
            grid=(B,),
            in_specs=[
                pl.BlockSpec((1, 1, d_latent), lambda b: (b, 0, 0)),          # z
                pl.BlockSpec((L0, d_latent, C0p), lambda b: (0, 0, 0)),       # W_in (packed)
                pl.BlockSpec((L0, C0p), lambda b: (0, 0)),                    # b_in
                pl.BlockSpec((c1['K'], c1p_in, c1['c_out_p']), lambda b: (0, 0, 0)),
                pl.BlockSpec((1, c1['c_out_p']), lambda b: (0, 0)),
                pl.BlockSpec((c2['K'], c2p_in, c2['c_out_p']), lambda b: (0, 0, 0)),
                pl.BlockSpec((1, c2['c_out_p']), lambda b: (0, 0)),
                pl.BlockSpec((c3['K'], c3p_in, c3['c_out_p']), lambda b: (0, 0, 0)),
                pl.BlockSpec((1, c3['c_out_p']), lambda b: (0, 0)),
                pl.BlockSpec((1, c3p), lambda b: (0, 0)),                     # gamma
                pl.BlockSpec((1, c3p), lambda b: (0, 0)),                     # beta
            ],
            out_specs=pl.BlockSpec((1, L3 - 1, c3p), lambda b: (b, 0, 0)),
            scratch_shapes=[
                pltpu.VMEM((r1, c1p_in), jnp.float32),   # conv1 dilated+halo input
                pltpu.VMEM((rx1, c1['c_out_p']), jnp.float32),   # conv1 output
                pltpu.VMEM((r2, c2p_in), jnp.float32),   # conv2 dilated+halo input
                pltpu.VMEM((r3, c3p_in), jnp.float32),   # conv3 halo-padded input
            ],
        ),
        compiler_params=pltpu.CompilerParams(
            dimension_semantics=("parallel",)),          # B>=2 -> 2 TCs on v7x
    )(z.reshape(B, 1, d_latent),
      packed['w_in'], packed['b_in'],
      c1['w'], c1['b'], c2['w'], c2['b'], c3['w'], c3['b'],
      packed['gamma'], packed['beta'])

    if c3p != d_model:
        out = out[:, :, :d_model]
    return out


# -----------------------------------------------------------------------------
# Plain-JAX reference (independent scatter formulation, torch semantics, f32)
# -----------------------------------------------------------------------------
def _ref_conv_transpose1d(x, w, b, stride, padding):
    # x: (B, C_in, L_in), w: (C_in, C_out, K), b: (C_out,)  (torch layouts)
    B, C_in, L_in = x.shape
    _, C_out, K = w.shape
    L_full = (L_in - 1) * stride + K
    y_full = jnp.zeros((B, C_out, L_full), jnp.float32)
    for k in range(K):
        contrib = jnp.einsum('bil,io->bol', x, w[:, :, k])
        y_full = y_full.at[:, :, k:k + (L_in - 1) * stride + 1:stride].add(contrib)
    L_out = L_full - 2 * padding
    return y_full[:, :, padding:padding + L_out] + b[None, :, None]


def ref_forward(z, params, eps):
    h = jax.nn.silu(z @ params['w_in'] + params['b_in'])
    B = h.shape[0]
    x = h.reshape(B, 64, 9)                               # (B, C, L)
    for (w, b, stride, padding) in params['convs']:
        x = jax.nn.silu(_ref_conv_transpose1d(x, w, b, stride, padding))
    x = x.transpose(0, 2, 1)                              # (B, L, d_model)
    mean = x.mean(-1, keepdims=True)
    std = jnp.sqrt(jnp.sum((x - mean) ** 2, -1, keepdims=True) / (x.shape[-1] - 1))
    out = params['a_2'] * (x - mean) / (std + eps) + params['b_2']
    return out[:, :-1, :]


if __name__ == "__main__":
    key = jax.random.PRNGKey(0)
    B, d_latent, d_model = 2, 32, 128
    eps = 1e-6

    keys = jax.random.split(key, 10)
    z = jax.random.normal(keys[0], (B, d_latent), dtype=jnp.float32)

    # reshape = Linear(d_latent, 576) + SiLU
    w_in = jax.random.normal(keys[1], (d_latent, 576), jnp.float32) / math.sqrt(d_latent)
    b_in = 0.1 * jax.random.normal(keys[2], (576,), jnp.float32)

    # deconv stack, mirroring the PyTorch constructor
    convs = []
    in_d, ki = 64, 3
    for i in range(3):
        out_d = (d_model - in_d) // 4 + in_d
        stride = 4 - i
        kernel_size = 11
        if i == 2:
            out_d = d_model
            stride = 1
        w = jax.random.normal(keys[ki], (in_d, out_d, kernel_size), jnp.float32) \
            / math.sqrt(in_d * kernel_size)
        b = 0.1 * jax.random.normal(keys[ki + 1], (out_d,), jnp.float32)
        convs.append((w, b, stride, 2))
        in_d = out_d
        ki += 2

    a_2 = jnp.ones((d_model,), jnp.float32)    # LayerNorm init: ones / zeros
    b_2 = jnp.zeros((d_model,), jnp.float32)
    params = dict(w_in=w_in, b_in=b_in, convs=convs, a_2=a_2, b_2=b_2)

    packed = pack_deconv_params(params)        # one-time weight packing
    fwd = jax.jit(lambda zz: deconv_forward(zz, packed, eps))

    out = jax.block_until_ready(fwd(z))
    assert out.shape == (B, 126, d_model), out.shape

    ref = ref_forward(z, params, eps)
    err = float(jnp.max(jnp.abs(out - ref)))
    # Tolerance covers bf16 MXU operands (perf feedback) + EUP approximate
    # reciprocals in SiLU and LayerNorm; the f32 reference stays untouched.
    assert jnp.allclose(out, ref, atol=3e-2, rtol=3e-2), f"mismatch vs reference: {err}"

    print("KERNEL_OK")
</pallas_src>

<mosaic_0001>
module attributes {stable_mosaic.version = 11 : i64} {
  func.func @_fused_deconv_kernel(%arg0: i32, %arg1: memref<1x1x32xf32, #tpu.memory_space<vmem>>, %arg2: memref<9x32x128xf32, #tpu.memory_space<vmem>>, %arg3: memref<9x128xf32, #tpu.memory_space<vmem>>, %arg4: memref<11x128x128xbf16, #tpu.memory_space<vmem>>, %arg5: memref<1x128xf32, #tpu.memory_space<vmem>>, %arg6: memref<11x128x128xbf16, #tpu.memory_space<vmem>>, %arg7: memref<1x128xf32, #tpu.memory_space<vmem>>, %arg8: memref<11x128x128xbf16, #tpu.memory_space<vmem>>, %arg9: memref<1x128xf32, #tpu.memory_space<vmem>>, %arg10: memref<1x128xf32, #tpu.memory_space<vmem>>, %arg11: memref<1x128xf32, #tpu.memory_space<vmem>>, %arg12: memref<1x126x128xf32, #tpu.memory_space<vmem>>, %arg13: memref<56x128xf32, #tpu.memory_space<vmem>>, %arg14: memref<40x128xf32, #tpu.memory_space<vmem>>, %arg15: memref<136x128xf32, #tpu.memory_space<vmem>>, %arg16: memref<144x128xf32, #tpu.memory_space<vmem>>) attributes {dimension_semantics = [#tpu.dimension_semantics<parallel>], iteration_bounds = array<i64: 2>, scalar_prefetch = 0 : i64, scratch_operands = 4 : i64, tpu.core_type = #tpu.core_type<tc>, window_params = [{transform_indices = @transform_0, window_bounds = array<i64: 1, 1, 32>}, {pipeline_mode = #tpu.pipeline_mode<synchronous>, transform_indices = @transform_1, window_bounds = array<i64: 9, 32, 128>}, {pipeline_mode = #tpu.pipeline_mode<synchronous>, transform_indices = @transform_2, window_bounds = array<i64: 9, 128>}, {pipeline_mode = #tpu.pipeline_mode<synchronous>, transform_indices = @transform_3, window_bounds = array<i64: 11, 128, 128>}, {pipeline_mode = #tpu.pipeline_mode<synchronous>, transform_indices = @transform_4, window_bounds = array<i64: 1, 128>}, {pipeline_mode = #tpu.pipeline_mode<synchronous>, transform_indices = @transform_5, window_bounds = array<i64: 11, 128, 128>}, {pipeline_mode = #tpu.pipeline_mode<synchronous>, transform_indices = @transform_6, window_bounds = array<i64: 1, 128>}, {pipeline_mode = #tpu.pipeline_mode<synchronous>, transform_indices = @transform_7, window_bounds = array<i64: 11, 128, 128>}, {pipeline_mode = #tpu.pipeline_mode<synchronous>, transform_indices = @transform_8, window_bounds = array<i64: 1, 128>}, {pipeline_mode = #tpu.pipeline_mode<synchronous>, transform_indices = @transform_9, window_bounds = array<i64: 1, 128>}, {pipeline_mode = #tpu.pipeline_mode<synchronous>, transform_indices = @transform_10, window_bounds = array<i64: 1, 128>}, {transform_indices = @transform_11, window_bounds = array<i64: 1, 126, 128>}]} {
    %cst = arith.constant 0.000000e+00 : f32
    %0 = vector.broadcast %cst : f32 to vector<56x128xf32>
    %c0 = arith.constant 0 : index
    %c0_0 = arith.constant 0 : index
    %1 = vector.load %arg13[%c0, %c0_0] : memref<56x128xf32, #tpu.memory_space<vmem>>, vector<56x128xf32>
    tpu.vector_store %arg13[%c0, %c0_0], %0 {strides = array<i32>} : memref<56x128xf32, #tpu.memory_space<vmem>>, vector<56x128xf32>,
    %cst_1 = arith.constant 0.000000e+00 : f32
    %2 = vector.broadcast %cst_1 : f32 to vector<136x128xf32>
    %c0_2 = arith.constant 0 : index
    %c0_3 = arith.constant 0 : index
    %3 = vector.load %arg15[%c0_2, %c0_3] : memref<136x128xf32, #tpu.memory_space<vmem>>, vector<136x128xf32>
    tpu.vector_store %arg15[%c0_2, %c0_3], %2 {strides = array<i32>} : memref<136x128xf32, #tpu.memory_space<vmem>>, vector<136x128xf32>,
    %cst_4 = arith.constant 0.000000e+00 : f32
    %4 = vector.broadcast %cst_4 : f32 to vector<144x128xf32>
    %c0_5 = arith.constant 0 : index
    %c0_6 = arith.constant 0 : index
    %5 = vector.load %arg16[%c0_5, %c0_6] : memref<144x128xf32, #tpu.memory_space<vmem>>, vector<144x128xf32>
    tpu.vector_store %arg16[%c0_5, %c0_6], %4 {strides = array<i32>} : memref<144x128xf32, #tpu.memory_space<vmem>>, vector<144x128xf32>,
    %c0_7 = arith.constant 0 : index
    %c0_8 = arith.constant 0 : index
    %c0_9 = arith.constant 0 : index
    %6 = vector.load %arg1[%c0_7, %c0_8, %c0_9] : memref<1x1x32xf32, #tpu.memory_space<vmem>>, vector<1x1x32xf32>
    %7 = vector.shape_cast %6 : vector<1x1x32xf32> to vector<1x32xf32>
    %c0_10 = arith.constant 0 : index
    %c0_11 = arith.constant 0 : index
    %c0_12 = arith.constant 0 : index
    %8 = vector.load %arg2[%c0_10, %c0_11, %c0_12] : memref<9x32x128xf32, #tpu.memory_space<vmem>>, vector<1x32x128xf32>
    %9 = vector.shape_cast %8 : vector<1x32x128xf32> to vector<32x128xf32>
    %cst_13 = arith.constant dense<0.000000e+00> : vector<1x128xf32>
    %10 = tpu.matmul %7, %9, %cst_13 {dimension_numbers = #tpu.dot_dimension_numbers<[1], [0], [0], [1], [0, 0, 1, 1], [], []>} : vector<1x32xf32>, vector<32x128xf32>, vector<1x128xf32> -> vector<1x128xf32>
    %c0_14 = arith.constant 0 : index
    %c0_15 = arith.constant 0 : index
    %11 = vector.load %arg3[%c0_14, %c0_15] : memref<9x128xf32, #tpu.memory_space<vmem>>, vector<1x128xf32>
    %12 = arith.addf %10, %11 : vector<1x128xf32>
    %cst_16 = arith.constant 0.000000e+00 : f32
    %13 = vector.broadcast %cst_16 : f32 to vector<1x128xf32>
    %14 = arith.subf %13, %12 : vector<1x128xf32>
    %15 = math.exp %14 : vector<1x128xf32>
    %cst_17 = arith.constant 1.000000e+00 : f32
    %16 = vector.broadcast %cst_17 : f32 to vector<1x128xf32>
    %17 = arith.addf %16, %15 : vector<1x128xf32>
    %18 = tpu.reciprocal %17 {approx = true} : vector<1x128xf32> -> vector<1x128xf32>
    %19 = arith.mulf %12, %18 : vector<1x128xf32>
    %c8 = arith.constant 8 : index
    %c0_18 = arith.constant 0 : index
    %20 = vector.load %arg13[%c8, %c0_18] : memref<56x128xf32, #tpu.memory_space<vmem>>, vector<1x128xf32>
    tpu.vector_store %arg13[%c8, %c0_18], %19 {strides = array<i32>} : memref<56x128xf32, #tpu.memory_space<vmem>>, vector<1x128xf32>,
    %c1 = arith.constant 1 : index
    %c0_19 = arith.constant 0 : index
    %c0_20 = arith.constant 0 : index
    %21 = vector.load %arg2[%c1, %c0_19, %c0_20] : memref<9x32x128xf32, #tpu.memory_space<vmem>>, vector<1x32x128xf32>
    %22 = vector.shape_cast %21 : vector<1x32x128xf32> to vector<32x128xf32>
    %cst_21 = arith.constant dense<0.000000e+00> : vector<1x128xf32>
    %23 = tpu.matmul %7, %22, %cst_21 {dimension_numbers = #tpu.dot_dimension_numbers<[1], [0], [0], [1], [0, 0, 1, 1], [], []>} : vector<1x32xf32>, vector<32x128xf32>, vector<1x128xf32> -> vector<1x128xf32>
    %c1_22 = arith.constant 1 : index
    %c0_23 = arith.constant 0 : index
    %24 = vector.load %arg3[%c1_22, %c0_23] : memref<9x128xf32, #tpu.memory_space<vmem>>, vector<1x128xf32>
    %25 = arith.addf %23, %24 : vector<1x128xf32>
    %cst_24 = arith.constant 0.000000e+00 : f32
    %26 = vector.broadcast %cst_24 : f32 to vector<1x128xf32>
    %27 = arith.subf %26, %25 : vector<1x128xf32>
    %28 = math.exp %27 : vector<1x128xf32>
    %cst_25 = arith.constant 1.000000e+00 : f32
    %29 = vector.broadcast %cst_25 : f32 to vector<1x128xf32>
    %30 = arith.addf %29, %28 : vector<1x128xf32>
    %31 = tpu.reciprocal %30 {approx = true} : vector<1x128xf32> -> vector<1x128xf32>
    %32 = arith.mulf %25, %31 : vector<1x128xf32>
    %c12 = arith.constant 12 : index
    %c0_26 = arith.constant 0 : index
    %33 = vector.load %arg13[%c12, %c0_26] : memref<56x128xf32, #tpu.memory_space<vmem>>, vector<1x128xf32>
    tpu.vector_store %arg13[%c12, %c0_26], %32 {strides = array<i32>} : memref<56x128xf32, #tpu.memory_space<vmem>>, vector<1x128xf32>,
    %c2 = arith.constant 2 : index
    %c0_27 = arith.constant 0 : index
    %c0_28 = arith.constant 0 : index
    %34 = vector.load %arg2[%c2, %c0_27, %c0_28] : memref<9x32x128xf32, #tpu.memory_space<vmem>>, vector<1x32x128xf32>
    %35 = vector.shape_cast %34 : vector<1x32x128xf32> to vector<32x128xf32>
    %cst_29 = arith.constant dense<0.000000e+00> : vector<1x128xf32>
    %36 = tpu.matmul %7, %35, %cst_29 {dimension_numbers = #tpu.dot_dimension_numbers<[1], [0], [0], [1], [0, 0, 1, 1], [], []>} : vector<1x32xf32>, vector<32x128xf32>, vector<1x128xf32> -> vector<1x128xf32>
    %c2_30 = arith.constant 2 : index
    %c0_31 = arith.constant 0 : index
    %37 = vector.load %arg3[%c2_30, %c0_31] : memref<9x128xf32, #tpu.memory_space<vmem>>, vector<1x128xf32>
    %38 = arith.addf %36, %37 : vector<1x128xf32>
    %cst_32 = arith.constant 0.000000e+00 : f32
    %39 = vector.broadcast %cst_32 : f32 to vector<1x128xf32>
    %40 = arith.subf %39, %38 : vector<1x128xf32>
    %41 = math.exp %40 : vector<1x128xf32>
    %cst_33 = arith.constant 1.000000e+00 : f32
    %42 = vector.broadcast %cst_33 : f32 to vector<1x128xf32>
    %43 = arith.addf %42, %41 : vector<1x128xf32>
    %44 = tpu.reciprocal %43 {approx = true} : vector<1x128xf32> -> vector<1x128xf32>
    %45 = arith.mulf %38, %44 : vector<1x128xf32>
    %c16 = arith.constant 16 : index
    %c0_34 = arith.constant 0 : index
    %46 = vector.load %arg13[%c16, %c0_34] : memref<56x128xf32, #tpu.memory_space<vmem>>, vector<1x128xf32>
    tpu.vector_store %arg13[%c16, %c0_34], %45 {strides = array<i32>} : memref<56x128xf32, #tpu.memory_space<vmem>>, vector<1x128xf32>,
    %c3 = arith.constant 3 : index
    %c0_35 = arith.constant 0 : index
    %c0_36 = arith.constant 0 : index
    %47 = vector.load %arg2[%c3, %c0_35, %c0_36] : memref<9x32x128xf32, #tpu.memory_space<vmem>>, vector<1x32x128xf32>
    %48 = vector.shape_cast %47 : vector<1x32x128xf32> to vector<32x128xf32>
    %cst_37 = arith.constant dense<0.000000e+00> : vector<1x128xf32>
    %49 = tpu.matmul %7, %48, %cst_37 {dimension_numbers = #tpu.dot_dimension_numbers<[1], [0], [0], [1], [0, 0, 1, 1], [], []>} : vector<1x32xf32>, vector<32x128xf32>, vector<1x128xf32> -> vector<1x128xf32>
    %c3_38 = arith.constant 3 : index
    %c0_39 = arith.constant 0 : index
    %50 = vector.load %arg3[%c3_38, %c0_39] : memref<9x128xf32, #tpu.memory_space<vmem>>, vector<1x128xf32>
    %51 = arith.addf %49, %50 : vector<1x128xf32>
    %cst_40 = arith.constant 0.000000e+00 : f32
    %52 = vector.broadcast %cst_40 : f32 to vector<1x128xf32>
    %53 = arith.subf %52, %51 : vector<1x128xf32>
    %54 = math.exp %53 : vector<1x128xf32>
    %cst_41 = arith.constant 1.000000e+00 : f32
    %55 = vector.broadcast %cst_41 : f32 to vector<1x128xf32>
    %56 = arith.addf %55, %54 : vector<1x128xf32>
    %57 = tpu.reciprocal %56 {approx = true} : vector<1x128xf32> -> vector<1x128xf32>
    %58 = arith.mulf %51, %57 : vector<1x128xf32>
    %c20 = arith.constant 20 : index
    %c0_42 = arith.constant 0 : index
    %59 = vector.load %arg13[%c20, %c0_42] : memref<56x128xf32, #tpu.memory_space<vmem>>, vector<1x128xf32>
    tpu.vector_store %arg13[%c20, %c0_42], %58 {strides = array<i32>} : memref<56x128xf32, #tpu.memory_space<vmem>>, vector<1x128xf32>,
    %c4 = arith.constant 4 : index
    %c0_43 = arith.constant 0 : index
    %c0_44 = arith.constant 0 : index
    %60 = vector.load %arg2[%c4, %c0_43, %c0_44] : memref<9x32x128xf32, #tpu.memory_space<vmem>>, vector<1x32x128xf32>
    %61 = vector.shape_cast %60 : vector<1x32x128xf32> to vector<32x128xf32>
    %cst_45 = arith.constant dense<0.000000e+00> : vector<1x128xf32>
    %62 = tpu.matmul %7, %61, %cst_45 {dimension_numbers = #tpu.dot_dimension_numbers<[1], [0], [0], [1], [0, 0, 1, 1], [], []>} : vector<1x32xf32>, vector<32x128xf32>, vector<1x128xf32> -> vector<1x128xf32>
    %c4_46 = arith.constant 4 : index
    %c0_47 = arith.constant 0 : index
    %63 = vector.load %arg3[%c4_46, %c0_47] : memref<9x128xf32, #tpu.memory_space<vmem>>, vector<1x128xf32>
    %64 = arith.addf %62, %63 : vector<1x128xf32>
    %cst_48 = arith.constant 0.000000e+00 : f32
    %65 = vector.broadcast %cst_48 : f32 to vector<1x128xf32>
    %66 = arith.subf %65, %64 : vector<1x128xf32>
    %67 = math.exp %66 : vector<1x128xf32>
    %cst_49 = arith.constant 1.000000e+00 : f32
    %68 = vector.broadcast %cst_49 : f32 to vector<1x128xf32>
    %69 = arith.addf %68, %67 : vector<1x128xf32>
    %70 = tpu.reciprocal %69 {approx = true} : vector<1x128xf32> -> vector<1x128xf32>
    %71 = arith.mulf %64, %70 : vector<1x128xf32>
    %c24 = arith.constant 24 : index
    %c0_50 = arith.constant 0 : index
    %72 = vector.load %arg13[%c24, %c0_50] : memref<56x128xf32, #tpu.memory_space<vmem>>, vector<1x128xf32>
    tpu.vector_store %arg13[%c24, %c0_50], %71 {strides = array<i32>} : memref<56x128xf32, #tpu.memory_space<vmem>>, vector<1x128xf32>,
    %c5 = arith.constant 5 : index
    %c0_51 = arith.constant 0 : index
    %c0_52 = arith.constant 0 : index
    %73 = vector.load %arg2[%c5, %c0_51, %c0_52] : memref<9x32x128xf32, #tpu.memory_space<vmem>>, vector<1x32x128xf32>
    %74 = vector.shape_cast %73 : vector<1x32x128xf32> to vector<32x128xf32>
    %cst_53 = arith.constant dense<0.000000e+00> : vector<1x128xf32>
    %75 = tpu.matmul %7, %74, %cst_53 {dimension_numbers = #tpu.dot_dimension_numbers<[1], [0], [0], [1], [0, 0, 1, 1], [], []>} : vector<1x32xf32>, vector<32x128xf32>, vector<1x128xf32> -> vector<1x128xf32>
    %c5_54 = arith.constant 5 : index
    %c0_55 = arith.constant 0 : index
    %76 = vector.load %arg3[%c5_54, %c0_55] : memref<9x128xf32, #tpu.memory_space<vmem>>, vector<1x128xf32>
    %77 = arith.addf %75, %76 : vector<1x128xf32>
    %cst_56 = arith.constant 0.000000e+00 : f32
    %78 = vector.broadcast %cst_56 : f32 to vector<1x128xf32>
    %79 = arith.subf %78, %77 : vector<1x128xf32>
    %80 = math.exp %79 : vector<1x128xf32>
    %cst_57 = arith.constant 1.000000e+00 : f32
    %81 = vector.broadcast %cst_57 : f32 to vector<1x128xf32>
    %82 = arith.addf %81, %80 : vector<1x128xf32>
    %83 = tpu.reciprocal %82 {approx = true} : vector<1x128xf32> -> vector<1x128xf32>
    %84 = arith.mulf %77, %83 : vector<1x128xf32>
    %c28 = arith.constant 28 : index
    %c0_58 = arith.constant 0 : index
    %85 = vector.load %arg13[%c28, %c0_58] : memref<56x128xf32, #tpu.memory_space<vmem>>, vector<1x128xf32>
    tpu.vector_store %arg13[%c28, %c0_58], %84 {strides = array<i32>} : memref<56x128xf32, #tpu.memory_space<vmem>>, vector<1x128xf32>,
    %c6 = arith.constant 6 : index
    %c0_59 = arith.constant 0 : index
    %c0_60 = arith.constant 0 : index
    %86 = vector.load %arg2[%c6, %c0_59, %c0_60] : memref<9x32x128xf32, #tpu.memory_space<vmem>>, vector<1x32x128xf32>
    %87 = vector.shape_cast %86 : vector<1x32x128xf32> to vector<32x128xf32>
    %cst_61 = arith.constant dense<0.000000e+00> : vector<1x128xf32>
    %88 = tpu.matmul %7, %87, %cst_61 {dimension_numbers = #tpu.dot_dimension_numbers<[1], [0], [0], [1], [0, 0, 1, 1], [], []>} : vector<1x32xf32>, vector<32x128xf32>, vector<1x128xf32> -> vector<1x128xf32>
    %c6_62 = arith.constant 6 : index
    %c0_63 = arith.constant 0 : index
    %89 = vector.load %arg3[%c6_62, %c0_63] : memref<9x128xf32, #tpu.memory_space<vmem>>, vector<1x128xf32>
    %90 = arith.addf %88, %89 : vector<1x128xf32>
    %cst_64 = arith.constant 0.000000e+00 : f32
    %91 = vector.broadcast %cst_64 : f32 to vector<1x128xf32>
    %92 = arith.subf %91, %90 : vector<1x128xf32>
    %93 = math.exp %92 : vector<1x128xf32>
    %cst_65 = arith.constant 1.000000e+00 : f32
    %94 = vector.broadcast %cst_65 : f32 to vector<1x128xf32>
    %95 = arith.addf %94, %93 : vector<1x128xf32>
    %96 = tpu.reciprocal %95 {approx = true} : vector<1x128xf32> -> vector<1x128xf32>
    %97 = arith.mulf %90, %96 : vector<1x128xf32>
    %c32 = arith.constant 32 : index
    %c0_66 = arith.constant 0 : index
    %98 = vector.load %arg13[%c32, %c0_66] : memref<56x128xf32, #tpu.memory_space<vmem>>, vector<1x128xf32>
    tpu.vector_store %arg13[%c32, %c0_66], %97 {strides = array<i32>} : memref<56x128xf32, #tpu.memory_space<vmem>>, vector<1x128xf32>,
    %c7 = arith.constant 7 : index
    %c0_67 = arith.constant 0 : index
    %c0_68 = arith.constant 0 : index
    %99 = vector.load %arg2[%c7, %c0_67, %c0_68] : memref<9x32x128xf32, #tpu.memory_space<vmem>>, vector<1x32x128xf32>
    %100 = vector.shape_cast %99 : vector<1x32x128xf32> to vector<32x128xf32>
    %cst_69 = arith.constant dense<0.000000e+00> : vector<1x128xf32>
    %101 = tpu.matmul %7, %100, %cst_69 {dimension_numbers = #tpu.dot_dimension_numbers<[1], [0], [0], [1], [0, 0, 1, 1], [], []>} : vector<1x32xf32>, vector<32x128xf32>, vector<1x128xf32> -> vector<1x128xf32>
    %c7_70 = arith.constant 7 : index
    %c0_71 = arith.constant 0 : index
    %102 = vector.load %arg3[%c7_70, %c0_71] : memref<9x128xf32, #tpu.memory_space<vmem>>, vector<1x128xf32>
    %103 = arith.addf %101, %102 : vector<1x128xf32>
    %cst_72 = arith.constant 0.000000e+00 : f32
    %104 = vector.broadcast %cst_72 : f32 to vector<1x128xf32>
    %105 = arith.subf %104, %103 : vector<1x128xf32>
    %106 = math.exp %105 : vector<1x128xf32>
    %cst_73 = arith.constant 1.000000e+00 : f32
    %107 = vector.broadcast %cst_73 : f32 to vector<1x128xf32>
    %108 = arith.addf %107, %106 : vector<1x128xf32>
    %109 = tpu.reciprocal %108 {approx = true} : vector<1x128xf32> -> vector<1x128xf32>
    %110 = arith.mulf %103, %109 : vector<1x128xf32>
    %c36 = arith.constant 36 : index
    %c0_74 = arith.constant 0 : index
    %111 = vector.load %arg13[%c36, %c0_74] : memref<56x128xf32, #tpu.memory_space<vmem>>, vector<1x128xf32>
    tpu.vector_store %arg13[%c36, %c0_74], %110 {strides = array<i32>} : memref<56x128xf32, #tpu.memory_space<vmem>>, vector<1x128xf32>,
    %c8_75 = arith.constant 8 : index
    %c0_76 = arith.constant 0 : index
    %c0_77 = arith.constant 0 : index
    %112 = vector.load %arg2[%c8_75, %c0_76, %c0_77] : memref<9x32x128xf32, #tpu.memory_space<vmem>>, vector<1x32x128xf32>
    %113 = vector.shape_cast %112 : vector<1x32x128xf32> to vector<32x128xf32>
    %cst_78 = arith.constant dense<0.000000e+00> : vector<1x128xf32>
    %114 = tpu.matmul %7, %113, %cst_78 {dimension_numbers = #tpu.dot_dimension_numbers<[1], [0], [0], [1], [0, 0, 1, 1], [], []>} : vector<1x32xf32>, vector<32x128xf32>, vector<1x128xf32> -> vector<1x128xf32>
    %c8_79 = arith.constant 8 : index
    %c0_80 = arith.constant 0 : index
    %115 = vector.load %arg3[%c8_79, %c0_80] : memref<9x128xf32, #tpu.memory_space<vmem>>, vector<1x128xf32>
    %116 = arith.addf %114, %115 : vector<1x128xf32>
    %cst_81 = arith.constant 0.000000e+00 : f32
    %117 = vector.broadcast %cst_81 : f32 to vector<1x128xf32>
    %118 = arith.subf %117, %116 : vector<1x128xf32>
    %119 = math.exp %118 : vector<1x128xf32>
    %cst_82 = arith.constant 1.000000e+00 : f32
    %120 = vector.broadcast %cst_82 : f32 to vector<1x128xf32>
    %121 = arith.addf %120, %119 : vector<1x128xf32>
    %122 = tpu.reciprocal %121 {approx = true} : vector<1x128xf32> -> vector<1x128xf32>
    %123 = arith.mulf %116, %122 : vector<1x128xf32>
    %c40 = arith.constant 40 : index
    %c0_83 = arith.constant 0 : index
    %124 = vector.load %arg13[%c40, %c0_83] : memref<56x128xf32, #tpu.memory_space<vmem>>, vector<1x128xf32>
    tpu.vector_store %arg13[%c40, %c0_83], %123 {strides = array<i32>} : memref<56x128xf32, #tpu.memory_space<vmem>>, vector<1x128xf32>,
    %c0_84 = arith.constant 0 : index
    %c0_85 = arith.constant 0 : index
    %125 = vector.load %arg13[%c0_84, %c0_85] : memref<56x128xf32, #tpu.memory_space<vmem>>, vector<39x128xf32>
    %126 = arith.truncf %125 : vector<39x128xf32> to vector<39x128xbf16>
    %c0_86 = arith.constant 0 : index
    %c0_87 = arith.constant 0 : index
    %c0_88 = arith.constant 0 : index
    %127 = vector.load %arg4[%c0_86, %c0_87, %c0_88] : memref<11x128x128xbf16, #tpu.memory_space<vmem>>, vector<1x128x128xbf16>
    %128 = vector.shape_cast %127 : vector<1x128x128xbf16> to vector<128x128xbf16>
    %cst_89 = arith.constant dense<0.000000e+00> : vector<39x128xf32>
    %129 = tpu.matmul %126, %128, %cst_89 {dimension_numbers = #tpu.dot_dimension_numbers<[1], [0], [0], [1], [0, 0, 1, 1], [], []>} : vector<39x128xbf16>, vector<128x128xbf16>, vector<39x128xf32> -> vector<39x128xf32>
    %c1_90 = arith.constant 1 : index
    %c0_91 = arith.constant 0 : index
    %130 = vector.load %arg13[%c1_90, %c0_91] : memref<56x128xf32, #tpu.memory_space<vmem>>, vector<39x128xf32>
    %131 = arith.truncf %130 : vector<39x128xf32> to vector<39x128xbf16>
    %c1_92 = arith.constant 1 : index
    %c0_93 = arith.constant 0 : index
    %c0_94 = arith.constant 0 : index
    %132 = vector.load %arg4[%c1_92, %c0_93, %c0_94] : memref<11x128x128xbf16, #tpu.memory_space<vmem>>, vector<1x128x128xbf16>
    %133 = vector.shape_cast %132 : vector<1x128x128xbf16> to vector<128x128xbf16>
    %cst_95 = arith.constant dense<0.000000e+00> : vector<39x128xf32>
    %134 = tpu.matmul %131, %133, %cst_95 {dimension_numbers = #tpu.dot_dimension_numbers<[1], [0], [0], [1], [0, 0, 1, 1], [], []>} : vector<39x128xbf16>, vector<128x128xbf16>, vector<39x128xf32> -> vector<39x128xf32>
    %135 = arith.addf %129, %134 : vector<39x128xf32>
    %c2_96 = arith.constant 2 : index
    %c0_97 = arith.constant 0 : index
    %136 = vector.load %arg13[%c2_96, %c0_97] : memref<56x128xf32, #tpu.memory_space<vmem>>, vector<39x128xf32>
    %137 = arith.truncf %136 : vector<39x128xf32> to vector<39x128xbf16>
    %c2_98 = arith.constant 2 : index
    %c0_99 = arith.constant 0 : index
    %c0_100 = arith.constant 0 : index
    %138 = vector.load %arg4[%c2_98, %c0_99, %c0_100] : memref<11x128x128xbf16, #tpu.memory_space<vmem>>, vector<1x128x128xbf16>
    %139 = vector.shape_cast %138 : vector<1x128x128xbf16> to vector<128x128xbf16>
    %cst_101 = arith.constant dense<0.000000e+00> : vector<39x128xf32>
    %140 = tpu.matmul %137, %139, %cst_101 {dimension_numbers = #tpu.dot_dimension_numbers<[1], [0], [0], [1], [0, 0, 1, 1], [], []>} : vector<39x128xbf16>, vector<128x128xbf16>, vector<39x128xf32> -> vector<39x128xf32>
    %141 = arith.addf %135, %140 : vector<39x128xf32>
    %c3_102 = arith.constant 3 : index
    %c0_103 = arith.constant 0 : index
    %142 = vector.load %arg13[%c3_102, %c0_103] : memref<56x128xf32, #tpu.memory_space<vmem>>, vector<39x128xf32>
    %143 = arith.truncf %142 : vector<39x128xf32> to vector<39x128xbf16>
    %c3_104 = arith.constant 3 : index
    %c0_105 = arith.constant 0 : index
    %c0_106 = arith.constant 0 : index
    %144 = vector.load %arg4[%c3_104, %c0_105, %c0_106] : memref<11x128x128xbf16, #tpu.memory_space<vmem>>, vector<1x128x128xbf16>
    %145 = vector.shape_cast %144 : vector<1x128x128xbf16> to vector<128x128xbf16>
    %cst_107 = arith.constant dense<0.000000e+00> : vector<39x128xf32>
    %146 = tpu.matmul %143, %145, %cst_107 {dimension_numbers = #tpu.dot_dimension_numbers<[1], [0], [0], [1], [0, 0, 1, 1], [], []>} : vector<39x128xbf16>, vector<128x128xbf16>, vector<39x128xf32> -> vector<39x128xf32>
    %147 = arith.addf %141, %146 : vector<39x128xf32>
    %c4_108 = arith.constant 4 : index
    %c0_109 = arith.constant 0 : index
    %148 = vector.load %arg13[%c4_108, %c0_109] : memref<56x128xf32, #tpu.memory_space<vmem>>, vector<39x128xf32>
    %149 = arith.truncf %148 : vector<39x128xf32> to vector<39x128xbf16>
    %c4_110 = arith.constant 4 : index
    %c0_111 = arith.constant 0 : index
    %c0_112 = arith.constant 0 : index
    %150 = vector.load %arg4[%c4_110, %c0_111, %c0_112] : memref<11x128x128xbf16, #tpu.memory_space<vmem>>, vector<1x128x128xbf16>
    %151 = vector.shape_cast %150 : vector<1x128x128xbf16> to vector<128x128xbf16>
    %cst_113 = arith.constant dense<0.000000e+00> : vector<39x128xf32>
    %152 = tpu.matmul %149, %151, %cst_113 {dimension_numbers = #tpu.dot_dimension_numbers<[1], [0], [0], [1], [0, 0, 1, 1], [], []>} : vector<39x128xbf16>, vector<128x128xbf16>, vector<39x128xf32> -> vector<39x128xf32>
    %153 = arith.addf %147, %152 : vector<39x128xf32>
    %c5_114 = arith.constant 5 : index
    %c0_115 = arith.constant 0 : index
    %154 = vector.load %arg13[%c5_114, %c0_115] : memref<56x128xf32, #tpu.memory_space<vmem>>, vector<39x128xf32>
    %155 = arith.truncf %154 : vector<39x128xf32> to vector<39x128xbf16>
    %c5_116 = arith.constant 5 : index
    %c0_117 = arith.constant 0 : index
    %c0_118 = arith.constant 0 : index
    %156 = vector.load %arg4[%c5_116, %c0_117, %c0_118] : memref<11x128x128xbf16, #tpu.memory_space<vmem>>, vector<1x128x128xbf16>
    %157 = vector.shape_cast %156 : vector<1x128x128xbf16> to vector<128x128xbf16>
    %cst_119 = arith.constant dense<0.000000e+00> : vector<39x128xf32>
    %158 = tpu.matmul %155, %157, %cst_119 {dimension_numbers = #tpu.dot_dimension_numbers<[1], [0], [0], [1], [0, 0, 1, 1], [], []>} : vector<39x128xbf16>, vector<128x128xbf16>, vector<39x128xf32> -> vector<39x128xf32>
    %159 = arith.addf %153, %158 : vector<39x128xf32>
    %c6_120 = arith.constant 6 : index
    %c0_121 = arith.constant 0 : index
    %160 = vector.load %arg13[%c6_120, %c0_121] : memref<56x128xf32, #tpu.memory_space<vmem>>, vector<39x128xf32>
    %161 = arith.truncf %160 : vector<39x128xf32> to vector<39x128xbf16>
    %c6_122 = arith.constant 6 : index
    %c0_123 = arith.constant 0 : index
    %c0_124 = arith.constant 0 : index
    %162 = vector.load %arg4[%c6_122, %c0_123, %c0_124] : memref<11x128x128xbf16, #tpu.memory_space<vmem>>, vector<1x128x128xbf16>
    %163 = vector.shape_cast %162 : vector<1x128x128xbf16> to vector<128x128xbf16>
    %cst_125 = arith.constant dense<0.000000e+00> : vector<39x128xf32>
    %164 = tpu.matmul %161, %163, %cst_125 {dimension_numbers = #tpu.dot_dimension_numbers<[1], [0], [0], [1], [0, 0, 1, 1], [], []>} : vector<39x128xbf16>, vector<128x128xbf16>, vector<39x128xf32> -> vector<39x128xf32>
    %165 = arith.addf %159, %164 : vector<39x128xf32>
    %c7_126 = arith.constant 7 : index
    %c0_127 = arith.constant 0 : index
    %166 = vector.load %arg13[%c7_126, %c0_127] : memref<56x128xf32, #tpu.memory_space<vmem>>, vector<39x128xf32>
    %167 = arith.truncf %166 : vector<39x128xf32> to vector<39x128xbf16>
    %c7_128 = arith.constant 7 : index
    %c0_129 = arith.constant 0 : index
    %c0_130 = arith.constant 0 : index
    %168 = vector.load %arg4[%c7_128, %c0_129, %c0_130] : memref<11x128x128xbf16, #tpu.memory_space<vmem>>, vector<1x128x128xbf16>
    %169 = vector.shape_cast %168 : vector<1x128x128xbf16> to vector<128x128xbf16>
    %cst_131 = arith.constant dense<0.000000e+00> : vector<39x128xf32>
    %170 = tpu.matmul %167, %169, %cst_131 {dimension_numbers = #tpu.dot_dimension_numbers<[1], [0], [0], [1], [0, 0, 1, 1], [], []>} : vector<39x128xbf16>, vector<128x128xbf16>, vector<39x128xf32> -> vector<39x128xf32>
    %171 = arith.addf %165, %170 : vector<39x128xf32>
    %c8_132 = arith.constant 8 : index
    %c0_133 = arith.constant 0 : index
    %172 = vector.load %arg13[%c8_132, %c0_133] : memref<56x128xf32, #tpu.memory_space<vmem>>, vector<39x128xf32>
    %173 = arith.truncf %172 : vector<39x128xf32> to vector<39x128xbf16>
    %c8_134 = arith.constant 8 : index
    %c0_135 = arith.constant 0 : index
    %c0_136 = arith.constant 0 : index
    %174 = vector.load %arg4[%c8_134, %c0_135, %c0_136] : memref<11x128x128xbf16, #tpu.memory_space<vmem>>, vector<1x128x128xbf16>
    %175 = vector.shape_cast %174 : vector<1x128x128xbf16> to vector<128x128xbf16>
    %cst_137 = arith.constant dense<0.000000e+00> : vector<39x128xf32>
    %176 = tpu.matmul %173, %175, %cst_137 {dimension_numbers = #tpu.dot_dimension_numbers<[1], [0], [0], [1], [0, 0, 1, 1], [], []>} : vector<39x128xbf16>, vector<128x128xbf16>, vector<39x128xf32> -> vector<39x128xf32>
    %177 = arith.addf %171, %176 : vector<39x128xf32>
    %c9 = arith.constant 9 : index
    %c0_138 = arith.constant 0 : index
    %178 = vector.load %arg13[%c9, %c0_138] : memref<56x128xf32, #tpu.memory_space<vmem>>, vector<39x128xf32>
    %179 = arith.truncf %178 : vector<39x128xf32> to vector<39x128xbf16>
    %c9_139 = arith.constant 9 : index
    %c0_140 = arith.constant 0 : index
    %c0_141 = arith.constant 0 : index
    %180 = vector.load %arg4[%c9_139, %c0_140, %c0_141] : memref<11x128x128xbf16, #tpu.memory_space<vmem>>, vector<1x128x128xbf16>
    %181 = vector.shape_cast %180 : vector<1x128x128xbf16> to vector<128x128xbf16>
    %cst_142 = arith.constant dense<0.000000e+00> : vector<39x128xf32>
    %182 = tpu.matmul %179, %181, %cst_142 {dimension_numbers = #tpu.dot_dimension_numbers<[1], [0], [0], [1], [0, 0, 1, 1], [], []>} : vector<39x128xbf16>, vector<128x128xbf16>, vector<39x128xf32> -> vector<39x128xf32>
    %183 = arith.addf %177, %182 : vector<39x128xf32>
    %c10 = arith.constant 10 : index
    %c0_143 = arith.constant 0 : index
    %184 = vector.load %arg13[%c10, %c0_143] : memref<56x128xf32, #tpu.memory_space<vmem>>, vector<39x128xf32>
    %185 = arith.truncf %184 : vector<39x128xf32> to vector<39x128xbf16>
    %c10_144 = arith.constant 10 : index
    %c0_145 = arith.constant 0 : index
    %c0_146 = arith.constant 0 : index
    %186 = vector.load %arg4[%c10_144, %c0_145, %c0_146] : memref<11x128x128xbf16, #tpu.memory_space<vmem>>, vector<1x128x128xbf16>
    %187 = vector.shape_cast %186 : vector<1x128x128xbf16> to vector<128x128xbf16>
    %cst_147 = arith.constant dense<0.000000e+00> : vector<39x128xf32>
    %188 = tpu.matmul %185, %187, %cst_147 {dimension_numbers = #tpu.dot_dimension_numbers<[1], [0], [0], [1], [0, 0, 1, 1], [], []>} : vector<39x128xbf16>, vector<128x128xbf16>, vector<39x128xf32> -> vector<39x128xf32>
    %189 = arith.addf %183, %188 : vector<39x128xf32>
    %c0_148 = arith.constant 0 : index
    %c0_149 = arith.constant 0 : index
    %190 = vector.load %arg5[%c0_148, %c0_149] : memref<1x128xf32, #tpu.memory_space<vmem>>, vector<1x128xf32>
    %191 = vector.broadcast %190 : vector<1x128xf32> to vector<39x128xf32>
    %192 = arith.addf %189, %191 : vector<39x128xf32>
    %cst_150 = arith.constant 0.000000e+00 : f32
    %193 = vector.broadcast %cst_150 : f32 to vector<39x128xf32>
    %194 = arith.subf %193, %192 : vector<39x128xf32>
    %195 = math.exp %194 : vector<39x128xf32>
    %cst_151 = arith.constant 1.000000e+00 : f32
    %196 = vector.broadcast %cst_151 : f32 to vector<39x128xf32>
    %197 = arith.addf %196, %195 : vector<39x128xf32>
    %198 = tpu.reciprocal %197 {approx = true} : vector<39x128xf32> -> vector<39x128xf32>
    %199 = arith.mulf %192, %198 : vector<39x128xf32>
    %c0_152 = arith.constant 0 : index
    %c0_153 = arith.constant 0 : index
    %200 = vector.load %arg14[%c0_152, %c0_153] : memref<40x128xf32, #tpu.memory_space<vmem>>, vector<39x128xf32>
    tpu.vector_store %arg14[%c0_152, %c0_153], %199 {strides = array<i32>} : memref<40x128xf32, #tpu.memory_space<vmem>>, vector<39x128xf32>,
    %c0_154 = arith.constant 0 : index
    %c0_155 = arith.constant 0 : index
    %201 = vector.load %arg14[%c0_154, %c0_155] : memref<40x128xf32, #tpu.memory_space<vmem>>, vector<1x128xf32>
    %c8_156 = arith.constant 8 : index
    %c0_157 = arith.constant 0 : index
    %202 = vector.load %arg15[%c8_156, %c0_157] : memref<136x128xf32, #tpu.memory_space<vmem>>, vector<1x128xf32>
    tpu.vector_store %arg15[%c8_156, %c0_157], %201 {strides = array<i32>} : memref<136x128xf32, #tpu.memory_space<vmem>>, vector<1x128xf32>,
    %c1_158 = arith.constant 1 : index
    %c0_159 = arith.constant 0 : index
    %203 = vector.load %arg14[%c1_158, %c0_159] : memref<40x128xf32, #tpu.memory_space<vmem>>, vector<1x128xf32>
    %c11 = arith.constant 11 : index
    %c0_160 = arith.constant 0 : index
    %204 = vector.load %arg15[%c11, %c0_160] : memref<136x128xf32, #tpu.memory_space<vmem>>, vector<1x128xf32>
    tpu.vector_store %arg15[%c11, %c0_160], %203 {strides = array<i32>} : memref<136x128xf32, #tpu.memory_space<vmem>>, vector<1x128xf32>,
    %c2_161 = arith.constant 2 : index
    %c0_162 = arith.constant 0 : index
    %205 = vector.load %arg14[%c2_161, %c0_162] : memref<40x128xf32, #tpu.memory_space<vmem>>, vector<1x128xf32>
    %c14 = arith.constant 14 : index
    %c0_163 = arith.constant 0 : index
    %206 = vector.load %arg15[%c14, %c0_163] : memref<136x128xf32, #tpu.memory_space<vmem>>, vector<1x128xf32>
    tpu.vector_store %arg15[%c14, %c0_163], %205 {strides = array<i32>} : memref<136x128xf32, #tpu.memory_space<vmem>>, vector<1x128xf32>,
    %c3_164 = arith.constant 3 : index
    %c0_165 = arith.constant 0 : index
    %207 = vector.load %arg14[%c3_164, %c0_165] : memref<40x128xf32, #tpu.memory_space<vmem>>, vector<1x128xf32>
    %c17 = arith.constant 17 : index
    %c0_166 = arith.constant 0 : index
    %208 = vector.load %arg15[%c17, %c0_166] : memref<136x128xf32, #tpu.memory_space<vmem>>, vector<1x128xf32>
    tpu.vector_store %arg15[%c17, %c0_166], %207 {strides = array<i32>} : memref<136x128xf32, #tpu.memory_space<vmem>>, vector<1x128xf32>,
    %c4_167 = arith.constant 4 : index
    %c0_168 = arith.constant 0 : index
    %209 = vector.load %arg14[%c4_167, %c0_168] : memref<40x128xf32, #tpu.memory_space<vmem>>, vector<1x128xf32>
    %c20_169 = arith.constant 20 : index
    %c0_170 = arith.constant 0 : index
    %210 = vector.load %arg15[%c20_169, %c0_170] : memref<136x128xf32, #tpu.memory_space<vmem>>, vector<1x128xf32>
    tpu.vector_store %arg15[%c20_169, %c0_170], %209 {strides = array<i32>} : memref<136x128xf32, #tpu.memory_space<vmem>>, vector<1x128xf32>,
    %c5_171 = arith.constant 5 : index
    %c0_172 = arith.constant 0 : index
    %211 = vector.load %arg14[%c5_171, %c0_172] : memref<40x128xf32, #tpu.memory_space<vmem>>, vector<1x128xf32>
    %c23 = arith.constant 23 : index
    %c0_173 = arith.constant 0 : index
    %212 = vector.load %arg15[%c23, %c0_173] : memref<136x128xf32, #tpu.memory_space<vmem>>, vector<1x128xf32>
    tpu.vector_store %arg15[%c23, %c0_173], %211 {strides = array<i32>} : memref<136x128xf32, #tpu.memory_space<vmem>>, vector<1x128xf32>,
    %c6_174 = arith.constant 6 : index
    %c0_175 = arith.constant 0 : index
    %213 = vector.load %arg14[%c6_174, %c0_175] : memref<40x128xf32, #tpu.memory_space<vmem>>, vector<1x128xf32>
    %c26 = arith.constant 26 : index
    %c0_176 = arith.constant 0 : index
    %214 = vector.load %arg15[%c26, %c0_176] : memref<136x128xf32, #tpu.memory_space<vmem>>, vector<1x128xf32>
    tpu.vector_store %arg15[%c26, %c0_176], %213 {strides = array<i32>} : memref<136x128xf32, #tpu.memory_space<vmem>>, vector<1x128xf32>,
    %c7_177 = arith.constant 7 : index
    %c0_178 = arith.constant 0 : index
    %215 = vector.load %arg14[%c7_177, %c0_178] : memref<40x128xf32, #tpu.memory_space<vmem>>, vector<1x128xf32>
    %c29 = arith.constant 29 : index
    %c0_179 = arith.constant 0 : index
    %216 = vector.load %arg15[%c29, %c0_179] : memref<136x128xf32, #tpu.memory_space<vmem>>, vector<1x128xf32>
    tpu.vector_store %arg15[%c29, %c0_179], %215 {strides = array<i32>} : memref<136x128xf32, #tpu.memory_space<vmem>>, vector<1x128xf32>,
    %c8_180 = arith.constant 8 : index
    %c0_181 = arith.constant 0 : index
    %217 = vector.load %arg14[%c8_180, %c0_181] : memref<40x128xf32, #tpu.memory_space<vmem>>, vector<1x128xf32>
    %c32_182 = arith.constant 32 : index
    %c0_183 = arith.constant 0 : index
    %218 = vector.load %arg15[%c32_182, %c0_183] : memref<136x128xf32, #tpu.memory_space<vmem>>, vector<1x128xf32>
    tpu.vector_store %arg15[%c32_182, %c0_183], %217 {strides = array<i32>} : memref<136x128xf32, #tpu.memory_space<vmem>>, vector<1x128xf32>,
    %c9_184 = arith.constant 9 : index
    %c0_185 = arith.constant 0 : index
    %219 = vector.load %arg14[%c9_184, %c0_185] : memref<40x128xf32, #tpu.memory_space<vmem>>, vector<1x128xf32>
    %c35 = arith.constant 35 : index
    %c0_186 = arith.constant 0 : index
    %220 = vector.load %arg15[%c35, %c0_186] : memref<136x128xf32, #tpu.memory_space<vmem>>, vector<1x128xf32>
    tpu.vector_store %arg15[%c35, %c0_186], %219 {strides = array<i32>} : memref<136x128xf32, #tpu.memory_space<vmem>>, vector<1x128xf32>,
    %c10_187 = arith.constant 10 : index
    %c0_188 = arith.constant 0 : index
    %221 = vector.load %arg14[%c10_187, %c0_188] : memref<40x128xf32, #tpu.memory_space<vmem>>, vector<1x128xf32>
    %c38 = arith.constant 38 : index
    %c0_189 = arith.constant 0 : index
    %222 = vector.load %arg15[%c38, %c0_189] : memref<136x128xf32, #tpu.memory_space<vmem>>, vector<1x128xf32>
    tpu.vector_store %arg15[%c38, %c0_189], %221 {strides = array<i32>} : memref<136x128xf32, #tpu.memory_space<vmem>>, vector<1x128xf32>,
    %c11_190 = arith.constant 11 : index
    %c0_191 = arith.constant 0 : index
    %223 = vector.load %arg14[%c11_190, %c0_191] : memref<40x128xf32, #tpu.memory_space<vmem>>, vector<1x128xf32>
    %c41 = arith.constant 41 : index
    %c0_192 = arith.constant 0 : index
    %224 = vector.load %arg15[%c41, %c0_192] : memref<136x128xf32, #tpu.memory_space<vmem>>, vector<1x128xf32>
    tpu.vector_store %arg15[%c41, %c0_192], %223 {strides = array<i32>} : memref<136x128xf32, #tpu.memory_space<vmem>>, vector<1x128xf32>,
    %c12_193 = arith.constant 12 : index
    %c0_194 = arith.constant 0 : index
    %225 = vector.load %arg14[%c12_193, %c0_194] : memref<40x128xf32, #tpu.memory_space<vmem>>, vector<1x128xf32>
    %c44 = arith.constant 44 : index
    %c0_195 = arith.constant 0 : index
    %226 = vector.load %arg15[%c44, %c0_195] : memref<136x128xf32, #tpu.memory_space<vmem>>, vector<1x128xf32>
    tpu.vector_store %arg15[%c44, %c0_195], %225 {strides = array<i32>} : memref<136x128xf32, #tpu.memory_space<vmem>>, vector<1x128xf32>,
    %c13 = arith.constant 13 : index
    %c0_196 = arith.constant 0 : index
    %227 = vector.load %arg14[%c13, %c0_196] : memref<40x128xf32, #tpu.memory_space<vmem>>, vector<1x128xf32>
    %c47 = arith.constant 47 : index
    %c0_197 = arith.constant 0 : index
    %228 = vector.load %arg15[%c47, %c0_197] : memref<136x128xf32, #tpu.memory_space<vmem>>, vector<1x128xf32>
    tpu.vector_store %arg15[%c47, %c0_197], %227 {strides = array<i32>} : memref<136x128xf32, #tpu.memory_space<vmem>>, vector<1x128xf32>,
    %c14_198 = arith.constant 14 : index
    %c0_199 = arith.constant 0 : index
    %229 = vector.load %arg14[%c14_198, %c0_199] : memref<40x128xf32, #tpu.memory_space<vmem>>, vector<1x128xf32>
    %c50 = arith.constant 50 : index
    %c0_200 = arith.constant 0 : index
    %230 = vector.load %arg15[%c50, %c0_200] : memref<136x128xf32, #tpu.memory_space<vmem>>, vector<1x128xf32>
    tpu.vector_store %arg15[%c50, %c0_200], %229 {strides = array<i32>} : memref<136x128xf32, #tpu.memory_space<vmem>>, vector<1x128xf32>,
    %c15 = arith.constant 15 : index
    %c0_201 = arith.constant 0 : index
    %231 = vector.load %arg14[%c15, %c0_201] : memref<40x128xf32, #tpu.memory_space<vmem>>, vector<1x128xf32>
    %c53 = arith.constant 53 : index
    %c0_202 = arith.constant 0 : index
    %232 = vector.load %arg15[%c53, %c0_202] : memref<136x128xf32, #tpu.memory_space<vmem>>, vector<1x128xf32>
    tpu.vector_store %arg15[%c53, %c0_202], %231 {strides = array<i32>} : memref<136x128xf32, #tpu.memory_space<vmem>>, vector<1x128xf32>,
    %c16_203 = arith.constant 16 : index
    %c0_204 = arith.constant 0 : index
    %233 = vector.load %arg14[%c16_203, %c0_204] : memref<40x128xf32, #tpu.memory_space<vmem>>, vector<1x128xf32>
    %c56 = arith.constant 56 : index
    %c0_205 = arith.constant 0 : index
    %234 = vector.load %arg15[%c56, %c0_205] : memref<136x128xf32, #tpu.memory_space<vmem>>, vector<1x128xf32>
    tpu.vector_store %arg15[%c56, %c0_205], %233 {strides = array<i32>} : memref<136x128xf32, #tpu.memory_space<vmem>>, vector<1x128xf32>,
    %c17_206 = arith.constant 17 : index
    %c0_207 = arith.constant 0 : index
    %235 = vector.load %arg14[%c17_206, %c0_207] : memref<40x128xf32, #tpu.memory_space<vmem>>, vector<1x128xf32>
    %c59 = arith.constant 59 : index
    %c0_208 = arith.constant 0 : index
    %236 = vector.load %arg15[%c59, %c0_208] : memref<136x128xf32, #tpu.memory_space<vmem>>, vector<1x128xf32>
    tpu.vector_store %arg15[%c59, %c0_208], %235 {strides = array<i32>} : memref<136x128xf32, #tpu.memory_space<vmem>>, vector<1x128xf32>,
    %c18 = arith.constant 18 : index
    %c0_209 = arith.constant 0 : index
    %237 = vector.load %arg14[%c18, %c0_209] : memref<40x128xf32, #tpu.memory_space<vmem>>, vector<1x128xf32>
    %c62 = arith.constant 62 : index
    %c0_210 = arith.constant 0 : index
    %238 = vector.load %arg15[%c62, %c0_210] : memref<136x128xf32, #tpu.memory_space<vmem>>, vector<1x128xf32>
    tpu.vector_store %arg15[%c62, %c0_210], %237 {strides = array<i32>} : memref<136x128xf32, #tpu.memory_space<vmem>>, vector<1x128xf32>,
    %c19 = arith.constant 19 : index
    %c0_211 = arith.constant 0 : index
    %239 = vector.load %arg14[%c19, %c0_211] : memref<40x128xf32, #tpu.memory_space<vmem>>, vector<1x128xf32>
    %c65 = arith.constant 65 : index
    %c0_212 = arith.constant 0 : index
    %240 = vector.load %arg15[%c65, %c0_212] : memref<136x128xf32, #tpu.memory_space<vmem>>, vector<1x128xf32>
    tpu.vector_store %arg15[%c65, %c0_212], %239 {strides = array<i32>} : memref<136x128xf32, #tpu.memory_space<vmem>>, vector<1x128xf32>,
    %c20_213 = arith.constant 20 : index
    %c0_214 = arith.constant 0 : index
    %241 = vector.load %arg14[%c20_213, %c0_214] : memref<40x128xf32, #tpu.memory_space<vmem>>, vector<1x128xf32>
    %c68 = arith.constant 68 : index
    %c0_215 = arith.constant 0 : index
    %242 = vector.load %arg15[%c68, %c0_215] : memref<136x128xf32, #tpu.memory_space<vmem>>, vector<1x128xf32>
    tpu.vector_store %arg15[%c68, %c0_215], %241 {strides = array<i32>} : memref<136x128xf32, #tpu.memory_space<vmem>>, vector<1x128xf32>,
    %c21 = arith.constant 21 : index
    %c0_216 = arith.constant 0 : index
    %243 = vector.load %arg14[%c21, %c0_216] : memref<40x128xf32, #tpu.memory_space<vmem>>, vector<1x128xf32>
    %c71 = arith.constant 71 : index
    %c0_217 = arith.constant 0 : index
    %244 = vector.load %arg15[%c71, %c0_217] : memref<136x128xf32, #tpu.memory_space<vmem>>, vector<1x128xf32>
    tpu.vector_store %arg15[%c71, %c0_217], %243 {strides = array<i32>} : memref<136x128xf32, #tpu.memory_space<vmem>>, vector<1x128xf32>,
    %c22 = arith.constant 22 : index
    %c0_218 = arith.constant 0 : index
    %245 = vector.load %arg14[%c22, %c0_218] : memref<40x128xf32, #tpu.memory_space<vmem>>, vector<1x128xf32>
    %c74 = arith.constant 74 : index
    %c0_219 = arith.constant 0 : index
    %246 = vector.load %arg15[%c74, %c0_219] : memref<136x128xf32, #tpu.memory_space<vmem>>, vector<1x128xf32>
    tpu.vector_store %arg15[%c74, %c0_219], %245 {strides = array<i32>} : memref<136x128xf32, #tpu.memory_space<vmem>>, vector<1x128xf32>,
    %c23_220 = arith.constant 23 : index
    %c0_221 = arith.constant 0 : index
    %247 = vector.load %arg14[%c23_220, %c0_221] : memref<40x128xf32, #tpu.memory_space<vmem>>, vector<1x128xf32>
    %c77 = arith.constant 77 : index
    %c0_222 = arith.constant 0 : index
    %248 = vector.load %arg15[%c77, %c0_222] : memref<136x128xf32, #tpu.memory_space<vmem>>, vector<1x128xf32>
    tpu.vector_store %arg15[%c77, %c0_222], %247 {strides = array<i32>} : memref<136x128xf32, #tpu.memory_space<vmem>>, vector<1x128xf32>,
    %c24_223 = arith.constant 24 : index
    %c0_224 = arith.constant 0 : index
    %249 = vector.load %arg14[%c24_223, %c0_224] : memref<40x128xf32, #tpu.memory_space<vmem>>, vector<1x128xf32>
    %c80 = arith.constant 80 : index
    %c0_225 = arith.constant 0 : index
    %250 = vector.load %arg15[%c80, %c0_225] : memref<136x128xf32, #tpu.memory_space<vmem>>, vector<1x128xf32>
    tpu.vector_store %arg15[%c80, %c0_225], %249 {strides = array<i32>} : memref<136x128xf32, #tpu.memory_space<vmem>>, vector<1x128xf32>,
    %c25 = arith.constant 25 : index
    %c0_226 = arith.constant 0 : index
    %251 = vector.load %arg14[%c25, %c0_226] : memref<40x128xf32, #tpu.memory_space<vmem>>, vector<1x128xf32>
    %c83 = arith.constant 83 : index
    %c0_227 = arith.constant 0 : index
    %252 = vector.load %arg15[%c83, %c0_227] : memref<136x128xf32, #tpu.memory_space<vmem>>, vector<1x128xf32>
    tpu.vector_store %arg15[%c83, %c0_227], %251 {strides = array<i32>} : memref<136x128xf32, #tpu.memory_space<vmem>>, vector<1x128xf32>,
    %c26_228 = arith.constant 26 : index
    %c0_229 = arith.constant 0 : index
    %253 = vector.load %arg14[%c26_228, %c0_229] : memref<40x128xf32, #tpu.memory_space<vmem>>, vector<1x128xf32>
    %c86 = arith.constant 86 : index
    %c0_230 = arith.constant 0 : index
    %254 = vector.load %arg15[%c86, %c0_230] : memref<136x128xf32, #tpu.memory_space<vmem>>, vector<1x128xf32>
    tpu.vector_store %arg15[%c86, %c0_230], %253 {strides = array<i32>} : memref<136x128xf32, #tpu.memory_space<vmem>>, vector<1x128xf32>,
    %c27 = arith.constant 27 : index
    %c0_231 = arith.constant 0 : index
    %255 = vector.load %arg14[%c27, %c0_231] : memref<40x128xf32, #tpu.memory_space<vmem>>, vector<1x128xf32>
    %c89 = arith.constant 89 : index
    %c0_232 = arith.constant 0 : index
    %256 = vector.load %arg15[%c89, %c0_232] : memref<136x128xf32, #tpu.memory_space<vmem>>, vector<1x128xf32>
    tpu.vector_store %arg15[%c89, %c0_232], %255 {strides = array<i32>} : memref<136x128xf32, #tpu.memory_space<vmem>>, vector<1x128xf32>,
    %c28_233 = arith.constant 28 : index
    %c0_234 = arith.constant 0 : index
    %257 = vector.load %arg14[%c28_233, %c0_234] : memref<40x128xf32, #tpu.memory_space<vmem>>, vector<1x128xf32>
    %c92 = arith.constant 92 : index
    %c0_235 = arith.constant 0 : index
    %258 = vector.load %arg15[%c92, %c0_235] : memref<136x128xf32, #tpu.memory_space<vmem>>, vector<1x128xf32>
    tpu.vector_store %arg15[%c92, %c0_235], %257 {strides = array<i32>} : memref<136x128xf32, #tpu.memory_space<vmem>>, vector<1x128xf32>,
    %c29_236 = arith.constant 29 : index
    %c0_237 = arith.constant 0 : index
    %259 = vector.load %arg14[%c29_236, %c0_237] : memref<40x128xf32, #tpu.memory_space<vmem>>, vector<1x128xf32>
    %c95 = arith.constant 95 : index
    %c0_238 = arith.constant 0 : index
    %260 = vector.load %arg15[%c95, %c0_238] : memref<136x128xf32, #tpu.memory_space<vmem>>, vector<1x128xf32>
    tpu.vector_store %arg15[%c95, %c0_238], %259 {strides = array<i32>} : memref<136x128xf32, #tpu.memory_space<vmem>>, vector<1x128xf32>,
    %c30 = arith.constant 30 : index
    %c0_239 = arith.constant 0 : index
    %261 = vector.load %arg14[%c30, %c0_239] : memref<40x128xf32, #tpu.memory_space<vmem>>, vector<1x128xf32>
    %c98 = arith.constant 98 : index
    %c0_240 = arith.constant 0 : index
    %262 = vector.load %arg15[%c98, %c0_240] : memref<136x128xf32, #tpu.memory_space<vmem>>, vector<1x128xf32>
    tpu.vector_store %arg15[%c98, %c0_240], %261 {strides = array<i32>} : memref<136x128xf32, #tpu.memory_space<vmem>>, vector<1x128xf32>,
    %c31 = arith.constant 31 : index
    %c0_241 = arith.constant 0 : index
    %263 = vector.load %arg14[%c31, %c0_241] : memref<40x128xf32, #tpu.memory_space<vmem>>, vector<1x128xf32>
    %c101 = arith.constant 101 : index
    %c0_242 = arith.constant 0 : index
    %264 = vector.load %arg15[%c101, %c0_242] : memref<136x128xf32, #tpu.memory_space<vmem>>, vector<1x128xf32>
    tpu.vector_store %arg15[%c101, %c0_242], %263 {strides = array<i32>} : memref<136x128xf32, #tpu.memory_space<vmem>>, vector<1x128xf32>,
    %c32_243 = arith.constant 32 : index
    %c0_244 = arith.constant 0 : index
    %265 = vector.load %arg14[%c32_243, %c0_244] : memref<40x128xf32, #tpu.memory_space<vmem>>, vector<1x128xf32>
    %c104 = arith.constant 104 : index
    %c0_245 = arith.constant 0 : index
    %266 = vector.load %arg15[%c104, %c0_245] : memref<136x128xf32, #tpu.memory_space<vmem>>, vector<1x128xf32>
    tpu.vector_store %arg15[%c104, %c0_245], %265 {strides = array<i32>} : memref<136x128xf32, #tpu.memory_space<vmem>>, vector<1x128xf32>,
    %c33 = arith.constant 33 : index
    %c0_246 = arith.constant 0 : index
    %267 = vector.load %arg14[%c33, %c0_246] : memref<40x128xf32, #tpu.memory_space<vmem>>, vector<1x128xf32>
    %c107 = arith.constant 107 : index
    %c0_247 = arith.constant 0 : index
    %268 = vector.load %arg15[%c107, %c0_247] : memref<136x128xf32, #tpu.memory_space<vmem>>, vector<1x128xf32>
    tpu.vector_store %arg15[%c107, %c0_247], %267 {strides = array<i32>} : memref<136x128xf32, #tpu.memory_space<vmem>>, vector<1x128xf32>,
    %c34 = arith.constant 34 : index
    %c0_248 = arith.constant 0 : index
    %269 = vector.load %arg14[%c34, %c0_248] : memref<40x128xf32, #tpu.memory_space<vmem>>, vector<1x128xf32>
    %c110 = arith.constant 110 : index
    %c0_249 = arith.constant 0 : index
    %270 = vector.load %arg15[%c110, %c0_249] : memref<136x128xf32, #tpu.memory_space<vmem>>, vector<1x128xf32>
    tpu.vector_store %arg15[%c110, %c0_249], %269 {strides = array<i32>} : memref<136x128xf32, #tpu.memory_space<vmem>>, vector<1x128xf32>,
    %c35_250 = arith.constant 35 : index
    %c0_251 = arith.constant 0 : index
    %271 = vector.load %arg14[%c35_250, %c0_251] : memref<40x128xf32, #tpu.memory_space<vmem>>, vector<1x128xf32>
    %c113 = arith.constant 113 : index
    %c0_252 = arith.constant 0 : index
    %272 = vector.load %arg15[%c113, %c0_252] : memref<136x128xf32, #tpu.memory_space<vmem>>, vector<1x128xf32>
    tpu.vector_store %arg15[%c113, %c0_252], %271 {strides = array<i32>} : memref<136x128xf32, #tpu.memory_space<vmem>>, vector<1x128xf32>,
    %c36_253 = arith.constant 36 : index
    %c0_254 = arith.constant 0 : index
    %273 = vector.load %arg14[%c36_253, %c0_254] : memref<40x128xf32, #tpu.memory_space<vmem>>, vector<1x128xf32>
    %c116 = arith.constant 116 : index
    %c0_255 = arith.constant 0 : index
    %274 = vector.load %arg15[%c116, %c0_255] : memref<136x128xf32, #tpu.memory_space<vmem>>, vector<1x128xf32>
    tpu.vector_store %arg15[%c116, %c0_255], %273 {strides = array<i32>} : memref<136x128xf32, #tpu.memory_space<vmem>>, vector<1x128xf32>,
    %c37 = arith.constant 37 : index
    %c0_256 = arith.constant 0 : index
    %275 = vector.load %arg14[%c37, %c0_256] : memref<40x128xf32, #tpu.memory_space<vmem>>, vector<1x128xf32>
    %c119 = arith.constant 119 : index
    %c0_257 = arith.constant 0 : index
    %276 = vector.load %arg15[%c119, %c0_257] : memref<136x128xf32, #tpu.memory_space<vmem>>, vector<1x128xf32>
    tpu.vector_store %arg15[%c119, %c0_257], %275 {strides = array<i32>} : memref<136x128xf32, #tpu.memory_space<vmem>>, vector<1x128xf32>,
    %c38_258 = arith.constant 38 : index
    %c0_259 = arith.constant 0 : index
    %277 = vector.load %arg14[%c38_258, %c0_259] : memref<40x128xf32, #tpu.memory_space<vmem>>, vector<1x128xf32>
    %c122 = arith.constant 122 : index
    %c0_260 = arith.constant 0 : index
    %278 = vector.load %arg15[%c122, %c0_260] : memref<136x128xf32, #tpu.memory_space<vmem>>, vector<1x128xf32>
    tpu.vector_store %arg15[%c122, %c0_260], %277 {strides = array<i32>} : memref<136x128xf32, #tpu.memory_space<vmem>>, vector<1x128xf32>,
    %c0_261 = arith.constant 0 : index
    %c0_262 = arith.constant 0 : index
    %279 = vector.load %arg15[%c0_261, %c0_262] : memref<136x128xf32, #tpu.memory_space<vmem>>, vector<121x128xf32>
    %280 = arith.truncf %279 : vector<121x128xf32> to vector<121x128xbf16>
    %c0_263 = arith.constant 0 : index
    %c0_264 = arith.constant 0 : index
    %c0_265 = arith.constant 0 : index
    %281 = vector.load %arg6[%c0_263, %c0_264, %c0_265] : memref<11x128x128xbf16, #tpu.memory_space<vmem>>, vector<1x128x128xbf16>
    %282 = vector.shape_cast %281 : vector<1x128x128xbf16> to vector<128x128xbf16>
    %cst_266 = arith.constant dense<0.000000e+00> : vector<121x128xf32>
    %283 = tpu.matmul %280, %282, %cst_266 {dimension_numbers = #tpu.dot_dimension_numbers<[1], [0], [0], [1], [0, 0, 1, 1], [], []>} : vector<121x128xbf16>, vector<128x128xbf16>, vector<121x128xf32> -> vector<121x128xf32>
    %c1_267 = arith.constant 1 : index
    %c0_268 = arith.constant 0 : index
    %284 = vector.load %arg15[%c1_267, %c0_268] : memref<136x128xf32, #tpu.memory_space<vmem>>, vector<121x128xf32>
    %285 = arith.truncf %284 : vector<121x128xf32> to vector<121x128xbf16>
    %c1_269 = arith.constant 1 : index
    %c0_270 = arith.constant 0 : index
    %c0_271 = arith.constant 0 : index
    %286 = vector.load %arg6[%c1_269, %c0_270, %c0_271] : memref<11x128x128xbf16, #tpu.memory_space<vmem>>, vector<1x128x128xbf16>
    %287 = vector.shape_cast %286 : vector<1x128x128xbf16> to vector<128x128xbf16>
    %cst_272 = arith.constant dense<0.000000e+00> : vector<121x128xf32>
    %288 = tpu.matmul %285, %287, %cst_272 {dimension_numbers = #tpu.dot_dimension_numbers<[1], [0], [0], [1], [0, 0, 1, 1], [], []>} : vector<121x128xbf16>, vector<128x128xbf16>, vector<121x128xf32> -> vector<121x128xf32>
    %289 = arith.addf %283, %288 : vector<121x128xf32>
    %c2_273 = arith.constant 2 : index
    %c0_274 = arith.constant 0 : index
    %290 = vector.load %arg15[%c2_273, %c0_274] : memref<136x128xf32, #tpu.memory_space<vmem>>, vector<121x128xf32>
    %291 = arith.truncf %290 : vector<121x128xf32> to vector<121x128xbf16>
    %c2_275 = arith.constant 2 : index
    %c0_276 = arith.constant 0 : index
    %c0_277 = arith.constant 0 : index
    %292 = vector.load %arg6[%c2_275, %c0_276, %c0_277] : memref<11x128x128xbf16, #tpu.memory_space<vmem>>, vector<1x128x128xbf16>
    %293 = vector.shape_cast %292 : vector<1x128x128xbf16> to vector<128x128xbf16>
    %cst_278 = arith.constant dense<0.000000e+00> : vector<121x128xf32>
    %294 = tpu.matmul %291, %293, %cst_278 {dimension_numbers = #tpu.dot_dimension_numbers<[1], [0], [0], [1], [0, 0, 1, 1], [], []>} : vector<121x128xbf16>, vector<128x128xbf16>, vector<121x128xf32> -> vector<121x128xf32>
    %295 = arith.addf %289, %294 : vector<121x128xf32>
    %c3_279 = arith.constant 3 : index
    %c0_280 = arith.constant 0 : index
    %296 = vector.load %arg15[%c3_279, %c0_280] : memref<136x128xf32, #tpu.memory_space<vmem>>, vector<121x128xf32>
    %297 = arith.truncf %296 : vector<121x128xf32> to vector<121x128xbf16>
    %c3_281 = arith.constant 3 : index
    %c0_282 = arith.constant 0 : index
    %c0_283 = arith.constant 0 : index
    %298 = vector.load %arg6[%c3_281, %c0_282, %c0_283] : memref<11x128x128xbf16, #tpu.memory_space<vmem>>, vector<1x128x128xbf16>
    %299 = vector.shape_cast %298 : vector<1x128x128xbf16> to vector<128x128xbf16>
    %cst_284 = arith.constant dense<0.000000e+00> : vector<121x128xf32>
    %300 = tpu.matmul %297, %299, %cst_284 {dimension_numbers = #tpu.dot_dimension_numbers<[1], [0], [0], [1], [0, 0, 1, 1], [], []>} : vector<121x128xbf16>, vector<128x128xbf16>, vector<121x128xf32> -> vector<121x128xf32>
    %301 = arith.addf %295, %300 : vector<121x128xf32>
    %c4_285 = arith.constant 4 : index
    %c0_286 = arith.constant 0 : index
    %302 = vector.load %arg15[%c4_285, %c0_286] : memref<136x128xf32, #tpu.memory_space<vmem>>, vector<121x128xf32>
    %303 = arith.truncf %302 : vector<121x128xf32> to vector<121x128xbf16>
    %c4_287 = arith.constant 4 : index
    %c0_288 = arith.constant 0 : index
    %c0_289 = arith.constant 0 : index
    %304 = vector.load %arg6[%c4_287, %c0_288, %c0_289] : memref<11x128x128xbf16, #tpu.memory_space<vmem>>, vector<1x128x128xbf16>
    %305 = vector.shape_cast %304 : vector<1x128x128xbf16> to vector<128x128xbf16>
    %cst_290 = arith.constant dense<0.000000e+00> : vector<121x128xf32>
    %306 = tpu.matmul %303, %305, %cst_290 {dimension_numbers = #tpu.dot_dimension_numbers<[1], [0], [0], [1], [0, 0, 1, 1], [], []>} : vector<121x128xbf16>, vector<128x128xbf16>, vector<121x128xf32> -> vector<121x128xf32>
    %307 = arith.addf %301, %306 : vector<121x128xf32>
    %c5_291 = arith.constant 5 : index
    %c0_292 = arith.constant 0 : index
    %308 = vector.load %arg15[%c5_291, %c0_292] : memref<136x128xf32, #tpu.memory_space<vmem>>, vector<121x128xf32>
    %309 = arith.truncf %308 : vector<121x128xf32> to vector<121x128xbf16>
    %c5_293 = arith.constant 5 : index
    %c0_294 = arith.constant 0 : index
    %c0_295 = arith.constant 0 : index
    %310 = vector.load %arg6[%c5_293, %c0_294, %c0_295] : memref<11x128x128xbf16, #tpu.memory_space<vmem>>, vector<1x128x128xbf16>
    %311 = vector.shape_cast %310 : vector<1x128x128xbf16> to vector<128x128xbf16>
    %cst_296 = arith.constant dense<0.000000e+00> : vector<121x128xf32>
    %312 = tpu.matmul %309, %311, %cst_296 {dimension_numbers = #tpu.dot_dimension_numbers<[1], [0], [0], [1], [0, 0, 1, 1], [], []>} : vector<121x128xbf16>, vector<128x128xbf16>, vector<121x128xf32> -> vector<121x128xf32>
    %313 = arith.addf %307, %312 : vector<121x128xf32>
    %c6_297 = arith.constant 6 : index
    %c0_298 = arith.constant 0 : index
    %314 = vector.load %arg15[%c6_297, %c0_298] : memref<136x128xf32, #tpu.memory_space<vmem>>, vector<121x128xf32>
    %315 = arith.truncf %314 : vector<121x128xf32> to vector<121x128xbf16>
    %c6_299 = arith.constant 6 : index
    %c0_300 = arith.constant 0 : index
    %c0_301 = arith.constant 0 : index
    %316 = vector.load %arg6[%c6_299, %c0_300, %c0_301] : memref<11x128x128xbf16, #tpu.memory_space<vmem>>, vector<1x128x128xbf16>
    %317 = vector.shape_cast %316 : vector<1x128x128xbf16> to vector<128x128xbf16>
    %cst_302 = arith.constant dense<0.000000e+00> : vector<121x128xf32>
    %318 = tpu.matmul %315, %317, %cst_302 {dimension_numbers = #tpu.dot_dimension_numbers<[1], [0], [0], [1], [0, 0, 1, 1], [], []>} : vector<121x128xbf16>, vector<128x128xbf16>, vector<121x128xf32> -> vector<121x128xf32>
    %319 = arith.addf %313, %318 : vector<121x128xf32>
    %c7_303 = arith.constant 7 : index
    %c0_304 = arith.constant 0 : index
    %320 = vector.load %arg15[%c7_303, %c0_304] : memref<136x128xf32, #tpu.memory_space<vmem>>, vector<121x128xf32>
    %321 = arith.truncf %320 : vector<121x128xf32> to vector<121x128xbf16>
    %c7_305 = arith.constant 7 : index
    %c0_306 = arith.constant 0 : index
    %c0_307 = arith.constant 0 : index
    %322 = vector.load %arg6[%c7_305, %c0_306, %c0_307] : memref<11x128x128xbf16, #tpu.memory_space<vmem>>, vector<1x128x128xbf16>
    %323 = vector.shape_cast %322 : vector<1x128x128xbf16> to vector<128x128xbf16>
    %cst_308 = arith.constant dense<0.000000e+00> : vector<121x128xf32>
    %324 = tpu.matmul %321, %323, %cst_308 {dimension_numbers = #tpu.dot_dimension_numbers<[1], [0], [0], [1], [0, 0, 1, 1], [], []>} : vector<121x128xbf16>, vector<128x128xbf16>, vector<121x128xf32> -> vector<121x128xf32>
    %325 = arith.addf %319, %324 : vector<121x128xf32>
    %c8_309 = arith.constant 8 : index
    %c0_310 = arith.constant 0 : index
    %326 = vector.load %arg15[%c8_309, %c0_310] : memref<136x128xf32, #tpu.memory_space<vmem>>, vector<121x128xf32>
    %327 = arith.truncf %326 : vector<121x128xf32> to vector<121x128xbf16>
    %c8_311 = arith.constant 8 : index
    %c0_312 = arith.constant 0 : index
    %c0_313 = arith.constant 0 : index
    %328 = vector.load %arg6[%c8_311, %c0_312, %c0_313] : memref<11x128x128xbf16, #tpu.memory_space<vmem>>, vector<1x128x128xbf16>
    %329 = vector.shape_cast %328 : vector<1x128x128xbf16> to vector<128x128xbf16>
    %cst_314 = arith.constant dense<0.000000e+00> : vector<121x128xf32>
    %330 = tpu.matmul %327, %329, %cst_314 {dimension_numbers = #tpu.dot_dimension_numbers<[1], [0], [0], [1], [0, 0, 1, 1], [], []>} : vector<121x128xbf16>, vector<128x128xbf16>, vector<121x128xf32> -> vector<121x128xf32>
    %331 = arith.addf %325, %330 : vector<121x128xf32>
    %c9_315 = arith.constant 9 : index
    %c0_316 = arith.constant 0 : index
    %332 = vector.load %arg15[%c9_315, %c0_316] : memref<136x128xf32, #tpu.memory_space<vmem>>, vector<121x128xf32>
    %333 = arith.truncf %332 : vector<121x128xf32> to vector<121x128xbf16>
    %c9_317 = arith.constant 9 : index
    %c0_318 = arith.constant 0 : index
    %c0_319 = arith.constant 0 : index
    %334 = vector.load %arg6[%c9_317, %c0_318, %c0_319] : memref<11x128x128xbf16, #tpu.memory_space<vmem>>, vector<1x128x128xbf16>
    %335 = vector.shape_cast %334 : vector<1x128x128xbf16> to vector<128x128xbf16>
    %cst_320 = arith.constant dense<0.000000e+00> : vector<121x128xf32>
    %336 = tpu.matmul %333, %335, %cst_320 {dimension_numbers = #tpu.dot_dimension_numbers<[1], [0], [0], [1], [0, 0, 1, 1], [], []>} : vector<121x128xbf16>, vector<128x128xbf16>, vector<121x128xf32> -> vector<121x128xf32>
    %337 = arith.addf %331, %336 : vector<121x128xf32>
    %c10_321 = arith.constant 10 : index
    %c0_322 = arith.constant 0 : index
    %338 = vector.load %arg15[%c10_321, %c0_322] : memref<136x128xf32, #tpu.memory_space<vmem>>, vector<121x128xf32>
    %339 = arith.truncf %338 : vector<121x128xf32> to vector<121x128xbf16>
    %c10_323 = arith.constant 10 : index
    %c0_324 = arith.constant 0 : index
    %c0_325 = arith.constant 0 : index
    %340 = vector.load %arg6[%c10_323, %c0_324, %c0_325] : memref<11x128x128xbf16, #tpu.memory_space<vmem>>, vector<1x128x128xbf16>
    %341 = vector.shape_cast %340 : vector<1x128x128xbf16> to vector<128x128xbf16>
    %cst_326 = arith.constant dense<0.000000e+00> : vector<121x128xf32>
    %342 = tpu.matmul %339, %341, %cst_326 {dimension_numbers = #tpu.dot_dimension_numbers<[1], [0], [0], [1], [0, 0, 1, 1], [], []>} : vector<121x128xbf16>, vector<128x128xbf16>, vector<121x128xf32> -> vector<121x128xf32>
    %343 = arith.addf %337, %342 : vector<121x128xf32>
    %c0_327 = arith.constant 0 : index
    %c0_328 = arith.constant 0 : index
    %344 = vector.load %arg7[%c0_327, %c0_328] : memref<1x128xf32, #tpu.memory_space<vmem>>, vector<1x128xf32>
    %345 = vector.broadcast %344 : vector<1x128xf32> to vector<121x128xf32>
    %346 = arith.addf %343, %345 : vector<121x128xf32>
    %cst_329 = arith.constant 0.000000e+00 : f32
    %347 = vector.broadcast %cst_329 : f32 to vector<121x128xf32>
    %348 = arith.subf %347, %346 : vector<121x128xf32>
    %349 = math.exp %348 : vector<121x128xf32>
    %cst_330 = arith.constant 1.000000e+00 : f32
    %350 = vector.broadcast %cst_330 : f32 to vector<121x128xf32>
    %351 = arith.addf %350, %349 : vector<121x128xf32>
    %352 = tpu.reciprocal %351 {approx = true} : vector<121x128xf32> -> vector<121x128xf32>
    %353 = arith.mulf %346, %352 : vector<121x128xf32>
    %c8_331 = arith.constant 8 : index
    %c0_332 = arith.constant 0 : index
    %354 = vector.load %arg16[%c8_331, %c0_332] : memref<144x128xf32, #tpu.memory_space<vmem>>, vector<121x128xf32>
    tpu.vector_store %arg16[%c8_331, %c0_332], %353 {strides = array<i32>} : memref<144x128xf32, #tpu.memory_space<vmem>>, vector<121x128xf32>,
    %c0_333 = arith.constant 0 : index
    %c0_334 = arith.constant 0 : index
    %355 = vector.load %arg16[%c0_333, %c0_334] : memref<144x128xf32, #tpu.memory_space<vmem>>, vector<127x128xf32>
    %356 = arith.truncf %355 : vector<127x128xf32> to vector<127x128xbf16>
    %c0_335 = arith.constant 0 : index
    %c0_336 = arith.constant 0 : index
    %c0_337 = arith.constant 0 : index
    %357 = vector.load %arg8[%c0_335, %c0_336, %c0_337] : memref<11x128x128xbf16, #tpu.memory_space<vmem>>, vector<1x128x128xbf16>
    %358 = vector.shape_cast %357 : vector<1x128x128xbf16> to vector<128x128xbf16>
    %cst_338 = arith.constant dense<0.000000e+00> : vector<127x128xf32>
    %359 = tpu.matmul %356, %358, %cst_338 {dimension_numbers = #tpu.dot_dimension_numbers<[1], [0], [0], [1], [0, 0, 1, 1], [], []>} : vector<127x128xbf16>, vector<128x128xbf16>, vector<127x128xf32> -> vector<127x128xf32>
    %c1_339 = arith.constant 1 : index
    %c0_340 = arith.constant 0 : index
    %360 = vector.load %arg16[%c1_339, %c0_340] : memref<144x128xf32, #tpu.memory_space<vmem>>, vector<127x128xf32>
    %361 = arith.truncf %360 : vector<127x128xf32> to vector<127x128xbf16>
    %c1_341 = arith.constant 1 : index
    %c0_342 = arith.constant 0 : index
    %c0_343 = arith.constant 0 : index
    %362 = vector.load %arg8[%c1_341, %c0_342, %c0_343] : memref<11x128x128xbf16, #tpu.memory_space<vmem>>, vector<1x128x128xbf16>
    %363 = vector.shape_cast %362 : vector<1x128x128xbf16> to vector<128x128xbf16>
    %cst_344 = arith.constant dense<0.000000e+00> : vector<127x128xf32>
    %364 = tpu.matmul %361, %363, %cst_344 {dimension_numbers = #tpu.dot_dimension_numbers<[1], [0], [0], [1], [0, 0, 1, 1], [], []>} : vector<127x128xbf16>, vector<128x128xbf16>, vector<127x128xf32> -> vector<127x128xf32>
    %365 = arith.addf %359, %364 : vector<127x128xf32>
    %c2_345 = arith.constant 2 : index
    %c0_346 = arith.constant 0 : index
    %366 = vector.load %arg16[%c2_345, %c0_346] : memref<144x128xf32, #tpu.memory_space<vmem>>, vector<127x128xf32>
    %367 = arith.truncf %366 : vector<127x128xf32> to vector<127x128xbf16>
    %c2_347 = arith.constant 2 : index
    %c0_348 = arith.constant 0 : index
    %c0_349 = arith.constant 0 : index
    %368 = vector.load %arg8[%c2_347, %c0_348, %c0_349] : memref<11x128x128xbf16, #tpu.memory_space<vmem>>, vector<1x128x128xbf16>
    %369 = vector.shape_cast %368 : vector<1x128x128xbf16> to vector<128x128xbf16>
    %cst_350 = arith.constant dense<0.000000e+00> : vector<127x128xf32>
    %370 = tpu.matmul %367, %369, %cst_350 {dimension_numbers = #tpu.dot_dimension_numbers<[1], [0], [0], [1], [0, 0, 1, 1], [], []>} : vector<127x128xbf16>, vector<128x128xbf16>, vector<127x128xf32> -> vector<127x128xf32>
    %371 = arith.addf %365, %370 : vector<127x128xf32>
    %c3_351 = arith.constant 3 : index
    %c0_352 = arith.constant 0 : index
    %372 = vector.load %arg16[%c3_351, %c0_352] : memref<144x128xf32, #tpu.memory_space<vmem>>, vector<127x128xf32>
    %373 = arith.truncf %372 : vector<127x128xf32> to vector<127x128xbf16>
    %c3_353 = arith.constant 3 : index
    %c0_354 = arith.constant 0 : index
    %c0_355 = arith.constant 0 : index
    %374 = vector.load %arg8[%c3_353, %c0_354, %c0_355] : memref<11x128x128xbf16, #tpu.memory_space<vmem>>, vector<1x128x128xbf16>
    %375 = vector.shape_cast %374 : vector<1x128x128xbf16> to vector<128x128xbf16>
    %cst_356 = arith.constant dense<0.000000e+00> : vector<127x128xf32>
    %376 = tpu.matmul %373, %375, %cst_356 {dimension_numbers = #tpu.dot_dimension_numbers<[1], [0], [0], [1], [0, 0, 1, 1], [], []>} : vector<127x128xbf16>, vector<128x128xbf16>, vector<127x128xf32> -> vector<127x128xf32>
    %377 = arith.addf %371, %376 : vector<127x128xf32>
    %c4_357 = arith.constant 4 : index
    %c0_358 = arith.constant 0 : index
    %378 = vector.load %arg16[%c4_357, %c0_358] : memref<144x128xf32, #tpu.memory_space<vmem>>, vector<127x128xf32>
    %379 = arith.truncf %378 : vector<127x128xf32> to vector<127x128xbf16>
    %c4_359 = arith.constant 4 : index
    %c0_360 = arith.constant 0 : index
    %c0_361 = arith.constant 0 : index
    %380 = vector.load %arg8[%c4_359, %c0_360, %c0_361] : memref<11x128x128xbf16, #tpu.memory_space<vmem>>, vector<1x128x128xbf16>
    %381 = vector.shape_cast %380 : vector<1x128x128xbf16> to vector<128x128xbf16>
    %cst_362 = arith.constant dense<0.000000e+00> : vector<127x128xf32>
    %382 = tpu.matmul %379, %381, %cst_362 {dimension_numbers = #tpu.dot_dimension_numbers<[1], [0], [0], [1], [0, 0, 1, 1], [], []>} : vector<127x128xbf16>, vector<128x128xbf16>, vector<127x128xf32> -> vector<127x128xf32>
    %383 = arith.addf %377, %382 : vector<127x128xf32>
    %c5_363 = arith.constant 5 : index
    %c0_364 = arith.constant 0 : index
    %384 = vector.load %arg16[%c5_363, %c0_364] : memref<144x128xf32, #tpu.memory_space<vmem>>, vector<127x128xf32>
    %385 = arith.truncf %384 : vector<127x128xf32> to vector<127x128xbf16>
    %c5_365 = arith.constant 5 : index
    %c0_366 = arith.constant 0 : index
    %c0_367 = arith.constant 0 : index
    %386 = vector.load %arg8[%c5_365, %c0_366, %c0_367] : memref<11x128x128xbf16, #tpu.memory_space<vmem>>, vector<1x128x128xbf16>
    %387 = vector.shape_cast %386 : vector<1x128x128xbf16> to vector<128x128xbf16>
    %cst_368 = arith.constant dense<0.000000e+00> : vector<127x128xf32>
    %388 = tpu.matmul %385, %387, %cst_368 {dimension_numbers = #tpu.dot_dimension_numbers<[1], [0], [0], [1], [0, 0, 1, 1], [], []>} : vector<127x128xbf16>, vector<128x128xbf16>, vector<127x128xf32> -> vector<127x128xf32>
    %389 = arith.addf %383, %388 : vector<127x128xf32>
    %c6_369 = arith.constant 6 : index
    %c0_370 = arith.constant 0 : index
    %390 = vector.load %arg16[%c6_369, %c0_370] : memref<144x128xf32, #tpu.memory_space<vmem>>, vector<127x128xf32>
    %391 = arith.truncf %390 : vector<127x128xf32> to vector<127x128xbf16>
    %c6_371 = arith.constant 6 : index
    %c0_372 = arith.constant 0 : index
    %c0_373 = arith.constant 0 : index
    %392 = vector.load %arg8[%c6_371, %c0_372, %c0_373] : memref<11x128x128xbf16, #tpu.memory_space<vmem>>, vector<1x128x128xbf16>
    %393 = vector.shape_cast %392 : vector<1x128x128xbf16> to vector<128x128xbf16>
    %cst_374 = arith.constant dense<0.000000e+00> : vector<127x128xf32>
    %394 = tpu.matmul %391, %393, %cst_374 {dimension_numbers = #tpu.dot_dimension_numbers<[1], [0], [0], [1], [0, 0, 1, 1], [], []>} : vector<127x128xbf16>, vector<128x128xbf16>, vector<127x128xf32> -> vector<127x128xf32>
    %395 = arith.addf %389, %394 : vector<127x128xf32>
    %c7_375 = arith.constant 7 : index
    %c0_376 = arith.constant 0 : index
    %396 = vector.load %arg16[%c7_375, %c0_376] : memref<144x128xf32, #tpu.memory_space<vmem>>, vector<127x128xf32>
    %397 = arith.truncf %396 : vector<127x128xf32> to vector<127x128xbf16>
    %c7_377 = arith.constant 7 : index
    %c0_378 = arith.constant 0 : index
    %c0_379 = arith.constant 0 : index
    %398 = vector.load %arg8[%c7_377, %c0_378, %c0_379] : memref<11x128x128xbf16, #tpu.memory_space<vmem>>, vector<1x128x128xbf16>
    %399 = vector.shape_cast %398 : vector<1x128x128xbf16> to vector<128x128xbf16>
    %cst_380 = arith.constant dense<0.000000e+00> : vector<127x128xf32>
    %400 = tpu.matmul %397, %399, %cst_380 {dimension_numbers = #tpu.dot_dimension_numbers<[1], [0], [0], [1], [0, 0, 1, 1], [], []>} : vector<127x128xbf16>, vector<128x128xbf16>, vector<127x128xf32> -> vector<127x128xf32>
    %401 = arith.addf %395, %400 : vector<127x128xf32>
    %c8_381 = arith.constant 8 : index
    %c0_382 = arith.constant 0 : index
    %402 = vector.load %arg16[%c8_381, %c0_382] : memref<144x128xf32, #tpu.memory_space<vmem>>, vector<127x128xf32>
    %403 = arith.truncf %402 : vector<127x128xf32> to vector<127x128xbf16>
    %c8_383 = arith.constant 8 : index
    %c0_384 = arith.constant 0 : index
    %c0_385 = arith.constant 0 : index
    %404 = vector.load %arg8[%c8_383, %c0_384, %c0_385] : memref<11x128x128xbf16, #tpu.memory_space<vmem>>, vector<1x128x128xbf16>
    %405 = vector.shape_cast %404 : vector<1x128x128xbf16> to vector<128x128xbf16>
    %cst_386 = arith.constant dense<0.000000e+00> : vector<127x128xf32>
    %406 = tpu.matmul %403, %405, %cst_386 {dimension_numbers = #tpu.dot_dimension_numbers<[1], [0], [0], [1], [0, 0, 1, 1], [], []>} : vector<127x128xbf16>, vector<128x128xbf16>, vector<127x128xf32> -> vector<127x128xf32>
    %407 = arith.addf %401, %406 : vector<127x128xf32>
    %c9_387 = arith.constant 9 : index
    %c0_388 = arith.constant 0 : index
    %408 = vector.load %arg16[%c9_387, %c0_388] : memref<144x128xf32, #tpu.memory_space<vmem>>, vector<127x128xf32>
    %409 = arith.truncf %408 : vector<127x128xf32> to vector<127x128xbf16>
    %c9_389 = arith.constant 9 : index
    %c0_390 = arith.constant 0 : index
    %c0_391 = arith.constant 0 : index
    %410 = vector.load %arg8[%c9_389, %c0_390, %c0_391] : memref<11x128x128xbf16, #tpu.memory_space<vmem>>, vector<1x128x128xbf16>
    %411 = vector.shape_cast %410 : vector<1x128x128xbf16> to vector<128x128xbf16>
    %cst_392 = arith.constant dense<0.000000e+00> : vector<127x128xf32>
    %412 = tpu.matmul %409, %411, %cst_392 {dimension_numbers = #tpu.dot_dimension_numbers<[1], [0], [0], [1], [0, 0, 1, 1], [], []>} : vector<127x128xbf16>, vector<128x128xbf16>, vector<127x128xf32> -> vector<127x128xf32>
    %413 = arith.addf %407, %412 : vector<127x128xf32>
    %c10_393 = arith.constant 10 : index
    %c0_394 = arith.constant 0 : index
    %414 = vector.load %arg16[%c10_393, %c0_394] : memref<144x128xf32, #tpu.memory_space<vmem>>, vector<127x128xf32>
    %415 = arith.truncf %414 : vector<127x128xf32> to vector<127x128xbf16>
    %c10_395 = arith.constant 10 : index
    %c0_396 = arith.constant 0 : index
    %c0_397 = arith.constant 0 : index
    %416 = vector.load %arg8[%c10_395, %c0_396, %c0_397] : memref<11x128x128xbf16, #tpu.memory_space<vmem>>, vector<1x128x128xbf16>
    %417 = vector.shape_cast %416 : vector<1x128x128xbf16> to vector<128x128xbf16>
    %cst_398 = arith.constant dense<0.000000e+00> : vector<127x128xf32>
    %418 = tpu.matmul %415, %417, %cst_398 {dimension_numbers = #tpu.dot_dimension_numbers<[1], [0], [0], [1], [0, 0, 1, 1], [], []>} : vector<127x128xbf16>, vector<128x128xbf16>, vector<127x128xf32> -> vector<127x128xf32>
    %419 = arith.addf %413, %418 : vector<127x128xf32>
    %c0_399 = arith.constant 0 : index
    %c0_400 = arith.constant 0 : index
    %420 = vector.load %arg9[%c0_399, %c0_400] : memref<1x128xf32, #tpu.memory_space<vmem>>, vector<1x128xf32>
    %421 = vector.broadcast %420 : vector<1x128xf32> to vector<127x128xf32>
    %422 = arith.addf %419, %421 : vector<127x128xf32>
    %cst_401 = arith.constant 0.000000e+00 : f32
    %423 = vector.broadcast %cst_401 : f32 to vector<127x128xf32>
    %424 = arith.subf %423, %422 : vector<127x128xf32>
    %425 = math.exp %424 : vector<127x128xf32>
    %cst_402 = arith.constant 1.000000e+00 : f32
    %426 = vector.broadcast %cst_402 : f32 to vector<127x128xf32>
    %427 = arith.addf %426, %425 : vector<127x128xf32>
    %428 = tpu.reciprocal %427 {approx = true} : vector<127x128xf32> -> vector<127x128xf32>
    %429 = arith.mulf %422, %428 : vector<127x128xf32>
    %cst_403 = arith.constant dense<0.000000e+00> : vector<127xf32>
    %430 = vector.multi_reduction <add>, %429, %cst_403 [1] : vector<127x128xf32> to vector<127xf32>
    %431 = vector.shape_cast %430 : vector<127xf32> to vector<127x1xf32>
    %cst_404 = arith.constant 7.812500e-03 : f32
    %432 = vector.broadcast %cst_404 : f32 to vector<127x1xf32>
    %433 = arith.mulf %431, %432 : vector<127x1xf32>
    %434 = vector.broadcast %433 : vector<127x1xf32> to vector<127x128xf32>
    %435 = arith.subf %429, %434 : vector<127x128xf32>
    %436 = arith.mulf %435, %435 : vector<127x128xf32>
    %cst_405 = arith.constant dense<0.000000e+00> : vector<127xf32>
    %437 = vector.multi_reduction <add>, %436, %cst_405 [1] : vector<127x128xf32> to vector<127xf32>
    %438 = vector.shape_cast %437 : vector<127xf32> to vector<127x1xf32>
    %cst_406 = arith.constant 0.00787401571 : f32
    %439 = vector.broadcast %cst_406 : f32 to vector<127x1xf32>
    %440 = arith.mulf %438, %439 : vector<127x1xf32>
    %441 = math.sqrt %440 : vector<127x1xf32>
    %cst_407 = arith.constant 9.99999997E-7 : f32
    %442 = vector.broadcast %cst_407 : f32 to vector<127x1xf32>
    %443 = arith.addf %441, %442 : vector<127x1xf32>
    %444 = tpu.reciprocal %443 {approx = true} : vector<127x1xf32> -> vector<127x1xf32>
    %c0_408 = arith.constant 0 : index
    %c0_409 = arith.constant 0 : index
    %445 = vector.load %arg10[%c0_408, %c0_409] : memref<1x128xf32, #tpu.memory_space<vmem>>, vector<1x128xf32>
    %446 = vector.broadcast %445 : vector<1x128xf32> to vector<127x128xf32>
    %447 = arith.mulf %446, %435 : vector<127x128xf32>
    %448 = vector.broadcast %444 : vector<127x1xf32> to vector<127x128xf32>
    %449 = arith.mulf %447, %448 : vector<127x128xf32>
    %c0_410 = arith.constant 0 : index
    %c0_411 = arith.constant 0 : index
    %450 = vector.load %arg11[%c0_410, %c0_411] : memref<1x128xf32, #tpu.memory_space<vmem>>, vector<1x128xf32>
    %451 = vector.broadcast %450 : vector<1x128xf32> to vector<127x128xf32>
    %452 = arith.addf %449, %451 : vector<127x128xf32>
    %453 = vector.extract_strided_slice %452 {offsets = [0, 0], sizes = [126, 128], strides = [1, 1]} : vector<127x128xf32> to vector<126x128xf32>
    %c0_412 = arith.constant 0 : index
    %c0_413 = arith.constant 0 : index
    %c0_414 = arith.constant 0 : index
    %454 = vector.load %arg12[%c0_412, %c0_413, %c0_414] : memref<1x126x128xf32, #tpu.memory_space<vmem>>, vector<1x126x128xf32>
    %455 = vector.shape_cast %454 : vector<1x126x128xf32> to vector<126x128xf32>
    %456 = vector.shape_cast %453 : vector<126x128xf32> to vector<1x126x128xf32>
    tpu.vector_store %arg12[%c0_412, %c0_413, %c0_414], %456 {strides = array<i32>} : memref<1x126x128xf32, #tpu.memory_space<vmem>>, vector<1x126x128xf32>,
    return
  }
  func.func @transform_0(%arg0: i32) -> (i32, i32, i32) {
    %c0_i32 = arith.constant 0 : i32
    %c0_i32_0 = arith.constant 0 : i32
    %c0_i32_1 = arith.constant 0 : i32
    return %arg0, %c0_i32, %c0_i32_0 : i32, i32, i32
  }
  func.func @transform_1(%arg0: i32) -> (i32, i32, i32) {
    %c0_i32 = arith.constant 0 : i32
    %c0_i32_0 = arith.constant 0 : i32
    %c0_i32_1 = arith.constant 0 : i32
    %c0_i32_2 = arith.constant 0 : i32
    return %c0_i32, %c0_i32_0, %c0_i32_1 : i32, i32, i32
  }
  func.func @transform_2(%arg0: i32) -> (i32, i32) {
    %c0_i32 = arith.constant 0 : i32
    %c0_i32_0 = arith.constant 0 : i32
    %c0_i32_1 = arith.constant 0 : i32
    return %c0_i32, %c0_i32_0 : i32, i32
  }
  func.func @transform_3(%arg0: i32) -> (i32, i32, i32) {
    %c0_i32 = arith.constant 0 : i32
    %c0_i32_0 = arith.constant 0 : i32
    %c0_i32_1 = arith.constant 0 : i32
    %c0_i32_2 = arith.constant 0 : i32
    return %c0_i32, %c0_i32_0, %c0_i32_1 : i32, i32, i32
  }
  func.func @transform_4(%arg0: i32) -> (i32, i32) {
    %c0_i32 = arith.constant 0 : i32
    %c0_i32_0 = arith.constant 0 : i32
    %c0_i32_1 = arith.constant 0 : i32
    return %c0_i32, %c0_i32_0 : i32, i32
  }
  func.func @transform_5(%arg0: i32) -> (i32, i32, i32) {
    %c0_i32 = arith.constant 0 : i32
    %c0_i32_0 = arith.constant 0 : i32
    %c0_i32_1 = arith.constant 0 : i32
    %c0_i32_2 = arith.constant 0 : i32
    return %c0_i32, %c0_i32_0, %c0_i32_1 : i32, i32, i32
  }
  func.func @transform_6(%arg0: i32) -> (i32, i32) {
    %c0_i32 = arith.constant 0 : i32
    %c0_i32_0 = arith.constant 0 : i32
    %c0_i32_1 = arith.constant 0 : i32
    return %c0_i32, %c0_i32_0 : i32, i32
  }
  func.func @transform_7(%arg0: i32) -> (i32, i32, i32) {
    %c0_i32 = arith.constant 0 : i32
    %c0_i32_0 = arith.constant 0 : i32
    %c0_i32_1 = arith.constant 0 : i32
    %c0_i32_2 = arith.constant 0 : i32
    return %c0_i32, %c0_i32_0, %c0_i32_1 : i32, i32, i32
  }
  func.func @transform_8(%arg0: i32) -> (i32, i32) {
    %c0_i32 = arith.constant 0 : i32
    %c0_i32_0 = arith.constant 0 : i32
    %c0_i32_1 = arith.constant 0 : i32
    return %c0_i32, %c0_i32_0 : i32, i32
  }
  func.func @transform_9(%arg0: i32) -> (i32, i32) {
    %c0_i32 = arith.constant 0 : i32
    %c0_i32_0 = arith.constant 0 : i32
    %c0_i32_1 = arith.constant 0 : i32
    return %c0_i32, %c0_i32_0 : i32, i32
  }
  func.func @transform_10(%arg0: i32) -> (i32, i32) {
    %c0_i32 = arith.constant 0 : i32
    %c0_i32_0 = arith.constant 0 : i32
    %c0_i32_1 = arith.constant 0 : i32
    return %c0_i32, %c0_i32_0 : i32, i32
  }
  func.func @transform_11(%arg0: i32) -> (i32, i32, i32) {
    %c0_i32 = arith.constant 0 : i32
    %c0_i32_0 = arith.constant 0 : i32
    %c0_i32_1 = arith.constant 0 : i32
    return %arg0, %c0_i32, %c0_i32_0 : i32, i32, i32
  }
}

</mosaic_0001>

<bundles_post_ra>
// kernel: _lambda_.1
= control target key start
LH: loop header
LB: loop body
LE: loop exit
PB: predicated region body
PF: predicated region fallthrough
CT: control target
= control target key end

     0   :  { %s12144_s0 = inlined_call_operand.vmem [shape: f32[2,1,32], index: 0, kind: input, shape index: {}]   ;;  %s12145_s1 = inlined_call_operand.hbm [shape: f32[9,32,128], index: 1, kind: input, shape index: {}]   ;;  %s12146_s2 = inlined_call_operand.vmem [shape: f32[9,128], index: 2, kind: input, shape index: {}]   ;;  %s12147_s3 = inlined_call_operand.hbm [shape: bf16[11,128,128], index: 3, kind: input, shape index: {}]   ;;  %s12148_s4 = inlined_call_operand.vmem [shape: f32[1,128], index: 4, kind: input, shape index: {}]   ;;  %s12149_s5 = inlined_call_operand.hbm [shape: bf16[11,128,128], index: 5, kind: input, shape index: {}]   ;;  %s12150_s6 = inlined_call_operand.vmem [shape: f32[1,128], index: 6, kind: input, shape index: {}]   ;;  %s12151_s7 = inlined_call_operand.hbm [shape: bf16[11,128,128], index: 7, kind: input, shape index: {}]   ;;  %s12152_s8 = inlined_call_operand.vmem [shape: f32[1,128], index: 8, kind: input, shape index: {}]   ;;  %s12153_s9 = inlined_call_operand.vmem [shape: f32[1,128], index: 9, kind: input, shape index: {}]   ;;  %s12154_s10 = inlined_call_operand.vmem [shape: f32[1,128], index: 10, kind: input, shape index: {}]   ;;  %s12155_s11 = inlined_call_operand.vmem [shape: f32[2,126,128], index: 11, kind: output, shape index: {}]  }
   0x1   :  { %12162 = sst [smem:[#allocation16_spill]] %s12147_s3 }
   0x2   :  { %16 = vsyncpa [#allocation7], 0 }
   0x3   :  { %17 = vsyncpa [#allocation9], 0 }
   0x4   :  { %18 = vsyncpa [#allocation12], 0  ;;  %s10974_s17 = smov 0  }
   0x5 LB: > { %s10903_s18 = smov [#allocation8]   ;;  %s10980_s20 = sadd.s32 4294967295, %s10901_s17   ;;  %s10901_s17 = sphi %s10974_s17, %s24_s17  }
   0x6   : > { %s319_s19 = sshll.u32 %s10903_s18, 4  ;;  %p7902_p0 = scmp.ge.s32.totalorder %s10901_s17, 1  ;;  %s10985_s19 = int_to_ptr.vmem [resolvable:$true] %s319_s19 }
   0x7   : > { %p291_p1 = scmp.lt.s32.totalorder %s10901_s17, 3  ;;  %p12160_p2 = scmp.eq.s32.totalorder %s10980_s20, 0 }
   0x8   : > { %s10904_s22 = smov [#allocation6]   ;;  %s10905_s25 = smov [#allocation10]  }
   0x9   : > { %p10987_p3 = pnand %p7902_p0, %p291_p1  ;;  %s303_s23 = sshll.u32 %s10904_s22, 4  ;;  %s10993_s23 = int_to_ptr.vmem [resolvable:$true] %s303_s23 }
   0xa   : > { %s11001_s26 = sshll.u32 %s10905_s25, 4  ;;  %s12165_s3 = sld [smem:[#allocation16_spill]]  ;;  %s336_s26 = int_to_ptr.vmem [resolvable:$true] %s11001_s26 }
   0xb   : > { %s12163_s21 = scalar_select %p10987_p3, 1, 0 }
   0xc   : > { %p10215_p4 = pneg %p10987_p3 }
   0xe   : > { %p10997_p5 = pnand %p12160_p2, %p10215_p4 }
  0x10   : > { %s10771_s29 = scalar_lea.hbm %s12165_s3, 11264  ;;  %p11011_p7 = pneg %p10997_p5 }
  0x11   : > { %p10772_p6 = scmp.ne.s32.totalorder %s12165_s3, %s10771_s29  ;;  %p10778_p10 = scmp.lt.u32.totalorder %s10771_s29, %s12165_s3 }
  0x13   : > { %p10774_p8 = pnand %p11011_p7, %p10772_p6 }
  0x15   : > { %p10775_p9 = pneg %p10774_p8 }
  0x17   : > { %p10780_p11 = pnand %p10778_p10, %p10775_p9 }
  0x19   : > { %10783 = shalt.err (!%p10780_p11)
}
  0x1a   : > { %s10784_s16 = scalar_lea.vmem %s10985_s19, 11264  ;;  %p10792_p1 = scmp.lt.s32.totalorder %s10985_s19, %s10985_s19 }
  0x1b   : > { %p10785_p12 = scmp.ne.s32.totalorder %s10985_s19, %s10784_s16  ;;  %p10793_p4 = scmp.lt.s32.totalorder %s10784_s16, %s10784_s16 }
  0x1d   : > { %p10787_p13 = pnand %p10785_p12, %p11011_p7  ;;  %p10794_p6 = por %p10793_p4, %p10792_p1 }
  0x1f   : > { %p10788_p0 = pneg %p10787_p13 }
  0x21   : > { %p10795_p8 = pnand %p10794_p6, %p10788_p0 }
  0x23   : > { %10798 = shalt.err (!%p10795_p8)
}
  0x24   : > { %s12156_s18 = smov 64   ;;  %s12158_s22 = smov 4  }
  0x25   : > { %10221 = dma.hbm_to_vmem [thread:$0]  (!%p10997_p5), %s12165_s3, 11264, %s10985_s19, [#allocation9], %s12156_s18, %s12156_s18, %s12158_s22  }
  0x26   : > { %s10799_s30 = scalar_lea.hbm %s12145_s1, 4608 }
  0x27   : > { %p10800_p9 = scmp.ne.s32.totalorder %s12145_s1, %s10799_s30  ;;  %p10806_p12 = scmp.lt.u32.totalorder %s10799_s30, %s12145_s1 }
  0x29   : > { %p10802_p10 = pnand %p10800_p9, %p11011_p7 }
  0x2b   : > { %p10803_p11 = pneg %p10802_p10 }
  0x2d   : > { %p10808_p13 = pnand %p10806_p12, %p10803_p11 }
  0x2f   : > { %10811 = shalt.err (!%p10808_p13)
}
  0x30   : > { %s10812_s19 = scalar_lea.vmem %s10993_s23, 4608  ;;  %p10820_p6 = scmp.lt.s32.totalorder %s10993_s23, %s10993_s23 }
  0x31   : > { %p10813_p0 = scmp.ne.s32.totalorder %s10993_s23, %s10812_s19  ;;  %p10821_p8 = scmp.lt.s32.totalorder %s10812_s19, %s10812_s19 }
  0x33   : > { %p10815_p1 = pnand %p10813_p0, %p11011_p7  ;;  %p10822_p9 = por %p10821_p8, %p10820_p6 }
  0x35   : > { %p10816_p4 = pneg %p10815_p1 }
  0x37   : > { %p10823_p10 = pnand %p10822_p9, %p10816_p4 }
  0x39   : > { %10826 = shalt.err (!%p10823_p10)
}
  0x3a   : > { %s10908_s25 = smov 128   ;;  %s10909_s27 = smov 8  }
  0x3b   : > { %10218 = dma.hbm_to_vmem [thread:$0]  (!%p10997_p5), %s12145_s1, 4608, %s10993_s23, [#allocation7], %s10908_s25, %s10908_s25, %s10909_s27  }
  0x3c   : > { %s10910_s30 = smov [#allocation11]   ;;  %s10827_s16 = scalar_lea.hbm %s12149_s5, 11264 }
  0x3d   : > { %s351_s12 = sshll.u32 %s10910_s30, 4  ;;  %p10828_p11 = scmp.ne.s32.totalorder %s12149_s5, %s10827_s16  ;;  %s352_s12 = int_to_ptr.vmem [resolvable:$true] %s351_s12 }
  0x3e   : > { %p10834_p0 = scmp.lt.u32.totalorder %s10827_s16, %s12149_s5 }
  0x3f   : > { %p10830_p12 = pnand %p10828_p11, %p11011_p7 }
  0x41   : > { %p10831_p13 = pneg %p10830_p12 }
  0x43   : > { %p10836_p1 = pnand %p10834_p0, %p10831_p13 }
  0x45   : > { %10839 = shalt.err (!%p10836_p1)
}
  0x46   : > { %s10840_s23 = scalar_lea.vmem %s336_s26, 11264  ;;  %p10848_p9 = scmp.lt.s32.totalorder %s336_s26, %s336_s26 }
  0x47   : > { %p10841_p4 = scmp.ne.s32.totalorder %s336_s26, %s10840_s23  ;;  %p10849_p10 = scmp.lt.s32.totalorder %s10840_s23, %s10840_s23 }
  0x49   : > { %p10843_p6 = pnand %p10841_p4, %p11011_p7  ;;  %p10850_p2 = por %p10849_p10, %p10848_p9 }
  0x4b   : > { %p10844_p8 = pneg %p10843_p6 }
  0x4d   : > { %p10851_p3 = pnand %p10850_p2, %p10844_p8 }
  0x4f   : > { %10854 = shalt.err (!%p10851_p3)
}
  0x50   : > { %s12167_s18 = smov 4   ;;  %s12168_s25 = smov 64  }
  0x51   : > { %10224 = dma.hbm_to_vmem [thread:$0]  (!%p10997_p5), %s12149_s5, 11264, %s336_s26, [#allocation9], %s12168_s25, %s12168_s25, %s12167_s18  }
  0x52   : > { %s10855_s29 = scalar_lea.hbm %s12151_s7, 11264 }
  0x53   : > { %p10856_p2 = scmp.ne.s32.totalorder %s12151_s7, %s10855_s29  ;;  %p10862_p12 = scmp.lt.u32.totalorder %s10855_s29, %s12151_s7 }
  0x55   : > { %p10858_p3 = pnand %p10856_p2, %p11011_p7 }
  0x57   : > { %p10859_p11 = pneg %p10858_p3 }
  0x59   : > { %p10864_p13 = pnand %p10862_p12, %p10859_p11 }
  0x5b   : > { %10867 = shalt.err (!%p10864_p13)
}
  0x5c   : > { %s10868_s19 = scalar_lea.vmem %s352_s12, 11264  ;;  %p10876_p6 = scmp.lt.s32.totalorder %s352_s12, %s352_s12 }
  0x5d   : > { %p10869_p0 = scmp.ne.s32.totalorder %s352_s12, %s10868_s19  ;;  %p10877_p8 = scmp.lt.s32.totalorder %s10868_s19, %s10868_s19 }
  0x5f   : > { %p10871_p1 = pnand %p10869_p0, %p11011_p7  ;;  %p10878_p9 = por %p10877_p8, %p10876_p6 }
  0x61   : > { %p10872_p4 = pneg %p10871_p1 }
  0x63   : > { %p10879_p10 = pnand %p10878_p9, %p10872_p4 }
  0x65   : > { %10882 = shalt.err (!%p10879_p10)
}
  0x66   : > { %10227 = dma.hbm_to_vmem [thread:$0]  (!%p10997_p5), %s12151_s7, 11264, %s352_s12, [#allocation12], %s12168_s25, %s12168_s25, %s12167_s18  }
  0x67   : > { %p12169_p2 = scmp.ne.s32.totalorder %s12163_s21, 0 }
  0x68   : > { %p12170_p7 = scmp.eq.s32.totalorder (!%p12169_p2), %s10980_s20, 0 }
  0x69   : > { %382 = sbr.rel (%p12169_p2) target bundleno = 2349 (0x92d), region = 64 }
  0x70   : > { %10888 = dma.done.wait (%p12170_p7), [#allocation7], 4608   ;;  %p12171_p3 = pmov %p12170_p7 }
  0x72   : > { %10890 = vsyncadd (%p12171_p3), [#allocation7], 4294962688  ;;  %p12172_p11 = pmov %p12171_p3 }
  0x73   : > { %p12173_p12 = pmov %p12171_p3 }
  0x74   : > { %10892 = dma.done.wait (%p12172_p11), [#allocation9], 22528  }
  0x75   : > { %10894 = vsyncadd (%p12173_p12), [#allocation9], 4294944768  ;;  %p12174_p13 = pmov %p12171_p3 }
  0x76   : > { %p12175_p5 = pmov %p12171_p3 }
  0x77   : > { %10896 = dma.done.wait (%p12174_p13), [#allocation12], 11264  }
  0x78   : > { %10898 = vsyncadd (%p12175_p5), [#allocation12], 4294956032  ;;  %v10911_v0 = vmov 0.0|0.0   ;;  %v10912_v1 = vmov 0.0   ;;  %vm10913_vm0 = vmmov 0   ;;  %p432_p0 = scmp.lt.s32.totalorder %s10980_s20, 1 }
  0x79   : > { %9825 = vmatprep.subr.bf16.mxu0 %v10911_v0  ;;  %9843 = vmatprep.subr.bf16.mxu1 %v10911_v0  ;;  %441 = vst [vmem:[#allocation2] sm:$0xff] %v10912_v1  ;;  %442 = vst [vmem:[#allocation2 + $0x8] sm:$0xff] %v10912_v1  ;;  %v484_v2 = vld [vmem:[#allocation6] sm:$0xff]  ;;  %v485_v3 = vld [vmem:[#allocation6 + $0x8] sm:$0xff]  ;;  %vm489_vm1 = vcmask 261120   ;;  %vm7484_vm2 = vcmask 1046528  }
  0x7a   : > { %443 = vst [vmem:[#allocation2 + $0x10] sm:$0xff] %v10912_v1  ;;  %444 = vst [vmem:[#allocation2 + $0x18] sm:$0xff] %v10912_v1  ;;  %8722 = vmatprep.mubr.msk.f32.mxu0 %vm10913_vm0, %v10912_v1  ;;  %8755 = vmatprep.mubr.msk.f32.mxu1 %vm10913_vm0, %v10912_v1  ;;  %v737_v4 = vld [vmem:[#allocation6 + $0x60] sm:$0xff]  ;;  %s12177_s20 = smov (!%p432_p0, %s10980_s20), 1  ;;  %v9826_v5 = vpack.c.bf16 %v485_v3, %v484_v2  ;;  %v738_v6 = vld [vmem:[#allocation6 + $0x68] sm:$0xff] }
  0x7b   : > { %445 = vst [vmem:[#allocation2 + $0x20] sm:$0xff] %v10912_v1  ;;  %446 = vst [vmem:[#allocation2 + $0x28] sm:$0xff] %v10912_v1  ;;  %v486_v7 = vld [vmem:[#allocation6 + $0x10] sm:$0xff]  ;;  %v487_v8 = vld [vmem:[#allocation6 + $0x18] sm:$0xff]  ;;  %v9844_v9 = vpack.c.bf16 %v738_v6, %v737_v4  ;;  %s434_s13 = scalar_lea.vmem %s12144_s0, %s12177_s20  ;;  %s8195_s30 = sshll.u32 %s12177_s20, 7 }
  0x7c   : > { %447 = vst [vmem:[#allocation2 + $0x30] sm:$0xff] %v10912_v1  ;;  %448 = vst [vmem:[#allocation4] sm:$0xff] %v10912_v1  ;;  %v739_v10 = vld [vmem:[#allocation6 + $0x70] sm:$0xff]  ;;  %v740_v11 = vld [vmem:[#allocation6 + $0x78] sm:$0xff]  ;;  %9827 = vmatpush3.bf16.msra.mxu0 %v9826_v5  ;;  %v9829_v12 = vpack.c.bf16 %v487_v8, %v486_v7  ;;  %s12023_s19 = scalar_lea.vmem %s12155_s11, %s8195_s30 }
  0x7d   : > { %449 = vst [vmem:[#allocation4 + $0x8] sm:$0xff] %v10912_v1  ;;  %450 = vst [vmem:[#allocation4 + $0x10] sm:$0xff] %v10912_v1  ;;  %9845 = vmatpush3.bf16.msra.mxu1 %v9844_v9  ;;  %9828 = vmatprep.subr.bf16.mxu0 %v10911_v0  ;;  %v9847_v13 = vpack.c.bf16 %v740_v11, %v739_v10  ;;  %v571_v14 = vld [vmem:[#allocation6 + $0x20] sm:$0xff]  ;;  %v572_v15 = vld [vmem:[#allocation6 + $0x28] sm:$0xff] }
  0x7e   : > { %451 = vst [vmem:[#allocation4 + $0x18] sm:$0xff] %v10912_v1  ;;  %452 = vst [vmem:[#allocation4 + $0x20] sm:$0xff] %v10912_v1  ;;  %9846 = vmatprep.subr.bf16.mxu1 %v10911_v0  ;;  %v903_v16 = vld [vmem:[#allocation6 + $0xa0] sm:$0xff]  ;;  %v904_v17 = vld [vmem:[#allocation6 + $0xa8] sm:$0xff]  ;;  %v9832_v19 = vpack.c.bf16 %v572_v15, %v571_v14 }
  0x7f   : > { %453 = vst [vmem:[#allocation4 + $0x28] sm:$0xff] %v10912_v1  ;;  %454 = vst [vmem:[#allocation4 + $0x30] sm:$0xff] %v10912_v1  ;;  %v11158_v18 = vld [vmem:[%s434_s13] sm:$0x1]  ;;  %v9856_v20 = vpack.c.bf16 %v904_v17, %v903_v16  ;;  %v573_v21 = vld [vmem:[#allocation6 + $0x30] sm:$0xff] }
  0x80   : > { %455 = vst [vmem:[#allocation4 + $0x38] sm:$0xff] %v10912_v1  ;;  %456 = vst [vmem:[#allocation4 + $0x40] sm:$0xff] %v10912_v1  ;;  %9830 = vmatpush3.bf16.msra.mxu0 %v9829_v12  ;;  %v574_v22 = vld [vmem:[#allocation6 + $0x38] sm:$0xff]  ;;  %v905_v23 = vld [vmem:[#allocation6 + $0xb0] sm:$0xff] }
  0x81   : > { %457 = vst [vmem:[#allocation4 + $0x48] sm:$0xff] %v10912_v1  ;;  %458 = vst [vmem:[#allocation4 + $0x50] sm:$0xff] %v10912_v1  ;;  %9848 = vmatpush3.bf16.msra.mxu1 %v9847_v13  ;;  %9831 = vmatprep.subr.bf16.mxu0 %v10911_v0  ;;  %v906_v24 = vld [vmem:[#allocation6 + $0xb8] sm:$0xff]  ;;  %v9835_v25 = vpack.c.bf16 %v574_v22, %v573_v21  ;;  %v654_v26 = vld [vmem:[#allocation6 + $0x40] sm:$0xff] }
  0x82   : > { %459 = vst [vmem:[#allocation4 + $0x58] sm:$0xff] %v10912_v1  ;;  %460 = vst [vmem:[#allocation4 + $0x60] sm:$0xff] %v10912_v1  ;;  %9855 = vmatprep.subr.bf16.mxu1 %v10911_v0  ;;  %v655_v27 = vld [vmem:[#allocation6 + $0x48] sm:$0xff]  ;;  %v9859_v28 = vpack.c.bf16 %v906_v24, %v905_v23  ;;  %v1069_v29 = vld [vmem:[#allocation6 + $0xe0] sm:$0xff] }
  0x83   : > { %461 = vst [vmem:[#allocation4 + $0x68] sm:$0xff] %v10912_v1  ;;  %462 = vst [vmem:[#allocation4 + $0x70] sm:$0xff] %v10912_v1  ;;  %8723 = vmatmul.mubr.msk.f32.vlgmr.msra.gmra.mrb[0].mxu0 %vm489_vm1, %v11158_v18  ;;  %v1070_v30 = vld [vmem:[#allocation6 + $0xe8] sm:$0xff]  ;;  %v656_v31 = vld [vmem:[#allocation6 + $0x50] sm:$0xff]  ;;  %v9838_v33 = vpack.c.bf16 %v655_v27, %v654_v26 }
  0x84   : > { %463 = vst [vmem:[#allocation4 + $0x78] sm:$0xff] %v10912_v1  ;;  %464 = vst [vmem:[#allocation4 + $0x80] sm:$0xff] %v10912_v1  ;;  %8756 = vmatmul.mubr.msk.f32.vlgmr.msra.gmra.mrb[0].mxu1 %vm489_vm1, %v11158_v18  ;;  %9833 = vmatpush3.bf16.msra.mxu0 %v9832_v19  ;;  %v657_v32 = vld [vmem:[#allocation6 + $0x58] sm:$0xff]  ;;  %v1071_v34 = vld [vmem:[#allocation6 + $0xf0] sm:$0xff]  ;;  %v9868_v36 = vpack.c.bf16 %v1070_v30, %v1069_v29 }
  0x85   : > { %465 = vst [vmem:[#allocation5] sm:$0xff] %v10912_v1  ;;  %481 = vst [vmem:[#allocation5 + $0x80] sm:$0xff] %v10912_v1  ;;  %9857 = vmatpush3.bf16.msra.mxu1 %v9856_v20  ;;  %9834 = vmatprep.subr.bf16.mxu0 %v10911_v0  ;;  %v1072_v35 = vld [vmem:[#allocation6 + $0xf8] sm:$0xff]  ;;  %v820_v37 = vld [vmem:[#allocation6 + $0x80] sm:$0xff]  ;;  %v9841_v39 = vpack.c.bf16 %v657_v32, %v656_v31 }
  0x86   : > { %482 = vst [vmem:[#allocation5 + $0x88] sm:$0xff] %v10912_v1  ;;  %9858 = vmatprep.subr.bf16.mxu1 %v10911_v0  ;;  %8733 = vmatprep.mubr.msk.f32.mxu0 %vm10913_vm0, %v10912_v1  ;;  %v821_v38 = vld [vmem:[#allocation6 + $0x88] sm:$0xff]  ;;  %v9871_v40 = vpack.c.bf16 %v1072_v35, %v1071_v34  ;;  %v822_v41 = vld [vmem:[#allocation6 + $0x90] sm:$0xff]  ;;  %v823_v42 = vld [vmem:[#allocation6 + $0x98] sm:$0xff] }
  0x87   : > { %8777 = vmatprep.mubr.msk.f32.mxu1 %vm10913_vm0, %v10912_v1  ;;  %v9850_v43 = vpack.c.bf16 %v821_v38, %v820_v37  ;;  %v986_v44 = vld [vmem:[#allocation6 + $0xc0] sm:$0xff]  ;;  %v987_v45 = vld [vmem:[#allocation6 + $0xc8] sm:$0xff]  ;;  %v9853_v46 = vpack.c.bf16 %v823_v42, %v822_v41  ;;  %v988_v47 = vld [vmem:[#allocation6 + $0xd0] sm:$0xff] }
  0x88   : > { %9836 = vmatpush3.bf16.msra.mxu0 %v9835_v25  ;;  %v989_v48 = vld [vmem:[#allocation6 + $0xd8] sm:$0xff]  ;;  %v9862_v49 = vpack.c.bf16 %v987_v45, %v986_v44  ;;  %v1152_v50 = vld [vmem:[#allocation6 + $0x100] sm:$0xff]  ;;  %v1153_v51 = vld [vmem:[#allocation6 + $0x108] sm:$0xff] }
  0x89   : > { %9860 = vmatpush3.bf16.msra.mxu1 %v9859_v28  ;;  %9837 = vmatprep.subr.bf16.mxu0 %v10911_v0  ;;  %v9865_v52 = vpack.c.bf16 %v989_v48, %v988_v47  ;;  %v1154_v53 = vld [vmem:[#allocation6 + $0x110] sm:$0xff]  ;;  %v1155_v54 = vld [vmem:[#allocation6 + $0x118] sm:$0xff]  ;;  %v9874_v55 = vpack.c.bf16 %v1153_v51, %v1152_v50  ;;  %v10255_v57 = vld [vmem:[#allocation8] sm:$0xff]  }
  0x8a   : > { %9867 = vmatprep.subr.bf16.mxu1 %v10911_v0  ;;  %v9877_v56 = vpack.c.bf16 %v1155_v54, %v1154_v53  ;;  %v10256_v58 = vld [vmem:[#allocation8 + $0x8] sm:$0xff]   ;;  %v10257_v59 = vld [vmem:[#allocation8 + $0x40] sm:$0xff]   ;;  %v10258_v60 = vld [vmem:[#allocation8 + $0x10] sm:$0xff]  }
  0x8b   : > { %8734 = vmatmul.mubr.msk.f32.vlgmr.msra.gmra.mrb[2].mxu0 %vm489_vm1, %v11158_v18  ;;  %v10259_v61 = vld [vmem:[#allocation8 + $0x48] sm:$0xff]   ;;  %v10260_v62 = vld [vmem:[#allocation8 + $0x18] sm:$0xff]   ;;  %v10261_v63 = vld [vmem:[#allocation8 + $0x50] sm:$0xff]  }
  0x8c   : > { %8778 = vmatmul.mubr.msk.f32.vlgmr.msra.gmra.mrb[2].mxu1 %vm489_vm1, %v11158_v18  ;;  %9839 = vmatpush3.bf16.msra.mxu0 %v9838_v33  ;;  %v10263_v2 = vld [vmem:[#allocation8 + $0x58] sm:$0xff]   ;;  %v10264_v3 = vld [vmem:[#allocation8 + $0x28] sm:$0xff]   ;;  %v10265_v5 = vld [vmem:[#allocation8 + $0x60] sm:$0xff]  }
  0x8d   : > { %9869 = vmatpush3.bf16.msra.mxu1 %v9868_v36  ;;  %9840 = vmatprep.subr.bf16.mxu0 %v10911_v0  ;;  %v11220_v4 = vld [vmem:[#allocation2] sm:$0xff]  ;;  %v10266_v6 = vld [vmem:[#allocation8 + $0x30] sm:$0xff]   ;;  %v10271_v9 = vld [vmem:[#allocation8 + $0x78] sm:$0xff]  }
  0x8e   : > { %9870 = vmatprep.subr.bf16.mxu1 %v10911_v0  ;;  %8744 = vmatprep.mubr.msk.f32.mxu0 %vm10913_vm0, %v10912_v1  ;;  %v10267_v7 = vld [vmem:[#allocation8 + $0x68] sm:$0xff]   ;;  %v10269_v8 = vld [vmem:[#allocation8 + $0x70] sm:$0xff]  }
  0x8f   : > { %8799 = vmatprep.mubr.msk.f32.mxu1 %vm10913_vm0, %v10912_v1  ;;  %v488_v10 = vld [vmem:[%s12146_s2] sm:$0x1]  ;;  %v741_v11 = vld [vmem:[%s12146_s2 + $0x3] sm:$0x1]  ;;  %v575_v22 = vld [vmem:[%s12146_s2 + $0x1] sm:$0x1] }
  0x90   : > { %9842 = vmatpush3.bf16.msra.mxu0 %v9841_v39  ;;  %v907_v23 = vld [vmem:[%s12146_s2 + $0x5] sm:$0x1]  ;;  %v658_v34 = vld [vmem:[%s12146_s2 + $0x2] sm:$0x1]  ;;  %v1073_v35 = vld [vmem:[%s12146_s2 + $0x7] sm:$0x1] }
  0x91   : > { %9872 = vmatpush3.bf16.msra.mxu1 %v9871_v40  ;;  %9849 = vmatprep.subr.bf16.mxu0 %v10911_v0  ;;  %v824_v50 = vld [vmem:[%s12146_s2 + $0x4] sm:$0x1] }
  0x92   : > { %8813 = vmatprep.subr.bf16.mxu1 %v10912_v1 }
  0x93   : > { %8745 = vmatmul.mubr.msk.f32.vlgmr.msra.gmra.mrb[4].mxu0 %vm489_vm1, %v11158_v18 }
  0x94   : > { %8800 = vmatmul.mubr.msk.f32.vlgmr.msra.gmra.mrb[4].mxu1 %vm489_vm1, %v11158_v18  ;;  %9851 = vmatpush3.bf16.msra.mxu0 %v9850_v43 }
  0x95   : > { %9852 = vmatprep.subr.bf16.mxu0 %v10911_v0  ;;  %8766 = vmatprep.mubr.msk.f32.mxu0 %vm10913_vm0, %v10912_v1 }
  0x96   : > { %8829 = vmatprep.mubr.msk.bf16.mxu1 %vm10913_vm0, %v10912_v1  ;;  %8814 = vmatpush3.bf16.msra.mxu1 %v10257_v59 }
  0x97   : > { %8815 = vmatprep.subr.bf16.mxu1 %v10912_v1 }
  0x98   : > { %9854 = vmatpush3.bf16.msra.mxu0 %v9853_v46 }
  0x99   : > { %9861 = vmatprep.subr.bf16.mxu0 %v10911_v0 }
  0x9a   : > { %8816 = vmatpush3.bf16.msra.mxu1 %v10259_v61  ;;  %v990_v61 = vld [vmem:[%s12146_s2 + $0x6] sm:$0x1] }
  0x9b   : > { %8767 = vmatmul.mubr.msk.f32.vlgmr.msra.gmra.mrb[6].mxu0 %vm489_vm1, %v11158_v18  ;;  %8817 = vmatprep.subr.bf16.mxu1 %v10912_v1 }
  0x9c   : > { %9863 = vmatpush3.bf16.msra.mxu0 %v9862_v49  ;;  %8788 = vmatprep.mubr.msk.f32.mxu0 %vm10913_vm0, %v10912_v1 }
  0x9d   : > { %9864 = vmatprep.subr.bf16.mxu0 %v10911_v0 }
  0x9e   : > { %8818 = vmatpush3.bf16.msra.mxu1 %v10261_v63 }
  0x9f   : > { %8819 = vmatprep.subr.bf16.mxu1 %v10912_v1 }
  0xa0   : > { %9866 = vmatpush3.bf16.msra.mxu0 %v9865_v52 }
  0xa1   : > { %9873 = vmatprep.subr.bf16.mxu0 %v10911_v0 }
  0xa2   : > { %8820 = vmatpush3.bf16.msra.mxu1 %v10263_v2 }
  0xa3   : > { %8789 = vmatmul.mubr.msk.f32.vlgmr.msra.gmra.mrb[8].mxu0 %vm489_vm1, %v11158_v18  ;;  %8821 = vmatprep.subr.bf16.mxu1 %v11220_v4 }
  0xa4   : > { %9875 = vmatpush3.bf16.msra.mxu0 %v9874_v55  ;;  %8810 = vmatprep.mubr.msk.f32.mxu0 %vm10913_vm0, %v10912_v1 }
  0xa5   : > { %9876 = vmatprep.subr.bf16.mxu0 %v10911_v0  ;;  %v10262_v0 = vld [vmem:[#allocation8 + $0x20] sm:$0xff]  }
  0xa6   : > { %8822 = vmatpush3.bf16.msra.mxu1 %v10265_v5 }
  0xa7   : > { %8823 = vmatprep.subr.bf16.mxu1 %v11220_v4 }
  0xa8   : > { %9878 = vmatpush3.bf16.msra.mxu0 %v9877_v56 }
  0xa9   : > { %8841 = vmatprep.subr.bf16.mxu0 %v10912_v1 }
  0xaa   : > { %8824 = vmatpush3.bf16.msra.mxu1 %v10267_v7 }
  0xab   : > { %8811 = vmatmul.mubr.msk.f32.vlgmr.msra.gmra.mrb[10].mxu0 %vm489_vm1, %v11158_v18  ;;  %8825 = vmatprep.subr.bf16.mxu1 %v11220_v4 }
  0xac   : > { %8857 = vmatprep.mubr.msk.bf16.mxu0 %vm10913_vm0, %v10912_v1  ;;  %8842 = vmatpush3.bf16.msra.mxu0 %v10255_v57 }
  0xad   : > { %8843 = vmatprep.subr.bf16.mxu0 %v10912_v1 }
  0xae   : > { %8826 = vmatpush3.bf16.msra.mxu1 %v10269_v8 }
  0xaf   : > { %8827 = vmatprep.subr.bf16.mxu1 %v11220_v4 }
  0xb0   : > { %8844 = vmatpush3.bf16.msra.mxu0 %v10256_v58 }
  0xb1   : > { %8845 = vmatprep.subr.bf16.mxu0 %v10912_v1 }
  0xb2   : > { %8828 = vmatpush3.bf16.msra.mxu1 %v10271_v9 }
  0xb3   : > { %8869 = vmatprep.subr.bf16.mxu1 %v11220_v4 }
  0xb4   : > { %8846 = vmatpush3.bf16.msra.mxu0 %v10258_v60 }
  0xb5   : > { %8847 = vmatprep.subr.bf16.mxu0 %v10912_v1 }
  0xb8   : > { %8848 = vmatpush3.bf16.msra.mxu0 %v10260_v62 }
  0xb9   : > { %8849 = vmatprep.subr.bf16.mxu0 %v10912_v1 }
  0xbc   : > { %8850 = vmatpush3.bf16.msra.mxu0 %v10262_v0 }
  0xbd   : > { %8851 = vmatprep.subr.bf16.mxu0 %v10912_v1  ;;  %v10268_v1 = vld [vmem:[#allocation8 + $0x38] sm:$0xff]  }
  0xc0   : > { %8852 = vmatpush3.bf16.msra.mxu0 %v10264_v3 }
  0xc1   : > { %8853 = vmatprep.subr.bf16.mxu0 %v11220_v4 }
  0xc4   : > { %8854 = vmatpush3.bf16.msra.mxu0 %v10266_v6 }
  0xc5   : > { %8855 = vmatprep.subr.bf16.mxu0 %v11220_v4 }
  0xc8   : > { %8856 = vmatpush3.bf16.msra.mxu0 %v10268_v1 }
  0xc9   : > { %8897 = vmatprep.subr.bf16.mxu0 %v11220_v4 }
 0x156   : > { %v559_v12 = vpop.f32.mrb[0].mxu0 }
 0x157   : > { %v560_v13 = vadd.f32 %v559_v12, %v488_v10  ;;  %v808_v14 = vpop.f32.mrb[0].mxu1  ;;  %v8724_v15 = vpop.f32.mrb[1].mxu0  ;;  %v1156_v12 = vld [vmem:[%s12146_s2 + $0x8] sm:$0x1] }
 0x158   : > { %v809_v16 = vadd.f32 %v808_v14, %v741_v11  ;;  %v8757_v17 = vpop.f32.mrb[1].mxu1 }
 0x159   : > { %v563_v18 = vsub.f32 0.0, %v560_v13 }
 0x15a   : > { %v812_v19 = vsub.f32 0.0, %v809_v16 }
 0x15b   : > { %v564_v20 = vmul.f32 1.442695, %v563_v18 }
 0x15c   : > { %v813_v21 = vmul.f32 1.442695, %v812_v19 }
 0x15d   : > { %10519 = vpow2.f32 %v564_v20 }
 0x15e   : > { %10521 = vpow2.f32 %v813_v21  ;;  %v642_v24 = vpop.f32.mrb[2].mxu0 }
 0x15f   : > { %v11242_v25 = vadd.f32 %v642_v24, %v575_v22  ;;  %v974_v26 = vpop.f32.mrb[2].mxu1  ;;  %v8735_v27 = vpop.f32.mrb[3].mxu0 }
 0x160   : > { %v11244_v28 = vadd.f32 %v974_v26, %v907_v23  ;;  %v8779_v29 = vpop.f32.mrb[3].mxu1 }
 0x161   : > { %v646_v30 = vsub.f32 0.0, %v11242_v25 }
 0x162   : > { %v978_v31 = vsub.f32 0.0, %v11244_v28 }
 0x163   : > { %v647_v32 = vmul.f32 1.442695, %v646_v30 }
 0x164   : > { %v979_v33 = vmul.f32 1.442695, %v978_v31 }
 0x165   : > { %10523 = vpow2.f32 %v647_v32  ;;  %v10272_v32 = vld [vmem:[#allocation8 + $0xc8] sm:$0xff]  }
 0x166   : > { %10525 = vpow2.f32 %v979_v33  ;;  %v725_v36 = vpop.f32.mrb[4].mxu0 }
 0x167   : > { %v10520_v37 = vpop.eup %10519  ;;  %v11254_v38 = vadd.f32 %v725_v36, %v658_v34  ;;  %v1140_v39 = vpop.f32.mrb[4].mxu1  ;;  %v10274_v36 = vld [vmem:[#allocation8 + $0xd0] sm:$0xff]  }
 0x168   : > { %v8746_v40 = vpop.f32.mrb[5].mxu0  ;;  %v10522_v41 = vpop.eup %10521  ;;  %v566_v42 = vadd.f32 1.0, %v10520_v37  ;;  %v1141_v43 = vadd.f32 %v1140_v39, %v1073_v35  ;;  %v10273_v35 = vld [vmem:[#allocation8 + $0x80] sm:$0xff]  }
 0x169   : > { %v8801_v44 = vpop.f32.mrb[5].mxu1  ;;  %v815_v45 = vadd.f32 1.0, %v10522_v41  ;;  %v729_v46 = vsub.f32 0.0, %v11254_v38 }
 0x16a   : > { %10527 = vrcp.f32 %v566_v42  ;;  %v1144_v47 = vsub.f32 0.0, %v1141_v43  ;;  %v10275_v44 = vld [vmem:[#allocation8 + $0x88] sm:$0xff]  }
 0x16b   : > { %10529 = vrcp.f32 %v815_v45  ;;  %v730_v48 = vmul.f32 1.442695, %v729_v46  ;;  %v10276_v45 = vld [vmem:[#allocation8 + $0xd8] sm:$0xff]  }
 0x16c   : > { %v1145_v49 = vmul.f32 1.442695, %v1144_v47 }
 0x16d   : > { %10531 = vpow2.f32 %v730_v48  ;;  %v10277_v48 = vld [vmem:[#allocation8 + $0x90] sm:$0xff]  }
 0x16e   : > { %10533 = vpow2.f32 %v1145_v49  ;;  %v891_v51 = vpop.f32.mrb[6].mxu0 }
 0x16f   : > { %v10524_v52 = vpop.eup %10523  ;;  %v11260_v53 = vadd.f32 %v891_v51, %v824_v50  ;;  %v8768_v54 = vpop.f32.mrb[7].mxu0  ;;  %v10278_v50 = vld [vmem:[#allocation8 + $0xe0] sm:$0xff]  }
 0x170   : > { %v10526_v55 = vpop.eup %10525  ;;  %v649_v56 = vadd.f32 1.0, %v10524_v52 }
 0x171   : > { %v981_v57 = vadd.f32 1.0, %v10526_v55  ;;  %v895_v58 = vsub.f32 0.0, %v11260_v53 }
 0x172   : > { %10535 = vrcp.f32 %v649_v56 }
 0x173   : > { %10537 = vrcp.f32 %v981_v57  ;;  %v896_v59 = vmul.f32 1.442695, %v895_v58  ;;  %v10279_v57 = vld [vmem:[#allocation8 + $0x98] sm:$0xff]   ;;  %v10280_v58 = vld [vmem:[#allocation8 + $0xe8] sm:$0xff]  }
 0x174   : > { %v10528_v60 = vpop.eup %10527 }
 0x175   : > { %v10530_v62 = vpop.eup %10529  ;;  %v568_v63 = vmul.f32 %v10528_v60, %v560_v13  ;;  %10539 = vpow2.f32 %v896_v59 }
 0x176   : > { %v817_v0 = vmul.f32 %v10530_v62, %v809_v16  ;;  %v1057_v2 = vpop.f32.mrb[8].mxu0 }
 0x177   : > { %v10532_v3 = vpop.eup %10531  ;;  %569 = vst [vmem:[#allocation2 + $0x8] sm:$0x1] %v568_v63  ;;  %v11266_v5 = vadd.f32 %v1057_v2, %v990_v61  ;;  %v8790_v6 = vpop.f32.mrb[9].mxu0  ;;  %v10281_v61 = vld [vmem:[#allocation8 + $0xa0] sm:$0xff]  }
 0x178   : > { %v10534_v7 = vpop.eup %10533  ;;  %818 = vst [vmem:[#allocation2 + $0x14] sm:$0x1] %v817_v0  ;;  %v732_v1 = vadd.f32 1.0, %v10532_v3  ;;  %v10282_v0 = vld [vmem:[#allocation8 + $0xf0] sm:$0xff]   ;;  %v10284_v6 = vld [vmem:[#allocation8 + $0xf8] sm:$0xff]  }
 0x179   : > { %v1147_v8 = vadd.f32 1.0, %v10534_v7  ;;  %v1061_v9 = vsub.f32 0.0, %v11266_v5 }
 0x17a   : > { %10541 = vrcp.f32 %v732_v1 }
 0x17b   : > { %10543 = vrcp.f32 %v1147_v8  ;;  %v1062_v10 = vmul.f32 1.442695, %v1061_v9  ;;  %v10285_v8 = vld [vmem:[#allocation8 + $0xb0] sm:$0xff]  }
 0x17c   : > { %v10536_v11 = vpop.eup %10535 }
 0x17d   : > { %v10538_v13 = vpop.eup %10537  ;;  %v651_v14 = vmul.f32 %v10536_v11, %v11242_v25  ;;  %10545 = vpow2.f32 %v1062_v10  ;;  %v10286_v10 = vld [vmem:[#allocation8 + $0x140] sm:$0xff]  }
 0x17e   : > { %v983_v15 = vmul.f32 %v10538_v13, %v11244_v28  ;;  %v1223_v16 = vpop.f32.mrb[10].mxu0  ;;  %v10270_v28 = vld [vmem:[#allocation8 + $0xc0] sm:$0xff]   ;;  %v1258_v37 = vld [vmem:[#allocation2 + $0x1] sm:$0xff]  ;;  %v10287_v13 = vld [vmem:[#allocation8 + $0xb8] sm:$0xff]  }
 0x17f   : > { %v10540_v17 = vpop.eup %10539  ;;  %652 = vst [vmem:[#allocation2 + $0xc] sm:$0x1] %v651_v14  ;;  %v11274_v18 = vadd.f32 %v1223_v16, %v1156_v12  ;;  %v8812_v19 = vpop.f32.mrb[11].mxu0  ;;  %v1625_v9 = vld [vmem:[#allocation2 + $0x3] sm:$0xff]  ;;  %v10289_v16 = vld [vmem:[#allocation8 + $0x100] sm:$0xff]  }
 0x180   : > { %984 = vst [vmem:[#allocation2 + $0x1c] sm:$0x1] %v983_v15  ;;  %v898_v20 = vadd.f32 1.0, %v10540_v17  ;;  %v10288_v14 = vld [vmem:[#allocation8 + $0x148] sm:$0xff]   ;;  %v10290_v19 = vld [vmem:[#allocation8 + $0x150] sm:$0xff]  }
 0x181   : > { %v1227_v21 = vsub.f32 0.0, %v11274_v18  ;;  %v1491_v17 = vld [vmem:[#allocation2 + $0x2] sm:$0xff] }
 0x182   : > { %10547 = vrcp.f32 %v898_v20 }
 0x183   : > { %v1228_v22 = vmul.f32 1.442695, %v1227_v21 }
 0x184   : > { %v10542_v23 = vpop.eup %10541 }
 0x185   : > { %v10544_v24 = vpop.eup %10543  ;;  %v734_v26 = vmul.f32 %v10542_v23, %v11254_v38  ;;  %10549 = vpow2.f32 %v1228_v22  ;;  %v10291_v22 = vld [vmem:[#allocation8 + $0x108] sm:$0xff]   ;;  %v10292_v23 = vld [vmem:[#allocation8 + $0x158] sm:$0xff]  }
 0x186   : > { %v1149_v25 = vmul.f32 %v10544_v24, %v1141_v43  ;;  %v11278_v27 = vld [vmem:[#allocation2 + $0x8] sm:$0xff] }
 0x187   : > { %v10546_v29 = vpop.eup %10545  ;;  %735 = vst [vmem:[#allocation2 + $0x10] sm:$0x1] %v734_v26  ;;  %v1239_v30 = vpack.c.bf16 %v11278_v27, %v11220_v4 }
 0x188   : > { %1150 = vst [vmem:[#allocation2 + $0x24] sm:$0x1] %v1149_v25  ;;  %v1064_v31 = vadd.f32 1.0, %v10546_v29  ;;  %v10293_v25 = vld [vmem:[#allocation8 + $0x110] sm:$0xff]  }
 0x189   : > { %8858 = vmatmul.mubr.bf16.vlgmr.msra.gmra.mrb[12].mxu0 %v1239_v30 }
 0x18a   : > { %10551 = vrcp.f32 %v1064_v31  ;;  %8898 = vmatpush3.bf16.msra.mxu0 %v10270_v28  ;;  %8861 = vmatprep.mubr.msk.bf16.mxu0 %vm10913_vm0, %v11220_v4  ;;  %v10294_v28 = vld [vmem:[#allocation8 + $0x160] sm:$0xff]   ;;  %v10295_v31 = vld [vmem:[#allocation8 + $0x118] sm:$0xff]  }
 0x18b   : > { %8899 = vmatprep.subr.bf16.mxu0 %v11220_v4 }
 0x18c   : > { %v10548_v33 = vpop.eup %10547 }
 0x18d   : > { %v900_v34 = vmul.f32 %v10548_v33, %v11260_v53 }
 0x18e   : > { %8900 = vmatpush3.bf16.msra.mxu0 %v10272_v32  ;;  %v11286_v38 = vld [vmem:[#allocation2 + $0x9] sm:$0xff]  ;;  %v10296_v32 = vld [vmem:[#allocation8 + $0x168] sm:$0xff]  }
 0x18f   : > { %v11288_v39 = vld [vmem:[#allocation2 + $0x10] sm:$0xff]  ;;  %v10550_v40 = vpop.eup %10549  ;;  %901 = vst [vmem:[#allocation2 + $0x18] sm:$0x1] %v900_v34  ;;  %8901 = vmatprep.subr.bf16.mxu0 %v11220_v4  ;;  %v1263_v41 = vpack.c.bf16 %v11286_v38, %v1258_v37  ;;  %v1262_v7 = vld [vmem:[#allocation2 + $0x21] sm:$0x7f]  ;;  %v10297_v34 = vld [vmem:[#allocation8 + $0x120] sm:$0xff]  }
 0x190   : > { %v2300_v42 = vpack.c.bf16 %v11288_v39, %v11278_v27  ;;  %v1230_v43 = vadd.f32 1.0, %v10550_v40  ;;  %v11307_v53 = vld [vmem:[#allocation2 + $0xa] sm:$0xff]  ;;  %v1265_v11 = vpack.c.bf16 %v1262_v7, %v1262_v7  ;;  %v10299_v37 = vld [vmem:[#allocation8 + $0x128] sm:$0xff]  }
 0x191   : > { %8830 = vmatmul.mubr.bf16.vlgmr.msra.gmra.mrb[8].mxu1 %v1263_v41  ;;  %v1626_v1 = vld [vmem:[#allocation2 + $0xb] sm:$0xff]  ;;  %v1496_v20 = vpack.c.bf16 %v11307_v53, %v1491_v17 }
 0x192   : > { %10553 = vrcp.f32 %v1230_v43  ;;  %8870 = vmatpush3.bf16.msra.mxu1 %v10273_v35  ;;  %8902 = vmatpush3.bf16.msra.mxu0 %v10274_v36  ;;  %v1630_v12 = vpack.c.bf16 %v1626_v1, %v1625_v9  ;;  %v10298_v35 = vld [vmem:[#allocation8 + $0x170] sm:$0xff]   ;;  %v10300_v40 = vld [vmem:[#allocation8 + $0x178] sm:$0xff]   ;;  %v10310_v1 = vld [vmem:[#allocation8 + $0x1e0] sm:$0xff]  }
 0x193   : > { %8871 = vmatprep.subr.bf16.mxu1 %v11220_v4  ;;  %8903 = vmatprep.subr.bf16.mxu0 %v11220_v4  ;;  %v1894_v41 = vld [vmem:[#allocation2 + $0xd] sm:$0xff]  ;;  %v1893_v43 = vld [vmem:[#allocation2 + $0x5] sm:$0xff] }
 0x194   : > { %v10552_v46 = vpop.eup %10551  ;;  %8833 = vmatprep.mubr.msk.bf16.mxu1 %vm10913_vm0, %v11220_v4  ;;  %v10309_v7 = vld [vmem:[#allocation8 + $0x190] sm:$0xff]   ;;  %v10316_v17 = vld [vmem:[#allocation8 + $0x1f8] sm:$0xff]  }
 0x195   : > { %v1066_v47 = vmul.f32 %v10552_v46, %v11266_v5  ;;  %v10283_v5 = vld [vmem:[#allocation8 + $0xa8] sm:$0xff]   ;;  %v1898_v46 = vpack.c.bf16 %v1894_v41, %v1893_v43  ;;  %v10325_v43 = vld [vmem:[#allocation8 + $0x210] sm:$0xff]   ;;  %v10338_v27 = vld [vmem:[#allocation8 + $0x298] sm:$0xff]  }
 0x196   : > { %8872 = vmatpush3.bf16.msra.mxu1 %v10275_v44  ;;  %8904 = vmatpush3.bf16.msra.mxu0 %v10276_v45  ;;  %v11299_v49 = vld [vmem:[#allocation2 + $0x18] sm:$0xff]  ;;  %v10301_v44 = vld [vmem:[#allocation8 + $0x130] sm:$0xff]  }
 0x197   : > { %v11301_v51 = vld [vmem:[#allocation2 + $0x11] sm:$0xff]  ;;  %1067 = vst [vmem:[#allocation2 + $0x20] sm:$0x1] %v1066_v47  ;;  %8873 = vmatprep.subr.bf16.mxu1 %v11220_v4  ;;  %8905 = vmatprep.subr.bf16.mxu0 %v11220_v4  ;;  %v1240_v52 = vpack.c.bf16 %v11299_v49, %v11288_v39 }
 0x198   : > { %v11309_v54 = vld [vmem:[#allocation2 + $0x12] sm:$0xff]  ;;  %v2434_v55 = vpack.c.bf16 %v11301_v51, %v11286_v38  ;;  %v10336_v38 = vld [vmem:[#allocation8 + $0x288] sm:$0xff]  }
 0x199   : > { %v2568_v56 = vpack.c.bf16 %v11309_v54, %v11307_v53  ;;  %8862 = vmatmul.mubr.bf16.gmra.mrb[16].mxu0 %v1240_v52  ;;  %v10302_v45 = vld [vmem:[#allocation8 + $0x1c0] sm:$0xff]   ;;  %v10303_v47 = vld [vmem:[#allocation8 + $0x138] sm:$0xff]  }
 0x19a   : > { %8874 = vmatpush3.bf16.msra.mxu1 %v10277_v48  ;;  %8906 = vmatpush3.bf16.msra.mxu0 %v10278_v50  ;;  %v10304_v48 = vld [vmem:[#allocation8 + $0x1c8] sm:$0xff]   ;;  %v1760_v50 = vld [vmem:[#allocation2 + $0xc] sm:$0xff]  ;;  %v2029_v41 = vld [vmem:[#allocation2 + $0x16] sm:$0xff] }
 0x19b   : > { %8875 = vmatprep.subr.bf16.mxu1 %v11220_v4  ;;  %8907 = vmatprep.subr.bf16.mxu0 %v11220_v4 }
 0x19c   : > { %v10554_v59 = vpop.eup %10553  ;;  %8865 = vmatprep.mubr.msk.bf16.mxu0 %vm10913_vm0, %v11220_v4 }
 0x19d   : > { %v1232_v60 = vmul.f32 %v10554_v59, %v11274_v18  ;;  %v1627_v18 = vld [vmem:[#allocation2 + $0x13] sm:$0xff] }
 0x19e   : > { %8876 = vmatpush3.bf16.msra.mxu1 %v10279_v57  ;;  %8908 = vmatpush3.bf16.msra.mxu0 %v10280_v58  ;;  %v11320_v62 = vld [vmem:[#allocation2 + $0x19] sm:$0xff]  ;;  %v1759_v58 = vld [vmem:[#allocation2 + $0x4] sm:$0xff] }
 0x19f   : > { %v1238_v63 = vld [vmem:[#allocation2 + $0x20] sm:$0x7f]  ;;  %1233 = vst [vmem:[#allocation2 + $0x28] sm:$0x1] %v1232_v60  ;;  %8877 = vmatprep.subr.bf16.mxu1 %v11220_v4  ;;  %8909 = vmatprep.subr.bf16.mxu0 %v11220_v4  ;;  %v1264_v2 = vpack.c.bf16 %v11320_v62, %v11301_v51  ;;  %v10305_v57 = vld [vmem:[#allocation8 + $0x180] sm:$0xff]   ;;  %v10306_v60 = vld [vmem:[#allocation8 + $0x1d0] sm:$0xff]  }
 0x1a0   : > { %v1241_v3 = vpack.c.bf16 %v1238_v63, %v1238_v63  ;;  %v1628_v15 = vld [vmem:[#allocation2 + $0x1b] sm:$0xff]  ;;  %v2433_v51 = vld [vmem:[#allocation2 + $0x29] sm:$0x7f] }
 0x1a1   : > { %8834 = vmatmul.mubr.bf16.gmra.mrb[12].mxu1 %v1264_v2  ;;  %v1631_v21 = vpack.c.bf16 %v1628_v15, %v1627_v18  ;;  %v11349_v24 = vld [vmem:[#allocation2 + $0x1a] sm:$0xff]  ;;  %v10308_v2 = vld [vmem:[#allocation8 + $0x1d8] sm:$0xff]  }
 0x1a2   : > { %8866 = vmatmul.mubr.bf16.gmra.mrb[20].mxu0 %v1241_v3  ;;  %8878 = vmatpush3.bf16.msra.mxu1 %v10281_v61  ;;  %v1497_v29 = vpack.c.bf16 %v11349_v24, %v11309_v54  ;;  %v1896_v52 = vld [vmem:[#allocation2 + $0x1d] sm:$0xff]  ;;  %v1895_v59 = vld [vmem:[#allocation2 + $0x15] sm:$0xff]  ;;  %v1764_v61 = vpack.c.bf16 %v1760_v50, %v1759_v58 }
 0x1a3   : > { %8910 = vmatpush3.bf16.msra.mxu0 %v10282_v0  ;;  %8879 = vmatprep.subr.bf16.mxu1 %v11220_v4  ;;  %v1899_v63 = vpack.c.bf16 %v1896_v52, %v1895_v59  ;;  %v10307_v0 = vld [vmem:[#allocation8 + $0x188] sm:$0xff]   ;;  %v2162_v18 = vld [vmem:[#allocation2 + $0xf] sm:$0xff]  ;;  %v10329_v52 = vld [vmem:[#allocation8 + $0x220] sm:$0xff]  }
 0x1a4   : > { %8911 = vmatprep.subr.bf16.mxu0 %v11220_v4  ;;  %8837 = vmatprep.mubr.msk.bf16.mxu1 %vm10913_vm0, %v11220_v4  ;;  %v1762_v3 = vld [vmem:[#allocation2 + $0x1c] sm:$0xff] }
 0x1a5   : > { %8913 = vmatprep.mubr.msk.bf16.mxu0 %vm10913_vm0, %v11220_v4  ;;  %v10331_v59 = vld [vmem:[#allocation8 + $0x228] sm:$0xff]  }
 0x1a6   : > { %8880 = vmatpush3.bf16.msra.mxu1 %v10283_v5  ;;  %v1629_v26 = vld [vmem:[#allocation2 + $0x23] sm:$0x7f] }
 0x1a7   : > { %8912 = vmatpush3.bf16.msra.mxu0 %v10284_v6  ;;  %8881 = vmatprep.subr.bf16.mxu1 %v11220_v4  ;;  %v1632_v30 = vpack.c.bf16 %v1629_v26, %v1629_v26  ;;  %v1495_v33 = vld [vmem:[#allocation2 + $0x22] sm:$0x7f]  ;;  %v1761_v6 = vld [vmem:[#allocation2 + $0x14] sm:$0xff] }
 0x1a8   : > { %8953 = vmatprep.subr.bf16.mxu0 %v11220_v4  ;;  %v1498_v36 = vpack.c.bf16 %v1495_v33, %v1495_v33  ;;  %v1897_v5 = vld [vmem:[#allocation2 + $0x25] sm:$0x7f] }
 0x1a9   : > { %8838 = vmatmul.mubr.bf16.gmra.mrb[16].mxu1 %v1265_v11  ;;  %v1900_v9 = vpack.c.bf16 %v1897_v5, %v1897_v5  ;;  %v10312_v11 = vld [vmem:[#allocation8 + $0x1e8] sm:$0xff]   ;;  %v10337_v5 = vld [vmem:[#allocation8 + $0x290] sm:$0xff]  }
 0x1aa   : > { %8914 = vmatmul.mubr.bf16.vlgmr.msra.gmra.mrb[24].mxu0 %v1630_v12  ;;  %8882 = vmatpush3.bf16.msra.mxu1 %v10285_v8  ;;  %v1765_v8 = vpack.c.bf16 %v1762_v3, %v1761_v6  ;;  %v11383_v12 = vld [vmem:[#allocation2] sm:$0xff]  ;;  %v2299_v39 = vld [vmem:[#allocation2 + $0x28] sm:$0x7f] }
 0x1ab   : > { %8954 = vmatpush3.bf16.msra.mxu0 %v10286_v10  ;;  %8883 = vmatprep.subr.bf16.mxu1 %v11220_v4  ;;  %v10311_v10 = vld [vmem:[#allocation8 + $0x198] sm:$0xff]   ;;  %v10320_v26 = vld [vmem:[#allocation8 + $0x248] sm:$0xff]  }
 0x1ac   : > { %8955 = vmatprep.subr.bf16.mxu0 %v11220_v4  ;;  %8885 = vmatprep.mubr.msk.bf16.mxu1 %vm10913_vm0, %v11220_v4  ;;  %v2031_v50 = vld [vmem:[#allocation2 + $0x26] sm:$0x7f] }
 0x1ad   : > { %8917 = vmatprep.mubr.msk.bf16.mxu0 %vm10913_vm0, %v11220_v4  ;;  %v2034_v58 = vpack.c.bf16 %v2031_v50, %v2031_v50 }
 0x1ae   : > { %8884 = vmatpush3.bf16.msra.mxu1 %v10287_v13  ;;  %v1763_v13 = vld [vmem:[#allocation2 + $0x24] sm:$0x7f] }
 0x1af   : > { %8956 = vmatpush3.bf16.msra.mxu0 %v10288_v14  ;;  %8925 = vmatprep.subr.bf16.mxu1 %v11220_v4  ;;  %v10314_v14 = vld [vmem:[#allocation8 + $0x1f0] sm:$0xff]   ;;  %v1766_v15 = vpack.c.bf16 %v1763_v13, %v1763_v13 }
 0x1b0   : > { %8957 = vmatprep.subr.bf16.mxu0 %v11220_v4 }
 0x1b1   : > { %8886 = vmatmul.mubr.bf16.vlgmr.msra.gmra.mrb[20].mxu1 %v1496_v20  ;;  %v10317_v20 = vld [vmem:[#allocation8 + $0x1b0] sm:$0xff]  }
 0x1b2   : > { %8918 = vmatmul.mubr.bf16.gmra.mrb[28].mxu0 %v1631_v21  ;;  %8926 = vmatpush3.bf16.msra.mxu1 %v10289_v16  ;;  %v10315_v16 = vld [vmem:[#allocation8 + $0x1a8] sm:$0xff]   ;;  %v10318_v21 = vld [vmem:[#allocation8 + $0x240] sm:$0xff]  }
 0x1b3   : > { %8958 = vmatpush3.bf16.msra.mxu0 %v10290_v19  ;;  %8927 = vmatprep.subr.bf16.mxu1 %v11220_v4  ;;  %v2161_v19 = vld [vmem:[#allocation2 + $0x7] sm:$0xff] }
 0x1b4   : > { %8959 = vmatprep.subr.bf16.mxu0 %v11220_v4  ;;  %8889 = vmatprep.mubr.msk.bf16.mxu1 %vm10913_vm0, %v11220_v4 }
 0x1b5   : > { %8921 = vmatprep.mubr.msk.bf16.mxu0 %vm10913_vm0, %v11220_v4 }
 0x1b6   : > { %8928 = vmatpush3.bf16.msra.mxu1 %v10291_v22  ;;  %v2166_v22 = vpack.c.bf16 %v2162_v18, %v2161_v19 }
 0x1b7   : > { %8960 = vmatpush3.bf16.msra.mxu0 %v10292_v23  ;;  %8929 = vmatprep.subr.bf16.mxu1 %v11220_v4  ;;  %v10319_v23 = vld [vmem:[#allocation8 + $0x1b8] sm:$0xff]  }
 0x1b8   : > { %8961 = vmatprep.subr.bf16.mxu0 %v11220_v4 }
 0x1b9   : > { %8890 = vmatmul.mubr.bf16.gmra.mrb[24].mxu1 %v1497_v29  ;;  %v10321_v29 = vld [vmem:[#allocation8 + $0x200] sm:$0xff]  }
 0x1ba   : > { %8922 = vmatmul.mubr.bf16.gmra.mrb[32].mxu0 %v1632_v30  ;;  %8930 = vmatpush3.bf16.msra.mxu1 %v10293_v25  ;;  %v2028_v25 = vld [vmem:[#allocation2 + $0xe] sm:$0xff]  ;;  %v2027_v30 = vld [vmem:[#allocation2 + $0x6] sm:$0xff] }
 0x1bb   : > { %8962 = vmatpush3.bf16.msra.mxu0 %v10294_v28  ;;  %8931 = vmatprep.subr.bf16.mxu1 %v11220_v4  ;;  %v2164_v28 = vld [vmem:[#allocation2 + $0x1f] sm:$0xff]  ;;  %v2032_v33 = vpack.c.bf16 %v2028_v25, %v2027_v30 }
 0x1bc   : > { %8963 = vmatprep.subr.bf16.mxu0 %v11220_v4  ;;  %8893 = vmatprep.mubr.msk.bf16.mxu1 %vm10913_vm0, %v11220_v4 }
 0x1bd   : > { %8969 = vmatprep.mubr.msk.bf16.mxu0 %vm10913_vm0, %v11220_v4 }
 0x1be   : > { %8932 = vmatpush3.bf16.msra.mxu1 %v10295_v31  ;;  %v2163_v31 = vld [vmem:[#allocation2 + $0x17] sm:$0xff] }
 0x1bf   : > { %8964 = vmatpush3.bf16.msra.mxu0 %v10296_v32  ;;  %8933 = vmatprep.subr.bf16.mxu1 %v11220_v4  ;;  %v10322_v32 = vld [vmem:[#allocation8 + $0x250] sm:$0xff]  }
 0x1c0   : > { %8965 = vmatprep.subr.bf16.mxu0 %v11220_v4 }
 0x1c1   : > { %8894 = vmatmul.mubr.bf16.gmra.mrb[28].mxu1 %v1498_v36  ;;  %v10324_v36 = vld [vmem:[#allocation8 + $0x258] sm:$0xff]  }
 0x1c2   : > { %8934 = vmatpush3.bf16.msra.mxu1 %v10297_v34  ;;  %8941 = vmatprep.mubr.msk.bf16.mxu1 %vm10913_vm0, %v11220_v4  ;;  %v2167_v34 = vpack.c.bf16 %v2164_v28, %v2163_v31 }
 0x1c3   : > { %8966 = vmatpush3.bf16.msra.mxu0 %v10298_v35  ;;  %8935 = vmatprep.subr.bf16.mxu1 %v11220_v4  ;;  %v10323_v35 = vld [vmem:[#allocation8 + $0x208] sm:$0xff]  }
 0x1c4   : > { %8967 = vmatprep.subr.bf16.mxu0 %v11220_v4 }
 0x1c6   : > { %8936 = vmatpush3.bf16.msra.mxu1 %v10299_v37  ;;  %v2030_v37 = vld [vmem:[#allocation2 + $0x1e] sm:$0xff] }
 0x1c7   : > { %8968 = vmatpush3.bf16.msra.mxu0 %v10300_v40  ;;  %8937 = vmatprep.subr.bf16.mxu1 %v11220_v4  ;;  %v2165_v40 = vld [vmem:[#allocation2 + $0x27] sm:$0x7f] }
 0x1c8   : > { %9009 = vmatprep.subr.bf16.mxu0 %v11220_v4 }
 0x1ca   : > { %8970 = vmatmul.mubr.bf16.vlgmr.msra.gmra.mrb[36].mxu0 %v1898_v46  ;;  %8938 = vmatpush3.bf16.msra.mxu1 %v10301_v44  ;;  %v10326_v44 = vld [vmem:[#allocation8 + $0x260] sm:$0xff]   ;;  %v2168_v46 = vpack.c.bf16 %v2165_v40, %v2165_v40 }
 0x1cb   : > { %9010 = vmatpush3.bf16.msra.mxu0 %v10302_v45  ;;  %8939 = vmatprep.subr.bf16.mxu1 %v11220_v4  ;;  %v2033_v45 = vpack.c.bf16 %v2030_v37, %v2029_v41 }
 0x1cc   : > { %9011 = vmatprep.subr.bf16.mxu0 %v11220_v4  ;;  %8973 = vmatprep.mubr.msk.bf16.mxu0 %vm10913_vm0, %v11220_v4 }
 0x1ce   : > { %8940 = vmatpush3.bf16.msra.mxu1 %v10303_v47  ;;  %v10327_v47 = vld [vmem:[#allocation8 + $0x218] sm:$0xff]  }
 0x1cf   : > { %9012 = vmatpush3.bf16.msra.mxu0 %v10304_v48  ;;  %8981 = vmatprep.subr.bf16.mxu1 %v11220_v4  ;;  %v10328_v48 = vld [vmem:[#allocation8 + $0x268] sm:$0xff]  }
 0x1d0   : > { %9013 = vmatprep.subr.bf16.mxu0 %v11220_v4 }
 0x1d1   : > { %8942 = vmatmul.mubr.bf16.vlgmr.msra.gmra.mrb[32].mxu1 %v1764_v61  ;;  %v10333_v61 = vld [vmem:[#allocation8 + $0x230] sm:$0xff]  }
 0x1d2   : > { %8974 = vmatmul.mubr.bf16.gmra.mrb[40].mxu0 %v1899_v63  ;;  %8982 = vmatpush3.bf16.msra.mxu1 %v10305_v57  ;;  %v10330_v57 = vld [vmem:[#allocation8 + $0x270] sm:$0xff]   ;;  %v10334_v63 = vld [vmem:[#allocation8 + $0x238] sm:$0xff]  }
 0x1d3   : > { %9014 = vmatpush3.bf16.msra.mxu0 %v10306_v60  ;;  %8983 = vmatprep.subr.bf16.mxu1 %v11220_v4  ;;  %v10332_v60 = vld [vmem:[#allocation8 + $0x278] sm:$0xff]  }
 0x1d4   : > { %9015 = vmatprep.subr.bf16.mxu0 %v11220_v4  ;;  %8945 = vmatprep.mubr.msk.bf16.mxu1 %vm10913_vm0, %v11220_v4 }
 0x1d5   : > { %8977 = vmatprep.mubr.msk.bf16.mxu0 %vm10913_vm0, %v11220_v4 }
 0x1d6   : > { %8984 = vmatpush3.bf16.msra.mxu1 %v10307_v0  ;;  %v2432_v0 = vld [vmem:[#allocation2 + $0x21] sm:$0xff] }
 0x1d7   : > { %9016 = vmatpush3.bf16.msra.mxu0 %v10308_v2  ;;  %8985 = vmatprep.subr.bf16.mxu1 %v11220_v4  ;;  %v10335_v2 = vld [vmem:[#allocation8 + $0x280] sm:$0xff]   ;;  %v2435_v3 = vpack.c.bf16 %v2432_v0, %v11320_v62  ;;  %v2436_v62 = vpack.c.bf16 %v2433_v51, %v2433_v51 }
 0x1d8   : > { %9017 = vmatprep.subr.bf16.mxu0 %v11220_v4  ;;  %v10313_v4 = vld [vmem:[#allocation8 + $0x1a0] sm:$0xff]  }
 0x1d9   : > { %8946 = vmatmul.mubr.bf16.gmra.mrb[36].mxu1 %v1765_v8  ;;  %v10342_v8 = vld [vmem:[#allocation8 + $0x2b8] sm:$0xff]  }
 0x1da   : > { %8978 = vmatmul.mubr.bf16.gmra.mrb[44].mxu0 %v1900_v9  ;;  %8986 = vmatpush3.bf16.msra.mxu1 %v10309_v7  ;;  %v2302_v7 = vpack.c.bf16 %v2299_v39, %v2299_v39  ;;  %v2566_v9 = vld [vmem:[#allocation2 + $0x22] sm:$0xff] }
 0x1db   : > { %9018 = vmatpush3.bf16.msra.mxu0 %v10310_v1  ;;  %8987 = vmatprep.subr.bf16.mxu1 %v11383_v12  ;;  %v10341_v1 = vld [vmem:[#allocation8 + $0x2b0] sm:$0xff]  }
 0x1dc   : > { %9019 = vmatprep.subr.bf16.mxu0 %v11383_v12  ;;  %8949 = vmatprep.mubr.msk.bf16.mxu1 %vm10913_vm0, %v11383_v12 }
 0x1dd   : > { %9025 = vmatprep.mubr.msk.bf16.mxu0 %vm10913_vm0, %v11383_v12 }
 0x1de   : > { %8988 = vmatpush3.bf16.msra.mxu1 %v10311_v10  ;;  %v2569_v10 = vpack.c.bf16 %v2566_v9, %v11349_v24 }
 0x1df   : > { %9020 = vmatpush3.bf16.msra.mxu0 %v10312_v11  ;;  %8989 = vmatprep.subr.bf16.mxu1 %v11383_v12  ;;  %v2567_v11 = vld [vmem:[#allocation2 + $0x2a] sm:$0x7f] }
 0x1e0   : > { %9021 = vmatprep.subr.bf16.mxu0 %v11383_v12  ;;  %v2570_v13 = vpack.c.bf16 %v2567_v11, %v2567_v11 }
 0x1e1   : > { %8950 = vmatmul.mubr.bf16.gmra.mrb[40].mxu1 %v1766_v15 }
 0x1e2   : > { %8990 = vmatpush3.bf16.msra.mxu1 %v10313_v4  ;;  %8997 = vmatprep.mubr.msk.bf16.mxu1 %vm10913_vm0, %v11383_v12 }
 0x1e3   : > { %9022 = vmatpush3.bf16.msra.mxu0 %v10314_v14  ;;  %8991 = vmatprep.subr.bf16.mxu1 %v11383_v12 }
 0x1e4   : > { %9023 = vmatprep.subr.bf16.mxu0 %v11383_v12 }
 0x1e6   : > { %8992 = vmatpush3.bf16.msra.mxu1 %v10315_v16 }
 0x1e7   : > { %9024 = vmatpush3.bf16.msra.mxu0 %v10316_v17  ;;  %8993 = vmatprep.subr.bf16.mxu1 %v11383_v12 }
 0x1e8   : > { %9065 = vmatprep.subr.bf16.mxu0 %v11383_v12 }
 0x1ea   : > { %9026 = vmatmul.mubr.bf16.vlgmr.msra.gmra.mrb[48].mxu0 %v2166_v22  ;;  %8994 = vmatpush3.bf16.msra.mxu1 %v10317_v20 }
 0x1eb   : > { %9066 = vmatpush3.bf16.msra.mxu0 %v10318_v21  ;;  %8995 = vmatprep.subr.bf16.mxu1 %v11383_v12 }
 0x1ec   : > { %9067 = vmatprep.subr.bf16.mxu0 %v11383_v12  ;;  %9029 = vmatprep.mubr.msk.bf16.mxu0 %vm10913_vm0, %v11383_v12 }
 0x1ee   : > { %8996 = vmatpush3.bf16.msra.mxu1 %v10319_v23 }
 0x1ef   : > { %9068 = vmatpush3.bf16.msra.mxu0 %v10320_v26  ;;  %9037 = vmatprep.subr.bf16.mxu1 %v11383_v12 }
 0x1f0   : > { %9069 = vmatprep.subr.bf16.mxu0 %v11383_v12 }
 0x1f1   : > { %8998 = vmatmul.mubr.bf16.vlgmr.msra.gmra.mrb[44].mxu1 %v2032_v33 }
 0x1f2   : > { %9030 = vmatmul.mubr.bf16.gmra.mrb[52].mxu0 %v2167_v34  ;;  %9038 = vmatpush3.bf16.msra.mxu1 %v10321_v29 }
 0x1f3   : > { %9070 = vmatpush3.bf16.msra.mxu0 %v10322_v32  ;;  %9039 = vmatprep.subr.bf16.mxu1 %v11383_v12 }
 0x1f4   : > { %9071 = vmatprep.subr.bf16.mxu0 %v11383_v12  ;;  %9001 = vmatprep.mubr.msk.bf16.mxu1 %vm10913_vm0, %v11383_v12 }
 0x1f5   : > { %9033 = vmatprep.mubr.msk.bf16.mxu0 %vm10913_vm0, %v11383_v12 }
 0x1f6   : > { %9040 = vmatpush3.bf16.msra.mxu1 %v10323_v35 }
 0x1f7   : > { %9072 = vmatpush3.bf16.msra.mxu0 %v10324_v36  ;;  %9041 = vmatprep.subr.bf16.mxu1 %v11383_v12 }
 0x1f8   : > { %9073 = vmatprep.subr.bf16.mxu0 %v11383_v12 }
 0x1f9   : > { %9002 = vmatmul.mubr.bf16.gmra.mrb[48].mxu1 %v2033_v45 }
 0x1fa   : > { %9034 = vmatmul.mubr.bf16.gmra.mrb[56].mxu0 %v2168_v46  ;;  %9042 = vmatpush3.bf16.msra.mxu1 %v10325_v43 }
 0x1fb   : > { %9074 = vmatpush3.bf16.msra.mxu0 %v10326_v44  ;;  %9043 = vmatprep.subr.bf16.mxu1 %v11383_v12 }
 0x1fc   : > { %9075 = vmatprep.subr.bf16.mxu0 %v11383_v12  ;;  %9005 = vmatprep.mubr.msk.bf16.mxu1 %vm10913_vm0, %v11383_v12 }
 0x1fd   : > { %9081 = vmatprep.mubr.msk.bf16.mxu0 %vm10913_vm0, %v11383_v12 }
 0x1fe   : > { %9044 = vmatpush3.bf16.msra.mxu1 %v10327_v47 }
 0x1ff   : > { %9076 = vmatpush3.bf16.msra.mxu0 %v10328_v48  ;;  %9045 = vmatprep.subr.bf16.mxu1 %v11383_v12 }
 0x200   : > { %9077 = vmatprep.subr.bf16.mxu0 %v11383_v12 }
 0x201   : > { %9006 = vmatmul.mubr.bf16.gmra.mrb[52].mxu1 %v2034_v58 }
 0x202   : > { %9046 = vmatpush3.bf16.msra.mxu1 %v10329_v52  ;;  %9053 = vmatprep.mubr.msk.bf16.mxu1 %vm10913_vm0, %v11383_v12 }
 0x203   : > { %9078 = vmatpush3.bf16.msra.mxu0 %v10330_v57  ;;  %9047 = vmatprep.subr.bf16.mxu1 %v11383_v12 }
 0x204   : > { %9079 = vmatprep.subr.bf16.mxu0 %v11383_v12 }
 0x206   : > { %9048 = vmatpush3.bf16.msra.mxu1 %v10331_v59 }
 0x207   : > { %9080 = vmatpush3.bf16.msra.mxu0 %v10332_v60  ;;  %9049 = vmatprep.subr.bf16.mxu1 %v11383_v12 }
 0x20a   : > { %9082 = vmatmul.mubr.bf16.vlgmr.msra.gmra.mrb[60].mxu0 %v2434_v55  ;;  %9050 = vmatpush3.bf16.msra.mxu1 %v10333_v61  ;;  %v2298_v55 = vld [vmem:[#allocation2 + $0x20] sm:$0xff] }
 0x20b   : > { %9085 = vmatprep.mubr.msk.bf16.mxu0 %vm10913_vm0, %v11383_v12  ;;  %9051 = vmatprep.subr.bf16.mxu1 %v11383_v12  ;;  %v2301_v6 = vpack.c.bf16 %v2298_v55, %v11299_v49  ;;  %v10340_v49 = vld [vmem:[#allocation8 + $0x2a8] sm:$0xff]  }
 0x20e   : > { %9052 = vmatpush3.bf16.msra.mxu1 %v10334_v63 }
 0x20f   : > { %9093 = vmatprep.subr.bf16.mxu1 %v11383_v12 }
 0x211   : > { %9054 = vmatmul.mubr.bf16.vlgmr.msra.gmra.mrb[56].mxu1 %v2300_v42  ;;  %v10339_v42 = vld [vmem:[#allocation8 + $0x2a0] sm:$0xff]  }
 0x212   : > { %9086 = vmatmul.mubr.bf16.gmra.mrb[64].mxu0 %v2435_v3  ;;  %9094 = vmatpush3.bf16.msra.mxu1 %v10335_v2 }
 0x213   : > { %9057 = vmatprep.mubr.msk.bf16.mxu1 %vm10913_vm0, %v11383_v12  ;;  %9095 = vmatprep.subr.bf16.mxu1 %v11383_v12 }
 0x214   : > { %9089 = vmatprep.mubr.msk.bf16.mxu0 %vm10913_vm0, %v11383_v12 }
 0x216   : > { %9096 = vmatpush3.bf16.msra.mxu1 %v10336_v38 }
 0x217   : > { %9097 = vmatprep.subr.bf16.mxu1 %v11383_v12 }
 0x219   : > { %9058 = vmatmul.mubr.bf16.gmra.mrb[60].mxu1 %v2301_v6 }
 0x21a   : > { %9090 = vmatmul.mubr.bf16.gmra.mrb[68].mxu0 %v2436_v62  ;;  %9098 = vmatpush3.bf16.msra.mxu1 %v10337_v5 }
 0x21b   : > { %9061 = vmatprep.mubr.msk.bf16.mxu1 %vm10913_vm0, %v11383_v12  ;;  %9099 = vmatprep.subr.bf16.mxu1 %v11383_v12 }
 0x21e   : > { %9100 = vmatpush3.bf16.msra.mxu1 %v10338_v27 }
 0x21f   : > { %9101 = vmatprep.subr.bf16.mxu1 %v11383_v12 }
 0x221   : > { %9062 = vmatmul.mubr.bf16.gmra.mrb[64].mxu1 %v2302_v7 }
 0x222   : > { %9102 = vmatpush3.bf16.msra.mxu1 %v10339_v42  ;;  %9109 = vmatprep.mubr.msk.bf16.mxu1 %vm10913_vm0, %v11383_v12 }
 0x223   : > { %9103 = vmatprep.subr.bf16.mxu1 %v11383_v12 }
 0x226   : > { %9104 = vmatpush3.bf16.msra.mxu1 %v10340_v49 }
 0x227   : > { %9105 = vmatprep.subr.bf16.mxu1 %v11383_v12 }
 0x22a   : > { %9106 = vmatpush3.bf16.msra.mxu1 %v10341_v1 }
 0x22b   : > { %9107 = vmatprep.subr.bf16.mxu1 %v11383_v12 }
 0x22e   : > { %9108 = vmatpush3.bf16.msra.mxu1 %v10342_v8 }
 0x231   : > { %9110 = vmatmul.mubr.bf16.vlgmr.msra.gmra.mrb[68].mxu1 %v2568_v56 }
 0x232   : > { %9113 = vmatprep.mubr.msk.bf16.mxu1 %vm10913_vm0, %v11383_v12 }
 0x239   : > { %9114 = vmatmul.mubr.bf16.gmra.mrb[72].mxu1 %v2569_v10 }
 0x23a   : > { %9117 = vmatprep.mubr.msk.bf16.mxu1 %vm10913_vm0, %v11383_v12 }
 0x241   : > { %9118 = vmatmul.mubr.bf16.gmra.mrb[76].mxu1 %v2570_v13 }
 0x25c   : > { %v1469_v4 = vpop.f32.mrb[12].mxu0 }
 0x25d   : > { %v8859_v14 = vpop.f32.mrb[13].mxu0 }
 0x25e   : > { %v1472_v15 = vpop.f32.mrb[14].mxu0 }
 0x25f   : > { %v8860_v16 = vpop.f32.mrb[15].mxu0 }
 0x264   : > { %v1365_v17 = vpop.f32.mrb[8].mxu1 }
 0x265   : > { %v1470_v53 = vadd.f32 %v1469_v4, %v1365_v17  ;;  %v8831_v54 = vpop.f32.mrb[9].mxu1  ;;  %v10343_v4 = vld [vmem:[#allocation10 + $0x40] sm:$0xff]   ;;  %v10344_v17 = vld [vmem:[#allocation10 + $0x48] sm:$0xff]  }
 0x266   : > { %v1368_v56 = vpop.f32.mrb[10].mxu1  ;;  %9121 = vmatprep.subr.bf16.mxu0 %v10343_v4 }
 0x267   : > { %v1473_v18 = vadd.f32 %v1472_v15, %v1368_v56  ;;  %v8832_v19 = vpop.f32.mrb[11].mxu1  ;;  %9122 = vmatpush3.bf16.msra.mxu0 %v10343_v4  ;;  %v10345_v56 = vld [vmem:[#allocation10 + $0x50] sm:$0xff]  }
 0x268   : > { %9123 = vmatprep.subr.bf16.mxu0 %v10344_v17 }
 0x26b   : > { %9124 = vmatpush3.bf16.msra.mxu0 %v10344_v17 }
 0x26c   : > { %v1477_v20 = vpop.f32.mrb[16].mxu0  ;;  %9125 = vmatprep.subr.bf16.mxu0 %v10345_v56 }
 0x26d   : > { %v8863_v21 = vpop.f32.mrb[17].mxu0 }
 0x26e   : > { %v1480_v24 = vpop.f32.mrb[18].mxu0 }
 0x26f   : > { %v8864_v22 = vpop.f32.mrb[19].mxu0  ;;  %9126 = vmatpush3.bf16.msra.mxu0 %v10345_v56 }
 0x274   : > { %v1373_v23 = vpop.f32.mrb[12].mxu1 }
 0x275   : > { %v1485_v26 = vpop.f32.mrb[20].mxu0  ;;  %v1478_v12 = vadd.f32 %v1477_v20, %v1373_v23  ;;  %v8835_v25 = vpop.f32.mrb[13].mxu1 }
 0x276   : > { %v8867_v28 = vpop.f32.mrb[21].mxu0  ;;  %v1376_v29 = vpop.f32.mrb[14].mxu1  ;;  %v10346_v25 = vld [vmem:[#allocation10 + $0x58] sm:$0xff]  }
 0x277   : > { %v1488_v30 = vpop.f32.mrb[22].mxu0  ;;  %v1481_v31 = vadd.f32 %v1480_v24, %v1376_v29  ;;  %v8836_v32 = vpop.f32.mrb[15].mxu1  ;;  %9127 = vmatprep.subr.bf16.mxu0 %v10346_v25 }
 0x278   : > { %v8868_v33 = vpop.f32.mrb[23].mxu0  ;;  %9128 = vmatpush3.bf16.msra.mxu0 %v10346_v25 }
 0x27c   : > { %v1381_v34 = vpop.f32.mrb[16].mxu1 }
 0x27d   : > { %v1732_v35 = vpop.f32.mrb[24].mxu0  ;;  %v1486_v36 = vadd.f32 %v1485_v26, %v1381_v34  ;;  %v8839_v37 = vpop.f32.mrb[17].mxu1 }
 0x27e   : > { %v8915_v40 = vpop.f32.mrb[25].mxu0  ;;  %v1384_v41 = vpop.f32.mrb[18].mxu1 }
 0x27f   : > { %v1735_v43 = vpop.f32.mrb[26].mxu0  ;;  %v8840_v44 = vpop.f32.mrb[19].mxu1 }
 0x280   : > { %v8916_v45 = vpop.f32.mrb[27].mxu0  ;;  %v10348_v44 = vld [vmem:[#allocation10 + $0x68] sm:$0xff]  }
 0x284   : > { %v1598_v46 = vpop.f32.mrb[20].mxu1 }
 0x285   : > { %v1740_v47 = vpop.f32.mrb[28].mxu0  ;;  %v1620_v48 = vadd.f32 %v1598_v46, %v1470_v53  ;;  %v8887_v50 = vpop.f32.mrb[21].mxu1 }
 0x286   : > { %v8919_v52 = vpop.f32.mrb[29].mxu0  ;;  %v1601_v57 = vpop.f32.mrb[22].mxu1 }
 0x287   : > { %v1743_v58 = vpop.f32.mrb[30].mxu0  ;;  %v1621_v59 = vadd.f32 %v1601_v57, %v1473_v18  ;;  %v8888_v60 = vpop.f32.mrb[23].mxu1  ;;  %v1754_v63 = vadd.f32 %v1732_v35, %v1620_v48 }
 0x288   : > { %v8920_v61 = vpop.f32.mrb[31].mxu0 }
 0x289   : > { %v1755_v0 = vadd.f32 %v1735_v43, %v1621_v59  ;;  %v10350_v59 = vld [vmem:[#allocation10 + $0x78] sm:$0xff]  }
 0x28c   : > { %v1606_v2 = vpop.f32.mrb[24].mxu1 }
 0x28d   : > { %v1748_v3 = vpop.f32.mrb[32].mxu0  ;;  %v1622_v38 = vadd.f32 %v1606_v2, %v1478_v12  ;;  %v8891_v51 = vpop.f32.mrb[25].mxu1 }
 0x28e   : > { %v8923_v55 = vpop.f32.mrb[33].mxu0  ;;  %v1609_v62 = vpop.f32.mrb[26].mxu1 }
 0x28f   : > { %v1751_v5 = vpop.f32.mrb[34].mxu0  ;;  %v1623_v6 = vadd.f32 %v1609_v62, %v1481_v31  ;;  %v8892_v27 = vpop.f32.mrb[27].mxu1  ;;  %v1756_v42 = vadd.f32 %v1740_v47, %v1622_v38  ;;  %v10347_v31 = vld [vmem:[#allocation10 + $0x60] sm:$0xff]   ;;  %v10349_v47 = vld [vmem:[#allocation10 + $0x70] sm:$0xff]  }
 0x290   : > { %v8924_v39 = vpop.f32.mrb[35].mxu0  ;;  %9129 = vmatprep.subr.bf16.mxu0 %v10347_v31 }
 0x291   : > { %v1757_v7 = vadd.f32 %v1743_v58, %v1623_v6  ;;  %9130 = vmatpush3.bf16.msra.mxu0 %v10347_v31 }
 0x292   : > { %9131 = vmatprep.subr.bf16.mxu0 %v10348_v44 }
 0x294   : > { %v1614_v49 = vpop.f32.mrb[28].mxu1 }
 0x295   : > { %v1624_v1 = vadd.f32 %v1614_v49, %v1486_v36  ;;  %v8895_v8 = vpop.f32.mrb[29].mxu1  ;;  %9132 = vmatpush3.bf16.msra.mxu0 %v10348_v44 }
 0x296   : > { %v1617_v9 = vpop.f32.mrb[30].mxu1  ;;  %9133 = vmatprep.subr.bf16.mxu0 %v10349_v47 }
 0x297   : > { %v8896_v10 = vpop.f32.mrb[31].mxu1  ;;  %v1758_v11 = vadd.f32 %v1748_v3, %v1624_v1 }
 0x299   : > { %9134 = vmatpush3.bf16.msra.mxu0 %v10349_v47 }
 0x29a   : > { %9135 = vmatprep.subr.bf16.mxu0 %v10350_v59 }
 0x29d   : > { %v2000_v13 = vpop.f32.mrb[36].mxu0  ;;  %9136 = vmatpush3.bf16.msra.mxu0 %v10350_v59 }
 0x29e   : > { %v8971_v14 = vpop.f32.mrb[37].mxu0 }
 0x29f   : > { %v2003_v15 = vpop.f32.mrb[38].mxu0 }
 0x2a0   : > { %v8972_v16 = vpop.f32.mrb[39].mxu0 }
 0x2a4   : > { %v1866_v53 = vpop.f32.mrb[32].mxu1 }
 0x2a5   : > { %v2008_v54 = vpop.f32.mrb[40].mxu0  ;;  %v1888_v18 = vadd.f32 %v1866_v53, %v1754_v63  ;;  %v8943_v19 = vpop.f32.mrb[33].mxu1 }
 0x2a6   : > { %v8975_v20 = vpop.f32.mrb[41].mxu0  ;;  %v1869_v21 = vpop.f32.mrb[34].mxu1 }
 0x2a7   : > { %v2011_v24 = vpop.f32.mrb[42].mxu0  ;;  %v1889_v22 = vadd.f32 %v1869_v21, %v1755_v0  ;;  %v8944_v23 = vpop.f32.mrb[35].mxu1  ;;  %v2022_v12 = vadd.f32 %v2000_v13, %v1888_v18  ;;  %v11461_v0 = vld [vmem:[#allocation10] sm:$0xff]  }
 0x2a8   : > { %v8976_v26 = vpop.f32.mrb[43].mxu0  ;;  %9153 = vmatprep.subr.bf16.mxu0 %v11461_v0 }
 0x2a9   : > { %v2023_v28 = vadd.f32 %v2003_v15, %v1889_v22 }
 0x2ac   : > { %v1874_v29 = vpop.f32.mrb[36].mxu1 }
 0x2ad   : > { %v2016_v30 = vpop.f32.mrb[44].mxu0  ;;  %v1890_v32 = vadd.f32 %v1874_v29, %v1756_v42  ;;  %v8947_v33 = vpop.f32.mrb[37].mxu1 }
 0x2ae   : > { %v8979_v34 = vpop.f32.mrb[45].mxu0  ;;  %v1877_v35 = vpop.f32.mrb[38].mxu1 }
 0x2af   : > { %v2019_v36 = vpop.f32.mrb[46].mxu0  ;;  %v1891_v37 = vadd.f32 %v1877_v35, %v1757_v7  ;;  %v8948_v40 = vpop.f32.mrb[39].mxu1  ;;  %v2024_v43 = vadd.f32 %v2008_v54, %v1890_v32 }
 0x2b0   : > { %v8980_v41 = vpop.f32.mrb[47].mxu0 }
 0x2b1   : > { %v2025_v45 = vadd.f32 %v2011_v24, %v1891_v37 }
 0x2b4   : > { %v1882_v46 = vpop.f32.mrb[40].mxu1 }
 0x2b5   : > { %v1892_v48 = vadd.f32 %v1882_v46, %v1758_v11  ;;  %v8951_v50 = vpop.f32.mrb[41].mxu1 }
 0x2b6   : > { %v1885_v52 = vpop.f32.mrb[42].mxu1 }
 0x2b7   : > { %v8952_v57 = vpop.f32.mrb[43].mxu1  ;;  %v2026_v58 = vadd.f32 %v2016_v30, %v1892_v48 }
 0x2bd   : > { %v2268_v60 = vpop.f32.mrb[48].mxu0 }
 0x2be   : > { %v9027_v61 = vpop.f32.mrb[49].mxu0 }
 0x2bf   : > { %v2271_v63 = vpop.f32.mrb[50].mxu0 }
 0x2c0   : > { %v9028_v2 = vpop.f32.mrb[51].mxu0 }
 0x2c4   : > { %v2134_v3 = vpop.f32.mrb[44].mxu1 }
 0x2c5   : > { %v2276_v38 = vpop.f32.mrb[52].mxu0  ;;  %v2156_v51 = vadd.f32 %v2134_v3, %v2022_v12  ;;  %v8999_v55 = vpop.f32.mrb[45].mxu1 }
 0x2c6   : > { %v9031_v62 = vpop.f32.mrb[53].mxu0  ;;  %v2137_v5 = vpop.f32.mrb[46].mxu1 }
 0x2c7   : > { %v2279_v6 = vpop.f32.mrb[54].mxu0  ;;  %v2157_v27 = vadd.f32 %v2137_v5, %v2023_v28  ;;  %v9000_v39 = vpop.f32.mrb[47].mxu1  ;;  %v2290_v7 = vadd.f32 %v2268_v60, %v2156_v51  ;;  %v8012_v51 = vld [vmem:[%s12148_s4] ss:$0 sm:$0xff] }
 0x2c8   : > { %v9032_v42 = vpop.f32.mrb[55].mxu0 }
 0x2c9   : > { %v2291_v49 = vadd.f32 %v2271_v63, %v2157_v27 }
 0x2cc   : > { %v2142_v1 = vpop.f32.mrb[48].mxu1 }
 0x2cd   : > { %v2284_v8 = vpop.f32.mrb[56].mxu0  ;;  %v2158_v9 = vadd.f32 %v2142_v1, %v2024_v43  ;;  %v9003_v10 = vpop.f32.mrb[49].mxu1 }
 0x2ce   : > { %v9035_v11 = vpop.f32.mrb[57].mxu0  ;;  %v2145_v13 = vpop.f32.mrb[50].mxu1 }
 0x2cf   : > { %v2287_v4 = vpop.f32.mrb[58].mxu0  ;;  %v2159_v14 = vadd.f32 %v2145_v13, %v2025_v45  ;;  %v9004_v15 = vpop.f32.mrb[51].mxu1  ;;  %v2292_v17 = vadd.f32 %v2276_v38, %v2158_v9 }
 0x2d0   : > { %v9036_v16 = vpop.f32.mrb[59].mxu0 }
 0x2d1   : > { %v2293_v53 = vadd.f32 %v2279_v6, %v2159_v14 }
 0x2d4   : > { %v2150_v54 = vpop.f32.mrb[52].mxu1 }
 0x2d5   : > { %v2160_v56 = vadd.f32 %v2150_v54, %v2026_v58  ;;  %v9007_v18 = vpop.f32.mrb[53].mxu1 }
 0x2d6   : > { %v2153_v19 = vpop.f32.mrb[54].mxu1 }
 0x2d7   : > { %v9008_v20 = vpop.f32.mrb[55].mxu1  ;;  %v2294_v21 = vadd.f32 %v2284_v8, %v2160_v56 }
 0x2dd   : > { %v2536_v24 = vpop.f32.mrb[60].mxu0 }
 0x2de   : > { %v9083_v22 = vpop.f32.mrb[61].mxu0 }
 0x2df   : > { %v2539_v23 = vpop.f32.mrb[62].mxu0 }
 0x2e0   : > { %v9084_v26 = vpop.f32.mrb[63].mxu0 }
 0x2e4   : > { %v2402_v12 = vpop.f32.mrb[56].mxu1 }
 0x2e5   : > { %v2544_v25 = vpop.f32.mrb[64].mxu0  ;;  %v2424_v28 = vadd.f32 %v2402_v12, %v2290_v7  ;;  %v9055_v29 = vpop.f32.mrb[57].mxu1 }
 0x2e6   : > { %v9087_v30 = vpop.f32.mrb[65].mxu0  ;;  %v2405_v31 = vpop.f32.mrb[58].mxu1 }
 0x2e7   : > { %v2547_v32 = vpop.f32.mrb[66].mxu0  ;;  %v2425_v33 = vadd.f32 %v2405_v31, %v2291_v49  ;;  %v9056_v34 = vpop.f32.mrb[59].mxu1  ;;  %v2558_v36 = vadd.f32 %v2536_v24, %v2424_v28 }
 0x2e8   : > { %v9088_v35 = vpop.f32.mrb[67].mxu0 }
 0x2e9   : > { %v2559_v37 = vadd.f32 %v2539_v23, %v2425_v33 }
 0x2ec   : > { %v2410_v40 = vpop.f32.mrb[60].mxu1 }
 0x2ed   : > { %v2552_v41 = vpop.f32.mrb[68].mxu0  ;;  %v2426_v43 = vadd.f32 %v2410_v40, %v2292_v17  ;;  %v9059_v44 = vpop.f32.mrb[61].mxu1 }
 0x2ee   : > { %v9091_v45 = vpop.f32.mrb[69].mxu0  ;;  %v2413_v46 = vpop.f32.mrb[62].mxu1 }
 0x2ef   : > { %v2555_v47 = vpop.f32.mrb[70].mxu0  ;;  %v2427_v48 = vadd.f32 %v2413_v46, %v2293_v53  ;;  %v9060_v50 = vpop.f32.mrb[63].mxu1  ;;  %v2560_v52 = vadd.f32 %v2544_v25, %v2426_v43 }
 0x2f0   : > { %v9092_v57 = vpop.f32.mrb[71].mxu0 }
 0x2f1   : > { %v2561_v58 = vadd.f32 %v2547_v32, %v2427_v48 }
 0x2f4   : > { %v2418_v59 = vpop.f32.mrb[64].mxu1 }
 0x2f5   : > { %v2428_v60 = vadd.f32 %v2418_v59, %v2294_v21  ;;  %v9063_v61 = vpop.f32.mrb[65].mxu1 }
 0x2f6   : > { %v2421_v63 = vpop.f32.mrb[66].mxu1 }
 0x2f7   : > { %v2562_v2 = vadd.f32 %v2552_v41, %v2428_v60  ;;  %v9064_v3 = vpop.f32.mrb[67].mxu1 }
 0x304   : > { %v2670_v38 = vpop.f32.mrb[68].mxu1 }
 0x305   : > { %v2692_v55 = vadd.f32 %v2670_v38, %v2558_v36  ;;  %v9111_v62 = vpop.f32.mrb[69].mxu1 }
 0x306   : > { %v2673_v5 = vpop.f32.mrb[70].mxu1 }
 0x307   : > { %v2704_v6 = vadd.f32 %v8012_v51, %v2692_v55  ;;  %v2693_v27 = vadd.f32 %v2673_v5, %v2559_v37  ;;  %v9112_v39 = vpop.f32.mrb[71].mxu1 }
 0x309   : > { %v2709_v42 = vsub.f32 0.0, %v2704_v6  ;;  %v2705_v7 = vadd.f32 %v8012_v51, %v2693_v27 }
 0x30b   : > { %v2714_v49 = vmul.f32 1.442695, %v2709_v42  ;;  %v2710_v1 = vsub.f32 0.0, %v2705_v7 }
 0x30c   : > { %v2678_v8 = vpop.f32.mrb[72].mxu1 }
 0x30d   : > { %10555 = vpow2.f32 %v2714_v49  ;;  %v2716_v9 = vmul.f32 1.442695, %v2710_v1  ;;  %v2694_v10 = vadd.f32 %v2678_v8, %v2560_v52  ;;  %v9115_v11 = vpop.f32.mrb[73].mxu1 }
 0x30e   : > { %v2681_v13 = vpop.f32.mrb[74].mxu1 }
 0x30f   : > { %10557 = vpow2.f32 %v2716_v9  ;;  %v2706_v4 = vadd.f32 %v8012_v51, %v2694_v10  ;;  %v2695_v14 = vadd.f32 %v2681_v13, %v2561_v58  ;;  %v9116_v15 = vpop.f32.mrb[75].mxu1 }
 0x311   : > { %v2711_v16 = vsub.f32 0.0, %v2706_v4  ;;  %v2707_v17 = vadd.f32 %v8012_v51, %v2695_v14 }
 0x313   : > { %v2718_v53 = vmul.f32 1.442695, %v2711_v16  ;;  %v2712_v54 = vsub.f32 0.0, %v2707_v17 }
 0x314   : > { %v2686_v56 = vpop.f32.mrb[76].mxu1 }
 0x315   : > { %10559 = vpow2.f32 %v2718_v53  ;;  %v2720_v18 = vmul.f32 1.442695, %v2712_v54  ;;  %v2696_v19 = vadd.f32 %v2686_v56, %v2562_v2  ;;  %v9119_v20 = vpop.f32.mrb[77].mxu1  ;;  %v10352_v56 = vld [vmem:[#allocation10 + $0x8] sm:$0xff]  }
 0x316   : > { %v2689_v21 = vpop.f32.mrb[78].mxu1 }
 0x317   : > { %v10556_v24 = vpop.eup %10555  ;;  %10561 = vpow2.f32 %v2720_v18  ;;  %v11467_v22 = vadd.f32 %v8012_v51, %v2696_v19  ;;  %v9120_v23 = vpop.f32.mrb[79].mxu1 }
 0x318   : > { %v2724_v26 = vadd.f32 1.0, %v10556_v24 }
 0x319   : > { %v10558_v12 = vpop.eup %10557  ;;  %v2713_v25 = vsub.f32 0.0, %v11467_v22 }
 0x31a   : > { %10563 = vrcp.f32 %v2724_v26  ;;  %v2725_v28 = vadd.f32 1.0, %v10558_v12 }
 0x31b   : > { %v2722_v29 = vmul.f32 1.442695, %v2713_v25 }
 0x31c   : > { %10565 = vrcp.f32 %v2725_v28 }
 0x31d   : > { %10567 = vpow2.f32 %v2722_v29 }
 0x31f   : > { %v10560_v30 = vpop.eup %10559 }
 0x320   : > { %v2726_v31 = vadd.f32 1.0, %v10560_v30 }
 0x321   : > { %v10562_v32 = vpop.eup %10561 }
 0x322   : > { %10569 = vrcp.f32 %v2726_v31  ;;  %v2727_v33 = vadd.f32 1.0, %v10562_v32 }
 0x324   : > { %v10564_v34 = vpop.eup %10563  ;;  %10571 = vrcp.f32 %v2727_v33 }
 0x325   : > { %v2734_v35 = vmul.f32 %v10564_v34, %v2704_v6 }
 0x326   : > { %v10566_v36 = vpop.eup %10565 }
 0x327   : > { %v10568_v37 = vpop.eup %10567  ;;  %2739 = vst [vmem:[#allocation3] sm:$0xff] %v2734_v35  ;;  %v2735_v40 = vmul.f32 %v10566_v36, %v2705_v7  ;;  %v10353_v35 = vld [vmem:[#allocation10 + $0x10] sm:$0xff]  }
 0x328   : > { %v2728_v41 = vadd.f32 1.0, %v10568_v37 }
 0x329   : > { %2740 = vst [vmem:[#allocation3 + $0x8] sm:$0xff] %v2735_v40 }
 0x32a   : > { %10573 = vrcp.f32 %v2728_v41 }
 0x32c   : > { %v10570_v43 = vpop.eup %10569 }
 0x32d   : > { %v2736_v44 = vmul.f32 %v10570_v43, %v2706_v4 }
 0x32e   : > { %v10572_v45 = vpop.eup %10571  ;;  %v2744_v46 = vld [vmem:[#allocation3] sm:$0x1]  ;;  %v2746_v47 = vld [vmem:[#allocation3 + $0x1] sm:$0x1]  ;;  %v2748_v48 = vld [vmem:[#allocation3 + $0x2] sm:$0x1] }
 0x32f   : > { %v2750_v50 = vld [vmem:[#allocation3 + $0x3] sm:$0x1]  ;;  %v2752_v52 = vld [vmem:[#allocation3 + $0x4] sm:$0x1]  ;;  %v2754_v57 = vld [vmem:[#allocation3 + $0x5] sm:$0x1]  ;;  %v2737_v58 = vmul.f32 %v10572_v45, %v2707_v17 }
 0x330   : > { %2745 = vst [vmem:[#allocation4 + $0x8] sm:$0x1] %v2744_v46  ;;  %2747 = vst [vmem:[#allocation4 + $0xb] sm:$0x1] %v2746_v47  ;;  %v2756_v59 = vld [vmem:[#allocation3 + $0x6] sm:$0x1] }
 0x331   : > { %2749 = vst [vmem:[#allocation4 + $0xe] sm:$0x1] %v2748_v48  ;;  %2741 = vst [vmem:[#allocation3 + $0x10] sm:$0xff] %v2736_v44  ;;  %v2758_v60 = vld [vmem:[#allocation3 + $0x7] sm:$0x1] }
 0x332   : > { %2751 = vst [vmem:[#allocation4 + $0x11] sm:$0x1] %v2750_v50  ;;  %2753 = vst [vmem:[#allocation4 + $0x14] sm:$0x1] %v2752_v52  ;;  %v2760_v61 = vld [vmem:[#allocation3 + $0x8] sm:$0x1] }
 0x333   : > { %2755 = vst [vmem:[#allocation4 + $0x17] sm:$0x1] %v2754_v57  ;;  %2757 = vst [vmem:[#allocation4 + $0x1a] sm:$0x1] %v2756_v59  ;;  %v2762_v63 = vld [vmem:[#allocation3 + $0x9] sm:$0x1] }
 0x334   : > { %2759 = vst [vmem:[#allocation4 + $0x1d] sm:$0x1] %v2758_v60  ;;  %2761 = vst [vmem:[#allocation4 + $0x20] sm:$0x1] %v2760_v61  ;;  %v2764_v2 = vld [vmem:[#allocation3 + $0xa] sm:$0x1]  ;;  %v10574_v5 = vpop.eup %10573 }
 0x335   : > { %v2766_v3 = vld [vmem:[#allocation3 + $0xb] sm:$0x1]  ;;  %2742 = vst [vmem:[#allocation3 + $0x18] sm:$0xff] %v2737_v58  ;;  %v2768_v38 = vld [vmem:[#allocation3 + $0xc] sm:$0x1]  ;;  %v2738_v6 = vmul.f32 %v10574_v5, %v11467_v22  ;;  %v10354_v60 = vld [vmem:[#allocation10 + $0x18] sm:$0xff]  }
 0x336   : > { %v2770_v51 = vld [vmem:[#allocation3 + $0xd] sm:$0x1]  ;;  %v2772_v55 = vld [vmem:[#allocation3 + $0xe] sm:$0x1]  ;;  %2763 = vst [vmem:[#allocation4 + $0x23] sm:$0x1] %v2762_v63 }
 0x337   : > { %2765 = vst [vmem:[#allocation4 + $0x26] sm:$0x1] %v2764_v2  ;;  %2767 = vst [vmem:[#allocation4 + $0x29] sm:$0x1] %v2766_v3  ;;  %v2774_v62 = vld [vmem:[#allocation3 + $0xf] sm:$0x1] }
 0x338   : > { %2769 = vst [vmem:[#allocation4 + $0x2c] sm:$0x1] %v2768_v38  ;;  %2771 = vst [vmem:[#allocation4 + $0x2f] sm:$0x1] %v2770_v51  ;;  %v2776_v27 = vld [vmem:[#allocation3 + $0x10] sm:$0x1] }
 0x339   : > { %2773 = vst [vmem:[#allocation4 + $0x32] sm:$0x1] %v2772_v55  ;;  %2775 = vst [vmem:[#allocation4 + $0x35] sm:$0x1] %v2774_v62  ;;  %v2778_v39 = vld [vmem:[#allocation3 + $0x11] sm:$0x1] }
 0x33a   : > { %v2780_v42 = vld [vmem:[#allocation3 + $0x12] sm:$0x1]  ;;  %v2782_v7 = vld [vmem:[#allocation3 + $0x13] sm:$0x1]  ;;  %v2784_v49 = vld [vmem:[#allocation3 + $0x14] sm:$0x1] }
 0x33b   : > { %v2786_v1 = vld [vmem:[#allocation3 + $0x15] sm:$0x1]  ;;  %2777 = vst [vmem:[#allocation4 + $0x38] sm:$0x1] %v2776_v27  ;;  %2779 = vst [vmem:[#allocation4 + $0x3b] sm:$0x1] %v2778_v39 }
 0x33c   : > { %2781 = vst [vmem:[#allocation4 + $0x3e] sm:$0x1] %v2780_v42  ;;  %2743 = vst [vmem:[#allocation3 + $0x20] sm:$0x7f] %v2738_v6  ;;  %v2788_v8 = vld [vmem:[#allocation3 + $0x16] sm:$0x1] }
 0x33d   : > { %v2790_v9 = vld [vmem:[#allocation3 + $0x17] sm:$0x1]  ;;  %2783 = vst [vmem:[#allocation4 + $0x41] sm:$0x1] %v2782_v7  ;;  %2785 = vst [vmem:[#allocation4 + $0x44] sm:$0x1] %v2784_v49 }
 0x33e   : > { %2787 = vst [vmem:[#allocation4 + $0x47] sm:$0x1] %v2786_v1  ;;  %v2792_v10 = vld [vmem:[#allocation3 + $0x18] sm:$0x1]  ;;  %2789 = vst [vmem:[#allocation4 + $0x4a] sm:$0x1] %v2788_v8 }
 0x33f   : > { %2791 = vst [vmem:[#allocation4 + $0x4d] sm:$0x1] %v2790_v9  ;;  %v2794_v11 = vld [vmem:[#allocation3 + $0x19] sm:$0x1]  ;;  %v2796_v13 = vld [vmem:[#allocation3 + $0x1a] sm:$0x1] }
 0x340   : > { %v2798_v4 = vld [vmem:[#allocation3 + $0x1b] sm:$0x1]  ;;  %2793 = vst [vmem:[#allocation4 + $0x50] sm:$0x1] %v2792_v10  ;;  %v2800_v14 = vld [vmem:[#allocation3 + $0x1c] sm:$0x1] }
 0x341   : > { %v2802_v15 = vld [vmem:[#allocation3 + $0x1d] sm:$0x1]  ;;  %v2804_v16 = vld [vmem:[#allocation3 + $0x1e] sm:$0x1]  ;;  %2795 = vst [vmem:[#allocation4 + $0x53] sm:$0x1] %v2794_v11 }
 0x342   : > { %2797 = vst [vmem:[#allocation4 + $0x56] sm:$0x1] %v2796_v13  ;;  %2799 = vst [vmem:[#allocation4 + $0x59] sm:$0x1] %v2798_v4  ;;  %v2806_v17 = vld [vmem:[#allocation3 + $0x1f] sm:$0x1] }
 0x343   : > { %2801 = vst [vmem:[#allocation4 + $0x5c] sm:$0x1] %v2800_v14  ;;  %2803 = vst [vmem:[#allocation4 + $0x5f] sm:$0x1] %v2802_v15  ;;  %v2862_v53 = vld [vmem:[#allocation4 + $0x1] sm:$0xff]  ;;  %v2863_v54 = vld [vmem:[#allocation4 + $0x9] sm:$0xff] }
 0x344   : > { %2805 = vst [vmem:[#allocation4 + $0x62] sm:$0x1] %v2804_v16  ;;  %2807 = vst [vmem:[#allocation4 + $0x65] sm:$0x1] %v2806_v17  ;;  %v2878_v18 = vpack.c.bf16 %v2863_v54, %v2862_v53  ;;  %v2864_v19 = vld [vmem:[#allocation4 + $0x11] sm:$0xff]  ;;  %v2865_v20 = vld [vmem:[#allocation4 + $0x19] sm:$0xff] }
 0x345   : > { %v2866_v21 = vld [vmem:[#allocation4 + $0x21] sm:$0xff]  ;;  %v2879_v24 = vpack.c.bf16 %v2865_v20, %v2864_v19  ;;  %v2867_v22 = vld [vmem:[#allocation4 + $0x29] sm:$0xff]  ;;  %v2808_v12 = vld [vmem:[#allocation3 + $0x20] sm:$0x1] }
 0x346   : > { %v11471_v23 = vld [vmem:[#allocation4 + $0x8] sm:$0xff]  ;;  %v11473_v26 = vld [vmem:[#allocation4 + $0x10] sm:$0xff]  ;;  %v2810_v25 = vld [vmem:[#allocation3 + $0x21] sm:$0x1]  ;;  %9137 = vmatprep.mubr.bf16.mxu0 %v2878_v18  ;;  %v2880_v29 = vpack.c.bf16 %v2867_v22, %v2866_v21  ;;  %2809 = vst [vmem:[#allocation4 + $0x68] sm:$0x1] %v2808_v12 }
 0x347   : > { %v2812_v28 = vld [vmem:[#allocation3 + $0x22] sm:$0x1]  ;;  %v4421_v30 = vpack.c.bf16 %v11473_v26, %v11471_v23  ;;  %v2814_v31 = vld [vmem:[#allocation3 + $0x23] sm:$0x1]  ;;  %v2816_v32 = vld [vmem:[#allocation3 + $0x24] sm:$0x1]  ;;  %9138 = vmatmul.mubr.bf16.vlgmr.msra.gmra.mrb[72].mxu0 %v2879_v24 }
 0x348   : > { %v2818_v33 = vld [vmem:[#allocation3 + $0x25] sm:$0x1]  ;;  %2811 = vst [vmem:[#allocation4 + $0x6b] sm:$0x1] %v2810_v25  ;;  %2813 = vst [vmem:[#allocation4 + $0x6e] sm:$0x1] %v2812_v28  ;;  %9154 = vmatpush3.bf16.msra.mxu0 %v11461_v0  ;;  %9141 = vmatprep.mubr.bf16.mxu0 %v2880_v29 }
 0x349   : > { %v2820_v34 = vld [vmem:[#allocation3 + $0x26] sm:$0x1]  ;;  %2815 = vst [vmem:[#allocation4 + $0x71] sm:$0x1] %v2814_v31  ;;  %2817 = vst [vmem:[#allocation4 + $0x74] sm:$0x1] %v2816_v32  ;;  %9155 = vmatprep.subr.bf16.mxu0 %v10352_v56 }
 0x34a   : > { %2819 = vst [vmem:[#allocation4 + $0x77] sm:$0x1] %v2818_v33  ;;  %2821 = vst [vmem:[#allocation4 + $0x7a] sm:$0x1] %v2820_v34  ;;  %v2868_v36 = vld [vmem:[#allocation4 + $0x31] sm:$0xff]  ;;  %v2869_v37 = vld [vmem:[#allocation4 + $0x39] sm:$0xff] }
 0x34b   : > { %v2871_v40 = vld [vmem:[#allocation4 + $0x49] sm:$0xff]  ;;  %v2870_v41 = vld [vmem:[#allocation4 + $0x41] sm:$0xff]  ;;  %v11478_v43 = vld [vmem:[#allocation4 + $0x18] sm:$0xff]  ;;  %v2881_v59 = vpack.c.bf16 %v2869_v37, %v2868_v36 }
 0x34c   : > { %v11480_v44 = vld [vmem:[#allocation4 + $0x20] sm:$0xff]  ;;  %v11482_v45 = vld [vmem:[#allocation4 + $0x28] sm:$0xff]  ;;  %v11484_v46 = vld [vmem:[#allocation4 + $0x30] sm:$0xff]  ;;  %9156 = vmatpush3.bf16.msra.mxu0 %v10352_v56  ;;  %v2882_v48 = vpack.c.bf16 %v2871_v40, %v2870_v41  ;;  %v2839_v16 = vpack.c.bf16 %v11478_v43, %v11473_v26 }
 0x34d   : > { %v11486_v47 = vld [vmem:[#allocation4 + $0x38] sm:$0xff]  ;;  %v4422_v0 = vpack.c.bf16 %v11480_v44, %v11478_v43  ;;  %v11490_v50 = vld [vmem:[#allocation4 + $0x40] sm:$0xff]  ;;  %v11492_v52 = vld [vmem:[#allocation4 + $0x48] sm:$0xff]  ;;  %v4423_v58 = vpack.c.bf16 %v11484_v46, %v11482_v45  ;;  %9157 = vmatprep.subr.bf16.mxu0 %v10353_v35  ;;  %v2840_v53 = vpack.c.bf16 %v11482_v45, %v11480_v44 }
 0x34e   : > { %v11494_v57 = vld [vmem:[#allocation4 + $0x50] sm:$0xff]  ;;  %v11498_v61 = vld [vmem:[#allocation4 + $0x58] sm:$0xff]  ;;  %v11500_v63 = vld [vmem:[#allocation4 + $0x60] sm:$0xff]  ;;  %v4424_v2 = vpack.c.bf16 %v11490_v50, %v11486_v47  ;;  %v2841_v56 = vpack.c.bf16 %v11486_v47, %v11484_v46  ;;  %v2842_v19 = vpack.c.bf16 %v11492_v52, %v11490_v50 }
 0x34f   : > { %v4425_v3 = vpack.c.bf16 %v11494_v57, %v11492_v52  ;;  %v11506_v38 = vld [vmem:[#allocation4 + $0x68] sm:$0xff]  ;;  %v4426_v51 = vpack.c.bf16 %v11500_v63, %v11498_v61  ;;  %9142 = vmatmul.mubr.bf16.gmra.mrb[76].mxu0 %v2881_v59  ;;  %v10355_v62 = vld [vmem:[#allocation10 + $0x20] sm:$0xff]   ;;  %v10356_v49 = vld [vmem:[#allocation10 + $0x28] sm:$0xff]   ;;  %v2843_v21 = vpack.c.bf16 %v11498_v61, %v11494_v57 }
 0x350   : > { %9158 = vmatpush3.bf16.msra.mxu0 %v10353_v35  ;;  %9145 = vmatprep.mubr.bf16.mxu0 %v2882_v48  ;;  %v2872_v6 = vld [vmem:[#allocation4 + $0x51] sm:$0xff]  ;;  %v2873_v27 = vld [vmem:[#allocation4 + $0x59] sm:$0xff]  ;;  %v2874_v39 = vld [vmem:[#allocation4 + $0x61] sm:$0xff]  ;;  %v2844_v22 = vpack.c.bf16 %v11506_v38, %v11500_v63 }
 0x351   : > { %v11510_v55 = vld [vmem:[#allocation4 + $0x70] sm:$0xff]  ;;  %9159 = vmatprep.subr.bf16.mxu0 %v10354_v60  ;;  %v2883_v7 = vpack.c.bf16 %v2873_v27, %v2872_v6  ;;  %v10357_v8 = vld [vmem:[#allocation10 + $0x30] sm:$0xff]   ;;  %v2877_v10 = vld [vmem:[#allocation4 + $0x79] sm:$0x1] }
 0x352   : > { %v4427_v5 = vpack.c.bf16 %v11510_v55, %v11506_v38  ;;  %v2875_v42 = vld [vmem:[#allocation4 + $0x69] sm:$0xff]  ;;  %v2876_v9 = vld [vmem:[#allocation4 + $0x71] sm:$0xff]  ;;  %v10769_v4 = vld [vmem:[#allocation2] sm:$0xff] }
 0x353   : > { %v2884_v1 = vpack.c.bf16 %v2875_v42, %v2874_v39  ;;  %v2885_v11 = vpack.c.bf16 %v2877_v10, %v2876_v9  ;;  %v10358_v13 = vld [vmem:[#allocation10 + $0x38] sm:$0xff]   ;;  %v2838_v14 = vpack.c.bf16 %v11471_v23, %v10769_v4  ;;  %v10359_v15 = vld [vmem:[#allocation10 + $0x80] sm:$0xff]   ;;  %v10360_v17 = vld [vmem:[#allocation10 + $0x88] sm:$0xff]  }
 0x354   : > { %9160 = vmatpush3.bf16.msra.mxu0 %v10354_v60  ;;  %v10361_v54 = vld [vmem:[#allocation10 + $0x90] sm:$0xff]   ;;  %v10362_v18 = vld [vmem:[#allocation10 + $0x98] sm:$0xff]   ;;  %v10363_v20 = vld [vmem:[#allocation10 + $0xa0] sm:$0xff]  }
 0x355   : > { %9161 = vmatprep.subr.bf16.mxu0 %v10355_v62  ;;  %v10364_v24 = vld [vmem:[#allocation10 + $0xa8] sm:$0xff]   ;;  %v10365_v12 = vld [vmem:[#allocation10 + $0xb0] sm:$0xff]   ;;  %v2837_v25 = vld [vmem:[#allocation4 + $0x78] sm:$0x1] }
 0x356   : > { %v3193_v28 = vld [vmem:[#allocation4 + $0x2] sm:$0xff]  ;;  %v3194_v29 = vld [vmem:[#allocation4 + $0xa] sm:$0xff]  ;;  %v2845_v31 = vpack.c.bf16 %v2837_v25, %v11510_v55  ;;  %v10367_v34 = vld [vmem:[#allocation10 + $0xc0] sm:$0xff]  }
 0x357   : > { %9146 = vmatmul.mubr.bf16.gmra.mrb[80].mxu0 %v2883_v7  ;;  %v10366_v32 = vld [vmem:[#allocation10 + $0xb8] sm:$0xff]   ;;  %v3209_v33 = vpack.c.bf16 %v3194_v29, %v3193_v28  ;;  %v3196_v35 = vld [vmem:[#allocation4 + $0x1a] sm:$0xff]  ;;  %v3197_v36 = vld [vmem:[#allocation4 + $0x22] sm:$0xff] }
 0x358   : > { %9162 = vmatpush3.bf16.msra.mxu0 %v10355_v62  ;;  %9149 = vmatprep.mubr.bf16.mxu0 %v2884_v1  ;;  %v3198_v37 = vld [vmem:[#allocation4 + $0x2a] sm:$0xff]  ;;  %v3195_v40 = vld [vmem:[#allocation4 + $0x12] sm:$0xff]  ;;  %v10368_v48 = vld [vmem:[#allocation10 + $0xc8] sm:$0xff]  }
 0x359   : > { %9163 = vmatprep.subr.bf16.mxu0 %v10356_v49  ;;  %v3210_v41 = vpack.c.bf16 %v3196_v35, %v3195_v40  ;;  %v3211_v59 = vpack.c.bf16 %v3198_v37, %v3197_v36  ;;  %v10369_v60 = vld [vmem:[#allocation10 + $0xd0] sm:$0xff]   ;;  %v3199_v62 = vld [vmem:[#allocation4 + $0x32] sm:$0xff]  ;;  %v3200_v6 = vld [vmem:[#allocation4 + $0x3a] sm:$0xff] }
 0x35a   : > { %v3202_v27 = vld [vmem:[#allocation4 + $0x4a] sm:$0xff]  ;;  %v3212_v39 = vpack.c.bf16 %v3200_v6, %v3199_v62  ;;  %v3201_v42 = vld [vmem:[#allocation4 + $0x42] sm:$0xff]  ;;  %v10371_v1 = vld [vmem:[#allocation10 + $0xe0] sm:$0xff]  }
 0x35b   : > { %v10370_v7 = vld [vmem:[#allocation10 + $0xd8] sm:$0xff]   ;;  %v3204_v9 = vld [vmem:[#allocation4 + $0x5a] sm:$0xff]  ;;  %v3205_v10 = vld [vmem:[#allocation4 + $0x62] sm:$0xff] }
 0x35c   : > { %9164 = vmatpush3.bf16.msra.mxu0 %v10356_v49  ;;  %v3213_v49 = vpack.c.bf16 %v3202_v27, %v3201_v42  ;;  %v10372_v4 = vld [vmem:[#allocation10 + $0xe8] sm:$0xff]   ;;  %v10378_v37 = vld [vmem:[#allocation10 + $0x118] sm:$0xff]   ;;  %v10381_v42 = vld [vmem:[#allocation10 + $0x130] sm:$0xff]  }
 0x35d   : > { %9165 = vmatprep.subr.bf16.mxu0 %v10357_v8  ;;  %v10376_v28 = vld [vmem:[#allocation10 + $0x108] sm:$0xff]   ;;  %v3408_v62 = vld [vmem:[#allocation4 + $0x6b] sm:$0xff]  ;;  %v10419_v26 = vld [vmem:[#allocation10 + $0x260] sm:$0xff]  }
 0x35e   : > { %v3403_v36 = vld [vmem:[#allocation4 + $0x43] sm:$0xff]  ;;  %v10418_v23 = vld [vmem:[#allocation10 + $0x258] sm:$0xff]   ;;  %v4419_v44 = vld [vmem:[#allocation4 + $0x78] sm:$0xff] }
 0x35f   : > { %9150 = vmatmul.mubr.bf16.gmra.mrb[84].mxu0 %v2885_v11  ;;  %v3206_v11 = vld [vmem:[#allocation4 + $0x6a] sm:$0xff]  ;;  %v10380_v27 = vld [vmem:[#allocation10 + $0x128] sm:$0xff]   ;;  %v10423_v57 = vld [vmem:[#allocation10 + $0x280] sm:$0xff]  }
 0x360   : > { %9166 = vmatpush3.bf16.msra.mxu0 %v10357_v8  ;;  %9169 = vmatprep.mubr.bf16.mxu0 %v2838_v14  ;;  %v3203_v8 = vld [vmem:[#allocation4 + $0x52] sm:$0xff]  ;;  %v3215_v14 = vpack.c.bf16 %v3206_v11, %v3205_v10  ;;  %v10421_v43 = vld [vmem:[#allocation10 + $0x270] sm:$0xff]   ;;  %v4420_v45 = vld [vmem:[#allocation4 + $0x80] sm:$0x1] }
 0x361   : > { %9167 = vmatprep.subr.bf16.mxu0 %v10358_v13  ;;  %v10382_v10 = vld [vmem:[#allocation10 + $0x138] sm:$0xff]   ;;  %v4610_v61 = vld [vmem:[#allocation4 + $0x21] sm:$0xff] }
 0x362   : > { %v4607_v46 = vld [vmem:[#allocation4 + $0x9] sm:$0xff]  ;;  %v4608_v47 = vld [vmem:[#allocation4 + $0x11] sm:$0xff]  ;;  %v10424_v38 = vld [vmem:[#allocation10 + $0x288] sm:$0xff]  }
 0x363   : > { %v10422_v50 = vld [vmem:[#allocation10 + $0x278] sm:$0xff]   ;;  %v4623_v52 = vpack.c.bf16 %v4608_v47, %v4607_v46  ;;  %v10425_v55 = vld [vmem:[#allocation10 + $0x290] sm:$0xff]  }
 0x364   : > { %9168 = vmatpush3.bf16.msra.mxu0 %v10358_v13  ;;  %v3214_v13 = vpack.c.bf16 %v3204_v9, %v3203_v8  ;;  %v3598_v8 = vld [vmem:[#allocation4 + $0xc] sm:$0xff] }
 0x365   : > { %9185 = vmatprep.subr.bf16.mxu0 %v10359_v15  ;;  %v4612_v63 = vld [vmem:[#allocation4 + $0x31] sm:$0xff]  ;;  %v10437_v46 = vld [vmem:[#allocation11 + $0x70] sm:$0xff]  }
 0x366   : > { %v10438_v47 = vld [vmem:[#allocation11 + $0x78] sm:$0xff]  }
 0x367   : > { %9170 = vmatmul.mubr.bf16.vlgmr.msra.gmra.mrb[72].mxu0 %v2839_v16  ;;  %v3207_v16 = vld [vmem:[#allocation4 + $0x72] sm:$0xff] }
 0x368   : > { %9186 = vmatpush3.bf16.msra.mxu0 %v10359_v15  ;;  %9173 = vmatprep.mubr.bf16.mxu0 %v2840_v53  ;;  %v10373_v15 = vld [vmem:[#allocation10 + $0xf0] sm:$0xff]  }
 0x369   : > { %9187 = vmatprep.subr.bf16.mxu0 %v10360_v17  ;;  %v3395_v53 = vld [vmem:[#allocation4 + $0x3] sm:$0xff] }
 0x36c   : > { %9188 = vmatpush3.bf16.msra.mxu0 %v10360_v17  ;;  %v3208_v17 = vld [vmem:[#allocation4 + $0x7a] sm:$0x1] }
 0x36d   : > { %9189 = vmatprep.subr.bf16.mxu0 %v10361_v54 }
 0x36f   : > { %9174 = vmatmul.mubr.bf16.gmra.mrb[76].mxu0 %v2841_v56  ;;  %v3216_v56 = vpack.c.bf16 %v3208_v17, %v3207_v16  ;;  %v3599_v16 = vld [vmem:[#allocation4 + $0x14] sm:$0xff] }
 0x370   : > { %9190 = vmatpush3.bf16.msra.mxu0 %v10361_v54  ;;  %9177 = vmatprep.mubr.bf16.mxu0 %v2842_v19  ;;  %v3396_v54 = vld [vmem:[#allocation4 + $0xb] sm:$0xff] }
 0x371   : > { %9191 = vmatprep.subr.bf16.mxu0 %v10362_v18  ;;  %v3411_v19 = vpack.c.bf16 %v3396_v54, %v3395_v53  ;;  %v10384_v53 = vld [vmem:[#allocation10 + $0x148] sm:$0xff]  }
 0x374   : > { %9192 = vmatpush3.bf16.msra.mxu0 %v10362_v18  ;;  %v10374_v18 = vld [vmem:[#allocation10 + $0xf8] sm:$0xff]  }
 0x375   : > { %9193 = vmatprep.subr.bf16.mxu0 %v10363_v20 }
 0x377   : > { %9178 = vmatmul.mubr.bf16.gmra.mrb[80].mxu0 %v2843_v21  ;;  %v3398_v21 = vld [vmem:[#allocation4 + $0x1b] sm:$0xff] }
 0x378   : > { %9194 = vmatpush3.bf16.msra.mxu0 %v10363_v20  ;;  %9181 = vmatprep.mubr.bf16.mxu0 %v2844_v22  ;;  %v10375_v20 = vld [vmem:[#allocation10 + $0x100] sm:$0xff]   ;;  %v3400_v22 = vld [vmem:[#allocation4 + $0x2b] sm:$0xff] }
 0x379   : > { %9195 = vmatprep.subr.bf16.mxu0 %v10364_v24 }
 0x37c   : > { %9196 = vmatpush3.bf16.msra.mxu0 %v10364_v24  ;;  %v3399_v24 = vld [vmem:[#allocation4 + $0x23] sm:$0xff] }
 0x37d   : > { %9197 = vmatprep.subr.bf16.mxu0 %v10365_v12  ;;  %v3413_v29 = vpack.c.bf16 %v3400_v22, %v3399_v24  ;;  %v3605_v24 = vld [vmem:[#allocation4 + $0x44] sm:$0xff]  ;;  %v10386_v22 = vld [vmem:[#allocation10 + $0x158] sm:$0xff]  }
 0x37f   : > { %9182 = vmatmul.mubr.bf16.gmra.mrb[84].mxu0 %v2845_v31  ;;  %v10377_v31 = vld [vmem:[#allocation10 + $0x110] sm:$0xff]  }
 0x380   : > { %9198 = vmatpush3.bf16.msra.mxu0 %v10365_v12  ;;  %9201 = vmatprep.mubr.bf16.mxu0 %v3209_v33  ;;  %v3397_v12 = vld [vmem:[#allocation4 + $0x13] sm:$0xff]  ;;  %v3402_v33 = vld [vmem:[#allocation4 + $0x3b] sm:$0xff] }
 0x381   : > { %9199 = vmatprep.subr.bf16.mxu0 %v10366_v32  ;;  %v3412_v25 = vpack.c.bf16 %v3398_v21, %v3397_v12 }
 0x384   : > { %9200 = vmatpush3.bf16.msra.mxu0 %v10366_v32  ;;  %v3401_v32 = vld [vmem:[#allocation4 + $0x33] sm:$0xff] }
 0x385   : > { %9217 = vmatprep.subr.bf16.mxu0 %v10367_v34  ;;  %v3414_v35 = vpack.c.bf16 %v3402_v33, %v3401_v32  ;;  %v3610_v32 = vld [vmem:[#allocation4 + $0x6c] sm:$0xff] }
 0x387   : > { %9202 = vmatmul.mubr.bf16.vlgmr.msra.gmra.mrb[72].mxu0 %v3210_v41  ;;  %v10379_v41 = vld [vmem:[#allocation10 + $0x120] sm:$0xff]  }
 0x388   : > { %9218 = vmatpush3.bf16.msra.mxu0 %v10367_v34  ;;  %9205 = vmatprep.mubr.bf16.mxu0 %v3211_v59  ;;  %v3404_v34 = vld [vmem:[#allocation4 + $0x4b] sm:$0xff]  ;;  %v3406_v59 = vld [vmem:[#allocation4 + $0x5b] sm:$0xff] }
 0x389   : > { %9219 = vmatprep.subr.bf16.mxu0 %v10368_v48  ;;  %v3415_v40 = vpack.c.bf16 %v3404_v34, %v3403_v36  ;;  %v10388_v34 = vld [vmem:[#allocation10 + $0x168] sm:$0xff]   ;;  %v10389_v36 = vld [vmem:[#allocation10 + $0x170] sm:$0xff]  }
 0x38c   : > { %9220 = vmatpush3.bf16.msra.mxu0 %v10368_v48  ;;  %v3405_v48 = vld [vmem:[#allocation4 + $0x53] sm:$0xff] }
 0x38d   : > { %9221 = vmatprep.subr.bf16.mxu0 %v10369_v60  ;;  %v3416_v6 = vpack.c.bf16 %v3406_v59, %v3405_v48  ;;  %v3800_v48 = vld [vmem:[#allocation4 + $0xd] sm:$0xff] }
 0x38f   : > { %9206 = vmatmul.mubr.bf16.gmra.mrb[76].mxu0 %v3212_v39 }
 0x390   : > { %9222 = vmatpush3.bf16.msra.mxu0 %v10369_v60  ;;  %9209 = vmatprep.mubr.bf16.mxu0 %v3213_v49  ;;  %v3407_v60 = vld [vmem:[#allocation4 + $0x63] sm:$0xff]  ;;  %v3410_v49 = vld [vmem:[#allocation4 + $0x7b] sm:$0x1] }
 0x391   : > { %9223 = vmatprep.subr.bf16.mxu0 %v10370_v7  ;;  %v3417_v39 = vpack.c.bf16 %v3408_v62, %v3407_v60  ;;  %v10390_v60 = vld [vmem:[#allocation10 + $0x178] sm:$0xff]  }
 0x394   : > { %9224 = vmatpush3.bf16.msra.mxu0 %v10370_v7  ;;  %v3409_v7 = vld [vmem:[#allocation4 + $0x73] sm:$0xff] }
 0x395   : > { %9225 = vmatprep.subr.bf16.mxu0 %v10371_v1  ;;  %v3418_v9 = vpack.c.bf16 %v3410_v49, %v3409_v7  ;;  %v3801_v7 = vld [vmem:[#allocation4 + $0x15] sm:$0xff] }
 0x397   : > { %9210 = vmatmul.mubr.bf16.gmra.mrb[80].mxu0 %v3214_v13  ;;  %v10383_v13 = vld [vmem:[#allocation10 + $0x140] sm:$0xff]  }
 0x398   : > { %9226 = vmatpush3.bf16.msra.mxu0 %v10371_v1  ;;  %9213 = vmatprep.mubr.bf16.mxu0 %v3215_v14  ;;  %v3597_v1 = vld [vmem:[#allocation4 + $0x4] sm:$0xff] }
 0x399   : > { %9227 = vmatprep.subr.bf16.mxu0 %v10372_v4  ;;  %v3613_v11 = vpack.c.bf16 %v3598_v8, %v3597_v1  ;;  %v3601_v14 = vld [vmem:[#allocation4 + $0x24] sm:$0xff] }
 0x39a   : > { %v10392_v1 = vld [vmem:[#allocation10 + $0x188] sm:$0xff]  }
 0x39c   : > { %9228 = vmatpush3.bf16.msra.mxu0 %v10372_v4  ;;  %v3600_v4 = vld [vmem:[#allocation4 + $0x1c] sm:$0xff] }
 0x39d   : > { %9229 = vmatprep.subr.bf16.mxu0 %v10373_v15  ;;  %v3614_v17 = vpack.c.bf16 %v3600_v4, %v3599_v16 }
 0x39f   : > { %9214 = vmatmul.mubr.bf16.gmra.mrb[84].mxu0 %v3216_v56  ;;  %v10385_v56 = vld [vmem:[#allocation10 + $0x150] sm:$0xff]  }
 0x3a0   : > { %9230 = vmatpush3.bf16.msra.mxu0 %v10373_v15  ;;  %9233 = vmatprep.mubr.bf16.mxu0 %v3411_v19  ;;  %v3602_v15 = vld [vmem:[#allocation4 + $0x2c] sm:$0xff]  ;;  %v3604_v19 = vld [vmem:[#allocation4 + $0x3c] sm:$0xff] }
 0x3a1   : > { %9231 = vmatprep.subr.bf16.mxu0 %v10374_v18  ;;  %v3615_v54 = vpack.c.bf16 %v3602_v15, %v3601_v14  ;;  %v3807_v14 = vld [vmem:[#allocation4 + $0x45] sm:$0xff]  ;;  %v10394_v15 = vld [vmem:[#allocation10 + $0x198] sm:$0xff]  }
 0x3a4   : > { %9232 = vmatpush3.bf16.msra.mxu0 %v10374_v18  ;;  %v3603_v18 = vld [vmem:[#allocation4 + $0x34] sm:$0xff] }
 0x3a5   : > { %9249 = vmatprep.subr.bf16.mxu0 %v10375_v20  ;;  %v3616_v21 = vpack.c.bf16 %v3604_v19, %v3603_v18  ;;  %v3812_v18 = vld [vmem:[#allocation4 + $0x6d] sm:$0xff] }
 0x3a7   : > { %9234 = vmatmul.mubr.bf16.vlgmr.msra.gmra.mrb[72].mxu0 %v3412_v25  ;;  %v10387_v25 = vld [vmem:[#allocation10 + $0x160] sm:$0xff]  }
 0x3a8   : > { %9250 = vmatpush3.bf16.msra.mxu0 %v10375_v20  ;;  %9237 = vmatprep.mubr.bf16.mxu0 %v3413_v29  ;;  %v3606_v20 = vld [vmem:[#allocation4 + $0x4c] sm:$0xff]  ;;  %v3608_v29 = vld [vmem:[#allocation4 + $0x5c] sm:$0xff] }
 0x3a9   : > { %9251 = vmatprep.subr.bf16.mxu0 %v10376_v28  ;;  %v3617_v12 = vpack.c.bf16 %v3606_v20, %v3605_v24  ;;  %v10396_v20 = vld [vmem:[#allocation10 + $0x1a8] sm:$0xff]   ;;  %v10397_v24 = vld [vmem:[#allocation10 + $0x1b0] sm:$0xff]  }
 0x3ac   : > { %9252 = vmatpush3.bf16.msra.mxu0 %v10376_v28  ;;  %v3607_v28 = vld [vmem:[#allocation4 + $0x54] sm:$0xff] }
 0x3ad   : > { %9253 = vmatprep.subr.bf16.mxu0 %v10377_v31  ;;  %v3618_v33 = vpack.c.bf16 %v3608_v29, %v3607_v28  ;;  %v4002_v28 = vld [vmem:[#allocation4 + $0xe] sm:$0xff] }
 0x3af   : > { %9238 = vmatmul.mubr.bf16.gmra.mrb[76].mxu0 %v3414_v35 }
 0x3b0   : > { %9254 = vmatpush3.bf16.msra.mxu0 %v10377_v31  ;;  %9241 = vmatprep.mubr.bf16.mxu0 %v3415_v40  ;;  %v3609_v31 = vld [vmem:[#allocation4 + $0x64] sm:$0xff]  ;;  %v3612_v40 = vld [vmem:[#allocation4 + $0x7c] sm:$0x1] }
 0x3b1   : > { %9255 = vmatprep.subr.bf16.mxu0 %v10378_v37  ;;  %v3619_v35 = vpack.c.bf16 %v3610_v32, %v3609_v31  ;;  %v10398_v31 = vld [vmem:[#allocation10 + $0x1b8] sm:$0xff]  }
 0x3b4   : > { %9256 = vmatpush3.bf16.msra.mxu0 %v10378_v37  ;;  %v3611_v37 = vld [vmem:[#allocation4 + $0x74] sm:$0xff] }
 0x3b5   : > { %9257 = vmatprep.subr.bf16.mxu0 %v10379_v41  ;;  %v3620_v59 = vpack.c.bf16 %v3612_v40, %v3611_v37  ;;  %v4003_v37 = vld [vmem:[#allocation4 + $0x16] sm:$0xff] }
 0x3b7   : > { %9242 = vmatmul.mubr.bf16.gmra.mrb[80].mxu0 %v3416_v6  ;;  %v10391_v6 = vld [vmem:[#allocation10 + $0x180] sm:$0xff]  }
 0x3b8   : > { %9258 = vmatpush3.bf16.msra.mxu0 %v10379_v41  ;;  %9245 = vmatprep.mubr.bf16.mxu0 %v3417_v39  ;;  %v3799_v41 = vld [vmem:[#allocation4 + $0x5] sm:$0xff] }
 0x3b9   : > { %9259 = vmatprep.subr.bf16.mxu0 %v10380_v27  ;;  %v3815_v62 = vpack.c.bf16 %v3800_v48, %v3799_v41  ;;  %v3803_v39 = vld [vmem:[#allocation4 + $0x25] sm:$0xff] }
 0x3ba   : > { %v10400_v41 = vld [vmem:[#allocation10 + $0x1c8] sm:$0xff]  }
 0x3bc   : > { %9260 = vmatpush3.bf16.msra.mxu0 %v10380_v27  ;;  %v3802_v27 = vld [vmem:[#allocation4 + $0x1d] sm:$0xff] }
 0x3bd   : > { %9261 = vmatprep.subr.bf16.mxu0 %v10381_v42  ;;  %v3816_v49 = vpack.c.bf16 %v3802_v27, %v3801_v7 }
 0x3bf   : > { %9246 = vmatmul.mubr.bf16.gmra.mrb[84].mxu0 %v3418_v9  ;;  %v10393_v9 = vld [vmem:[#allocation10 + $0x190] sm:$0xff]  }
 0x3c0   : > { %9262 = vmatpush3.bf16.msra.mxu0 %v10381_v42  ;;  %9265 = vmatprep.mubr.bf16.mxu0 %v3613_v11  ;;  %v3804_v42 = vld [vmem:[#allocation4 + $0x2d] sm:$0xff]  ;;  %v3806_v11 = vld [vmem:[#allocation4 + $0x3d] sm:$0xff] }
 0x3c1   : > { %9263 = vmatprep.subr.bf16.mxu0 %v10382_v10  ;;  %v3817_v8 = vpack.c.bf16 %v3804_v42, %v3803_v39  ;;  %v4009_v39 = vld [vmem:[#allocation4 + $0x46] sm:$0xff]  ;;  %v10402_v42 = vld [vmem:[#allocation10 + $0x1d8] sm:$0xff]  }
 0x3c4   : > { %9264 = vmatpush3.bf16.msra.mxu0 %v10382_v10  ;;  %v3805_v10 = vld [vmem:[#allocation4 + $0x35] sm:$0xff] }
 0x3c5   : > { %9281 = vmatprep.subr.bf16.mxu0 %v10383_v13  ;;  %v3818_v4 = vpack.c.bf16 %v3806_v11, %v3805_v10  ;;  %v4014_v10 = vld [vmem:[#allocation4 + $0x6e] sm:$0xff] }
 0x3c7   : > { %9266 = vmatmul.mubr.bf16.vlgmr.msra.gmra.mrb[72].mxu0 %v3614_v17  ;;  %v10395_v17 = vld [vmem:[#allocation10 + $0x1a0] sm:$0xff]  }
 0x3c8   : > { %9282 = vmatpush3.bf16.msra.mxu0 %v10383_v13  ;;  %9269 = vmatprep.mubr.bf16.mxu0 %v3615_v54  ;;  %v3808_v13 = vld [vmem:[#allocation4 + $0x4d] sm:$0xff]  ;;  %v3810_v54 = vld [vmem:[#allocation4 + $0x5d] sm:$0xff] }
 0x3c9   : > { %9283 = vmatprep.subr.bf16.mxu0 %v10384_v53  ;;  %v3819_v16 = vpack.c.bf16 %v3808_v13, %v3807_v14  ;;  %v10404_v13 = vld [vmem:[#allocation10 + $0x1e8] sm:$0xff]   ;;  %v10405_v14 = vld [vmem:[#allocation10 + $0x1f0] sm:$0xff]  }
 0x3cc   : > { %9284 = vmatpush3.bf16.msra.mxu0 %v10384_v53  ;;  %v3809_v53 = vld [vmem:[#allocation4 + $0x55] sm:$0xff] }
 0x3cd   : > { %9285 = vmatprep.subr.bf16.mxu0 %v10385_v56  ;;  %v3820_v19 = vpack.c.bf16 %v3810_v54, %v3809_v53  ;;  %v4204_v53 = vld [vmem:[#allocation4 + $0xf] sm:$0xff] }
 0x3cf   : > { %9270 = vmatmul.mubr.bf16.gmra.mrb[76].mxu0 %v3616_v21 }
 0x3d0   : > { %9286 = vmatpush3.bf16.msra.mxu0 %v10385_v56  ;;  %9273 = vmatprep.mubr.bf16.mxu0 %v3617_v12  ;;  %v3811_v56 = vld [vmem:[#allocation4 + $0x65] sm:$0xff]  ;;  %v3814_v12 = vld [vmem:[#allocation4 + $0x7d] sm:$0x1] }
 0x3d1   : > { %9287 = vmatprep.subr.bf16.mxu0 %v10386_v22  ;;  %v3821_v21 = vpack.c.bf16 %v3812_v18, %v3811_v56  ;;  %v10406_v56 = vld [vmem:[#allocation10 + $0x1f8] sm:$0xff]  }
 0x3d4   : > { %9288 = vmatpush3.bf16.msra.mxu0 %v10386_v22  ;;  %v3813_v22 = vld [vmem:[#allocation4 + $0x75] sm:$0xff] }
 0x3d5   : > { %9289 = vmatprep.subr.bf16.mxu0 %v10387_v25  ;;  %v3822_v29 = vpack.c.bf16 %v3814_v12, %v3813_v22  ;;  %v4205_v22 = vld [vmem:[#allocation4 + $0x17] sm:$0xff] }
 0x3d7   : > { %9274 = vmatmul.mubr.bf16.gmra.mrb[80].mxu0 %v3618_v33  ;;  %v10399_v33 = vld [vmem:[#allocation10 + $0x1c0] sm:$0xff]  }
 0x3d8   : > { %9290 = vmatpush3.bf16.msra.mxu0 %v10387_v25  ;;  %9277 = vmatprep.mubr.bf16.mxu0 %v3619_v35  ;;  %v4001_v25 = vld [vmem:[#allocation4 + $0x6] sm:$0xff] }
 0x3d9   : > { %9291 = vmatprep.subr.bf16.mxu0 %v10388_v34  ;;  %v4017_v32 = vpack.c.bf16 %v4002_v28, %v4001_v25  ;;  %v4005_v35 = vld [vmem:[#allocation4 + $0x26] sm:$0xff] }
 0x3da   : > { %v10408_v25 = vld [vmem:[#allocation10 + $0x208] sm:$0xff]  }
 0x3dc   : > { %9292 = vmatpush3.bf16.msra.mxu0 %v10388_v34  ;;  %v4004_v34 = vld [vmem:[#allocation4 + $0x1e] sm:$0xff] }
 0x3dd   : > { %9293 = vmatprep.subr.bf16.mxu0 %v10389_v36  ;;  %v4018_v40 = vpack.c.bf16 %v4004_v34, %v4003_v37 }
 0x3df   : > { %9278 = vmatmul.mubr.bf16.gmra.mrb[84].mxu0 %v3620_v59  ;;  %v10401_v59 = vld [vmem:[#allocation10 + $0x1d0] sm:$0xff]  }
 0x3e0   : > { %9294 = vmatpush3.bf16.msra.mxu0 %v10389_v36  ;;  %9297 = vmatprep.mubr.bf16.mxu0 %v3815_v62  ;;  %v4006_v36 = vld [vmem:[#allocation4 + $0x2e] sm:$0xff]  ;;  %v4008_v62 = vld [vmem:[#allocation4 + $0x3e] sm:$0xff] }
 0x3e1   : > { %9295 = vmatprep.subr.bf16.mxu0 %v10390_v60  ;;  %v4019_v48 = vpack.c.bf16 %v4006_v36, %v4005_v35  ;;  %v4211_v35 = vld [vmem:[#allocation4 + $0x47] sm:$0xff]  ;;  %v10410_v36 = vld [vmem:[#allocation10 + $0x218] sm:$0xff]  }
 0x3e4   : > { %9296 = vmatpush3.bf16.msra.mxu0 %v10390_v60  ;;  %v4007_v60 = vld [vmem:[#allocation4 + $0x36] sm:$0xff] }
 0x3e5   : > { %9313 = vmatprep.subr.bf16.mxu0 %v10391_v6  ;;  %v4020_v27 = vpack.c.bf16 %v4008_v62, %v4007_v60  ;;  %v4216_v60 = vld [vmem:[#allocation4 + $0x6f] sm:$0xff] }
 0x3e7   : > { %9298 = vmatmul.mubr.bf16.vlgmr.msra.gmra.mrb[72].mxu0 %v3816_v49  ;;  %v10403_v49 = vld [vmem:[#allocation10 + $0x1e0] sm:$0xff]  }
 0x3e8   : > { %9314 = vmatpush3.bf16.msra.mxu0 %v10391_v6  ;;  %9301 = vmatprep.mubr.bf16.mxu0 %v3817_v8  ;;  %v4010_v6 = vld [vmem:[#allocation4 + $0x4e] sm:$0xff]  ;;  %v4012_v8 = vld [vmem:[#allocation4 + $0x5e] sm:$0xff] }
 0x3e9   : > { %9315 = vmatprep.subr.bf16.mxu0 %v10392_v1  ;;  %v4021_v7 = vpack.c.bf16 %v4010_v6, %v4009_v39  ;;  %v10412_v6 = vld [vmem:[#allocation10 + $0x228] sm:$0xff]   ;;  %v10413_v39 = vld [vmem:[#allocation10 + $0x230] sm:$0xff]  }
 0x3ec   : > { %9316 = vmatpush3.bf16.msra.mxu0 %v10392_v1  ;;  %v4011_v1 = vld [vmem:[#allocation4 + $0x56] sm:$0xff] }
 0x3ed   : > { %9317 = vmatprep.subr.bf16.mxu0 %v10393_v9  ;;  %v4022_v11 = vpack.c.bf16 %v4012_v8, %v4011_v1  ;;  %v10414_v1 = vld [vmem:[#allocation10 + $0x238] sm:$0xff]   ;;  %v10415_v8 = vld [vmem:[#allocation10 + $0x240] sm:$0xff]  }
 0x3ef   : > { %9302 = vmatmul.mubr.bf16.gmra.mrb[76].mxu0 %v3818_v4 }
 0x3f0   : > { %9318 = vmatpush3.bf16.msra.mxu0 %v10393_v9  ;;  %9305 = vmatprep.mubr.bf16.mxu0 %v3819_v16  ;;  %v4013_v9 = vld [vmem:[#allocation4 + $0x66] sm:$0xff]  ;;  %v4016_v16 = vld [vmem:[#allocation4 + $0x7e] sm:$0x1] }
 0x3f1   : > { %9319 = vmatprep.subr.bf16.mxu0 %v10394_v15  ;;  %v4023_v4 = vpack.c.bf16 %v4014_v10, %v4013_v9  ;;  %v10416_v9 = vld [vmem:[#allocation10 + $0x248] sm:$0xff]   ;;  %v10417_v10 = vld [vmem:[#allocation10 + $0x250] sm:$0xff]  }
 0x3f4   : > { %9320 = vmatpush3.bf16.msra.mxu0 %v10394_v15  ;;  %v4015_v15 = vld [vmem:[#allocation4 + $0x76] sm:$0xff] }
 0x3f5   : > { %9321 = vmatprep.subr.bf16.mxu0 %v10395_v17  ;;  %v4024_v54 = vpack.c.bf16 %v4016_v16, %v4015_v15  ;;  %v10426_v15 = vld [vmem:[#allocation10 + $0x298] sm:$0xff]  }
 0x3f7   : > { %9306 = vmatmul.mubr.bf16.gmra.mrb[80].mxu0 %v3820_v19  ;;  %v10407_v19 = vld [vmem:[#allocation10 + $0x200] sm:$0xff]  }
 0x3f8   : > { %9322 = vmatpush3.bf16.msra.mxu0 %v10395_v17  ;;  %9309 = vmatprep.mubr.bf16.mxu0 %v3821_v21  ;;  %v4203_v17 = vld [vmem:[#allocation4 + $0x7] sm:$0xff] }
 0x3f9   : > { %9323 = vmatprep.subr.bf16.mxu0 %v10396_v20  ;;  %v4219_v18 = vpack.c.bf16 %v4204_v53, %v4203_v17  ;;  %v4207_v21 = vld [vmem:[#allocation4 + $0x27] sm:$0xff]  ;;  %v10427_v17 = vld [vmem:[#allocation10 + $0x2a0] sm:$0xff]  }
 0x3fa   : > { %v4618_v53 = vld [vmem:[#allocation4 + $0x61] sm:$0xff] }
 0x3fc   : > { %9324 = vmatpush3.bf16.msra.mxu0 %v10396_v20  ;;  %v4206_v20 = vld [vmem:[#allocation4 + $0x1f] sm:$0xff] }
 0x3fd   : > { %9325 = vmatprep.subr.bf16.mxu0 %v10397_v24  ;;  %v4220_v12 = vpack.c.bf16 %v4206_v20, %v4205_v22  ;;  %v10428_v20 = vld [vmem:[#allocation10 + $0x2a8] sm:$0xff]  }
 0x3fe   : > { %v4621_v22 = vld [vmem:[#allocation4 + $0x79] sm:$0xff] }
 0x3ff   : > { %9310 = vmatmul.mubr.bf16.gmra.mrb[84].mxu0 %v3822_v29  ;;  %v10409_v29 = vld [vmem:[#allocation10 + $0x210] sm:$0xff]  }
 0x400   : > { %9326 = vmatpush3.bf16.msra.mxu0 %v10397_v24  ;;  %9329 = vmatprep.mubr.bf16.mxu0 %v4017_v32  ;;  %v4208_v24 = vld [vmem:[#allocation4 + $0x2f] sm:$0xff]  ;;  %v4210_v32 = vld [vmem:[#allocation4 + $0x3f] sm:$0xff] }
 0x401   : > { %9327 = vmatprep.subr.bf16.mxu0 %v10398_v31  ;;  %v4221_v28 = vpack.c.bf16 %v4208_v24, %v4207_v21  ;;  %v10429_v24 = vld [vmem:[#allocation10 + $0x2b0] sm:$0xff]  }
 0x404   : > { %9328 = vmatpush3.bf16.msra.mxu0 %v10398_v31  ;;  %v4209_v31 = vld [vmem:[#allocation4 + $0x37] sm:$0xff] }
 0x405   : > { %9345 = vmatprep.subr.bf16.mxu0 %v10399_v33  ;;  %v4222_v34 = vpack.c.bf16 %v4210_v32, %v4209_v31  ;;  %v10430_v31 = vld [vmem:[#allocation10 + $0x2b8] sm:$0xff]  }
 0x407   : > { %9330 = vmatmul.mubr.bf16.vlgmr.msra.gmra.mrb[72].mxu0 %v4018_v40  ;;  %v10411_v40 = vld [vmem:[#allocation10 + $0x220] sm:$0xff]  }
 0x408   : > { %9346 = vmatpush3.bf16.msra.mxu0 %v10399_v33  ;;  %9333 = vmatprep.mubr.bf16.mxu0 %v4019_v48  ;;  %v4212_v33 = vld [vmem:[#allocation4 + $0x4f] sm:$0xff]  ;;  %v4214_v48 = vld [vmem:[#allocation4 + $0x5f] sm:$0xff] }
 0x409   : > { %9347 = vmatprep.subr.bf16.mxu0 %v10400_v41  ;;  %v4223_v37 = vpack.c.bf16 %v4212_v33, %v4211_v35  ;;  %v4811_v33 = vld [vmem:[#allocation4 + $0x1a] sm:$0xff]  ;;  %v4814_v35 = vld [vmem:[#allocation4 + $0x32] sm:$0xff] }
 0x40c   : > { %9348 = vmatpush3.bf16.msra.mxu0 %v10400_v41  ;;  %v4213_v41 = vld [vmem:[#allocation4 + $0x57] sm:$0xff] }
 0x40d   : > { %9349 = vmatprep.subr.bf16.mxu0 %v10401_v59  ;;  %v4224_v62 = vpack.c.bf16 %v4214_v48, %v4213_v41  ;;  %v4815_v41 = vld [vmem:[#allocation4 + $0x3a] sm:$0xff]  ;;  %v4816_v48 = vld [vmem:[#allocation4 + $0x42] sm:$0xff] }
 0x40f   : > { %9334 = vmatmul.mubr.bf16.gmra.mrb[76].mxu0 %v4020_v27 }
 0x410   : > { %9350 = vmatpush3.bf16.msra.mxu0 %v10401_v59  ;;  %9337 = vmatprep.mubr.bf16.mxu0 %v4021_v7  ;;  %v4215_v59 = vld [vmem:[#allocation4 + $0x67] sm:$0xff]  ;;  %v4218_v7 = vld [vmem:[#allocation4 + $0x7f] sm:$0x1] }
 0x411   : > { %9351 = vmatprep.subr.bf16.mxu0 %v10402_v42  ;;  %v4225_v27 = vpack.c.bf16 %v4216_v60, %v4215_v59  ;;  %v4817_v59 = vld [vmem:[#allocation4 + $0x4a] sm:$0xff]  ;;  %v4818_v60 = vld [vmem:[#allocation4 + $0x52] sm:$0xff] }
 0x414   : > { %9352 = vmatpush3.bf16.msra.mxu0 %v10402_v42  ;;  %v4217_v42 = vld [vmem:[#allocation4 + $0x77] sm:$0xff] }
 0x415   : > { %9353 = vmatprep.subr.bf16.mxu0 %v10403_v49 }
 0x417   : > { %9338 = vmatmul.mubr.bf16.gmra.mrb[80].mxu0 %v4022_v11  ;;  %v4614_v11 = vld [vmem:[#allocation4 + $0x41] sm:$0xff] }
 0x418   : > { %9354 = vmatpush3.bf16.msra.mxu0 %v10403_v49  ;;  %9341 = vmatprep.mubr.bf16.mxu0 %v4023_v4  ;;  %v4226_v49 = vpack.c.bf16 %v4218_v7, %v4217_v42  ;;  %v4616_v4 = vld [vmem:[#allocation4 + $0x51] sm:$0xff]  ;;  %v4819_v7 = vld [vmem:[#allocation4 + $0x5a] sm:$0xff] }
 0x419   : > { %9355 = vmatprep.subr.bf16.mxu0 %v10404_v13  ;;  %v4822_v42 = vld [vmem:[#allocation4 + $0x72] sm:$0xff] }
 0x41c   : > { %9356 = vmatpush3.bf16.msra.mxu0 %v10404_v13  ;;  %v4615_v13 = vld [vmem:[#allocation4 + $0x49] sm:$0xff] }
 0x41d   : > { %9357 = vmatprep.subr.bf16.mxu0 %v10405_v14  ;;  %v4627_v16 = vpack.c.bf16 %v4616_v4, %v4615_v13 }
 0x41f   : > { %9342 = vmatmul.mubr.bf16.gmra.mrb[84].mxu0 %v4024_v54  ;;  %v4619_v54 = vld [vmem:[#allocation4 + $0x69] sm:$0xff] }
 0x420   : > { %9358 = vmatpush3.bf16.msra.mxu0 %v10405_v14  ;;  %9361 = vmatprep.mubr.bf16.mxu0 %v4219_v18  ;;  %v4617_v18 = vld [vmem:[#allocation4 + $0x59] sm:$0xff] }
 0x421   : > { %9359 = vmatprep.subr.bf16.mxu0 %v10406_v56 }
 0x424   : > { %9360 = vmatpush3.bf16.msra.mxu0 %v10406_v56  ;;  %v4620_v56 = vld [vmem:[#allocation4 + $0x71] sm:$0xff] }
 0x425   : > { %9377 = vmatprep.subr.bf16.mxu0 %v10407_v19  ;;  %v4629_v21 = vpack.c.bf16 %v4620_v56, %v4619_v54 }
 0x427   : > { %9362 = vmatmul.mubr.bf16.vlgmr.msra.gmra.mrb[72].mxu0 %v4220_v12  ;;  %v4622_v12 = vld [vmem:[#allocation4 + $0x81] sm:$0x1] }
 0x428   : > { %9378 = vmatpush3.bf16.msra.mxu0 %v10407_v19  ;;  %9365 = vmatprep.mubr.bf16.mxu0 %v4221_v28  ;;  %v4628_v19 = vpack.c.bf16 %v4618_v53, %v4617_v18  ;;  %v4810_v28 = vld [vmem:[#allocation4 + $0x12] sm:$0xff] }
 0x429   : > { %9379 = vmatprep.subr.bf16.mxu0 %v10408_v25 }
 0x42c   : > { %9380 = vmatpush3.bf16.msra.mxu0 %v10408_v25  ;;  %v4809_v25 = vld [vmem:[#allocation4 + $0xa] sm:$0xff] }
 0x42d   : > { %9381 = vmatprep.subr.bf16.mxu0 %v10409_v29  ;;  %v4825_v32 = vpack.c.bf16 %v4810_v28, %v4809_v25 }
 0x42f   : > { %9366 = vmatmul.mubr.bf16.gmra.mrb[76].mxu0 %v4222_v34  ;;  %v4812_v34 = vld [vmem:[#allocation4 + $0x22] sm:$0xff] }
 0x430   : > { %9382 = vmatpush3.bf16.msra.mxu0 %v10409_v29  ;;  %9369 = vmatprep.mubr.bf16.mxu0 %v4223_v37  ;;  %v4630_v29 = vpack.c.bf16 %v4622_v12, %v4621_v22  ;;  %v4813_v37 = vld [vmem:[#allocation4 + $0x2a] sm:$0xff] }
 0x431   : > { %9383 = vmatprep.subr.bf16.mxu0 %v10410_v36 }
 0x434   : > { %9384 = vmatpush3.bf16.msra.mxu0 %v10410_v36  ;;  %v4826_v36 = vpack.c.bf16 %v4812_v34, %v4811_v33 }
 0x435   : > { %9385 = vmatprep.subr.bf16.mxu0 %v10411_v40 }
 0x437   : > { %9370 = vmatmul.mubr.bf16.gmra.mrb[80].mxu0 %v4224_v62  ;;  %v4828_v62 = vpack.c.bf16 %v4816_v48, %v4815_v41 }
 0x438   : > { %9386 = vmatpush3.bf16.msra.mxu0 %v10411_v40  ;;  %9373 = vmatprep.mubr.bf16.mxu0 %v4225_v27  ;;  %v4827_v40 = vpack.c.bf16 %v4814_v35, %v4813_v37  ;;  %v4820_v27 = vld [vmem:[#allocation4 + $0x62] sm:$0xff] }
 0x439   : > { %9387 = vmatprep.subr.bf16.mxu0 %v10412_v6 }
 0x43c   : > { %9388 = vmatpush3.bf16.msra.mxu0 %v10412_v6  ;;  %v4829_v6 = vpack.c.bf16 %v4818_v60, %v4817_v59 }
 0x43d   : > { %9389 = vmatprep.subr.bf16.mxu0 %v10413_v39 }
 0x43f   : > { %9374 = vmatmul.mubr.bf16.gmra.mrb[84].mxu0 %v4226_v49  ;;  %v4830_v49 = vpack.c.bf16 %v4820_v27, %v4819_v7 }
 0x440   : > { %9390 = vmatpush3.bf16.msra.mxu0 %v10413_v39  ;;  %9393 = vmatprep.mubr.bf16.mxu0 %v4421_v30  ;;  %v10420_v30 = vld [vmem:[#allocation10 + $0x268] sm:$0xff]   ;;  %v4821_v39 = vld [vmem:[#allocation4 + $0x6a] sm:$0xff] }
 0x441   : > { %9391 = vmatprep.subr.bf16.mxu0 %v10414_v1 }
 0x444   : > { %9392 = vmatpush3.bf16.msra.mxu0 %v10414_v1  ;;  %v4831_v1 = vpack.c.bf16 %v4822_v42, %v4821_v39 }
 0x445   : > { %9409 = vmatprep.subr.bf16.mxu0 %v10415_v8 }
 0x447   : > { %9394 = vmatmul.mubr.bf16.vlgmr.msra.gmra.mrb[72].mxu0 %v4422_v0  ;;  %v4428_v0 = vpack.c.bf16 %v4420_v45, %v4419_v44  ;;  %v10435_v44 = vld [vmem:[#allocation11 + $0x60] sm:$0xff]   ;;  %v10436_v45 = vld [vmem:[#allocation11 + $0x68] sm:$0xff]  }
 0x448   : > { %9410 = vmatpush3.bf16.msra.mxu0 %v10415_v8  ;;  %9397 = vmatprep.mubr.bf16.mxu0 %v4423_v58  ;;  %v4609_v58 = vld [vmem:[#allocation4 + $0x19] sm:$0xff] }
 0x449   : > { %9411 = vmatprep.subr.bf16.mxu0 %v10416_v9  ;;  %v4823_v8 = vld [vmem:[#allocation4 + $0x7a] sm:$0xff] }
 0x44c   : > { %9412 = vmatpush3.bf16.msra.mxu0 %v10416_v9  ;;  %v4824_v9 = vld [vmem:[#allocation4 + $0x82] sm:$0x1] }
 0x44d   : > { %9413 = vmatprep.subr.bf16.mxu0 %v10417_v10 }
 0x44f   : > { %9398 = vmatmul.mubr.bf16.gmra.mrb[76].mxu0 %v4424_v2  ;;  %v4624_v2 = vpack.c.bf16 %v4610_v61, %v4609_v58 }
 0x450   : > { %9414 = vmatpush3.bf16.msra.mxu0 %v10417_v10  ;;  %9401 = vmatprep.mubr.bf16.mxu0 %v4425_v3  ;;  %v4611_v3 = vld [vmem:[#allocation4 + $0x29] sm:$0xff]  ;;  %v4832_v10 = vpack.c.bf16 %v4824_v9, %v4823_v8 }
 0x451   : > { %9415 = vmatprep.subr.bf16.mxu0 %v10418_v23 }
 0x454   : > { %9416 = vmatpush3.bf16.msra.mxu0 %v10418_v23  ;;  %v10431_v23 = vld [vmem:[#allocation11 + $0x40] sm:$0xff]  }
 0x455   : > { %9417 = vmatprep.subr.bf16.mxu0 %v10419_v26  ;;  %9473 = vmatprep.subr.bf16.mxu1 %v10431_v23 }
 0x456   : > { %9474 = vmatpush3.bf16.msra.mxu1 %v10431_v23 }
 0x457   : > { %9402 = vmatmul.mubr.bf16.gmra.mrb[80].mxu0 %v4426_v51  ;;  %v4625_v51 = vpack.c.bf16 %v4612_v63, %v4611_v3 }
 0x458   : > { %9418 = vmatpush3.bf16.msra.mxu0 %v10419_v26  ;;  %9405 = vmatprep.mubr.bf16.mxu0 %v4427_v5  ;;  %v4613_v5 = vld [vmem:[#allocation4 + $0x39] sm:$0xff] }
 0x459   : > { %9419 = vmatprep.subr.bf16.mxu0 %v10420_v30  ;;  %v4626_v14 = vpack.c.bf16 %v4614_v11, %v4613_v5  ;;  %v10432_v26 = vld [vmem:[#allocation11 + $0x48] sm:$0xff]  }
 0x45a   : > { %9475 = vmatprep.subr.bf16.mxu1 %v10432_v26 }
 0x45b   : > { %9476 = vmatpush3.bf16.msra.mxu1 %v10432_v26 }
 0x45c   : > { %9420 = vmatpush3.bf16.msra.mxu0 %v10420_v30  ;;  %v10433_v30 = vld [vmem:[#allocation11 + $0x50] sm:$0xff]  }
 0x45d   : > { %9421 = vmatprep.subr.bf16.mxu0 %v10421_v43  ;;  %9477 = vmatprep.subr.bf16.mxu1 %v10433_v30 }
 0x45f   : > { %9406 = vmatmul.mubr.bf16.gmra.mrb[84].mxu0 %v4428_v0  ;;  %9478 = vmatpush3.bf16.msra.mxu1 %v10433_v30  ;;  %v11549_v0 = vld [vmem:[#allocation11] sm:$0xff]  }
 0x460   : > { %9422 = vmatpush3.bf16.msra.mxu0 %v10421_v43  ;;  %9425 = vmatprep.mubr.bf16.mxu0 %v4623_v52  ;;  %v10434_v43 = vld [vmem:[#allocation11 + $0x58] sm:$0xff]  }
 0x461   : > { %9423 = vmatprep.subr.bf16.mxu0 %v10422_v50  ;;  %9479 = vmatprep.subr.bf16.mxu1 %v10434_v43 }
 0x463   : > { %9480 = vmatpush3.bf16.msra.mxu1 %v10434_v43 }
 0x464   : > { %9424 = vmatpush3.bf16.msra.mxu0 %v10422_v50  ;;  %9481 = vmatprep.subr.bf16.mxu1 %v10435_v44  ;;  %v11555_v50 = vld [vmem:[%s12150_s6] ss:$0 sm:$0xff] }
 0x465   : > { %9441 = vmatprep.subr.bf16.mxu0 %v10423_v57 }
 0x467   : > { %9426 = vmatmul.mubr.bf16.vlgmr.msra.gmra.mrb[72].mxu0 %v4624_v2  ;;  %9482 = vmatpush3.bf16.msra.mxu1 %v10435_v44 }
 0x468   : > { %9442 = vmatpush3.bf16.msra.mxu0 %v10423_v57  ;;  %9429 = vmatprep.mubr.bf16.mxu0 %v4625_v51 }
 0x469   : > { %9443 = vmatprep.subr.bf16.mxu0 %v10424_v38  ;;  %9483 = vmatprep.subr.bf16.mxu1 %v10436_v45 }
 0x46b   : > { %9484 = vmatpush3.bf16.msra.mxu1 %v10436_v45 }
 0x46c   : > { %9444 = vmatpush3.bf16.msra.mxu0 %v10424_v38  ;;  %9485 = vmatprep.subr.bf16.mxu1 %v10437_v46 }
 0x46d   : > { %9445 = vmatprep.subr.bf16.mxu0 %v10425_v55 }
 0x46f   : > { %9430 = vmatmul.mubr.bf16.gmra.mrb[76].mxu0 %v4626_v14  ;;  %9486 = vmatpush3.bf16.msra.mxu1 %v10437_v46 }
 0x470   : > { %9446 = vmatpush3.bf16.msra.mxu0 %v10425_v55  ;;  %9433 = vmatprep.mubr.bf16.mxu0 %v4627_v16 }
 0x471   : > { %9447 = vmatprep.subr.bf16.mxu0 %v10426_v15  ;;  %9487 = vmatprep.subr.bf16.mxu1 %v10438_v47 }
 0x473   : > { %9488 = vmatpush3.bf16.msra.mxu1 %v10438_v47 }
 0x474   : > { %9448 = vmatpush3.bf16.msra.mxu0 %v10426_v15  ;;  %9505 = vmatprep.subr.bf16.mxu1 %v11549_v0 }
 0x475   : > { %9449 = vmatprep.subr.bf16.mxu0 %v10427_v17 }
 0x477   : > { %9434 = vmatmul.mubr.bf16.gmra.mrb[80].mxu0 %v4628_v19 }
 0x478   : > { %9450 = vmatpush3.bf16.msra.mxu0 %v10427_v17  ;;  %9437 = vmatprep.mubr.bf16.mxu0 %v4629_v21 }
 0x479   : > { %9451 = vmatprep.subr.bf16.mxu0 %v10428_v20 }
 0x47c   : > { %9452 = vmatpush3.bf16.msra.mxu0 %v10428_v20 }
 0x47d   : > { %9453 = vmatprep.subr.bf16.mxu0 %v10429_v24 }
 0x47f   : > { %9438 = vmatmul.mubr.bf16.gmra.mrb[84].mxu0 %v4630_v29 }
 0x480   : > { %9454 = vmatpush3.bf16.msra.mxu0 %v10429_v24  ;;  %9457 = vmatprep.mubr.bf16.mxu0 %v4825_v32 }
 0x481   : > { %9455 = vmatprep.subr.bf16.mxu0 %v10430_v31 }
 0x484   : > { %9456 = vmatpush3.bf16.msra.mxu0 %v10430_v31 }
 0x487   : > { %9458 = vmatmul.mubr.bf16.vlgmr.msra.gmra.mrb[72].mxu0 %v4826_v36 }
 0x488   : > { %9461 = vmatprep.mubr.bf16.mxu0 %v4827_v40 }
 0x48f   : > { %9462 = vmatmul.mubr.bf16.gmra.mrb[76].mxu0 %v4828_v62 }
 0x490   : > { %9465 = vmatprep.mubr.bf16.mxu0 %v4829_v6 }
 0x497   : > { %9466 = vmatmul.mubr.bf16.gmra.mrb[80].mxu0 %v4830_v49 }
 0x498   : > { %9469 = vmatprep.mubr.bf16.mxu0 %v4831_v1 }
 0x49f   : > { %9470 = vmatmul.mubr.bf16.gmra.mrb[84].mxu0 %v4832_v10 }
 0x55a   : > { %v9459_v52 = vpop.f32.mrb[72].mxu0 }
 0x55b   : > { %v11558_v57 = vadd.f32 %v9459_v52, %v11555_v50  ;;  %v4932_v58 = vpop.f32.mrb[73].mxu0 }
 0x55c   : > { %v11561_v61 = vadd.f32 %v11555_v50, %v4932_v58  ;;  %v9460_v63 = vpop.f32.mrb[74].mxu0 }
 0x55d   : > { %v5036_v2 = vsub.f32 0.0, %v11558_v57  ;;  %v11565_v3 = vadd.f32 %v9460_v63, %v11555_v50  ;;  %v4935_v38 = vpop.f32.mrb[75].mxu0 }
 0x55e   : > { %v5034_v51 = vsub.f32 0.0, %v11561_v61  ;;  %v11569_v55 = vadd.f32 %v11555_v50, %v4935_v38 }
 0x55f   : > { %v5054_v5 = vmul.f32 1.442695, %v5036_v2  ;;  %v5037_v11 = vsub.f32 0.0, %v11565_v3 }
 0x560   : > { %v5050_v13 = vmul.f32 1.442695, %v5034_v51  ;;  %v5035_v4 = vsub.f32 0.0, %v11569_v55 }
 0x561   : > { %10575 = vpow2.f32 %v5054_v5  ;;  %v5056_v14 = vmul.f32 1.442695, %v5037_v11 }
 0x562   : > { %10577 = vpow2.f32 %v5050_v13  ;;  %v5052_v15 = vmul.f32 1.442695, %v5035_v4  ;;  %v9463_v16 = vpop.f32.mrb[76].mxu0 }
 0x563   : > { %10579 = vpow2.f32 %v5056_v14  ;;  %v11574_v17 = vadd.f32 %v9463_v16, %v11555_v50  ;;  %v4948_v53 = vpop.f32.mrb[77].mxu0 }
 0x564   : > { %10581 = vpow2.f32 %v5052_v15  ;;  %v11577_v54 = vadd.f32 %v11555_v50, %v4948_v53  ;;  %v9464_v56 = vpop.f32.mrb[78].mxu0 }
 0x565   : > { %v5040_v18 = vsub.f32 0.0, %v11574_v17  ;;  %v11581_v19 = vadd.f32 %v9464_v56, %v11555_v50  ;;  %v4951_v20 = vpop.f32.mrb[79].mxu0 }
 0x566   : > { %v5038_v21 = vsub.f32 0.0, %v11577_v54  ;;  %v11585_v24 = vadd.f32 %v11555_v50, %v4951_v20 }
 0x567   : > { %v5062_v22 = vmul.f32 1.442695, %v5040_v18  ;;  %v5041_v12 = vsub.f32 0.0, %v11581_v19 }
 0x568   : > { %v5058_v25 = vmul.f32 1.442695, %v5038_v21  ;;  %v5039_v28 = vsub.f32 0.0, %v11585_v24 }
 0x569   : > { %10583 = vpow2.f32 %v5062_v22  ;;  %v5064_v29 = vmul.f32 1.442695, %v5041_v12 }
 0x56a   : > { %10585 = vpow2.f32 %v5058_v25  ;;  %v5060_v31 = vmul.f32 1.442695, %v5039_v28  ;;  %v9467_v32 = vpop.f32.mrb[80].mxu0 }
 0x56b   : > { %v10576_v33 = vpop.eup %10575  ;;  %10587 = vpow2.f32 %v5064_v29  ;;  %v11590_v34 = vadd.f32 %v9467_v32, %v11555_v50  ;;  %v4964_v35 = vpop.f32.mrb[81].mxu0 }
 0x56c   : > { %v10578_v36 = vpop.eup %10577  ;;  %v5084_v37 = vadd.f32 1.0, %v10576_v33  ;;  %10589 = vpow2.f32 %v5060_v31  ;;  %v11593_v40 = vadd.f32 %v11555_v50, %v4964_v35  ;;  %v9468_v41 = vpop.f32.mrb[82].mxu0 }
 0x56d   : > { %v10580_v48 = vpop.eup %10579  ;;  %v5082_v59 = vadd.f32 1.0, %v10578_v36  ;;  %v5044_v60 = vsub.f32 0.0, %v11590_v34  ;;  %v11597_v62 = vadd.f32 %v9468_v41, %v11555_v50  ;;  %v4967_v6 = vpop.f32.mrb[83].mxu0 }
 0x56e   : > { %v10582_v27 = vpop.eup %10581  ;;  %10591 = vrcp.f32 %v5084_v37  ;;  %v5085_v39 = vadd.f32 1.0, %v10580_v48  ;;  %v5042_v42 = vsub.f32 0.0, %v11593_v40  ;;  %v11601_v7 = vadd.f32 %v11555_v50, %v4967_v6 }
 0x56f   : > { %10593 = vrcp.f32 %v5082_v59  ;;  %v5083_v49 = vadd.f32 1.0, %v10582_v27  ;;  %v5070_v1 = vmul.f32 1.442695, %v5044_v60  ;;  %v5045_v8 = vsub.f32 0.0, %v11597_v62 }
 0x570   : > { %10595 = vrcp.f32 %v5085_v39  ;;  %v5066_v9 = vmul.f32 1.442695, %v5042_v42  ;;  %v5043_v10 = vsub.f32 0.0, %v11601_v7 }
 0x571   : > { %10597 = vrcp.f32 %v5083_v49  ;;  %v5072_v23 = vmul.f32 1.442695, %v5045_v8 }
 0x572   : > { %10599 = vpow2.f32 %v5070_v1  ;;  %v5068_v26 = vmul.f32 1.442695, %v5043_v10  ;;  %v9471_v30 = vpop.f32.mrb[84].mxu0 }
 0x573   : > { %v10584_v43 = vpop.eup %10583  ;;  %10601 = vpow2.f32 %v5066_v9  ;;  %v11606_v44 = vadd.f32 %v9471_v30, %v11555_v50  ;;  %v4980_v45 = vpop.f32.mrb[85].mxu0 }
 0x574   : > { %v10586_v46 = vpop.eup %10585  ;;  %v5088_v47 = vadd.f32 1.0, %v10584_v43  ;;  %10603 = vpow2.f32 %v5072_v23  ;;  %v11609_v52 = vadd.f32 %v11555_v50, %v4980_v45  ;;  %v9472_v58 = vpop.f32.mrb[86].mxu0 }
 0x575   : > { %v10588_v63 = vpop.eup %10587  ;;  %v5086_v2 = vadd.f32 1.0, %v10586_v46  ;;  %10605 = vpow2.f32 %v5068_v26  ;;  %v5048_v38 = vsub.f32 0.0, %v11606_v44  ;;  %v11613_v51 = vadd.f32 %v9472_v58, %v11555_v50  ;;  %v4983_v5 = vpop.f32.mrb[87].mxu0  ;;  %v10440_v58 = vld [vmem:[#allocation11 + $0x8] sm:$0xff]  }
 0x576   : > { %v10590_v11 = vpop.eup %10589  ;;  %10607 = vrcp.f32 %v5088_v47  ;;  %v5089_v13 = vadd.f32 1.0, %v10588_v63  ;;  %v5046_v4 = vsub.f32 0.0, %v11609_v52  ;;  %v11617_v14 = vadd.f32 %v11555_v50, %v4983_v5 }
 0x577   : > { %10609 = vrcp.f32 %v5086_v2  ;;  %v5087_v15 = vadd.f32 1.0, %v10590_v11  ;;  %v5078_v16 = vmul.f32 1.442695, %v5048_v38  ;;  %v5049_v53 = vsub.f32 0.0, %v11613_v51 }
 0x578   : > { %v10592_v56 = vpop.eup %10591  ;;  %10611 = vrcp.f32 %v5089_v13  ;;  %v5074_v18 = vmul.f32 1.442695, %v5046_v4  ;;  %v5047_v20 = vsub.f32 0.0, %v11617_v14  ;;  %v10441_v4 = vld [vmem:[#allocation11 + $0x10] sm:$0xff]  }
 0x579   : > { %v10594_v21 = vpop.eup %10593  ;;  %v11622_v22 = vmul.f32 %v10592_v56, %v11558_v57  ;;  %10613 = vrcp.f32 %v5087_v15  ;;  %v5080_v12 = vmul.f32 1.442695, %v5049_v53 }
 0x57a   : > { %v10596_v25 = vpop.eup %10595  ;;  %v11625_v50 = vmul.f32 %v10594_v21, %v11561_v61  ;;  %10615 = vpow2.f32 %v5078_v16  ;;  %v5076_v28 = vmul.f32 1.442695, %v5047_v20 }
 0x57b   : > { %v10598_v29 = vpop.eup %10597  ;;  %5132 = vst [vmem:[#allocation5 + $0x18] sm:$0xff] %v11622_v22  ;;  %v11629_v31 = vmul.f32 %v10596_v25, %v11565_v3  ;;  %10617 = vpow2.f32 %v5074_v18 }
 0x57c   : > { %v10600_v32 = vpop.eup %10599  ;;  %5130 = vst [vmem:[#allocation5 + $0x8] sm:$0xff] %v11625_v50  ;;  %v11633_v57 = vmul.f32 %v10598_v29, %v11569_v55  ;;  %10619 = vpow2.f32 %v5080_v12 }
 0x57d   : > { %v10602_v33 = vpop.eup %10601  ;;  %5133 = vst [vmem:[#allocation5 + $0x20] sm:$0xff] %v11629_v31  ;;  %v5092_v61 = vadd.f32 1.0, %v10600_v32  ;;  %10621 = vpow2.f32 %v5076_v28 }
 0x57e   : > { %v10604_v35 = vpop.eup %10603  ;;  %5131 = vst [vmem:[#allocation5 + $0x10] sm:$0xff] %v11633_v57  ;;  %v5090_v36 = vadd.f32 1.0, %v10602_v33  ;;  %v5163_v3 = vpack.c.bf16 %v11622_v22, %v11633_v57  ;;  %v10443_v33 = vld [vmem:[#allocation11 + $0x20] sm:$0xff]   ;;  %v10453_v57 = vld [vmem:[#allocation11 + $0xb0] sm:$0xff]  }
 0x57f   : > { %v10606_v37 = vpop.eup %10605  ;;  %10623 = vrcp.f32 %v5092_v61  ;;  %v5093_v41 = vadd.f32 1.0, %v10604_v35  ;;  %v10451_v22 = vld [vmem:[#allocation11 + $0xa0] sm:$0xff]  }
 0x580   : > { %v10608_v48 = vpop.eup %10607  ;;  %10625 = vrcp.f32 %v5090_v36  ;;  %v5091_v55 = vadd.f32 1.0, %v10606_v37 }
 0x581   : > { %v10610_v59 = vpop.eup %10609  ;;  %v11640_v60 = vmul.f32 %v10608_v48, %v11574_v17  ;;  %10627 = vrcp.f32 %v5093_v41 }
 0x582   : > { %v10612_v6 = vpop.eup %10611  ;;  %v11643_v27 = vmul.f32 %v10610_v59, %v11577_v54  ;;  %10629 = vrcp.f32 %v5091_v55 }
 0x583   : > { %v10614_v39 = vpop.eup %10613  ;;  %5136 = vst [vmem:[#allocation5 + $0x38] sm:$0xff] %v11640_v60  ;;  %v11647_v42 = vmul.f32 %v10612_v6, %v11581_v19  ;;  %v5186_v10 = vld [vmem:[#allocation5 + $0x1] sm:$0xff] }
 0x584   : > { %v10616_v49 = vpop.eup %10615  ;;  %5134 = vst [vmem:[#allocation5 + $0x28] sm:$0xff] %v11643_v27  ;;  %v11651_v1 = vmul.f32 %v10614_v39, %v11585_v24  ;;  %v5189_v17 = vld [vmem:[#allocation5 + $0x19] sm:$0xff]  ;;  %v5164_v8 = vpack.c.bf16 %v11643_v27, %v11629_v31 }
 0x585   : > { %v10618_v9 = vpop.eup %10617  ;;  %5137 = vst [vmem:[#allocation5 + $0x40] sm:$0xff] %v11647_v42  ;;  %v5096_v54 = vadd.f32 1.0, %v10616_v49  ;;  %v5187_v23 = vld [vmem:[#allocation5 + $0x9] sm:$0xff]  ;;  %v5188_v26 = vld [vmem:[#allocation5 + $0x11] sm:$0xff] }
 0x586   : > { %v10620_v30 = vpop.eup %10619  ;;  %5135 = vst [vmem:[#allocation5 + $0x30] sm:$0xff] %v11651_v1  ;;  %v5094_v19 = vadd.f32 1.0, %v10618_v9  ;;  %v5202_v43 = vpack.c.bf16 %v5187_v23, %v5186_v10  ;;  %v5203_v45 = vpack.c.bf16 %v5189_v17, %v5188_v26  ;;  %v5165_v24 = vpack.c.bf16 %v11640_v60, %v11651_v1  ;;  %v10446_v10 = vld [vmem:[#allocation11 + $0x38] sm:$0xff]   ;;  %v10770_v23 = vld [vmem:[#allocation2] sm:$0xff] }
 0x587   : > { %v10622_v46 = vpop.eup %10621  ;;  %10631 = vrcp.f32 %v5096_v54  ;;  %v5097_v47 = vadd.f32 1.0, %v10620_v30  ;;  %v5162_v26 = vpack.c.bf16 %v11625_v50, %v10770_v23  ;;  %v10447_v30 = vld [vmem:[#allocation11 + $0x80] sm:$0xff]   ;;  %v10450_v50 = vld [vmem:[#allocation11 + $0x98] sm:$0xff]   ;;  %v10452_v31 = vld [vmem:[#allocation11 + $0xa8] sm:$0xff]  }
 0x588   : > { %10633 = vrcp.f32 %v5094_v19  ;;  %v5095_v63 = vadd.f32 1.0, %v10622_v46  ;;  %9489 = vmatprep.mubr.bf16.mxu1 %v5202_v43  ;;  %v10448_v19 = vld [vmem:[#allocation11 + $0x88] sm:$0xff]   ;;  %v10449_v43 = vld [vmem:[#allocation11 + $0x90] sm:$0xff]   ;;  %v5518_v60 = vld [vmem:[#allocation5 + $0xa] sm:$0xff] }
 0x589   : > { %v10624_v2 = vpop.eup %10623  ;;  %10635 = vrcp.f32 %v5097_v47  ;;  %9490 = vmatmul.mubr.bf16.vlgmr.msra.gmra.mrb[80].mxu1 %v5203_v45  ;;  %v10454_v1 = vld [vmem:[#allocation11 + $0xb8] sm:$0xff]   ;;  %v10455_v45 = vld [vmem:[#allocation11 + $0xc0] sm:$0xff]   ;;  %v5520_v46 = vld [vmem:[#allocation5 + $0x1a] sm:$0xff] }
 0x58a   : > { %v10626_v38 = vpop.eup %10625  ;;  %v11660_v5 = vmul.f32 %v10624_v2, %v11590_v34  ;;  %10637 = vrcp.f32 %v5095_v63  ;;  %9506 = vmatpush3.bf16.msra.mxu1 %v11549_v0  ;;  %v10456_v2 = vld [vmem:[#allocation11 + $0xc8] sm:$0xff]  }
 0x58b   : > { %v10628_v11 = vpop.eup %10627  ;;  %v11664_v13 = vmul.f32 %v10626_v38, %v11593_v40  ;;  %9507 = vmatprep.subr.bf16.mxu1 %v10440_v58  ;;  %v5190_v56 = vld [vmem:[#allocation5 + $0x21] sm:$0xff] }
 0x58c   : > { %v10630_v15 = vpop.eup %10629  ;;  %5140 = vst [vmem:[#allocation5 + $0x58] sm:$0xff] %v11660_v5  ;;  %v11668_v16 = vmul.f32 %v10628_v11, %v11597_v62  ;;  %v5193_v53 = vld [vmem:[#allocation5 + $0x39] sm:$0xff]  ;;  %v10442_v62 = vld [vmem:[#allocation11 + $0x18] sm:$0xff]  }
 0x58d   : > { %5138 = vst [vmem:[#allocation5 + $0x48] sm:$0xff] %v11664_v13  ;;  %v11672_v34 = vmul.f32 %v10630_v15, %v11601_v7  ;;  %v5191_v0 = vld [vmem:[#allocation5 + $0x29] sm:$0xff]  ;;  %v5192_v18 = vld [vmem:[#allocation5 + $0x31] sm:$0xff]  ;;  %v5166_v40 = vpack.c.bf16 %v11664_v13, %v11647_v42  ;;  %v5524_v13 = vld [vmem:[#allocation5 + $0x3a] sm:$0xff] }
 0x58e   : > { %5141 = vst [vmem:[#allocation5 + $0x60] sm:$0xff] %v11668_v16  ;;  %9508 = vmatpush3.bf16.msra.mxu1 %v10440_v58  ;;  %v5204_v20 = vpack.c.bf16 %v5191_v0, %v5190_v56  ;;  %v5205_v21 = vpack.c.bf16 %v5193_v53, %v5192_v18  ;;  %v5517_v42 = vld [vmem:[#allocation5 + $0x2] sm:$0xff]  ;;  %v5522_v47 = vld [vmem:[#allocation5 + $0x2a] sm:$0xff]  ;;  %v5523_v11 = vld [vmem:[#allocation5 + $0x32] sm:$0xff] }
 0x58f   : > { %5139 = vst [vmem:[#allocation5 + $0x50] sm:$0xff] %v11672_v34  ;;  %9509 = vmatprep.subr.bf16.mxu1 %v10441_v4  ;;  %v5167_v12 = vpack.c.bf16 %v11660_v5, %v11672_v34  ;;  %v5521_v63 = vld [vmem:[#allocation5 + $0x22] sm:$0xff]  ;;  %v5536_v15 = vpack.c.bf16 %v5524_v13, %v5523_v11  ;;  %v10459_v56 = vld [vmem:[#allocation11 + $0xe0] sm:$0xff]  }
 0x590   : > { %9493 = vmatprep.mubr.bf16.mxu1 %v5204_v20  ;;  %v5535_v38 = vpack.c.bf16 %v5522_v47, %v5521_v63  ;;  %v10457_v5 = vld [vmem:[#allocation11 + $0xd0] sm:$0xff]   ;;  %v10458_v53 = vld [vmem:[#allocation11 + $0xd8] sm:$0xff]   ;;  %v5927_v11 = vld [vmem:[#allocation5 + $0x34] sm:$0xff] }
 0x591   : > { %v10632_v7 = vpop.eup %10631  ;;  %9494 = vmatmul.mubr.bf16.gmra.mrb[84].mxu1 %v5205_v21  ;;  %v5926_v47 = vld [vmem:[#allocation5 + $0x2c] sm:$0xff]  ;;  %v5925_v63 = vld [vmem:[#allocation5 + $0x24] sm:$0xff]  ;;  %v5928_v13 = vld [vmem:[#allocation5 + $0x3c] sm:$0xff] }
 0x592   : > { %v10634_v25 = vpop.eup %10633  ;;  %v5128_v28 = vmul.f32 %v10632_v7, %v11606_v44  ;;  %9510 = vmatpush3.bf16.msra.mxu1 %v10441_v4  ;;  %v10461_v7 = vld [vmem:[#allocation11 + $0xf0] sm:$0xff]  }
 0x593   : > { %v10636_v29 = vpop.eup %10635  ;;  %v11682_v32 = vmul.f32 %v10634_v25, %v11609_v52  ;;  %9511 = vmatprep.subr.bf16.mxu1 %v10442_v62 }
 0x594   : > { %v10638_v61 = vpop.eup %10637  ;;  %5144 = vst [vmem:[#allocation5 + $0x78] sm:$0xff] %v5128_v28  ;;  %v5129_v35 = vmul.f32 %v10636_v29, %v11613_v51  ;;  %v5194_v41 = vld [vmem:[#allocation5 + $0x41] sm:$0xff]  ;;  %v10444_v51 = vld [vmem:[#allocation11 + $0x28] sm:$0xff]   ;;  %v5720_v29 = vld [vmem:[#allocation5 + $0xb] sm:$0xff] }
 0x595   : > { %5142 = vst [vmem:[#allocation5 + $0x68] sm:$0xff] %v11682_v32  ;;  %v11687_v36 = vmul.f32 %v10638_v61, %v11617_v14  ;;  %v5197_v37 = vld [vmem:[#allocation5 + $0x59] sm:$0xff]  ;;  %v5168_v44 = vpack.c.bf16 %v11682_v32, %v11668_v16  ;;  %v5525_v16 = vld [vmem:[#allocation5 + $0x42] sm:$0xff] }
 0x596   : > { %5145 = vst [vmem:[#allocation5 + $0x80] sm:$0x1] %v5129_v35  ;;  %9512 = vmatpush3.bf16.msra.mxu1 %v10442_v62  ;;  %v5195_v52 = vld [vmem:[#allocation5 + $0x49] sm:$0xff]  ;;  %v5196_v48 = vld [vmem:[#allocation5 + $0x51] sm:$0xff]  ;;  %v10445_v14 = vld [vmem:[#allocation11 + $0x30] sm:$0xff]  }
 0x597   : > { %5143 = vst [vmem:[#allocation5 + $0x70] sm:$0xff] %v11687_v36  ;;  %v5206_v55 = vpack.c.bf16 %v5195_v52, %v5194_v41  ;;  %9513 = vmatprep.subr.bf16.mxu1 %v10443_v33  ;;  %v5207_v59 = vpack.c.bf16 %v5197_v37, %v5196_v48  ;;  %v5526_v4 = vld [vmem:[#allocation5 + $0x4a] sm:$0xff]  ;;  %v5527_v0 = vld [vmem:[#allocation5 + $0x52] sm:$0xff]  ;;  %v5528_v18 = vld [vmem:[#allocation5 + $0x5a] sm:$0xff] }
 0x598   : > { %v5537_v34 = vpack.c.bf16 %v5526_v4, %v5525_v16  ;;  %v5538_v20 = vpack.c.bf16 %v5528_v18, %v5527_v0  ;;  %v10460_v62 = vld [vmem:[#allocation11 + $0xe8] sm:$0xff]   ;;  %v10462_v61 = vld [vmem:[#allocation11 + $0xf8] sm:$0xff]  }
 0x599   : > { %9497 = vmatprep.mubr.bf16.mxu1 %v5206_v55  ;;  %v5721_v37 = vld [vmem:[#allocation5 + $0x13] sm:$0xff]  ;;  %v5724_v41 = vld [vmem:[#allocation5 + $0x2b] sm:$0xff]  ;;  %v5723_v48 = vld [vmem:[#allocation5 + $0x23] sm:$0xff] }
 0x59a   : > { %9498 = vmatmul.mubr.bf16.gmra.mrb[88].mxu1 %v5207_v59  ;;  %v10464_v55 = vld [vmem:[#allocation11 + $0x108] sm:$0xff]   ;;  %v5737_v59 = vpack.c.bf16 %v5724_v41, %v5723_v48  ;;  %v5930_v4 = vld [vmem:[#allocation5 + $0x4c] sm:$0xff]  ;;  %v5929_v16 = vld [vmem:[#allocation5 + $0x44] sm:$0xff] }
 0x59b   : > { %9514 = vmatpush3.bf16.msra.mxu1 %v10443_v33  ;;  %v5201_v6 = vld [vmem:[#allocation5 + $0x79] sm:$0x7f]  ;;  %v5719_v33 = vld [vmem:[#allocation5 + $0x3] sm:$0xff]  ;;  %v6128_v41 = vld [vmem:[#allocation5 + $0x2d] sm:$0xff] }
 0x59c   : > { %9515 = vmatprep.subr.bf16.mxu1 %v10444_v51  ;;  %v5198_v39 = vld [vmem:[#allocation5 + $0x61] sm:$0xff]  ;;  %v5735_v35 = vpack.c.bf16 %v5720_v29, %v5719_v33  ;;  %v5729_v23 = vld [vmem:[#allocation5 + $0x53] sm:$0xff] }
 0x59d   : > { %v5529_v21 = vld [vmem:[#allocation5 + $0x62] sm:$0xff]  ;;  %v5532_v28 = vld [vmem:[#allocation5 + $0x7a] sm:$0x7f]  ;;  %v6124_v29 = vld [vmem:[#allocation5 + $0xd] sm:$0xff] }
 0x59e   : > { %v5199_v49 = vld [vmem:[#allocation5 + $0x69] sm:$0xff]  ;;  %v5200_v17 = vld [vmem:[#allocation5 + $0x71] sm:$0xff]  ;;  %v5932_v18 = vld [vmem:[#allocation5 + $0x5c] sm:$0xff] }
 0x59f   : > { %9516 = vmatpush3.bf16.msra.mxu1 %v10444_v51  ;;  %v5208_v9 = vpack.c.bf16 %v5199_v49, %v5198_v39  ;;  %v5209_v54 = vpack.c.bf16 %v5201_v6, %v5200_v17  ;;  %v5531_v25 = vld [vmem:[#allocation5 + $0x72] sm:$0xff]  ;;  %v10465_v51 = vld [vmem:[#allocation11 + $0x110] sm:$0xff]  }
 0x5a0   : > { %9517 = vmatprep.subr.bf16.mxu1 %v10445_v14  ;;  %v5540_v32 = vpack.c.bf16 %v5532_v28, %v5531_v25  ;;  %v5726_v6 = vld [vmem:[#allocation5 + $0x3b] sm:$0xff]  ;;  %v5728_v39 = vld [vmem:[#allocation5 + $0x4b] sm:$0xff]  ;;  %v5727_v17 = vld [vmem:[#allocation5 + $0x43] sm:$0xff] }
 0x5a1   : > { %9501 = vmatprep.mubr.bf16.mxu1 %v5208_v9  ;;  %v10466_v9 = vld [vmem:[#allocation11 + $0x118] sm:$0xff]   ;;  %v5931_v0 = vld [vmem:[#allocation5 + $0x54] sm:$0xff]  ;;  %v5936_v28 = vld [vmem:[#allocation5 + $0x7c] sm:$0x7f] }
 0x5a2   : > { %9502 = vmatmul.mubr.bf16.gmra.mrb[92].mxu1 %v5209_v54  ;;  %v5739_v54 = vpack.c.bf16 %v5728_v39, %v5727_v17  ;;  %v5935_v25 = vld [vmem:[#allocation5 + $0x74] sm:$0xff]  ;;  %v6123_v33 = vld [vmem:[#allocation5 + $0x5] sm:$0xff] }
 0x5a3   : > { %9518 = vmatpush3.bf16.msra.mxu1 %v10445_v14  ;;  %9521 = vmatprep.mubr.bf16.mxu1 %v5162_v26  ;;  %v5725_v14 = vld [vmem:[#allocation5 + $0x33] sm:$0xff]  ;;  %v5730_v26 = vld [vmem:[#allocation5 + $0x5b] sm:$0xff]  ;;  %v6127_v48 = vld [vmem:[#allocation5 + $0x25] sm:$0xff] }
 0x5a4   : > { %9519 = vmatprep.subr.bf16.mxu1 %v10446_v10  ;;  %v5738_v49 = vpack.c.bf16 %v5726_v6, %v5725_v14  ;;  %v6129_v14 = vld [vmem:[#allocation5 + $0x35] sm:$0xff]  ;;  %v6130_v6 = vld [vmem:[#allocation5 + $0x3d] sm:$0xff]  ;;  %v6132_v39 = vld [vmem:[#allocation5 + $0x4d] sm:$0xff] }
 0x5a5   : > { %v6131_v17 = vld [vmem:[#allocation5 + $0x45] sm:$0xff] }
 0x5a7   : > { %9520 = vmatpush3.bf16.msra.mxu1 %v10446_v10  ;;  %v10467_v10 = vld [vmem:[#allocation11 + $0x120] sm:$0xff]  }
 0x5a8   : > { %9537 = vmatprep.subr.bf16.mxu1 %v10447_v30 }
 0x5aa   : > { %9522 = vmatmul.mubr.bf16.vlgmr.msra.gmra.mrb[80].mxu1 %v5163_v3  ;;  %v5161_v3 = vld [vmem:[#allocation5 + $0x78] sm:$0x7f] }
 0x5ab   : > { %9538 = vmatpush3.bf16.msra.mxu1 %v10447_v30  ;;  %9525 = vmatprep.mubr.bf16.mxu1 %v5164_v8  ;;  %v5169_v27 = vpack.c.bf16 %v5161_v3, %v11687_v36  ;;  %v5533_v8 = vpack.c.bf16 %v5518_v60, %v5517_v42  ;;  %v10463_v36 = vld [vmem:[#allocation11 + $0x100] sm:$0xff]   ;;  %v5734_v3 = vld [vmem:[#allocation5 + $0x7b] sm:$0x7f]  ;;  %v5921_v42 = vld [vmem:[#allocation5 + $0x4] sm:$0xff] }
 0x5ac   : > { %9539 = vmatprep.subr.bf16.mxu1 %v10448_v19  ;;  %v5732_v30 = vld [vmem:[#allocation5 + $0x6b] sm:$0xff] }
 0x5ad   : > { %v5922_v60 = vld [vmem:[#allocation5 + $0xc] sm:$0xff] }
 0x5af   : > { %9540 = vmatpush3.bf16.msra.mxu1 %v10448_v19  ;;  %v5740_v19 = vpack.c.bf16 %v5730_v26, %v5729_v23  ;;  %v6133_v23 = vld [vmem:[#allocation5 + $0x55] sm:$0xff]  ;;  %v6134_v26 = vld [vmem:[#allocation5 + $0x5d] sm:$0xff] }
 0x5b0   : > { %9541 = vmatprep.subr.bf16.mxu1 %v10449_v43 }
 0x5b2   : > { %9526 = vmatmul.mubr.bf16.gmra.mrb[84].mxu1 %v5165_v24  ;;  %v5519_v24 = vld [vmem:[#allocation5 + $0x12] sm:$0xff] }
 0x5b3   : > { %9542 = vmatpush3.bf16.msra.mxu1 %v10449_v43  ;;  %9529 = vmatprep.mubr.bf16.mxu1 %v5166_v40  ;;  %v5534_v58 = vpack.c.bf16 %v5520_v46, %v5519_v24  ;;  %v5530_v40 = vld [vmem:[#allocation5 + $0x6a] sm:$0xff]  ;;  %v5923_v24 = vld [vmem:[#allocation5 + $0x14] sm:$0xff]  ;;  %v5924_v46 = vld [vmem:[#allocation5 + $0x1c] sm:$0xff] }
 0x5b4   : > { %9543 = vmatprep.subr.bf16.mxu1 %v10450_v50  ;;  %v5731_v43 = vld [vmem:[#allocation5 + $0x63] sm:$0xff] }
 0x5b7   : > { %9544 = vmatpush3.bf16.msra.mxu1 %v10450_v50  ;;  %v10468_v50 = vld [vmem:[#allocation11 + $0x128] sm:$0xff]  }
 0x5b8   : > { %9545 = vmatprep.subr.bf16.mxu1 %v10451_v22 }
 0x5ba   : > { %9530 = vmatmul.mubr.bf16.gmra.mrb[88].mxu1 %v5167_v12  ;;  %v5539_v12 = vpack.c.bf16 %v5530_v40, %v5529_v21  ;;  %v5934_v40 = vld [vmem:[#allocation5 + $0x6c] sm:$0xff]  ;;  %v5933_v21 = vld [vmem:[#allocation5 + $0x64] sm:$0xff] }
 0x5bb   : > { %9546 = vmatpush3.bf16.msra.mxu1 %v10451_v22  ;;  %9533 = vmatprep.mubr.bf16.mxu1 %v5168_v44  ;;  %v5722_v44 = vld [vmem:[#allocation5 + $0x1b] sm:$0xff]  ;;  %v5741_v22 = vpack.c.bf16 %v5732_v30, %v5731_v43  ;;  %v6136_v30 = vld [vmem:[#allocation5 + $0x6d] sm:$0xff]  ;;  %v6135_v43 = vld [vmem:[#allocation5 + $0x65] sm:$0xff] }
 0x5bc   : > { %9547 = vmatprep.subr.bf16.mxu1 %v10452_v31  ;;  %v5736_v52 = vpack.c.bf16 %v5722_v44, %v5721_v37  ;;  %v6125_v37 = vld [vmem:[#allocation5 + $0x15] sm:$0xff]  ;;  %v6126_v44 = vld [vmem:[#allocation5 + $0x1d] sm:$0xff] }
 0x5bf   : > { %9548 = vmatpush3.bf16.msra.mxu1 %v10452_v31  ;;  %v10469_v31 = vld [vmem:[#allocation11 + $0x130] sm:$0xff]  }
 0x5c0   : > { %9549 = vmatprep.subr.bf16.mxu1 %v10453_v57 }
 0x5c2   : > { %9534 = vmatmul.mubr.bf16.gmra.mrb[92].mxu1 %v5169_v27 }
 0x5c3   : > { %9550 = vmatpush3.bf16.msra.mxu1 %v10453_v57  ;;  %9553 = vmatprep.mubr.bf16.mxu1 %v5533_v8  ;;  %v5733_v57 = vld [vmem:[#allocation5 + $0x73] sm:$0xff]  ;;  %v5937_v8 = vpack.c.bf16 %v5922_v60, %v5921_v42  ;;  %v6325_v42 = vld [vmem:[#allocation5 + $0x6] sm:$0xff] }
 0x5c4   : > { %9551 = vmatprep.subr.bf16.mxu1 %v10454_v1  ;;  %v5742_v27 = vpack.c.bf16 %v5734_v3, %v5733_v57  ;;  %v6137_v57 = vld [vmem:[#allocation5 + $0x75] sm:$0xff]  ;;  %v6138_v3 = vld [vmem:[#allocation5 + $0x7d] sm:$0x7f] }
 0x5c5   : > { %v6326_v60 = vld [vmem:[#allocation5 + $0xe] sm:$0xff] }
 0x5c7   : > { %9552 = vmatpush3.bf16.msra.mxu1 %v10454_v1  ;;  %v10470_v1 = vld [vmem:[#allocation11 + $0x138] sm:$0xff]  }
 0x5c8   : > { %9569 = vmatprep.subr.bf16.mxu1 %v10455_v45 }
 0x5ca   : > { %9554 = vmatmul.mubr.bf16.vlgmr.msra.gmra.mrb[80].mxu1 %v5534_v58  ;;  %v5938_v58 = vpack.c.bf16 %v5924_v46, %v5923_v24  ;;  %v6327_v24 = vld [vmem:[#allocation5 + $0x16] sm:$0xff]  ;;  %v6328_v46 = vld [vmem:[#allocation5 + $0x1e] sm:$0xff] }
 0x5cb   : > { %9570 = vmatpush3.bf16.msra.mxu1 %v10455_v45  ;;  %9557 = vmatprep.mubr.bf16.mxu1 %v5535_v38  ;;  %v10471_v45 = vld [vmem:[#allocation11 + $0x140] sm:$0xff]   ;;  %v5939_v38 = vpack.c.bf16 %v5926_v47, %v5925_v63  ;;  %v6329_v63 = vld [vmem:[#allocation5 + $0x26] sm:$0xff] }
 0x5cc   : > { %9571 = vmatprep.subr.bf16.mxu1 %v10456_v2  ;;  %v6330_v47 = vld [vmem:[#allocation5 + $0x2e] sm:$0xff] }
 0x5cf   : > { %9572 = vmatpush3.bf16.msra.mxu1 %v10456_v2  ;;  %v10472_v2 = vld [vmem:[#allocation11 + $0x148] sm:$0xff]  }
 0x5d0   : > { %9573 = vmatprep.subr.bf16.mxu1 %v10457_v5 }
 0x5d2   : > { %9558 = vmatmul.mubr.bf16.gmra.mrb[84].mxu1 %v5536_v15  ;;  %v5940_v15 = vpack.c.bf16 %v5928_v13, %v5927_v11  ;;  %v6331_v11 = vld [vmem:[#allocation5 + $0x36] sm:$0xff]  ;;  %v6332_v13 = vld [vmem:[#allocation5 + $0x3e] sm:$0xff] }
 0x5d3   : > { %9574 = vmatpush3.bf16.msra.mxu1 %v10457_v5  ;;  %9561 = vmatprep.mubr.bf16.mxu1 %v5537_v34  ;;  %v10473_v5 = vld [vmem:[#allocation11 + $0x150] sm:$0xff]   ;;  %v5941_v34 = vpack.c.bf16 %v5930_v4, %v5929_v16  ;;  %v6334_v4 = vld [vmem:[#allocation5 + $0x4e] sm:$0xff] }
 0x5d4   : > { %9575 = vmatprep.subr.bf16.mxu1 %v10458_v53  ;;  %v6333_v16 = vld [vmem:[#allocation5 + $0x46] sm:$0xff] }
 0x5d7   : > { %9576 = vmatpush3.bf16.msra.mxu1 %v10458_v53  ;;  %v10474_v53 = vld [vmem:[#allocation11 + $0x158] sm:$0xff]  }
 0x5d8   : > { %9577 = vmatprep.subr.bf16.mxu1 %v10459_v56 }
 0x5da   : > { %9562 = vmatmul.mubr.bf16.gmra.mrb[88].mxu1 %v5538_v20  ;;  %v5942_v20 = vpack.c.bf16 %v5932_v18, %v5931_v0  ;;  %v6335_v0 = vld [vmem:[#allocation5 + $0x56] sm:$0xff]  ;;  %v6336_v18 = vld [vmem:[#allocation5 + $0x5e] sm:$0xff] }
 0x5db   : > { %9578 = vmatpush3.bf16.msra.mxu1 %v10459_v56  ;;  %9565 = vmatprep.mubr.bf16.mxu1 %v5539_v12  ;;  %v10475_v56 = vld [vmem:[#allocation11 + $0x160] sm:$0xff]   ;;  %v5943_v12 = vpack.c.bf16 %v5934_v40, %v5933_v21  ;;  %v6337_v21 = vld [vmem:[#allocation5 + $0x66] sm:$0xff] }
 0x5dc   : > { %9579 = vmatprep.subr.bf16.mxu1 %v10460_v62  ;;  %v6338_v40 = vld [vmem:[#allocation5 + $0x6e] sm:$0xff] }
 0x5df   : > { %9580 = vmatpush3.bf16.msra.mxu1 %v10460_v62  ;;  %v10476_v62 = vld [vmem:[#allocation11 + $0x168] sm:$0xff]  }
 0x5e0   : > { %9581 = vmatprep.subr.bf16.mxu1 %v10461_v7 }
 0x5e2   : > { %9566 = vmatmul.mubr.bf16.gmra.mrb[92].mxu1 %v5540_v32  ;;  %v5944_v32 = vpack.c.bf16 %v5936_v28, %v5935_v25  ;;  %v6339_v25 = vld [vmem:[#allocation5 + $0x76] sm:$0xff]  ;;  %v6340_v28 = vld [vmem:[#allocation5 + $0x7e] sm:$0x7f] }
 0x5e3   : > { %9582 = vmatpush3.bf16.msra.mxu1 %v10461_v7  ;;  %9585 = vmatprep.mubr.bf16.mxu1 %v5735_v35  ;;  %v10477_v7 = vld [vmem:[#allocation11 + $0x170] sm:$0xff]   ;;  %v6139_v35 = vpack.c.bf16 %v6124_v29, %v6123_v33  ;;  %v6528_v29 = vld [vmem:[#allocation5 + $0xf] sm:$0xff] }
 0x5e4   : > { %9583 = vmatprep.subr.bf16.mxu1 %v10462_v61  ;;  %v6527_v33 = vld [vmem:[#allocation5 + $0x7] sm:$0xff] }
 0x5e7   : > { %9584 = vmatpush3.bf16.msra.mxu1 %v10462_v61  ;;  %v10478_v61 = vld [vmem:[#allocation11 + $0x178] sm:$0xff]  }
 0x5e8   : > { %9601 = vmatprep.subr.bf16.mxu1 %v10463_v36 }
 0x5ea   : > { %9586 = vmatmul.mubr.bf16.vlgmr.msra.gmra.mrb[80].mxu1 %v5736_v52  ;;  %v6140_v52 = vpack.c.bf16 %v6126_v44, %v6125_v37  ;;  %v6529_v37 = vld [vmem:[#allocation5 + $0x17] sm:$0xff]  ;;  %v6530_v44 = vld [vmem:[#allocation5 + $0x1f] sm:$0xff] }
 0x5eb   : > { %9602 = vmatpush3.bf16.msra.mxu1 %v10463_v36  ;;  %9589 = vmatprep.mubr.bf16.mxu1 %v5737_v59  ;;  %v10479_v36 = vld [vmem:[#allocation11 + $0x180] sm:$0xff]   ;;  %v6141_v59 = vpack.c.bf16 %v6128_v41, %v6127_v48  ;;  %v6531_v48 = vld [vmem:[#allocation5 + $0x27] sm:$0xff] }
 0x5ec   : > { %9603 = vmatprep.subr.bf16.mxu1 %v10464_v55  ;;  %v6532_v41 = vld [vmem:[#allocation5 + $0x2f] sm:$0xff] }
 0x5ef   : > { %9604 = vmatpush3.bf16.msra.mxu1 %v10464_v55  ;;  %v10480_v55 = vld [vmem:[#allocation11 + $0x188] sm:$0xff]  }
 0x5f0   : > { %9605 = vmatprep.subr.bf16.mxu1 %v10465_v51 }
 0x5f2   : > { %9590 = vmatmul.mubr.bf16.gmra.mrb[84].mxu1 %v5738_v49  ;;  %v6142_v49 = vpack.c.bf16 %v6130_v6, %v6129_v14  ;;  %v6533_v14 = vld [vmem:[#allocation5 + $0x37] sm:$0xff]  ;;  %v6534_v6 = vld [vmem:[#allocation5 + $0x3f] sm:$0xff] }
 0x5f3   : > { %9606 = vmatpush3.bf16.msra.mxu1 %v10465_v51  ;;  %9593 = vmatprep.mubr.bf16.mxu1 %v5739_v54  ;;  %v10481_v51 = vld [vmem:[#allocation11 + $0x190] sm:$0xff]   ;;  %v6143_v54 = vpack.c.bf16 %v6132_v39, %v6131_v17  ;;  %v6536_v39 = vld [vmem:[#allocation5 + $0x4f] sm:$0xff] }
 0x5f4   : > { %9607 = vmatprep.subr.bf16.mxu1 %v10466_v9  ;;  %v6535_v17 = vld [vmem:[#allocation5 + $0x47] sm:$0xff] }
 0x5f7   : > { %9608 = vmatpush3.bf16.msra.mxu1 %v10466_v9  ;;  %v10482_v9 = vld [vmem:[#allocation11 + $0x198] sm:$0xff]  }
 0x5f8   : > { %9609 = vmatprep.subr.bf16.mxu1 %v10467_v10 }
 0x5fa   : > { %9594 = vmatmul.mubr.bf16.gmra.mrb[88].mxu1 %v5740_v19  ;;  %v6144_v19 = vpack.c.bf16 %v6134_v26, %v6133_v23  ;;  %v6537_v23 = vld [vmem:[#allocation5 + $0x57] sm:$0xff]  ;;  %v6538_v26 = vld [vmem:[#allocation5 + $0x5f] sm:$0xff] }
 0x5fb   : > { %9610 = vmatpush3.bf16.msra.mxu1 %v10467_v10  ;;  %9597 = vmatprep.mubr.bf16.mxu1 %v5741_v22  ;;  %v10483_v10 = vld [vmem:[#allocation11 + $0x1a0] sm:$0xff]   ;;  %v6145_v22 = vpack.c.bf16 %v6136_v30, %v6135_v43  ;;  %v6539_v43 = vld [vmem:[#allocation5 + $0x67] sm:$0xff] }
 0x5fc   : > { %9611 = vmatprep.subr.bf16.mxu1 %v10468_v50  ;;  %v6540_v30 = vld [vmem:[#allocation5 + $0x6f] sm:$0xff] }
 0x5ff   : > { %9612 = vmatpush3.bf16.msra.mxu1 %v10468_v50  ;;  %v10484_v50 = vld [vmem:[#allocation11 + $0x1a8] sm:$0xff]  }
 0x600   : > { %9613 = vmatprep.subr.bf16.mxu1 %v10469_v31 }
 0x602   : > { %9598 = vmatmul.mubr.bf16.gmra.mrb[92].mxu1 %v5742_v27  ;;  %v6146_v27 = vpack.c.bf16 %v6138_v3, %v6137_v57  ;;  %v6541_v57 = vld [vmem:[#allocation5 + $0x77] sm:$0xff]  ;;  %v6542_v3 = vld [vmem:[#allocation5 + $0x7f] sm:$0x7f] }
 0x603   : > { %9614 = vmatpush3.bf16.msra.mxu1 %v10469_v31  ;;  %9617 = vmatprep.mubr.bf16.mxu1 %v5937_v8  ;;  %v10485_v31 = vld [vmem:[#allocation11 + $0x1b0] sm:$0xff]   ;;  %v6341_v8 = vpack.c.bf16 %v6326_v60, %v6325_v42  ;;  %v6730_v60 = vld [vmem:[#allocation5 + $0x10] sm:$0xff]  ;;  %v6729_v42 = vld [vmem:[#allocation5 + $0x8] sm:$0xff] }
 0x604   : > { %9615 = vmatprep.subr.bf16.mxu1 %v10470_v1 }
 0x607   : > { %9616 = vmatpush3.bf16.msra.mxu1 %v10470_v1  ;;  %v10486_v1 = vld [vmem:[#allocation11 + $0x1b8] sm:$0xff]  }
 0x608   : > { %9633 = vmatprep.subr.bf16.mxu1 %v10471_v45 }
 0x60a   : > { %9618 = vmatmul.mubr.bf16.vlgmr.msra.gmra.mrb[80].mxu1 %v5938_v58  ;;  %v6342_v58 = vpack.c.bf16 %v6328_v46, %v6327_v24  ;;  %v6732_v24 = vld [vmem:[#allocation5 + $0x20] sm:$0xff]  ;;  %v6734_v46 = vld [vmem:[#allocation5 + $0x30] sm:$0xff] }
 0x60b   : > { %9634 = vmatpush3.bf16.msra.mxu1 %v10471_v45  ;;  %9621 = vmatprep.mubr.bf16.mxu1 %v5939_v38  ;;  %v10487_v45 = vld [vmem:[#allocation11 + $0x1c0] sm:$0xff]   ;;  %v6343_v38 = vpack.c.bf16 %v6330_v47, %v6329_v63  ;;  %v6731_v47 = vld [vmem:[#allocation5 + $0x18] sm:$0xff]  ;;  %v6733_v63 = vld [vmem:[#allocation5 + $0x28] sm:$0xff] }
 0x60c   : > { %9635 = vmatprep.subr.bf16.mxu1 %v10472_v2 }
 0x60f   : > { %9636 = vmatpush3.bf16.msra.mxu1 %v10472_v2  ;;  %v10488_v2 = vld [vmem:[#allocation11 + $0x1c8] sm:$0xff]  }
 0x610   : > { %9637 = vmatprep.subr.bf16.mxu1 %v10473_v5 }
 0x612   : > { %9622 = vmatmul.mubr.bf16.gmra.mrb[84].mxu1 %v5940_v15  ;;  %v6344_v15 = vpack.c.bf16 %v6332_v13, %v6331_v11  ;;  %v6736_v11 = vld [vmem:[#allocation5 + $0x40] sm:$0xff]  ;;  %v6738_v13 = vld [vmem:[#allocation5 + $0x50] sm:$0xff] }
 0x613   : > { %9638 = vmatpush3.bf16.msra.mxu1 %v10473_v5  ;;  %9625 = vmatprep.mubr.bf16.mxu1 %v5941_v34  ;;  %v10489_v5 = vld [vmem:[#allocation11 + $0x1d0] sm:$0xff]   ;;  %v6345_v34 = vpack.c.bf16 %v6334_v4, %v6333_v16  ;;  %v6735_v4 = vld [vmem:[#allocation5 + $0x38] sm:$0xff]  ;;  %v6737_v16 = vld [vmem:[#allocation5 + $0x48] sm:$0xff] }
 0x614   : > { %9639 = vmatprep.subr.bf16.mxu1 %v10474_v53 }
 0x617   : > { %9640 = vmatpush3.bf16.msra.mxu1 %v10474_v53  ;;  %v10490_v53 = vld [vmem:[#allocation11 + $0x1d8] sm:$0xff]  }
 0x618   : > { %9641 = vmatprep.subr.bf16.mxu1 %v10475_v56 }
 0x61a   : > { %9626 = vmatmul.mubr.bf16.gmra.mrb[88].mxu1 %v5942_v20  ;;  %v6346_v20 = vpack.c.bf16 %v6336_v18, %v6335_v0  ;;  %v6740_v0 = vld [vmem:[#allocation5 + $0x60] sm:$0xff]  ;;  %v6742_v18 = vld [vmem:[#allocation5 + $0x70] sm:$0xff] }
 0x61b   : > { %9642 = vmatpush3.bf16.msra.mxu1 %v10475_v56  ;;  %9629 = vmatprep.mubr.bf16.mxu1 %v5943_v12  ;;  %v10491_v56 = vld [vmem:[#allocation11 + $0x1e0] sm:$0xff]   ;;  %v6347_v12 = vpack.c.bf16 %v6338_v40, %v6337_v21  ;;  %v6739_v40 = vld [vmem:[#allocation5 + $0x58] sm:$0xff]  ;;  %v6741_v21 = vld [vmem:[#allocation5 + $0x68] sm:$0xff] }
 0x61c   : > { %9643 = vmatprep.subr.bf16.mxu1 %v10476_v62 }
 0x61f   : > { %9644 = vmatpush3.bf16.msra.mxu1 %v10476_v62  ;;  %v10492_v62 = vld [vmem:[#allocation11 + $0x1e8] sm:$0xff]  }
 0x620   : > { %9645 = vmatprep.subr.bf16.mxu1 %v10477_v7 }
 0x622   : > { %9630 = vmatmul.mubr.bf16.gmra.mrb[92].mxu1 %v5944_v32  ;;  %v6348_v32 = vpack.c.bf16 %v6340_v28, %v6339_v25  ;;  %v6744_v25 = vld [vmem:[#allocation5 + $0x80] sm:$0x7f]  ;;  %v6931_v28 = vld [vmem:[#allocation5 + $0x9] sm:$0xff] }
 0x623   : > { %9646 = vmatpush3.bf16.msra.mxu1 %v10477_v7  ;;  %9649 = vmatprep.mubr.bf16.mxu1 %v6139_v35  ;;  %v10493_v7 = vld [vmem:[#allocation11 + $0x1f0] sm:$0xff]   ;;  %v6543_v35 = vpack.c.bf16 %v6528_v29, %v6527_v33  ;;  %v6932_v29 = vld [vmem:[#allocation5 + $0x11] sm:$0xff] }
 0x624   : > { %9647 = vmatprep.subr.bf16.mxu1 %v10478_v61 }
 0x627   : > { %9648 = vmatpush3.bf16.msra.mxu1 %v10478_v61  ;;  %v10494_v61 = vld [vmem:[#allocation11 + $0x1f8] sm:$0xff]  }
 0x628   : > { %9665 = vmatprep.subr.bf16.mxu1 %v10479_v36 }
 0x62a   : > { %9650 = vmatmul.mubr.bf16.vlgmr.msra.gmra.mrb[80].mxu1 %v6140_v52  ;;  %v6544_v52 = vpack.c.bf16 %v6530_v44, %v6529_v37  ;;  %v6934_v37 = vld [vmem:[#allocation5 + $0x21] sm:$0xff]  ;;  %v6935_v44 = vld [vmem:[#allocation5 + $0x29] sm:$0xff] }
 0x62b   : > { %9666 = vmatpush3.bf16.msra.mxu1 %v10479_v36  ;;  %9653 = vmatprep.mubr.bf16.mxu1 %v6141_v59  ;;  %v10495_v36 = vld [vmem:[#allocation11 + $0x200] sm:$0xff]   ;;  %v6545_v59 = vpack.c.bf16 %v6532_v41, %v6531_v48 }
 0x62c   : > { %9667 = vmatprep.subr.bf16.mxu1 %v10480_v55  ;;  %v6936_v41 = vld [vmem:[#allocation5 + $0x31] sm:$0xff] }
 0x62f   : > { %9668 = vmatpush3.bf16.msra.mxu1 %v10480_v55  ;;  %v10496_v55 = vld [vmem:[#allocation11 + $0x208] sm:$0xff]  }
 0x630   : > { %9669 = vmatprep.subr.bf16.mxu1 %v10481_v51 }
 0x632   : > { %9654 = vmatmul.mubr.bf16.gmra.mrb[84].mxu1 %v6142_v49  ;;  %v6546_v49 = vpack.c.bf16 %v6534_v6, %v6533_v14  ;;  %v6938_v14 = vld [vmem:[#allocation5 + $0x41] sm:$0xff]  ;;  %v6939_v6 = vld [vmem:[#allocation5 + $0x49] sm:$0xff] }
 0x633   : > { %9670 = vmatpush3.bf16.msra.mxu1 %v10481_v51  ;;  %9657 = vmatprep.mubr.bf16.mxu1 %v6143_v54  ;;  %v10497_v51 = vld [vmem:[#allocation11 + $0x210] sm:$0xff]   ;;  %v6547_v54 = vpack.c.bf16 %v6536_v39, %v6535_v17  ;;  %v6940_v39 = vld [vmem:[#allocation5 + $0x51] sm:$0xff] }
 0x634   : > { %9671 = vmatprep.subr.bf16.mxu1 %v10482_v9 }
 0x637   : > { %9672 = vmatpush3.bf16.msra.mxu1 %v10482_v9  ;;  %v10498_v9 = vld [vmem:[#allocation11 + $0x218] sm:$0xff]  }
 0x638   : > { %9673 = vmatprep.subr.bf16.mxu1 %v10483_v10 }
 0x63a   : > { %9658 = vmatmul.mubr.bf16.gmra.mrb[88].mxu1 %v6144_v19  ;;  %v6548_v19 = vpack.c.bf16 %v6538_v26, %v6537_v23  ;;  %v6942_v23 = vld [vmem:[#allocation5 + $0x61] sm:$0xff]  ;;  %v6943_v26 = vld [vmem:[#allocation5 + $0x69] sm:$0xff] }
 0x63b   : > { %9674 = vmatpush3.bf16.msra.mxu1 %v10483_v10  ;;  %9661 = vmatprep.mubr.bf16.mxu1 %v6145_v22  ;;  %v10499_v10 = vld [vmem:[#allocation11 + $0x220] sm:$0xff]   ;;  %v6549_v22 = vpack.c.bf16 %v6540_v30, %v6539_v43 }
 0x63c   : > { %9675 = vmatprep.subr.bf16.mxu1 %v10484_v50  ;;  %v6944_v30 = vld [vmem:[#allocation5 + $0x71] sm:$0xff] }
 0x63f   : > { %9676 = vmatpush3.bf16.msra.mxu1 %v10484_v50  ;;  %v10500_v50 = vld [vmem:[#allocation11 + $0x228] sm:$0xff]  }
 0x640   : > { %9677 = vmatprep.subr.bf16.mxu1 %v10485_v31 }
 0x642   : > { %9662 = vmatmul.mubr.bf16.gmra.mrb[92].mxu1 %v6146_v27  ;;  %v6550_v27 = vpack.c.bf16 %v6542_v3, %v6541_v57  ;;  %v6945_v57 = vld [vmem:[#allocation5 + $0x79] sm:$0xff]  ;;  %v6946_v3 = vld [vmem:[#allocation5 + $0x81] sm:$0x7f] }
 0x643   : > { %9678 = vmatpush3.bf16.msra.mxu1 %v10485_v31  ;;  %9681 = vmatprep.mubr.bf16.mxu1 %v6341_v8  ;;  %v10501_v31 = vld [vmem:[#allocation11 + $0x230] sm:$0xff]   ;;  %v6745_v8 = vpack.c.bf16 %v6730_v60, %v6729_v42  ;;  %v7133_v60 = vld [vmem:[#allocation5 + $0xa] sm:$0xff]  ;;  %v6954_v42 = vpack.c.bf16 %v6946_v3, %v6945_v57 }
 0x644   : > { %9679 = vmatprep.subr.bf16.mxu1 %v10486_v1 }
 0x647   : > { %9680 = vmatpush3.bf16.msra.mxu1 %v10486_v1  ;;  %v10502_v1 = vld [vmem:[#allocation11 + $0x238] sm:$0xff]  }
 0x648   : > { %9697 = vmatprep.subr.bf16.mxu1 %v10487_v45 }
 0x64a   : > { %9682 = vmatmul.mubr.bf16.vlgmr.msra.gmra.mrb[80].mxu1 %v6342_v58  ;;  %v6746_v58 = vpack.c.bf16 %v6732_v24, %v6731_v47  ;;  %v7137_v24 = vld [vmem:[#allocation5 + $0x2a] sm:$0xff]  ;;  %v7135_v47 = vld [vmem:[#allocation5 + $0x1a] sm:$0xff] }
 0x64b   : > { %9698 = vmatpush3.bf16.msra.mxu1 %v10487_v45  ;;  %9685 = vmatprep.mubr.bf16.mxu1 %v6343_v38  ;;  %v10503_v45 = vld [vmem:[#allocation11 + $0x240] sm:$0xff]   ;;  %v6747_v38 = vpack.c.bf16 %v6734_v46, %v6733_v63 }
 0x64c   : > { %9699 = vmatprep.subr.bf16.mxu1 %v10488_v2  ;;  %v7138_v46 = vld [vmem:[#allocation5 + $0x32] sm:$0xff] }
 0x64d   : > { %v7151_v63 = vpack.c.bf16 %v7138_v46, %v7137_v24 }
 0x64f   : > { %9700 = vmatpush3.bf16.msra.mxu1 %v10488_v2  ;;  %v10504_v2 = vld [vmem:[#allocation11 + $0x248] sm:$0xff]  }
 0x650   : > { %9701 = vmatprep.subr.bf16.mxu1 %v10489_v5 }
 0x652   : > { %9686 = vmatmul.mubr.bf16.gmra.mrb[84].mxu1 %v6344_v15  ;;  %v6748_v15 = vpack.c.bf16 %v6736_v11, %v6735_v4  ;;  %v7139_v11 = vld [vmem:[#allocation5 + $0x3a] sm:$0xff] }
 0x653   : > { %9702 = vmatpush3.bf16.msra.mxu1 %v10489_v5  ;;  %9689 = vmatprep.mubr.bf16.mxu1 %v6345_v34  ;;  %v10505_v5 = vld [vmem:[#allocation11 + $0x250] sm:$0xff]   ;;  %v6749_v34 = vpack.c.bf16 %v6738_v13, %v6737_v16  ;;  %v7145_v16 = vld [vmem:[#allocation5 + $0x6a] sm:$0xff] }
 0x654   : > { %9703 = vmatprep.subr.bf16.mxu1 %v10490_v53 }
 0x657   : > { %9704 = vmatpush3.bf16.msra.mxu1 %v10490_v53  ;;  %v10506_v53 = vld [vmem:[#allocation11 + $0x258] sm:$0xff]  }
 0x658   : > { %9705 = vmatprep.subr.bf16.mxu1 %v10491_v56 }
 0x65a   : > { %9690 = vmatmul.mubr.bf16.gmra.mrb[88].mxu1 %v6346_v20  ;;  %v6750_v20 = vpack.c.bf16 %v6740_v0, %v6739_v40  ;;  %v7148_v40 = vld [vmem:[#allocation5 + $0x82] sm:$0x7f] }
 0x65b   : > { %9706 = vmatpush3.bf16.msra.mxu1 %v10491_v56  ;;  %9693 = vmatprep.mubr.bf16.mxu1 %v6347_v12  ;;  %v10507_v56 = vld [vmem:[#allocation11 + $0x260] sm:$0xff]   ;;  %v6751_v12 = vpack.c.bf16 %v6742_v18, %v6741_v21  ;;  %v7147_v18 = vld [vmem:[#allocation5 + $0x7a] sm:$0xff]  ;;  %v11712_v21 = vld [vmem:[%s12152_s8] ss:$0 sm:$0xff] }
 0x65c   : > { %9707 = vmatprep.subr.bf16.mxu1 %v10492_v62 }
 0x65f   : > { %9708 = vmatpush3.bf16.msra.mxu1 %v10492_v62  ;;  %v10508_v62 = vld [vmem:[#allocation11 + $0x268] sm:$0xff]  }
 0x660   : > { %9709 = vmatprep.subr.bf16.mxu1 %v10493_v7 }
 0x662   : > { %9694 = vmatmul.mubr.bf16.gmra.mrb[92].mxu1 %v6348_v32  ;;  %v6743_v32 = vld [vmem:[#allocation5 + $0x78] sm:$0xff] }
 0x663   : > { %9710 = vmatpush3.bf16.msra.mxu1 %v10493_v7  ;;  %9713 = vmatprep.mubr.bf16.mxu1 %v6543_v35  ;;  %v10509_v7 = vld [vmem:[#allocation11 + $0x270] sm:$0xff]   ;;  %v6752_v33 = vpack.c.bf16 %v6744_v25, %v6743_v32  ;;  %v6947_v35 = vpack.c.bf16 %v6932_v29, %v6931_v28 }
 0x664   : > { %9711 = vmatprep.subr.bf16.mxu1 %v10494_v61 }
 0x667   : > { %9712 = vmatpush3.bf16.msra.mxu1 %v10494_v61  ;;  %v10510_v61 = vld [vmem:[#allocation11 + $0x278] sm:$0xff]  }
 0x668   : > { %9729 = vmatprep.subr.bf16.mxu1 %v10495_v36 }
 0x66a   : > { %9714 = vmatmul.mubr.bf16.vlgmr.msra.gmra.mrb[80].mxu1 %v6544_v52  ;;  %v6933_v52 = vld [vmem:[#allocation5 + $0x19] sm:$0xff] }
 0x66b   : > { %9730 = vmatpush3.bf16.msra.mxu1 %v10495_v36  ;;  %9717 = vmatprep.mubr.bf16.mxu1 %v6545_v59  ;;  %v10511_v36 = vld [vmem:[#allocation11 + $0x280] sm:$0xff]   ;;  %v6948_v48 = vpack.c.bf16 %v6934_v37, %v6933_v52  ;;  %v6949_v59 = vpack.c.bf16 %v6936_v41, %v6935_v44 }
 0x66c   : > { %9731 = vmatprep.subr.bf16.mxu1 %v10496_v55 }
 0x66f   : > { %9732 = vmatpush3.bf16.msra.mxu1 %v10496_v55  ;;  %v10512_v55 = vld [vmem:[#allocation11 + $0x288] sm:$0xff]  }
 0x670   : > { %9733 = vmatprep.subr.bf16.mxu1 %v10497_v51 }
 0x672   : > { %9718 = vmatmul.mubr.bf16.gmra.mrb[84].mxu1 %v6546_v49  ;;  %v6937_v49 = vld [vmem:[#allocation5 + $0x39] sm:$0xff] }
 0x673   : > { %9734 = vmatpush3.bf16.msra.mxu1 %v10497_v51  ;;  %9721 = vmatprep.mubr.bf16.mxu1 %v6547_v54  ;;  %v10513_v51 = vld [vmem:[#allocation11 + $0x290] sm:$0xff]   ;;  %v6950_v17 = vpack.c.bf16 %v6938_v14, %v6937_v49  ;;  %v6951_v54 = vpack.c.bf16 %v6940_v39, %v6939_v6 }
 0x674   : > { %9735 = vmatprep.subr.bf16.mxu1 %v10498_v9 }
 0x677   : > { %9736 = vmatpush3.bf16.msra.mxu1 %v10498_v9  ;;  %v10514_v9 = vld [vmem:[#allocation11 + $0x298] sm:$0xff]  }
 0x678   : > { %9737 = vmatprep.subr.bf16.mxu1 %v10499_v10 }
 0x67a   : > { %9722 = vmatmul.mubr.bf16.gmra.mrb[88].mxu1 %v6548_v19  ;;  %v6941_v19 = vld [vmem:[#allocation5 + $0x59] sm:$0xff] }
 0x67b   : > { %9738 = vmatpush3.bf16.msra.mxu1 %v10499_v10  ;;  %9725 = vmatprep.mubr.bf16.mxu1 %v6549_v22  ;;  %v10515_v10 = vld [vmem:[#allocation11 + $0x2a0] sm:$0xff]   ;;  %v6952_v43 = vpack.c.bf16 %v6942_v23, %v6941_v19  ;;  %v6953_v22 = vpack.c.bf16 %v6944_v30, %v6943_v26 }
 0x67c   : > { %9739 = vmatprep.subr.bf16.mxu1 %v10500_v50 }
 0x67f   : > { %9740 = vmatpush3.bf16.msra.mxu1 %v10500_v50  ;;  %v10516_v50 = vld [vmem:[#allocation11 + $0x2a8] sm:$0xff]  }
 0x680   : > { %9741 = vmatprep.subr.bf16.mxu1 %v10501_v31 }
 0x682   : > { %9726 = vmatmul.mubr.bf16.gmra.mrb[92].mxu1 %v6550_v27  ;;  %v7134_v27 = vld [vmem:[#allocation5 + $0x12] sm:$0xff] }
 0x683   : > { %9742 = vmatpush3.bf16.msra.mxu1 %v10501_v31  ;;  %9745 = vmatprep.mubr.bf16.mxu1 %v6745_v8  ;;  %v10517_v31 = vld [vmem:[#allocation11 + $0x2b0] sm:$0xff]   ;;  %v7149_v8 = vpack.c.bf16 %v7134_v27, %v7133_v60 }
 0x684   : > { %9743 = vmatprep.subr.bf16.mxu1 %v10502_v1 }
 0x687   : > { %9744 = vmatpush3.bf16.msra.mxu1 %v10502_v1  ;;  %v10518_v1 = vld [vmem:[#allocation11 + $0x2b8] sm:$0xff]  }
 0x688   : > { %9761 = vmatprep.subr.bf16.mxu1 %v10503_v45 }
 0x68a   : > { %9746 = vmatmul.mubr.bf16.vlgmr.msra.gmra.mrb[80].mxu1 %v6746_v58 }
 0x68b   : > { %9762 = vmatpush3.bf16.msra.mxu1 %v10503_v45  ;;  %9749 = vmatprep.mubr.bf16.mxu1 %v6747_v38  ;;  %v7136_v45 = vld [vmem:[#allocation5 + $0x22] sm:$0xff]  ;;  %v7141_v38 = vld [vmem:[#allocation5 + $0x4a] sm:$0xff] }
 0x68c   : > { %9763 = vmatprep.subr.bf16.mxu1 %v10504_v2  ;;  %v7150_v58 = vpack.c.bf16 %v7136_v45, %v7135_v47 }
 0x68f   : > { %9764 = vmatpush3.bf16.msra.mxu1 %v10504_v2  ;;  %v7140_v2 = vld [vmem:[#allocation5 + $0x42] sm:$0xff] }
 0x690   : > { %9765 = vmatprep.subr.bf16.mxu1 %v10505_v5  ;;  %v7152_v13 = vpack.c.bf16 %v7140_v2, %v7139_v11 }
 0x692   : > { %9750 = vmatmul.mubr.bf16.gmra.mrb[84].mxu1 %v6748_v15  ;;  %v7144_v15 = vld [vmem:[#allocation5 + $0x62] sm:$0xff] }
 0x693   : > { %9766 = vmatpush3.bf16.msra.mxu1 %v10505_v5  ;;  %9753 = vmatprep.mubr.bf16.mxu1 %v6749_v34  ;;  %v7142_v5 = vld [vmem:[#allocation5 + $0x52] sm:$0xff]  ;;  %v7143_v34 = vld [vmem:[#allocation5 + $0x5a] sm:$0xff] }
 0x694   : > { %9767 = vmatprep.subr.bf16.mxu1 %v10506_v53  ;;  %v7153_v4 = vpack.c.bf16 %v7142_v5, %v7141_v38 }
 0x697   : > { %9768 = vmatpush3.bf16.msra.mxu1 %v10506_v53  ;;  %v7146_v53 = vld [vmem:[#allocation5 + $0x72] sm:$0xff] }
 0x698   : > { %9769 = vmatprep.subr.bf16.mxu1 %v10507_v56  ;;  %v7155_v0 = vpack.c.bf16 %v7146_v53, %v7145_v16 }
 0x69a   : > { %9754 = vmatmul.mubr.bf16.gmra.mrb[88].mxu1 %v6750_v20  ;;  %v7156_v20 = vpack.c.bf16 %v7148_v40, %v7147_v18 }
 0x69b   : > { %9770 = vmatpush3.bf16.msra.mxu1 %v10507_v56  ;;  %9757 = vmatprep.mubr.bf16.mxu1 %v6751_v12  ;;  %v7154_v56 = vpack.c.bf16 %v7144_v15, %v7143_v34 }
 0x69c   : > { %9771 = vmatprep.subr.bf16.mxu1 %v10508_v62 }
 0x69f   : > { %9772 = vmatpush3.bf16.msra.mxu1 %v10508_v62 }
 0x6a0   : > { %9773 = vmatprep.subr.bf16.mxu1 %v10509_v7 }
 0x6a2   : > { %9758 = vmatmul.mubr.bf16.gmra.mrb[92].mxu1 %v6752_v33 }
 0x6a3   : > { %9774 = vmatpush3.bf16.msra.mxu1 %v10509_v7  ;;  %9777 = vmatprep.mubr.bf16.mxu1 %v6947_v35 }
 0x6a4   : > { %9775 = vmatprep.subr.bf16.mxu1 %v10510_v61 }
 0x6a7   : > { %9776 = vmatpush3.bf16.msra.mxu1 %v10510_v61 }
 0x6a8   : > { %9793 = vmatprep.subr.bf16.mxu1 %v10511_v36 }
 0x6aa   : > { %9778 = vmatmul.mubr.bf16.vlgmr.msra.gmra.mrb[80].mxu1 %v6948_v48 }
 0x6ab   : > { %9794 = vmatpush3.bf16.msra.mxu1 %v10511_v36  ;;  %9781 = vmatprep.mubr.bf16.mxu1 %v6949_v59 }
 0x6ac   : > { %9795 = vmatprep.subr.bf16.mxu1 %v10512_v55 }
 0x6af   : > { %9796 = vmatpush3.bf16.msra.mxu1 %v10512_v55 }
 0x6b0   : > { %9797 = vmatprep.subr.bf16.mxu1 %v10513_v51 }
 0x6b2   : > { %9782 = vmatmul.mubr.bf16.gmra.mrb[84].mxu1 %v6950_v17 }
 0x6b3   : > { %9798 = vmatpush3.bf16.msra.mxu1 %v10513_v51  ;;  %9785 = vmatprep.mubr.bf16.mxu1 %v6951_v54 }
 0x6b4   : > { %9799 = vmatprep.subr.bf16.mxu1 %v10514_v9 }
 0x6b7   : > { %9800 = vmatpush3.bf16.msra.mxu1 %v10514_v9 }
 0x6b8   : > { %9801 = vmatprep.subr.bf16.mxu1 %v10515_v10 }
 0x6ba   : > { %9786 = vmatmul.mubr.bf16.gmra.mrb[88].mxu1 %v6952_v43 }
 0x6bb   : > { %9802 = vmatpush3.bf16.msra.mxu1 %v10515_v10  ;;  %9789 = vmatprep.mubr.bf16.mxu1 %v6953_v22 }
 0x6bc   : > { %9803 = vmatprep.subr.bf16.mxu1 %v10516_v50 }
 0x6bf   : > { %9804 = vmatpush3.bf16.msra.mxu1 %v10516_v50 }
 0x6c0   : > { %9805 = vmatprep.subr.bf16.mxu1 %v10517_v31 }
 0x6c2   : > { %9790 = vmatmul.mubr.bf16.gmra.mrb[92].mxu1 %v6954_v42 }
 0x6c3   : > { %9806 = vmatpush3.bf16.msra.mxu1 %v10517_v31  ;;  %9809 = vmatprep.mubr.bf16.mxu1 %v7149_v8 }
 0x6c4   : > { %9807 = vmatprep.subr.bf16.mxu1 %v10518_v1 }
 0x6c7   : > { %9808 = vmatpush3.bf16.msra.mxu1 %v10518_v1 }
 0x6ca   : > { %9810 = vmatmul.mubr.bf16.vlgmr.msra.gmra.mrb[80].mxu1 %v7150_v58 }
 0x6cb   : > { %9813 = vmatprep.mubr.bf16.mxu1 %v7151_v63 }
 0x6d2   : > { %9814 = vmatmul.mubr.bf16.gmra.mrb[84].mxu1 %v7152_v13 }
 0x6d3   : > { %9817 = vmatprep.mubr.bf16.mxu1 %v7153_v4 }
 0x6da   : > { %9818 = vmatmul.mubr.bf16.gmra.mrb[88].mxu1 %v7154_v56 }
 0x6db   : > { %9821 = vmatprep.mubr.bf16.mxu1 %v7155_v0 }
 0x6e2   : > { %9822 = vmatmul.mubr.bf16.gmra.mrb[92].mxu1 %v7156_v20 }
 0x79d   : > { %v9811_v62 = vpop.f32.mrb[80].mxu1 }
 0x79e   : > { %v11715_v12 = vadd.f32 %v9811_v62, %v11712_v21  ;;  %v7256_v7 = vpop.f32.mrb[81].mxu1 }
 0x79f   : > { %v11718_v25 = vadd.f32 %v11712_v21, %v7256_v7  ;;  %v9812_v28 = vpop.f32.mrb[82].mxu1 }
 0x7a0   : > { %v7360_v29 = vsub.f32 0.0, %v11715_v12  ;;  %v11722_v32 = vadd.f32 %v9812_v28, %v11712_v21  ;;  %v7259_v33 = vpop.f32.mrb[83].mxu1 }
 0x7a1   : > { %v7358_v61 = vsub.f32 0.0, %v11718_v25  ;;  %v11726_v35 = vadd.f32 %v11712_v21, %v7259_v33 }
 0x7a2   : > { %v7378_v36 = vmul.f32 1.442695, %v7360_v29  ;;  %v7361_v37 = vsub.f32 0.0, %v11722_v32 }
 0x7a3   : > { %v7374_v44 = vmul.f32 1.442695, %v7358_v61  ;;  %v7359_v41 = vsub.f32 0.0, %v11726_v35 }
 0x7a4   : > { %10639 = vpow2.f32 %v7378_v36  ;;  %v7380_v52 = vmul.f32 1.442695, %v7361_v37 }
 0x7a5   : > { %10641 = vpow2.f32 %v7374_v44  ;;  %v7376_v48 = vmul.f32 1.442695, %v7359_v41  ;;  %v9815_v55 = vpop.f32.mrb[84].mxu1 }
 0x7a6   : > { %10643 = vpow2.f32 %v7380_v52  ;;  %v11731_v59 = vadd.f32 %v9815_v55, %v11712_v21  ;;  %v7272_v51 = vpop.f32.mrb[85].mxu1 }
 0x7a7   : > { %10645 = vpow2.f32 %v7376_v48  ;;  %v11734_v14 = vadd.f32 %v11712_v21, %v7272_v51  ;;  %v9816_v6 = vpop.f32.mrb[86].mxu1 }
 0x7a8   : > { %v7364_v39 = vsub.f32 0.0, %v11731_v59  ;;  %v11738_v49 = vadd.f32 %v9816_v6, %v11712_v21  ;;  %v7275_v17 = vpop.f32.mrb[87].mxu1 }
 0x7a9   : > { %v7362_v9 = vsub.f32 0.0, %v11734_v14  ;;  %v11742_v54 = vadd.f32 %v11712_v21, %v7275_v17 }
 0x7aa   : > { %v7386_v10 = vmul.f32 1.442695, %v7364_v39  ;;  %v7365_v23 = vsub.f32 0.0, %v11738_v49 }
 0x7ab   : > { %v7382_v26 = vmul.f32 1.442695, %v7362_v9  ;;  %v7363_v30 = vsub.f32 0.0, %v11742_v54 }
 0x7ac   : > { %10647 = vpow2.f32 %v7386_v10  ;;  %v7388_v19 = vmul.f32 1.442695, %v7365_v23 }
 0x7ad   : > { %10649 = vpow2.f32 %v7382_v26  ;;  %v7384_v43 = vmul.f32 1.442695, %v7363_v30  ;;  %v9819_v50 = vpop.f32.mrb[88].mxu1 }
 0x7ae   : > { %v10640_v22 = vpop.eup %10639  ;;  %10651 = vpow2.f32 %v7388_v19  ;;  %v11747_v31 = vadd.f32 %v9819_v50, %v11712_v21  ;;  %v7288_v57 = vpop.f32.mrb[89].mxu1 }
 0x7af   : > { %v10642_v3 = vpop.eup %10641  ;;  %v7408_v60 = vadd.f32 1.0, %v10640_v22  ;;  %10653 = vpow2.f32 %v7384_v43  ;;  %v11750_v27 = vadd.f32 %v11712_v21, %v7288_v57  ;;  %v9820_v42 = vpop.f32.mrb[90].mxu1 }
 0x7b0   : > { %v10644_v1 = vpop.eup %10643  ;;  %v7406_v8 = vadd.f32 1.0, %v10642_v3  ;;  %v7368_v45 = vsub.f32 0.0, %v11747_v31  ;;  %v11754_v24 = vadd.f32 %v9820_v42, %v11712_v21  ;;  %v7291_v46 = vpop.f32.mrb[91].mxu1 }
 0x7b1   : > { %v10646_v47 = vpop.eup %10645  ;;  %10655 = vrcp.f32 %v7408_v60  ;;  %v7409_v58 = vadd.f32 1.0, %v10644_v1  ;;  %v7366_v63 = vsub.f32 0.0, %v11750_v27  ;;  %v11758_v2 = vadd.f32 %v11712_v21, %v7291_v46 }
 0x7b2   : > { %10657 = vrcp.f32 %v7406_v8  ;;  %v7407_v38 = vadd.f32 1.0, %v10646_v47  ;;  %v7394_v5 = vmul.f32 1.442695, %v7368_v45  ;;  %v7369_v11 = vsub.f32 0.0, %v11754_v24 }
 0x7b3   : > { %10659 = vrcp.f32 %v7409_v58  ;;  %v7390_v13 = vmul.f32 1.442695, %v7366_v63  ;;  %v7367_v4 = vsub.f32 0.0, %v11758_v2 }
 0x7b4   : > { %10661 = vrcp.f32 %v7407_v38  ;;  %v7396_v15 = vmul.f32 1.442695, %v7369_v11 }
 0x7b5   : > { %10663 = vpow2.f32 %v7394_v5  ;;  %v7392_v16 = vmul.f32 1.442695, %v7367_v4  ;;  %v9823_v53 = vpop.f32.mrb[92].mxu1 }
 0x7b6   : > { %v10648_v34 = vpop.eup %10647  ;;  %10665 = vpow2.f32 %v7390_v13  ;;  %v11763_v56 = vadd.f32 %v9823_v53, %v11712_v21  ;;  %v7304_v0 = vpop.f32.mrb[93].mxu1 }
 0x7b7   : > { %v10650_v18 = vpop.eup %10649  ;;  %v7412_v40 = vadd.f32 1.0, %v10648_v34  ;;  %10667 = vpow2.f32 %v7396_v15  ;;  %v11766_v20 = vadd.f32 %v11712_v21, %v7304_v0  ;;  %v9824_v62 = vpop.f32.mrb[94].mxu1 }
 0x7b8   : > { %v10652_v7 = vpop.eup %10651  ;;  %v7410_v28 = vadd.f32 1.0, %v10650_v18  ;;  %10669 = vpow2.f32 %v7392_v16  ;;  %v7372_v29 = vsub.f32 0.0, %v11763_v56  ;;  %v11770_v33 = vadd.f32 %v9824_v62, %v11712_v21  ;;  %v7307_v61 = vpop.f32.mrb[95].mxu1 }
 0x7b9   : > { %v10654_v36 = vpop.eup %10653  ;;  %10671 = vrcp.f32 %v7412_v40  ;;  %v7413_v37 = vadd.f32 1.0, %v10652_v7  ;;  %v7370_v44 = vsub.f32 0.0, %v11766_v20  ;;  %v11774_v41 = vadd.f32 %v11712_v21, %v7307_v61 }
 0x7ba   : > { %10673 = vrcp.f32 %v7410_v28  ;;  %v7411_v52 = vadd.f32 1.0, %v10654_v36  ;;  %v7402_v48 = vmul.f32 1.442695, %v7372_v29  ;;  %v7373_v55 = vsub.f32 0.0, %v11770_v33 }
 0x7bb   : > { %v10656_v51 = vpop.eup %10655  ;;  %10675 = vrcp.f32 %v7413_v37  ;;  %v7398_v6 = vmul.f32 1.442695, %v7370_v44  ;;  %v7371_v39 = vsub.f32 0.0, %v11774_v41 }
 0x7bc   : > { %v10658_v17 = vpop.eup %10657  ;;  %10677 = vrcp.f32 %v7411_v52  ;;  %v7404_v9 = vmul.f32 1.442695, %v7373_v55  ;;  %v11779_v10 = vmul.f32 %v10656_v51, %v11715_v12 }
 0x7bd   : > { %v10660_v23 = vpop.eup %10659  ;;  %10679 = vpow2.f32 %v7402_v48  ;;  %v7400_v21 = vmul.f32 1.442695, %v7371_v39  ;;  %v11782_v26 = vmul.f32 %v10658_v17, %v11718_v25 }
 0x7be   : > { %v10662_v30 = vpop.eup %10661  ;;  %10681 = vpow2.f32 %v7398_v6  ;;  %7458 = vadd.xlane.f32.xlu1 %v11779_v10  ;;  %v11790_v3 = vmul.f32 %v10660_v23, %v11722_v32 }
 0x7bf   : > { %v10664_v19 = vpop.eup %10663  ;;  %10683 = vpow2.f32 %v7404_v9  ;;  %7454 = vadd.xlane.f32.xlu0 %v11782_v26  ;;  %v11787_v43 = vmul.f32 %v10662_v30, %v11726_v35 }
 0x7c0   : > { %v10666_v50 = vpop.eup %10665  ;;  %v7416_v12 = vadd.f32 1.0, %v10664_v19  ;;  %10685 = vpow2.f32 %v7400_v21 }
 0x7c1   : > { %v10668_v22 = vpop.eup %10667  ;;  %v7414_v57 = vadd.f32 1.0, %v10666_v50 }
 0x7c2   : > { %v10670_v25 = vpop.eup %10669  ;;  %10687 = vrcp.f32 %v7416_v12  ;;  %v7417_v60 = vadd.f32 1.0, %v10668_v22  ;;  %7456 = vadd.xlane.f32.xlu1 %v11787_v43 }
 0x7c3   : > { %v10672_v42 = vpop.eup %10671  ;;  %10689 = vrcp.f32 %v7414_v57  ;;  %v7415_v1 = vadd.f32 1.0, %v10670_v25  ;;  %7460 = vadd.xlane.f32.xlu0 %v11790_v3 }
 0x7c4   : > { %v10674_v35 = vpop.eup %10673  ;;  %10691 = vrcp.f32 %v7417_v60  ;;  %v11795_v8 = vmul.f32 %v10672_v42, %v11731_v59 }
 0x7c5   : > { %v10676_v45 = vpop.eup %10675  ;;  %10693 = vrcp.f32 %v7415_v1  ;;  %v11803_v63 = vmul.f32 %v10674_v35, %v11734_v14 }
 0x7c6   : > { %v10678_v46 = vpop.eup %10677  ;;  %7466 = vadd.xlane.f32.xlu1 %v11795_v8  ;;  %v11799_v32 = vmul.f32 %v10676_v45, %v11738_v49 }
 0x7c7   : > { %v10680_v47 = vpop.eup %10679  ;;  %v11807_v4 = vmul.f32 %v10678_v46, %v11742_v54 }
 0x7c8   : > { %v10682_v58 = vpop.eup %10681  ;;  %7468 = vadd.xlane.f32.xlu0 %v11799_v32  ;;  %v7420_v5 = vadd.f32 1.0, %v10680_v47 }
 0x7c9   : > { %v10684_v38 = vpop.eup %10683  ;;  %v7418_v11 = vadd.f32 1.0, %v10682_v58 }
 0x7ca   : > { %v10686_v59 = vpop.eup %10685  ;;  %v7421_v13 = vadd.f32 1.0, %v10684_v38  ;;  %7462 = vadd.xlane.f32.xlu1 %v11803_v63 }
 0x7cb   : > { %10695 = vrcp.f32 %v7418_v11  ;;  %v7419_v49 = vadd.f32 1.0, %v10686_v59 }
 0x7cc   : > { %v10688_v15 = vpop.eup %10687  ;;  %10697 = vrcp.f32 %v7421_v13  ;;  %7464 = vadd.xlane.f32.xlu0 %v11807_v4 }
 0x7cd   : > { %v10690_v16 = vpop.eup %10689  ;;  %10699 = vrcp.f32 %v7420_v5  ;;  %v11811_v14 = vmul.f32 %v10688_v15, %v11747_v31 }
 0x7ce   : > { %v10692_v53 = vpop.eup %10691  ;;  %10701 = vrcp.f32 %v7419_v49  ;;  %v11819_v0 = vmul.f32 %v10690_v16, %v11750_v27 }
 0x7cf   : > { %7474 = vadd.xlane.f32.xlu1 %v11811_v14  ;;  %v11815_v34 = vmul.f32 %v10692_v53, %v11754_v24  ;;  %v10694_v54 = vpop.eup %10693 }
 0x7d0   : > { %v11823_v18 = vmul.f32 %v10694_v54, %v11758_v2 }
 0x7d1   : > { %7476 = vadd.xlane.f32.xlu0 %v11815_v34 }
 0x7d3   : > { %7470 = vadd.xlane.f32.xlu1 %v11819_v0 }
 0x7d5   : > { %v10696_v31 = vpop.eup %10695  ;;  %7472 = vadd.xlane.f32.xlu0 %v11823_v18 }
 0x7d6   : > { %v10698_v40 = vpop.eup %10697  ;;  %v11827_v62 = vmul.f32 %v10696_v31, %v11766_v20 }
 0x7d7   : > { %v10700_v24 = vpop.eup %10699  ;;  %v11830_v7 = vmul.f32 %v10698_v40, %v11770_v33 }
 0x7d8   : > { %7478 = vadd.xlane.f32.xlu1 %v11827_v62  ;;  %v10702_v27 = vpop.eup %10701  ;;  %v11836_v2 = vmul.f32 %v10700_v24, %v11763_v56 }
 0x7d9   : > { %v7485_v28 = vsel %vm7484_vm2, %v11830_v7, 0.0  ;;  %v11840_v20 = vmul.f32 %v10702_v27, %v11774_v41 }
 0x7da   : > { %7486 = vadd.xlane.f32.xlu0 %v7485_v28 }
 0x7dc   : > { %7482 = vadd.xlane.f32.xlu1 %v11836_v2 }
 0x7de   : > { %7480 = vadd.xlane.f32.xlu0 %v11840_v20 }
 0x84b   : > { %v7459_v29 = vpop.xlane.xlu1 %7458 }
 0x84c   : > { %v7490_v33 = vmul.f32 0.0078125, %v7459_v29  ;;  %v7455_v61 = vpop.xlane.xlu0 %7454 }
 0x84d   : > { %v7488_v36 = vmul.f32 0.0078125, %v7455_v61 }
 0x84e   : > { %v11844_v37 = vsub.f32 %v11779_v10, %v7490_v33 }
 0x84f   : > { %v7457_v44 = vpop.xlane.xlu1 %7456  ;;  %v11847_v52 = vsub.f32 %v11782_v26, %v7488_v36 }
 0x850   : > { %v7461_v56 = vpop.xlane.xlu0 %7460  ;;  %v7522_v48 = vmul.f32 %v11844_v37, %v11844_v37  ;;  %v7489_v55 = vmul.f32 0.0078125, %v7457_v44 }
 0x851   : > { %v7491_v41 = vmul.f32 0.0078125, %v7461_v56  ;;  %v7520_v17 = vmul.f32 %v11847_v52, %v11847_v52 }
 0x852   : > { %7540 = vadd.xlane.f32.xlu0 %v7522_v48  ;;  %v11857_v9 = vsub.f32 %v11787_v43, %v7489_v55 }
 0x853   : > { %v11852_v51 = vsub.f32 %v11790_v3, %v7491_v41  ;;  %v7467_v6 = vpop.xlane.xlu1 %7466 }
 0x854   : > { %v7494_v39 = vmul.f32 0.0078125, %v7467_v6  ;;  %v7521_v22 = vmul.f32 %v11857_v9, %v11857_v9 }
 0x855   : > { %v7469_v10 = vpop.xlane.xlu0 %7468  ;;  %v7523_v23 = vmul.f32 %v11852_v51, %v11852_v51 }
 0x856   : > { %v11862_v21 = vsub.f32 %v11795_v8, %v7494_v39  ;;  %v7495_v26 = vmul.f32 0.0078125, %v7469_v10  ;;  %7536 = vadd.xlane.f32.xlu0 %v7520_v17  ;;  %v11929_v39 = vld [vmem:[%s12153_s9] ss:$0 sm:$0xff] }
 0x857   : > { %v7463_v30 = vpop.xlane.xlu1 %7462  ;;  %7542 = vadd.xlane.f32.xlu1 %v7523_v23 }
 0x858   : > { %v7492_v19 = vmul.f32 0.0078125, %v7463_v30  ;;  %v7526_v50 = vmul.f32 %v11862_v21, %v11862_v21  ;;  %v11867_v12 = vsub.f32 %v11799_v32, %v7495_v26  ;;  %v11937_v26 = vmul.f32 %v11929_v39, %v11844_v37 }
 0x859   : > { %v7465_v43 = vpop.xlane.xlu0 %7464  ;;  %v11941_v30 = vmul.f32 %v11929_v39, %v11847_v52 }
 0x85a   : > { %v11872_v57 = vsub.f32 %v11803_v63, %v7492_v19  ;;  %v7493_v3 = vmul.f32 0.0078125, %v7465_v43  ;;  %7548 = vadd.xlane.f32.xlu0 %v7526_v50  ;;  %v7527_v35 = vmul.f32 %v11867_v12, %v11867_v12  ;;  %v11945_v19 = vmul.f32 %v11929_v39, %v11857_v9 }
 0x85b   : > { %7538 = vadd.xlane.f32.xlu1 %v7521_v22  ;;  %v11951_v22 = vmul.f32 %v11929_v39, %v11852_v51  ;;  %v11961_v52 = vmul.f32 %v11929_v39, %v11867_v12 }
 0x85c   : > { %v7475_v25 = vpop.xlane.xlu1 %7474  ;;  %v7524_v60 = vmul.f32 %v11872_v57, %v11872_v57  ;;  %v11877_v42 = vsub.f32 %v11807_v4, %v7493_v3  ;;  %v11955_v3 = vmul.f32 %v11929_v39, %v11862_v21 }
 0x85d   : > { %v7498_v1 = vmul.f32 0.0078125, %v7475_v25 }
 0x85e   : > { %v7477_v8 = vpop.xlane.xlu0 %7476  ;;  %7544 = vadd.xlane.f32.xlu0 %v7524_v60  ;;  %v7525_v38 = vmul.f32 %v11877_v42, %v11877_v42 }
 0x85f   : > { %v11882_v45 = vsub.f32 %v11811_v14, %v7498_v1  ;;  %v7499_v46 = vmul.f32 0.0078125, %v7477_v8  ;;  %7550 = vadd.xlane.f32.xlu1 %v7527_v35 }
 0x860   : > { %v7471_v32 = vpop.xlane.xlu1 %7470 }
 0x861   : > { %v11885_v47 = vsub.f32 %v11815_v34, %v7499_v46  ;;  %v7496_v58 = vmul.f32 0.0078125, %v7471_v32  ;;  %v7530_v63 = vmul.f32 %v11882_v45, %v11882_v45 }
 0x862   : > { %v7473_v5 = vpop.xlane.xlu0 %7472 }
 0x863   : > { %v11892_v11 = vsub.f32 %v11819_v0, %v7496_v58  ;;  %v7497_v59 = vmul.f32 0.0078125, %v7473_v5  ;;  %7556 = vadd.xlane.f32.xlu0 %v7530_v63  ;;  %7546 = vadd.xlane.f32.xlu1 %v7525_v38  ;;  %v7531_v15 = vmul.f32 %v11885_v47, %v11885_v47 }
 0x865   : > { %v11895_v13 = vsub.f32 %v11823_v18, %v7497_v59  ;;  %v7479_v4 = vpop.xlane.xlu1 %7478  ;;  %v7528_v49 = vmul.f32 %v11892_v11, %v11892_v11 }
 0x866   : > { %v7500_v16 = vmul.f32 0.0078125, %v7479_v4 }
 0x867   : > { %v7487_v14 = vpop.xlane.xlu0 %7486  ;;  %7552 = vadd.xlane.f32.xlu0 %v7528_v49  ;;  %7558 = vadd.xlane.f32.xlu1 %v7531_v15  ;;  %v7529_v0 = vmul.f32 %v11895_v13, %v11895_v13 }
 0x868   : > { %v11902_v53 = vsub.f32 %v11827_v62, %v7500_v16  ;;  %v7503_v34 = vmul.f32 0.0078125, %v7487_v14 }
 0x869   : > { %v7483_v54 = vpop.xlane.xlu1 %7482 }
 0x86a   : > { %v7502_v18 = vmul.f32 0.0078125, %v7483_v54  ;;  %v7532_v31 = vmul.f32 %v11902_v53, %v11902_v53  ;;  %v11912_v28 = vsub.f32 %v11830_v7, %v7503_v34 }
 0x86b   : > { %v7481_v40 = vpop.xlane.xlu0 %7480  ;;  %7554 = vadd.xlane.f32.xlu1 %v7529_v0 }
 0x86c   : > { %v11909_v24 = vsub.f32 %v11836_v2, %v7502_v18  ;;  %v7501_v27 = vmul.f32 0.0078125, %v7481_v40  ;;  %7560 = vadd.xlane.f32.xlu0 %v7532_v31  ;;  %v7535_v61 = vmul.f32 %v11912_v28, %v11912_v28 }
 0x86e   : > { %v11915_v62 = vsub.f32 %v11840_v20, %v7501_v27  ;;  %v7534_v29 = vmul.f32 %v11909_v24, %v11909_v24  ;;  %v7566_v2 = vsel %vm7484_vm2, %v7535_v61, 0.0 }
 0x870   : > { %7564 = vadd.xlane.f32.xlu0 %v7534_v29  ;;  %v7533_v33 = vmul.f32 %v11915_v62, %v11915_v62 }
 0x872   : > { %7562 = vadd.xlane.f32.xlu1 %v7533_v33 }
 0x876   : > { %7567 = vadd.xlane.f32.xlu1 %v7566_v2 }
 0x8df   : > { %v7541_v36 = vpop.xlane.xlu0 %7540 }
 0x8e0   : > { %v7571_v7 = vmul.f32 0.007874016, %v7541_v36 }
 0x8e2   : > { %10703 = vrsqrt.f32 %v7571_v7  ;;  %vm7601_vm3 = vcmp.eq.f32.partialorder %v7571_v7, inf  ;;  %v7604_v9 = vand.u32 2147483648, %v7571_v7  ;;  %vm7603_vm4 = vcmp.eq.f32.partialorder %v7571_v7, 0.0 }
 0x8e3   : > { %v7537_v44 = vpop.xlane.xlu0 %7536 }
 0x8e4   : > { %v7569_v20 = vmul.f32 0.007874016, %v7537_v44  ;;  %v7543_v56 = vpop.xlane.xlu1 %7542 }
 0x8e5   : > { %v7572_v48 = vmul.f32 0.007874016, %v7543_v56 }
 0x8e6   : > { %10705 = vrsqrt.f32 %v7569_v20  ;;  %vm7587_vm5 = vcmp.eq.f32.partialorder %v7569_v20, inf  ;;  %vm7589_vm6 = vcmp.eq.f32.partialorder %v7569_v20, 0.0  ;;  %v7590_v21 = vand.u32 2147483648, %v7569_v20 }
 0x8e7   : > { %10707 = vrsqrt.f32 %v7572_v48  ;;  %v7549_v55 = vpop.xlane.xlu0 %7548  ;;  %vm7608_vm7 = vcmp.eq.f32.partialorder %v7572_v48, inf  ;;  %vm7610_vm8 = vcmp.eq.f32.partialorder %v7572_v48, 0.0  ;;  %v7611_v5 = vand.u32 2147483648, %v7572_v48 }
 0x8e8   : > { %v11924_v41 = vmul.f32 0.007874016, %v7549_v55  ;;  %v7539_v6 = vpop.xlane.xlu1 %7538 }
 0x8e9   : > { %v11931_v17 = vmul.f32 0.007874016, %v7539_v6 }
 0x8ea   : > { %10709 = vrsqrt.f32 %v11924_v41  ;;  %vm7629_vm9 = vcmp.eq.f32.partialorder %v11924_v41, inf  ;;  %vm7631_vm10 = vcmp.eq.f32.partialorder %v11924_v41, 0.0  ;;  %v7632_v4 = vand.u32 2147483648, %v11924_v41 }
 0x8eb   : > { %10711 = vrsqrt.f32 %v11931_v17  ;;  %v7545_v10 = vpop.xlane.xlu0 %7544  ;;  %vm7594_vm11 = vcmp.eq.f32.partialorder %v11931_v17, inf  ;;  %vm7596_vm12 = vcmp.eq.f32.partialorder %v11931_v17, 0.0  ;;  %v7597_v29 = vand.u32 2147483648, %v11931_v17 }
 0x8ec   : > { %v10704_v23 = vpop.eup %10703  ;;  %v11947_v50 = vmul.f32 0.007874016, %v7545_v10  ;;  %v7551_v43 = vpop.xlane.xlu1 %7550 }
 0x8ed   : > { %v7600_v37 = vmul.f32 %v10704_v23, %v7571_v7  ;;  %v11957_v25 = vmul.f32 0.007874016, %v7551_v43 }
 0x8ee   : > { %10713 = vrsqrt.f32 %v11947_v50  ;;  %vm7615_vm13 = vcmp.eq.f32.partialorder %v11947_v50, inf  ;;  %vm7617_vm14 = vcmp.eq.f32.partialorder %v11947_v50, 0.0 }
 0x8ef   : > { %v7602_v60 = vsel %vm7601_vm3, %v7571_v7, %v7600_v37  ;;  %10715 = vrsqrt.f32 %v11957_v25  ;;  %vm7636_vm15 = vcmp.eq.f32.partialorder %v11957_v25, inf  ;;  %v7639_v43 = vand.u32 2147483648, %v11957_v25 }
 0x8f0   : > { %v10706_v51 = vpop.eup %10705  ;;  %v7605_v1 = vsel %vm7603_vm4, %v7604_v9, %v7602_v60  ;;  %v7557_v35 = vpop.xlane.xlu0 %7556  ;;  %vm7638_vm0 = vcmp.eq.f32.partialorder %v11957_v25, 0.0 }
 0x8f1   : > { %v7547_v8 = vpop.xlane.xlu1 %7546  ;;  %v10708_v46 = vpop.eup %10707  ;;  %v7699_v32 = vadd.f32 1e-06, %v7605_v1  ;;  %v7586_v12 = vmul.f32 %v10706_v51, %v7569_v20  ;;  %v11965_v58 = vmul.f32 0.007874016, %v7557_v35  ;;  %v12011_v1 = vld [vmem:[%s12154_s10] ss:$0 sm:$0xff] }
 0x8f2   : > { %v11967_v63 = vmul.f32 0.007874016, %v7547_v8  ;;  %v7607_v38 = vmul.f32 %v10708_v46, %v7572_v48 }
 0x8f3   : > { %10717 = vrcp.f32 %v7699_v32  ;;  %v7588_v59 = vsel %vm7587_vm5, %v7569_v20, %v7586_v12  ;;  %vm7657_vm1 = vcmp.eq.f32.partialorder %v11965_v58, inf  ;;  %vm7659_vm2 = vcmp.eq.f32.partialorder %v11965_v58, 0.0 }
 0x8f4   : > { %v10710_v49 = vpop.eup %10709  ;;  %v7591_v15 = vsel %vm7589_vm6, %v7590_v21, %v7588_v59  ;;  %v7609_v16 = vsel %vm7608_vm7, %v7572_v48, %v7607_v38  ;;  %10719 = vrsqrt.f32 %v11965_v58  ;;  %v7553_v14 = vpop.xlane.xlu0 %7552  ;;  %vm7622_vm3 = vcmp.eq.f32.partialorder %v11967_v63, inf }
 0x8f5   : > { %v10712_v34 = vpop.eup %10711  ;;  %v7697_v54 = vadd.f32 1e-06, %v7591_v15  ;;  %v7612_v0 = vsel %vm7610_vm8, %v7611_v5, %v7609_v16  ;;  %v7628_v18 = vmul.f32 %v10710_v49, %v11924_v41  ;;  %10721 = vrsqrt.f32 %v11967_v63  ;;  %v7559_v31 = vpop.xlane.xlu1 %7558 }
 0x8f6   : > { %v7700_v40 = vadd.f32 1e-06, %v7612_v0  ;;  %v7593_v27 = vmul.f32 %v10712_v34, %v11931_v17  ;;  %v11986_v61 = vmul.f32 0.007874016, %v7553_v14  ;;  %v11993_v44 = vmul.f32 0.007874016, %v7559_v31 }
 0x8f7   : > { %10723 = vrcp.f32 %v7697_v54  ;;  %v7630_v33 = vsel %vm7629_vm9, %v11924_v41, %v7628_v18  ;;  %v7618_v41 = vand.u32 2147483648, %v11947_v50  ;;  %v7660_v5 = vand.u32 2147483648, %v11965_v58 }
 0x8f8   : > { %v10714_v2 = vpop.eup %10713  ;;  %10725 = vrcp.f32 %v7700_v40  ;;  %v7633_v36 = vsel %vm7631_vm10, %v7632_v4, %v7630_v33  ;;  %v7595_v7 = vsel %vm7594_vm11, %v11931_v17, %v7593_v27  ;;  %vm7624_vm4 = vcmp.eq.f32.partialorder %v11967_v63, 0.0 }
 0x8f9   : > { %v10716_v20 = vpop.eup %10715  ;;  %v7703_v56 = vadd.f32 1e-06, %v7633_v36  ;;  %v7598_v48 = vsel %vm7596_vm12, %v7597_v29, %v7595_v7  ;;  %v7614_v55 = vmul.f32 %v10714_v2, %v11947_v50  ;;  %10727 = vrsqrt.f32 %v11986_v61  ;;  %v7561_v23 = vpop.xlane.xlu0 %7560 }
 0x8fa   : > { %v7698_v6 = vadd.f32 1e-06, %v7598_v48  ;;  %v7635_v10 = vmul.f32 %v10716_v20, %v11957_v25  ;;  %v7555_v37 = vpop.xlane.xlu1 %7554  ;;  %v12018_v12 = vmul.f32 0.007874016, %v7561_v23  ;;  %v7625_v14 = vand.u32 2147483648, %v11967_v63 }
 0x8fb   : > { %10729 = vrcp.f32 %v7703_v56  ;;  %v7616_v17 = vsel %vm7615_vm13, %v11947_v50, %v7614_v55  ;;  %v12016_v32 = vmul.f32 0.007874016, %v7555_v37  ;;  %v7740_v2 = vmul.f32 %v11929_v39, %v11872_v57 }
 0x8fc   : > { %10731 = vrcp.f32 %v7698_v6  ;;  %v7619_v9 = vsel %vm7617_vm14, %v7618_v41, %v7616_v17  ;;  %v7637_v60 = vsel %vm7636_vm15, %v11957_v25, %v7635_v10  ;;  %vm7643_vm5 = vcmp.eq.f32.partialorder %v11986_v61, inf }
 0x8fd   : > { %v10718_v51 = vpop.eup %10717  ;;  %v7701_v21 = vadd.f32 1e-06, %v7619_v9  ;;  %v7640_v50 = vsel %vm7638_vm0, %v7639_v43, %v7637_v60  ;;  %10733 = vrsqrt.f32 %v11993_v44  ;;  %v7565_v4 = vpop.xlane.xlu0 %7564  ;;  %vm7645_vm6 = vcmp.eq.f32.partialorder %v11986_v61, 0.0 }
 0x8fe   : > { %v10720_v35 = vpop.eup %10719  ;;  %v7754_v8 = vmul.f32 %v10718_v51, %v11937_v26  ;;  %v7704_v46 = vadd.f32 1e-06, %v7640_v50  ;;  %v12044_v33 = vmul.f32 0.007874016, %v7565_v4  ;;  %v7746_v6 = vmul.f32 %v11929_v39, %v11882_v45 }
 0x8ff   : > { %v10722_v25 = vpop.eup %10721  ;;  %10735 = vrcp.f32 %v7701_v21  ;;  %v7656_v38 = vmul.f32 %v10720_v35, %v11965_v58  ;;  %v7563_v49 = vpop.xlane.xlu1 %7562  ;;  %vm7664_vm7 = vcmp.eq.f32.partialorder %v11993_v44, inf  ;;  %v7667_v45 = vand.u32 2147483648, %v11993_v44 }
 0x900   : > { %v7777_v26 = vadd.f32 %v12011_v1, %v7754_v8  ;;  %10737 = vrcp.f32 %v7704_v46  ;;  %v7621_v59 = vmul.f32 %v10722_v25, %v11967_v63  ;;  %v12064_v43 = vmul.f32 0.007874016, %v7563_v49 }
 0x901   : > { %v10724_v15 = vpop.eup %10723  ;;  %v7658_v16 = vsel %vm7657_vm1, %v11965_v58, %v7656_v38  ;;  %10739 = vrsqrt.f32 %v12016_v32  ;;  %vm7666_vm8 = vcmp.eq.f32.partialorder %v11993_v44, 0.0  ;;  %vm7650_vm9 = vcmp.eq.f32.partialorder %v12016_v32, inf }
 0x902   : > { %v10726_v34 = vpop.eup %10725  ;;  %7793 = vst [vmem:[%s12023_s19 + $0x10] sm:$0xff] %v7777_v26  ;;  %v7752_v54 = vmul.f32 %v10724_v15, %v11941_v30  ;;  %v7661_v0 = vsel %vm7659_vm2, %v7660_v5, %v7658_v16  ;;  %v7623_v18 = vsel %vm7622_vm3, %v11967_v63, %v7621_v59  ;;  %10741 = vrsqrt.f32 %v12018_v12 }
 0x903   : > { %v10728_v31 = vpop.eup %10727  ;;  %v7755_v40 = vmul.f32 %v10726_v34, %v11951_v22  ;;  %v7707_v27 = vadd.f32 1e-06, %v7661_v0  ;;  %v7626_v29 = vsel %vm7624_vm4, %v7625_v14, %v7623_v18  ;;  %v7646_v22 = vand.u32 2147483648, %v11986_v61  ;;  %v7568_v48 = vpop.xlane.xlu1 %7567 }
 0x904   : > { %v7775_v30 = vadd.f32 %v12011_v1, %v7752_v54  ;;  %v7702_v36 = vadd.f32 1e-06, %v7626_v29  ;;  %v7642_v58 = vmul.f32 %v10728_v31, %v11986_v61  ;;  %v12069_v9 = vmul.f32 0.007874016, %v7568_v48 }
 0x905   : > { %v10730_v63 = vpop.eup %10729  ;;  %v7778_v7 = vadd.f32 %v12011_v1, %v7755_v40  ;;  %10743 = vrcp.f32 %v7707_v27  ;;  %vm7652_vm10 = vcmp.eq.f32.partialorder %v12016_v32, 0.0  ;;  %v7653_v5 = vand.u32 2147483648, %v12016_v32 }
 0x906   : > { %v10732_v20 = vpop.eup %10731  ;;  %7791 = vst [vmem:[%s12023_s19] sm:$0xff] %v7775_v30  ;;  %v7758_v56 = vmul.f32 %v10730_v63, %v11955_v3  ;;  %10745 = vrcp.f32 %v7702_v36  ;;  %v7644_v57 = vsel %vm7643_vm5, %v11986_v61, %v7642_v58  ;;  %vm7671_vm11 = vcmp.eq.f32.partialorder %v12018_v12, inf }
 0x907   : > { %v10734_v55 = vpop.eup %10733  ;;  %7794 = vst [vmem:[%s12023_s19 + $0x18] sm:$0xff] %v7778_v7  ;;  %v7753_v41 = vmul.f32 %v10732_v20, %v11945_v19  ;;  %v7647_v10 = vsel %vm7645_vm6, %v7646_v22, %v7644_v57  ;;  %10747 = vrsqrt.f32 %v12044_v33  ;;  %v7674_v59 = vand.u32 2147483648, %v12018_v12 }
 0x908   : > { %v7781_v23 = vadd.f32 %v12011_v1, %v7758_v56  ;;  %v7705_v3 = vadd.f32 1e-06, %v7647_v10  ;;  %v7663_v17 = vmul.f32 %v10734_v55, %v11993_v44  ;;  %v7741_v49 = vmul.f32 %v11929_v39, %v11877_v42 }
 0x909   : > { %v10736_v61 = vpop.eup %10735  ;;  %v7776_v37 = vadd.f32 %v12011_v1, %v7753_v41  ;;  %vm7673_vm12 = vcmp.eq.f32.partialorder %v12018_v12, 0.0  ;;  %v7744_v40 = vmul.f32 %v11929_v39, %v11892_v11  ;;  %vm7685_vm13 = vcmp.eq.f32.partialorder %v12044_v33, inf }
 0x90a   : > { %v10738_v19 = vpop.eup %10737  ;;  %7797 = vst [vmem:[%s12023_s19 + $0x30] sm:$0xff] %v7781_v23  ;;  %v7756_v60 = vmul.f32 %v10736_v61, %v7740_v2  ;;  %10749 = vrcp.f32 %v7705_v3  ;;  %v7665_v51 = vsel %vm7664_vm7, %v11993_v44, %v7663_v17  ;;  %vm7687_vm14 = vcmp.eq.f32.partialorder %v12044_v33, 0.0 }
 0x90b   : > { %v10740_v21 = vpop.eup %10739  ;;  %7792 = vst [vmem:[%s12023_s19 + $0x8] sm:$0xff] %v7776_v37  ;;  %v7759_v50 = vmul.f32 %v10738_v19, %v11961_v52  ;;  %v7668_v35 = vsel %vm7666_vm8, %v7667_v45, %v7665_v51  ;;  %10751 = vrsqrt.f32 %v12064_v43  ;;  %v7747_v20 = vmul.f32 %v11929_v39, %v11885_v47 }
 0x90c   : > { %v10742_v8 = vpop.eup %10741  ;;  %v7779_v46 = vadd.f32 %v12011_v1, %v7756_v60  ;;  %v7708_v25 = vadd.f32 1e-06, %v7668_v35  ;;  %v7649_v38 = vmul.f32 %v10740_v21, %v12016_v32  ;;  %10753 = vrsqrt.f32 %v12069_v9 }
 0x90d   : > { %v7782_v44 = vadd.f32 %v12011_v1, %v7759_v50  ;;  %v7670_v52 = vmul.f32 %v10742_v8, %v12018_v12  ;;  %vm7678_vm15 = vcmp.eq.f32.partialorder %v12064_v43, inf  ;;  %v7681_v57 = vand.u32 2147483648, %v12064_v43 }
 0x90e   : > { %7795 = vst [vmem:[%s12023_s19 + $0x20] sm:$0xff] %v7779_v46  ;;  %10755 = vrcp.f32 %v7708_v25  ;;  %v7651_v26 = vsel %vm7650_vm9, %v12016_v32, %v7649_v38  ;;  %vm7680_vm0 = vcmp.eq.f32.partialorder %v12064_v43, 0.0  ;;  %vm7692_vm1 = vcmp.eq.f32.partialorder %v12069_v9, inf }
 0x90f   : > { %v10744_v4 = vpop.eup %10743  ;;  %7798 = vst [vmem:[%s12023_s19 + $0x38] sm:$0xff] %v7782_v44  ;;  %v7654_v15 = vsel %vm7652_vm10, %v7653_v5, %v7651_v26  ;;  %v7672_v16 = vsel %vm7671_vm11, %v12018_v12, %v7670_v52  ;;  %v7688_v12 = vand.u32 2147483648, %v12044_v33  ;;  %v7695_v47 = vand.u32 2147483648, %v12069_v9 }
 0x910   : > { %v10746_v14 = vpop.eup %10745  ;;  %v7762_v34 = vmul.f32 %v10744_v4, %v7746_v6  ;;  %v7706_v54 = vadd.f32 1e-06, %v7654_v15  ;;  %v7675_v0 = vsel %vm7673_vm12, %v7674_v59, %v7672_v16  ;;  %vm7694_vm2 = vcmp.eq.f32.partialorder %v12069_v9, 0.0 }
 0x911   : > { %v10748_v32 = vpop.eup %10747  ;;  %v7757_v18 = vmul.f32 %v10746_v14, %v7741_v49  ;;  %v7709_v31 = vadd.f32 1e-06, %v7675_v0  ;;  %v7745_v3 = vmul.f32 %v11929_v39, %v11895_v13  ;;  %v7748_v37 = vmul.f32 %v11929_v39, %v11902_v53 }
 0x912   : > { %v7785_v42 = vadd.f32 %v12011_v1, %v7762_v34  ;;  %10757 = vrcp.f32 %v7706_v54  ;;  %v7684_v27 = vmul.f32 %v10748_v32, %v12044_v33  ;;  %v7750_v21 = vmul.f32 %v11929_v39, %v11909_v24 }
 0x913   : > { %v7780_v29 = vadd.f32 %v12011_v1, %v7757_v18  ;;  %10759 = vrcp.f32 %v7709_v31  ;;  %v7749_v35 = vmul.f32 %v11929_v39, %v11915_v62  ;;  %v7751_v25 = vmul.f32 %v11929_v39, %v11912_v28 }
 0x914   : > { %v10750_v2 = vpop.eup %10749  ;;  %7801 = vst [vmem:[%s12023_s19 + $0x50] sm:$0xff] %v7785_v42  ;;  %v7686_v30 = vsel %vm7685_vm13, %v12044_v33, %v7684_v27 }
 0x915   : > { %v10752_v36 = vpop.eup %10751  ;;  %7796 = vst [vmem:[%s12023_s19 + $0x28] sm:$0xff] %v7780_v29  ;;  %v7760_v11 = vmul.f32 %v10750_v2, %v7744_v40  ;;  %v7689_v58 = vsel %vm7687_vm14, %v7688_v12, %v7686_v30 }
 0x916   : > { %v7711_v63 = vadd.f32 1e-06, %v7689_v58  ;;  %v7677_v7 = vmul.f32 %v10752_v36, %v12064_v43  ;;  %v10754_v22 = vpop.eup %10753 }
 0x917   : > { %v7783_v56 = vadd.f32 %v12011_v1, %v7760_v11  ;;  %v7691_v55 = vmul.f32 %v10754_v22, %v12069_v9 }
 0x918   : > { %v10756_v48 = vpop.eup %10755  ;;  %10761 = vrcp.f32 %v7711_v63  ;;  %v7679_v33 = vsel %vm7678_vm15, %v12064_v43, %v7677_v7 }
 0x919   : > { %7799 = vst [vmem:[%s12023_s19 + $0x40] sm:$0xff] %v7783_v56  ;;  %v7763_v6 = vmul.f32 %v10756_v48, %v7747_v20  ;;  %v7682_v41 = vsel %vm7680_vm0, %v7681_v57, %v7679_v33  ;;  %v7693_v23 = vsel %vm7692_vm1, %v12069_v9, %v7691_v55 }
 0x91a   : > { %v7710_v10 = vadd.f32 1e-06, %v7682_v41  ;;  %v7696_v43 = vsel %vm7694_vm2, %v7695_v47, %v7693_v23 }
 0x91b   : > { %v7786_v17 = vadd.f32 %v12011_v1, %v7763_v6  ;;  %v7712_v45 = vadd.f32 1e-06, %v7696_v43 }
 0x91c   : > { %v10758_v61 = vpop.eup %10757  ;;  %10763 = vrcp.f32 %v7710_v10 }
 0x91d   : > { %v10760_v19 = vpop.eup %10759  ;;  %7802 = vst [vmem:[%s12023_s19 + $0x58] sm:$0xff] %v7786_v17  ;;  %v7761_v60 = vmul.f32 %v10758_v61, %v7745_v3  ;;  %10765 = vrcp.f32 %v7712_v45 }
 0x91e   : > { %v7764_v51 = vmul.f32 %v10760_v19, %v7748_v37 }
 0x91f   : > { %v7784_v9 = vadd.f32 %v12011_v1, %v7761_v60 }
 0x920   : > { %v7787_v13 = vadd.f32 %v12011_v1, %v7764_v51 }
 0x921   : > { %7800 = vst [vmem:[%s12023_s19 + $0x48] sm:$0xff] %v7784_v9 }
 0x922   : > { %v10762_v50 = vpop.eup %10761  ;;  %7803 = vst [vmem:[%s12023_s19 + $0x60] sm:$0xff] %v7787_v13 }
 0x923   : > { %v7766_v53 = vmul.f32 %v10762_v50, %v7750_v21 }
 0x925   : > { %v7789_v8 = vadd.f32 %v12011_v1, %v7766_v53 }
 0x926   : > { %v10764_v46 = vpop.eup %10763 }
 0x927   : > { %7805 = vst [vmem:[%s12023_s19 + $0x70] sm:$0xff] %v7789_v8  ;;  %v7765_v38 = vmul.f32 %v10764_v46, %v7749_v35  ;;  %v10766_v44 = vpop.eup %10765 }
 0x928   : > { %v7767_v24 = vmul.f32 %v10766_v44, %v7751_v25 }
 0x929   : > { %v7788_v5 = vadd.f32 %v12011_v1, %v7765_v38 }
 0x92a   : > { %v7790_v52 = vadd.f32 %v12011_v1, %v7767_v24 }
 0x92b   : > { %7804 = vst [vmem:[%s12023_s19 + $0x68] sm:$0xff] %v7788_v5 }
 0x92c   : > { %7806 = vst [vmem:[%s12023_s19 + $0x78] sm:$0x3f] %v7790_v52 }
 0x92d PF: > { %s24_s17 = sadd.s32 1, %s10901_s17  }
 0x92e   : > { %p21_p1 = scmp.ge.s32.totalorder %s24_s17, 4  }
 0x930   :  { %23 = sbr.rel (!%p21_p1) target bundleno = 5 (0x5), region = 149 }
 0x937   :  { %7828 = vsyncpa [#allocation7], 1 }
 0x938   :  { %7830 = vsyncpa [#allocation7 + $0x1], 1 }
 0x939   :  { %7831 = vsyncpa [#allocation9], 1 }
 0x93a   :  { %7832 = vsyncpa [#allocation12], 1 }

</bundles_post_ra>
